<compile_context>
chip_gen: v6e
topology: v6e:2x2x1
jax: 0.10.0
libtpu: 0.0.40
codegen_flags: <defaults>
</compile_context>

<pallas_src>
import functools

import jax
import jax.numpy as jnp
from jax.experimental import pallas as pl
from jax.experimental.pallas import tpu as pltpu

LEAKY = 0.1
EPS = 1e-5
_VMEM_LIMIT = 32 * 1024 * 1024  # well under v7x's 64 MiB physical VMEM; > v5e default


def _round_up(n, m):
    return (n + m - 1) // m * m


def _leaky(x):
    return jnp.where(x >= 0, x, LEAKY * x)


# ---------------------------------------------------------------------------
# Pallas kernels
# ---------------------------------------------------------------------------

def resblock_s1_kernel(x_ref, w1_ref, b1_ref, w2_ref, ws_ref, b2s_ref, out_ref,
                       s_ref, y_ref, acc1_ref, acc2_ref, *, H, W):
    """Fused ResBlock (stride 1), whole (H, W) plane of one batch element.

    conv1(3x3)+BN+LeakyReLU -> conv2(3x3)+BN + shortcut(1x1)+BN -> add -> LeakyReLU.
    Convs are shifted-window matmuls over a zero-padded, spatially flattened
    VMEM scratch with row pitch Wp = W + 2: tap (ky, kx) is the contiguous row
    slice starting at ky*Wp + kx.  Accumulator columns j >= W are garbage and
    never read back.
    """
    Wp = W + 2
    n = H * Wp
    s_ref[...] = jnp.zeros_like(s_ref)
    y_ref[...] = jnp.zeros_like(y_ref)
    acc1_ref[...] = jnp.zeros_like(acc1_ref)
    acc2_ref[...] = jnp.zeros_like(acc2_ref)
    # Scatter the input rows into the padded, flattened scratch.
    for r in range(H):
        base = (r + 1) * Wp + 1
        s_ref[base:base + W, :] = x_ref[0, r, :, :]
    # conv1: 9 shifted-window matmuls (contraction Cin), f32 accumulation in VMEM.
    for ky in range(3):
        for kx in range(3):
            off = ky * Wp + kx
            acc1_ref[...] += jnp.dot(s_ref[off:off + n, :], w1_ref[ky * 3 + kx],
                                     preferred_element_type=jnp.float32)
    # BN bias + LeakyReLU, re-pad into the conv2 scratch (bf16, stays in VMEM).
    b1 = b1_ref[...]
    for i in range(H):
        row = _leaky(acc1_ref[i * Wp:i * Wp + W, :] + b1)
        base = (i + 1) * Wp + 1
        y_ref[base:base + W, :] = row.astype(y_ref.dtype)
    # conv2 (9 taps) + fused 1x1 shortcut, all accumulated into one f32 scratch.
    for ky in range(3):
        for kx in range(3):
            off = ky * Wp + kx
            acc2_ref[...] += jnp.dot(y_ref[off:off + n, :], w2_ref[ky * 3 + kx],
                                     preferred_element_type=jnp.float32)
    acc2_ref[...] += jnp.dot(s_ref[Wp + 1:Wp + 1 + n, :], ws_ref[...],
                             preferred_element_type=jnp.float32)
    # folded BN bias + LeakyReLU, lane-dense store of the valid columns.
    b2s = b2s_ref[...]
    for i in range(H):
        row = _leaky(acc2_ref[i * Wp:i * Wp + W, :] + b2s)
        out_ref[0, i, :, :] = row.astype(out_ref.dtype)


def _resblock_s2_core(x_ref, w1_ref, b1_ref, w2_ref, ws_ref,
                      s0_ref, s1_ref, y_ref, acc1_ref, acc2_ref, Ho, Wo):
    """Shared body of the stride-2 ResBlock: fills acc2 with the pre-activation
    result (conv2+BN + shortcut+BN), row pitch Wq = Wo + 2."""
    Wq = Wo + 2
    n = Ho * Wq
    s0_ref[...] = jnp.zeros_like(s0_ref)
    s1_ref[...] = jnp.zeros_like(s1_ref)
    y_ref[...] = jnp.zeros_like(y_ref)
    acc1_ref[...] = jnp.zeros_like(acc1_ref)
    acc2_ref[...] = jnp.zeros_like(acc2_ref)
    # x_ref: (1, Ho, 2, Wo, 2*Cin) -- the host's FREE reshape of NHWC into
    # (row-pair, row-parity, col-pair, col-parity*Cin).  Scatter each row parity
    # into its own padded, flattened scratch.
    for a in range(Ho):
        base = (a + 1) * Wq + 1
        s0_ref[base:base + Wo, :] = x_ref[0, a, 0, :, :]
        s1_ref[base:base + Wo, :] = x_ref[0, a, 1, :, :]
    # conv1 (3x3, stride 2) as 6 shifted-window matmuls of contraction 2*Cin.
    # row tap ky -> (row-pair shift da, row-parity scratch):
    #   ky=0 -> (0, s1), ky=1 -> (1, s0), ky=2 -> (1, s1)
    for ky, da, src in ((0, 0, s1_ref), (1, 1, s0_ref), (2, 1, s1_ref)):
        for db in range(2):
            off = da * Wq + db
            acc1_ref[...] += jnp.dot(src[off:off + n, :], w1_ref[ky, db],
                                     preferred_element_type=jnp.float32)
    b1 = b1_ref[...]
    for i in range(Ho):
        row = _leaky(acc1_ref[i * Wq:i * Wq + Wo, :] + b1)
        base = (i + 1) * Wq + 1
        y_ref[base:base + Wo, :] = row.astype(y_ref.dtype)
    # conv2 (3x3, stride 1) on y1 + fused 1x1 stride-2 shortcut on x.
    for ky in range(3):
        for kx in range(3):
            off = ky * Wq + kx
            acc2_ref[...] += jnp.dot(y_ref[off:off + n, :], w2_ref[ky * 3 + kx],
                                     preferred_element_type=jnp.float32)
    acc2_ref[...] += jnp.dot(s0_ref[Wq + 1:Wq + 1 + n, :], ws_ref[...],
                             preferred_element_type=jnp.float32)


def resblock_s2_kernel(x_ref, w1_ref, b1_ref, w2_ref, ws_ref, b2s_ref, out_ref,
                       s0_ref, s1_ref, y_ref, acc1_ref, acc2_ref, *, Ho, Wo):
    _resblock_s2_core(x_ref, w1_ref, b1_ref, w2_ref, ws_ref,
                      s0_ref, s1_ref, y_ref, acc1_ref, acc2_ref, Ho, Wo)
    Wq = Wo + 2
    b2s = b2s_ref[...]
    for i in range(Ho):
        row = _leaky(acc2_ref[i * Wq:i * Wq + Wo, :] + b2s)
        out_ref[0, i, :, :] = row.astype(out_ref.dtype)


def resblock_s2_pool_heads_kernel(x_ref, w1_ref, b1_ref, w2_ref, ws_ref, b2s_ref,
                                  hw1_ref, hb1_ref, hw2_ref, hb2_ref, sig_ref,
                                  out_ref,
                                  s0_ref, s1_ref, y_ref, acc1_ref, acc2_ref,
                                  *, Ho, Wo):
    _resblock_s2_core(x_ref, w1_ref, b1_ref, w2_ref, ws_ref,
                      s0_ref, s1_ref, y_ref, acc1_ref, acc2_ref, Ho, Wo)
    Wq = Wo + 2
    b2s = b2s_ref[...]
    # Global average pool fused into the epilogue: the e2 feature map never
    # leaves VMEM.
    psum = jnp.zeros((1, b2s.shape[-1]), jnp.float32)
    for i in range(Ho):
        row = _leaky(acc2_ref[i * Wq:i * Wq + Wo, :] + b2s)
        psum = psum + jnp.sum(row, axis=0, keepdims=True)
    fea = (psum * (1.0 / (Ho * Wo))).astype(jnp.bfloat16)          # (1, 256)
    # All 8 heads fused: Linear(256,256) -> LeakyReLU -> Linear(256,num)[-> Sigmoid].
    h = jnp.dot(fea, hw1_ref[...], preferred_element_type=jnp.float32) + hb1_ref[...]
    h = _leaky(h).astype(jnp.bfloat16)
    o = jnp.dot(h, hw2_ref[...], preferred_element_type=jnp.float32) + hb2_ref[...]
    sg = 1.0 / (1.0 + jnp.exp(-o))
    out_ref[...] = jnp.where(sig_ref[...] > 0.5, sg, o).astype(out_ref.dtype)


# ---------------------------------------------------------------------------
# pallas_call wrappers
# ---------------------------------------------------------------------------

def run_resblock_s1(x, p):
    B, H, W, Cin = x.shape
    Wp = W + 2
    Cmid = p["w1"].shape[-1]
    Cout = p["w2"].shape[-1]
    return pl.pallas_call(
        functools.partial(resblock_s1_kernel, H=H, W=W),
        out_shape=jax.ShapeDtypeStruct((B, H, W, Cout), jnp.bfloat16),
        grid=(B,),
        in_specs=[
            pl.BlockSpec((1, H, W, Cin), lambda b: (b, 0, 0, 0)),
            pl.BlockSpec(p["w1"].shape, lambda b: (0, 0, 0)),
            pl.BlockSpec(p["b1"].shape, lambda b: (0, 0)),
            pl.BlockSpec(p["w2"].shape, lambda b: (0, 0, 0)),
            pl.BlockSpec(p["ws"].shape, lambda b: (0, 0)),
            pl.BlockSpec(p["b2s"].shape, lambda b: (0, 0)),
        ],
        out_specs=pl.BlockSpec((1, H, W, Cout), lambda b: (b, 0, 0, 0)),
        scratch_shapes=[
            pltpu.VMEM(((H + 2) * Wp + 8, Cin), jnp.bfloat16),
            pltpu.VMEM(((H + 2) * Wp + 8, Cmid), jnp.bfloat16),
            pltpu.VMEM((H * Wp, Cmid), jnp.float32),
            pltpu.VMEM((H * Wp, Cout), jnp.float32),
        ],
        compiler_params=pltpu.CompilerParams(
            dimension_semantics=("parallel",),
            vmem_limit_bytes=_VMEM_LIMIT),
    )(x, p["w1"], p["b1"], p["w2"], p["ws"], p["b2s"])


def run_resblock_s2(x5, p, heads=None):
    B, Ho, _, Wo, C2 = x5.shape
    Wq = Wo + 2
    Cmid = p["w1"].shape[-1]
    Cout = p["w2"].shape[-1]
    in_specs = [
        pl.BlockSpec((1, Ho, 2, Wo, C2), lambda b: (b, 0, 0, 0, 0)),
        pl.BlockSpec(p["w1"].shape, lambda b: (0, 0, 0, 0)),
        pl.BlockSpec(p["b1"].shape, lambda b: (0, 0)),
        pl.BlockSpec(p["w2"].shape, lambda b: (0, 0, 0)),
        pl.BlockSpec(p["ws"].shape, lambda b: (0, 0)),
        pl.BlockSpec(p["b2s"].shape, lambda b: (0, 0)),
    ]
    scratch_shapes = [
        pltpu.VMEM(((Ho + 1) * Wq + 8, C2), jnp.bfloat16),
        pltpu.VMEM(((Ho + 1) * Wq + 8, C2), jnp.bfloat16),
        pltpu.VMEM(((Ho + 2) * Wq + 8, Cmid), jnp.bfloat16),
        pltpu.VMEM((Ho * Wq, Cmid), jnp.float32),
        pltpu.VMEM((Ho * Wq, Cout), jnp.float32),
    ]
    cp = pltpu.CompilerParams(dimension_semantics=("parallel",),
                              vmem_limit_bytes=_VMEM_LIMIT)
    if heads is None:
        return pl.pallas_call(
            functools.partial(resblock_s2_kernel, Ho=Ho, Wo=Wo),
            out_shape=jax.ShapeDtypeStruct((B, Ho, Wo, Cout), jnp.bfloat16),
            grid=(B,),
            in_specs=in_specs,
            out_specs=pl.BlockSpec((1, Ho, Wo, Cout), lambda b: (b, 0, 0, 0)),
            scratch_shapes=scratch_shapes,
            compiler_params=cp,
        )(x5, p["w1"], p["b1"], p["w2"], p["ws"], p["b2s"])
    outp = heads["w2"].shape[1]
    return pl.pallas_call(
        functools.partial(resblock_s2_pool_heads_kernel, Ho=Ho, Wo=Wo),
        out_shape=jax.ShapeDtypeStruct((B, outp), jnp.float32),
        grid=(B,),
        in_specs=in_specs + [
            pl.BlockSpec(heads["w1"].shape, lambda b: (0, 0)),
            pl.BlockSpec(heads["b1"].shape, lambda b: (0, 0)),
            pl.BlockSpec(heads["w2"].shape, lambda b: (0, 0)),
            pl.BlockSpec(heads["b2"].shape, lambda b: (0, 0)),
            pl.BlockSpec(heads["sig"].shape, lambda b: (0, 0)),
        ],
        out_specs=pl.BlockSpec((1, outp), lambda b: (b, 0)),
        scratch_shapes=scratch_shapes,
        compiler_params=cp,
    )(x5, p["w1"], p["b1"], p["w2"], p["ws"], p["b2s"],
      heads["w1"], heads["b1"], heads["w2"], heads["b2"], heads["sig"])


# ---------------------------------------------------------------------------
# Parameter construction (synthetic weights; BN folded in eval mode)
# ---------------------------------------------------------------------------

def init_bn(key, c):
    k1, k2, k3, k4 = jax.random.split(key, 4)
    gamma = 1.0 + 0.1 * jax.random.normal(k1, (c,), jnp.float32)
    beta = 0.1 * jax.random.normal(k2, (c,), jnp.float32)
    mean = 0.1 * jax.random.normal(k3, (c,), jnp.float32)
    var = jnp.abs(1.0 + 0.1 * jax.random.normal(k4, (c,), jnp.float32))
    scale = gamma / jnp.sqrt(var + EPS)
    bias = beta - mean * scale
    return scale, bias


def init_conv(key, k, cin, cout):
    fan_in = k * k * cin
    return jax.random.normal(key, (k, k, cin, cout), jnp.float32) * (2.0 / fan_in) ** 0.5


def init_block_s1(key, cin, cmid, cout_pad, cin_pad=8):
    ks = jax.random.split(key, 6)
    w1 = init_conv(ks[0], 3, cin, cmid)
    s1, b1 = init_bn(ks[1], cmid)
    w2 = init_conv(ks[2], 3, cmid, cmid)
    s2, b2 = init_bn(ks[3], cmid)
    wsc = init_conv(ks[4], 1, cin, cmid)
    ss, bs = init_bn(ks[5], cmid)
    w1f = jnp.pad(w1 * s1, ((0, 0), (0, 0), (0, cin_pad - cin), (0, 0)))
    w2f = jnp.pad(w2 * s2, ((0, 0), (0, 0), (0, 0), (0, cout_pad - cmid)))
    wsf = jnp.pad(wsc[0, 0] * ss, ((0, cin_pad - cin), (0, cout_pad - cmid)))
    b2s = jnp.pad(b2 + bs, ((0, cout_pad - cmid),))
    return dict(
        w1=w1f.reshape(9, cin_pad, cmid).astype(jnp.bfloat16),
        b1=b1.reshape(1, cmid).astype(jnp.float32),
        w2=w2f.reshape(9, cmid, cout_pad).astype(jnp.bfloat16),
        ws=wsf.astype(jnp.bfloat16),
        b2s=b2s.reshape(1, cout_pad).astype(jnp.float32),
    )


def init_block_s2(key, cin_real, cin_feed, cmid):
    ks = jax.random.split(key, 6)
    w1 = init_conv(ks[0], 3, cin_real, cmid)
    s1, b1 = init_bn(ks[1], cmid)
    w2 = init_conv(ks[2], 3, cmid, cmid)
    s2, b2 = init_bn(ks[3], cmid)
    wsc = init_conv(ks[4], 1, cin_real, cmid)
    ss, bs = init_bn(ks[5], cmid)
    w1f = jnp.pad(w1 * s1, ((0, 0), (0, 0), (0, cin_feed - cin_real), (0, 0)))
    # Stack taps for the column-paired layout: contraction 2*cin_feed,
    # [ky, db=0] = [zeros; w[ky,0]], [ky, db=1] = [w[ky,1]; w[ky,2]].
    z = jnp.zeros((cin_feed, cmid), jnp.float32)
    taps = []
    for ky in range(3):
        taps.append(jnp.concatenate([z, w1f[ky, 0]], axis=0))
        taps.append(jnp.concatenate([w1f[ky, 1], w1f[ky, 2]], axis=0))
    w1st = jnp.stack(taps, axis=0).reshape(3, 2, 2 * cin_feed, cmid)
    wsf = jnp.pad(wsc[0, 0] * ss, ((0, cin_feed - cin_real), (0, 0)))
    wsst = jnp.concatenate([wsf, jnp.zeros_like(wsf)], axis=0)
    return dict(
        w1=w1st.astype(jnp.bfloat16),
        b1=b1.reshape(1, cmid).astype(jnp.float32),
        w2=(w2 * s2).reshape(9, cmid, cmid).astype(jnp.bfloat16),
        ws=wsst.astype(jnp.bfloat16),
        b2s=(b2 + bs).reshape(1, cmid).astype(jnp.float32),
    )


def init_head(key, num):
    k1, k2, k3, k4 = jax.random.split(key, 4)
    return dict(
        w1=jax.random.normal(k1, (256, 256), jnp.float32) / 16.0,
        b1=0.01 * jax.random.normal(k2, (256,), jnp.float32),
        w2=jax.random.normal(k3, (256, num), jnp.float32) / 16.0,
        b2=0.01 * jax.random.normal(k4, (num,), jnp.float32),
    )


def fuse_heads(mask_heads, pred_heads):
    heads, is_mask = [], []
    for m, p in zip(mask_heads, pred_heads):
        heads.append(m); is_mask.append(True)
        heads.append(p); is_mask.append(False)
    hid = 256
    n = len(heads)
    w1 = jnp.concatenate([h["w1"] for h in heads], axis=1)          # (256, n*256)
    b1 = jnp.concatenate([h["b1"] for h in heads]).reshape(1, -1)
    total = sum(h["w2"].shape[1] for h in heads)
    outp = _round_up(total, 128)
    w2 = jnp.zeros((n * hid, outp), jnp.float32)
    b2 = jnp.zeros((outp,), jnp.float32)
    sig = jnp.zeros((outp,), jnp.float32)
    mask_cols, pred_cols = [], []
    off = 0
    for hi, (h, m) in enumerate(zip(heads, is_mask)):
        num = h["w2"].shape[1]
        w2 = w2.at[hi * hid:(hi + 1) * hid, off:off + num].set(h["w2"])
        b2 = b2.at[off:off + num].set(h["b2"])
        if m:
            sig = sig.at[off:off + num].set(1.0)
            mask_cols.append((off, num))
        else:
            pred_cols.append((off, num))
        off += num
    return dict(
        w1=w1.astype(jnp.bfloat16), b1=b1.astype(jnp.float32),
        w2=w2.astype(jnp.bfloat16), b2=b2.reshape(1, -1).astype(jnp.float32),
        sig=sig.reshape(1, -1).astype(jnp.float32),
        mask_cols=mask_cols, pred_cols=pred_cols,
    )


def init_params(key):
    keys = jax.random.split(key, 11)
    layers = [1, 2, 4, 8]
    pred = [init_head(keys[3 + i], n) for i, n in enumerate(layers)]
    mask = [init_head(keys[7 + i], n) for i, n in enumerate(layers)]
    return dict(
        e_pre=init_block_s1(keys[0], cin=3, cmid=64, cout_pad=128),
        e1=init_block_s2(keys[1], cin_real=64, cin_feed=128, cmid=128),
        e2=init_block_s2(keys[2], cin_real=128, cin_feed=128, cmid=256),
        heads=fuse_heads(mask, pred),
    )


# ---------------------------------------------------------------------------
# Model forward
# ---------------------------------------------------------------------------

def degradation_encoder(params, x_nchw, pos):
    x = jnp.transpose(x_nchw, (0, 2, 3, 1))                      # NCHW -> NHWC
    B, H, W, C = x.shape
    assert H % 4 == 0 and W % 4 == 0, "spatial dims must be divisible by 4"
    x = jnp.pad(x, ((0, 0), (0, 0), (0, 0), (0, 8 - C))).astype(jnp.bfloat16)

    inter = run_resblock_s1(x, params["e_pre"])                  # (B, H, W, 128)
    x1 = inter.reshape(B, H // 2, 2, W // 2, 2 * inter.shape[-1])   # free reshape
    f = run_resblock_s2(x1, params["e1"])                        # (B, H/2, W/2, 128)
    x2 = f.reshape(B, H // 4, 2, W // 4, 2 * f.shape[-1])            # free reshape
    out_all = run_resblock_s2(x2, params["e2"], heads=params["heads"])  # (B, 128)

    hp = params["heads"]
    out_mask, out_pred = [], []
    for idx in range(pos):
        moff, mnum = hp["mask_cols"][idx]
        poff, pnum = hp["pred_cols"][idx]
        out_mask.append(out_all[:, moff:moff + mnum])
        out_pred.append(out_all[:, poff:poff + pnum])
    return out_mask, out_pred


if __name__ == "__main__":
    key = jax.random.PRNGKey(0)
    pkey, xkey = jax.random.split(key)
    params = init_params(pkey)
    x = jax.random.normal(xkey, (2, 3, 16, 16), jnp.float32)     # NCHW, like PyTorch
    pos = 4
    out_mask, out_pred = degradation_encoder(params, x, pos)
    jax.block_until_ready((out_mask, out_pred))

    layers = [1, 2, 4, 8]
    assert len(out_mask) == pos and len(out_pred) == pos
    for i in range(pos):
        assert out_mask[i].shape == (2, layers[i])
        assert out_pred[i].shape == (2, layers[i])
        assert bool(jnp.all((out_mask[i] >= 0) & (out_mask[i] <= 1)))
        assert bool(jnp.all(jnp.isfinite(out_pred[i])))
    print("KERNEL_OK")
</pallas_src>

<mosaic_0001>
module attributes {stable_mosaic.version = 11 : i64} {
  func.func @resblock_s1_kernel(%arg0: i32, %arg1: memref<1x16x16x8xbf16, #tpu.memory_space<vmem>>, %arg2: memref<9x8x64xbf16, #tpu.memory_space<vmem>>, %arg3: memref<1x64xf32, #tpu.memory_space<vmem>>, %arg4: memref<9x64x128xbf16, #tpu.memory_space<vmem>>, %arg5: memref<8x128xbf16, #tpu.memory_space<vmem>>, %arg6: memref<1x128xf32, #tpu.memory_space<vmem>>, %arg7: memref<1x16x16x128xbf16, #tpu.memory_space<vmem>>, %arg8: memref<332x8xbf16, #tpu.memory_space<vmem>>, %arg9: memref<332x64xbf16, #tpu.memory_space<vmem>>, %arg10: memref<288x64xf32, #tpu.memory_space<vmem>>, %arg11: memref<288x128xf32, #tpu.memory_space<vmem>>) attributes {dimension_semantics = [#tpu.dimension_semantics<parallel>], iteration_bounds = array<i64: 2>, scalar_prefetch = 0 : i64, scratch_operands = 4 : i64, tpu.core_type = #tpu.core_type<tc>, window_params = [{transform_indices = @transform_0, window_bounds = array<i64: 1, 16, 16, 8>}, {pipeline_mode = #tpu.pipeline_mode<synchronous>, transform_indices = @transform_1, window_bounds = array<i64: 9, 8, 64>}, {pipeline_mode = #tpu.pipeline_mode<synchronous>, transform_indices = @transform_2, window_bounds = array<i64: 1, 64>}, {pipeline_mode = #tpu.pipeline_mode<synchronous>, transform_indices = @transform_3, window_bounds = array<i64: 9, 64, 128>}, {pipeline_mode = #tpu.pipeline_mode<synchronous>, transform_indices = @transform_4, window_bounds = array<i64: 8, 128>}, {pipeline_mode = #tpu.pipeline_mode<synchronous>, transform_indices = @transform_5, window_bounds = array<i64: 1, 128>}, {transform_indices = @transform_6, window_bounds = array<i64: 1, 16, 16, 128>}]} {
    %cst = arith.constant 0.000000e+00 : bf16
    %0 = vector.broadcast %cst : bf16 to vector<332x8xbf16>
    %c0 = arith.constant 0 : index
    %c0_0 = arith.constant 0 : index
    %1 = vector.load %arg8[%c0, %c0_0] : memref<332x8xbf16, #tpu.memory_space<vmem>>, vector<332x8xbf16>
    tpu.vector_store %arg8[%c0, %c0_0], %0 {strides = array<i32>} : memref<332x8xbf16, #tpu.memory_space<vmem>>, vector<332x8xbf16>,
    %cst_1 = arith.constant 0.000000e+00 : bf16
    %2 = vector.broadcast %cst_1 : bf16 to vector<332x64xbf16>
    %c0_2 = arith.constant 0 : index
    %c0_3 = arith.constant 0 : index
    %3 = vector.load %arg9[%c0_2, %c0_3] : memref<332x64xbf16, #tpu.memory_space<vmem>>, vector<332x64xbf16>
    tpu.vector_store %arg9[%c0_2, %c0_3], %2 {strides = array<i32>} : memref<332x64xbf16, #tpu.memory_space<vmem>>, vector<332x64xbf16>,
    %cst_4 = arith.constant 0.000000e+00 : f32
    %4 = vector.broadcast %cst_4 : f32 to vector<288x64xf32>
    %c0_5 = arith.constant 0 : index
    %c0_6 = arith.constant 0 : index
    %5 = vector.load %arg10[%c0_5, %c0_6] : memref<288x64xf32, #tpu.memory_space<vmem>>, vector<288x64xf32>
    tpu.vector_store %arg10[%c0_5, %c0_6], %4 {strides = array<i32>} : memref<288x64xf32, #tpu.memory_space<vmem>>, vector<288x64xf32>,
    %cst_7 = arith.constant 0.000000e+00 : f32
    %6 = vector.broadcast %cst_7 : f32 to vector<288x128xf32>
    %c0_8 = arith.constant 0 : index
    %c0_9 = arith.constant 0 : index
    %7 = vector.load %arg11[%c0_8, %c0_9] : memref<288x128xf32, #tpu.memory_space<vmem>>, vector<288x128xf32>
    tpu.vector_store %arg11[%c0_8, %c0_9], %6 {strides = array<i32>} : memref<288x128xf32, #tpu.memory_space<vmem>>, vector<288x128xf32>,
    %c0_10 = arith.constant 0 : index
    %c0_11 = arith.constant 0 : index
    %c0_12 = arith.constant 0 : index
    %c0_13 = arith.constant 0 : index
    %8 = vector.load %arg1[%c0_10, %c0_11, %c0_12, %c0_13] : memref<1x16x16x8xbf16, #tpu.memory_space<vmem>>, vector<1x1x16x8xbf16>
    %9 = vector.shape_cast %8 : vector<1x1x16x8xbf16> to vector<16x8xbf16>
    %c19 = arith.constant 19 : index
    %c0_14 = arith.constant 0 : index
    %10 = vector.load %arg8[%c19, %c0_14] : memref<332x8xbf16, #tpu.memory_space<vmem>>, vector<16x8xbf16>
    tpu.vector_store %arg8[%c19, %c0_14], %9 {strides = array<i32>} : memref<332x8xbf16, #tpu.memory_space<vmem>>, vector<16x8xbf16>,
    %c0_15 = arith.constant 0 : index
    %c1 = arith.constant 1 : index
    %c0_16 = arith.constant 0 : index
    %c0_17 = arith.constant 0 : index
    %11 = vector.load %arg1[%c0_15, %c1, %c0_16, %c0_17] : memref<1x16x16x8xbf16, #tpu.memory_space<vmem>>, vector<1x1x16x8xbf16>
    %12 = vector.shape_cast %11 : vector<1x1x16x8xbf16> to vector<16x8xbf16>
    %c37 = arith.constant 37 : index
    %c0_18 = arith.constant 0 : index
    %13 = vector.load %arg8[%c37, %c0_18] : memref<332x8xbf16, #tpu.memory_space<vmem>>, vector<16x8xbf16>
    tpu.vector_store %arg8[%c37, %c0_18], %12 {strides = array<i32>} : memref<332x8xbf16, #tpu.memory_space<vmem>>, vector<16x8xbf16>,
    %c0_19 = arith.constant 0 : index
    %c2 = arith.constant 2 : index
    %c0_20 = arith.constant 0 : index
    %c0_21 = arith.constant 0 : index
    %14 = vector.load %arg1[%c0_19, %c2, %c0_20, %c0_21] : memref<1x16x16x8xbf16, #tpu.memory_space<vmem>>, vector<1x1x16x8xbf16>
    %15 = vector.shape_cast %14 : vector<1x1x16x8xbf16> to vector<16x8xbf16>
    %c55 = arith.constant 55 : index
    %c0_22 = arith.constant 0 : index
    %16 = vector.load %arg8[%c55, %c0_22] : memref<332x8xbf16, #tpu.memory_space<vmem>>, vector<16x8xbf16>
    tpu.vector_store %arg8[%c55, %c0_22], %15 {strides = array<i32>} : memref<332x8xbf16, #tpu.memory_space<vmem>>, vector<16x8xbf16>,
    %c0_23 = arith.constant 0 : index
    %c3 = arith.constant 3 : index
    %c0_24 = arith.constant 0 : index
    %c0_25 = arith.constant 0 : index
    %17 = vector.load %arg1[%c0_23, %c3, %c0_24, %c0_25] : memref<1x16x16x8xbf16, #tpu.memory_space<vmem>>, vector<1x1x16x8xbf16>
    %18 = vector.shape_cast %17 : vector<1x1x16x8xbf16> to vector<16x8xbf16>
    %c73 = arith.constant 73 : index
    %c0_26 = arith.constant 0 : index
    %19 = vector.load %arg8[%c73, %c0_26] : memref<332x8xbf16, #tpu.memory_space<vmem>>, vector<16x8xbf16>
    tpu.vector_store %arg8[%c73, %c0_26], %18 {strides = array<i32>} : memref<332x8xbf16, #tpu.memory_space<vmem>>, vector<16x8xbf16>,
    %c0_27 = arith.constant 0 : index
    %c4 = arith.constant 4 : index
    %c0_28 = arith.constant 0 : index
    %c0_29 = arith.constant 0 : index
    %20 = vector.load %arg1[%c0_27, %c4, %c0_28, %c0_29] : memref<1x16x16x8xbf16, #tpu.memory_space<vmem>>, vector<1x1x16x8xbf16>
    %21 = vector.shape_cast %20 : vector<1x1x16x8xbf16> to vector<16x8xbf16>
    %c91 = arith.constant 91 : index
    %c0_30 = arith.constant 0 : index
    %22 = vector.load %arg8[%c91, %c0_30] : memref<332x8xbf16, #tpu.memory_space<vmem>>, vector<16x8xbf16>
    tpu.vector_store %arg8[%c91, %c0_30], %21 {strides = array<i32>} : memref<332x8xbf16, #tpu.memory_space<vmem>>, vector<16x8xbf16>,
    %c0_31 = arith.constant 0 : index
    %c5 = arith.constant 5 : index
    %c0_32 = arith.constant 0 : index
    %c0_33 = arith.constant 0 : index
    %23 = vector.load %arg1[%c0_31, %c5, %c0_32, %c0_33] : memref<1x16x16x8xbf16, #tpu.memory_space<vmem>>, vector<1x1x16x8xbf16>
    %24 = vector.shape_cast %23 : vector<1x1x16x8xbf16> to vector<16x8xbf16>
    %c109 = arith.constant 109 : index
    %c0_34 = arith.constant 0 : index
    %25 = vector.load %arg8[%c109, %c0_34] : memref<332x8xbf16, #tpu.memory_space<vmem>>, vector<16x8xbf16>
    tpu.vector_store %arg8[%c109, %c0_34], %24 {strides = array<i32>} : memref<332x8xbf16, #tpu.memory_space<vmem>>, vector<16x8xbf16>,
    %c0_35 = arith.constant 0 : index
    %c6 = arith.constant 6 : index
    %c0_36 = arith.constant 0 : index
    %c0_37 = arith.constant 0 : index
    %26 = vector.load %arg1[%c0_35, %c6, %c0_36, %c0_37] : memref<1x16x16x8xbf16, #tpu.memory_space<vmem>>, vector<1x1x16x8xbf16>
    %27 = vector.shape_cast %26 : vector<1x1x16x8xbf16> to vector<16x8xbf16>
    %c127 = arith.constant 127 : index
    %c0_38 = arith.constant 0 : index
    %28 = vector.load %arg8[%c127, %c0_38] : memref<332x8xbf16, #tpu.memory_space<vmem>>, vector<16x8xbf16>
    tpu.vector_store %arg8[%c127, %c0_38], %27 {strides = array<i32>} : memref<332x8xbf16, #tpu.memory_space<vmem>>, vector<16x8xbf16>,
    %c0_39 = arith.constant 0 : index
    %c7 = arith.constant 7 : index
    %c0_40 = arith.constant 0 : index
    %c0_41 = arith.constant 0 : index
    %29 = vector.load %arg1[%c0_39, %c7, %c0_40, %c0_41] : memref<1x16x16x8xbf16, #tpu.memory_space<vmem>>, vector<1x1x16x8xbf16>
    %30 = vector.shape_cast %29 : vector<1x1x16x8xbf16> to vector<16x8xbf16>
    %c145 = arith.constant 145 : index
    %c0_42 = arith.constant 0 : index
    %31 = vector.load %arg8[%c145, %c0_42] : memref<332x8xbf16, #tpu.memory_space<vmem>>, vector<16x8xbf16>
    tpu.vector_store %arg8[%c145, %c0_42], %30 {strides = array<i32>} : memref<332x8xbf16, #tpu.memory_space<vmem>>, vector<16x8xbf16>,
    %c0_43 = arith.constant 0 : index
    %c8 = arith.constant 8 : index
    %c0_44 = arith.constant 0 : index
    %c0_45 = arith.constant 0 : index
    %32 = vector.load %arg1[%c0_43, %c8, %c0_44, %c0_45] : memref<1x16x16x8xbf16, #tpu.memory_space<vmem>>, vector<1x1x16x8xbf16>
    %33 = vector.shape_cast %32 : vector<1x1x16x8xbf16> to vector<16x8xbf16>
    %c163 = arith.constant 163 : index
    %c0_46 = arith.constant 0 : index
    %34 = vector.load %arg8[%c163, %c0_46] : memref<332x8xbf16, #tpu.memory_space<vmem>>, vector<16x8xbf16>
    tpu.vector_store %arg8[%c163, %c0_46], %33 {strides = array<i32>} : memref<332x8xbf16, #tpu.memory_space<vmem>>, vector<16x8xbf16>,
    %c0_47 = arith.constant 0 : index
    %c9 = arith.constant 9 : index
    %c0_48 = arith.constant 0 : index
    %c0_49 = arith.constant 0 : index
    %35 = vector.load %arg1[%c0_47, %c9, %c0_48, %c0_49] : memref<1x16x16x8xbf16, #tpu.memory_space<vmem>>, vector<1x1x16x8xbf16>
    %36 = vector.shape_cast %35 : vector<1x1x16x8xbf16> to vector<16x8xbf16>
    %c181 = arith.constant 181 : index
    %c0_50 = arith.constant 0 : index
    %37 = vector.load %arg8[%c181, %c0_50] : memref<332x8xbf16, #tpu.memory_space<vmem>>, vector<16x8xbf16>
    tpu.vector_store %arg8[%c181, %c0_50], %36 {strides = array<i32>} : memref<332x8xbf16, #tpu.memory_space<vmem>>, vector<16x8xbf16>,
    %c0_51 = arith.constant 0 : index
    %c10 = arith.constant 10 : index
    %c0_52 = arith.constant 0 : index
    %c0_53 = arith.constant 0 : index
    %38 = vector.load %arg1[%c0_51, %c10, %c0_52, %c0_53] : memref<1x16x16x8xbf16, #tpu.memory_space<vmem>>, vector<1x1x16x8xbf16>
    %39 = vector.shape_cast %38 : vector<1x1x16x8xbf16> to vector<16x8xbf16>
    %c199 = arith.constant 199 : index
    %c0_54 = arith.constant 0 : index
    %40 = vector.load %arg8[%c199, %c0_54] : memref<332x8xbf16, #tpu.memory_space<vmem>>, vector<16x8xbf16>
    tpu.vector_store %arg8[%c199, %c0_54], %39 {strides = array<i32>} : memref<332x8xbf16, #tpu.memory_space<vmem>>, vector<16x8xbf16>,
    %c0_55 = arith.constant 0 : index
    %c11 = arith.constant 11 : index
    %c0_56 = arith.constant 0 : index
    %c0_57 = arith.constant 0 : index
    %41 = vector.load %arg1[%c0_55, %c11, %c0_56, %c0_57] : memref<1x16x16x8xbf16, #tpu.memory_space<vmem>>, vector<1x1x16x8xbf16>
    %42 = vector.shape_cast %41 : vector<1x1x16x8xbf16> to vector<16x8xbf16>
    %c217 = arith.constant 217 : index
    %c0_58 = arith.constant 0 : index
    %43 = vector.load %arg8[%c217, %c0_58] : memref<332x8xbf16, #tpu.memory_space<vmem>>, vector<16x8xbf16>
    tpu.vector_store %arg8[%c217, %c0_58], %42 {strides = array<i32>} : memref<332x8xbf16, #tpu.memory_space<vmem>>, vector<16x8xbf16>,
    %c0_59 = arith.constant 0 : index
    %c12 = arith.constant 12 : index
    %c0_60 = arith.constant 0 : index
    %c0_61 = arith.constant 0 : index
    %44 = vector.load %arg1[%c0_59, %c12, %c0_60, %c0_61] : memref<1x16x16x8xbf16, #tpu.memory_space<vmem>>, vector<1x1x16x8xbf16>
    %45 = vector.shape_cast %44 : vector<1x1x16x8xbf16> to vector<16x8xbf16>
    %c235 = arith.constant 235 : index
    %c0_62 = arith.constant 0 : index
    %46 = vector.load %arg8[%c235, %c0_62] : memref<332x8xbf16, #tpu.memory_space<vmem>>, vector<16x8xbf16>
    tpu.vector_store %arg8[%c235, %c0_62], %45 {strides = array<i32>} : memref<332x8xbf16, #tpu.memory_space<vmem>>, vector<16x8xbf16>,
    %c0_63 = arith.constant 0 : index
    %c13 = arith.constant 13 : index
    %c0_64 = arith.constant 0 : index
    %c0_65 = arith.constant 0 : index
    %47 = vector.load %arg1[%c0_63, %c13, %c0_64, %c0_65] : memref<1x16x16x8xbf16, #tpu.memory_space<vmem>>, vector<1x1x16x8xbf16>
    %48 = vector.shape_cast %47 : vector<1x1x16x8xbf16> to vector<16x8xbf16>
    %c253 = arith.constant 253 : index
    %c0_66 = arith.constant 0 : index
    %49 = vector.load %arg8[%c253, %c0_66] : memref<332x8xbf16, #tpu.memory_space<vmem>>, vector<16x8xbf16>
    tpu.vector_store %arg8[%c253, %c0_66], %48 {strides = array<i32>} : memref<332x8xbf16, #tpu.memory_space<vmem>>, vector<16x8xbf16>,
    %c0_67 = arith.constant 0 : index
    %c14 = arith.constant 14 : index
    %c0_68 = arith.constant 0 : index
    %c0_69 = arith.constant 0 : index
    %50 = vector.load %arg1[%c0_67, %c14, %c0_68, %c0_69] : memref<1x16x16x8xbf16, #tpu.memory_space<vmem>>, vector<1x1x16x8xbf16>
    %51 = vector.shape_cast %50 : vector<1x1x16x8xbf16> to vector<16x8xbf16>
    %c271 = arith.constant 271 : index
    %c0_70 = arith.constant 0 : index
    %52 = vector.load %arg8[%c271, %c0_70] : memref<332x8xbf16, #tpu.memory_space<vmem>>, vector<16x8xbf16>
    tpu.vector_store %arg8[%c271, %c0_70], %51 {strides = array<i32>} : memref<332x8xbf16, #tpu.memory_space<vmem>>, vector<16x8xbf16>,
    %c0_71 = arith.constant 0 : index
    %c15 = arith.constant 15 : index
    %c0_72 = arith.constant 0 : index
    %c0_73 = arith.constant 0 : index
    %53 = vector.load %arg1[%c0_71, %c15, %c0_72, %c0_73] : memref<1x16x16x8xbf16, #tpu.memory_space<vmem>>, vector<1x1x16x8xbf16>
    %54 = vector.shape_cast %53 : vector<1x1x16x8xbf16> to vector<16x8xbf16>
    %c289 = arith.constant 289 : index
    %c0_74 = arith.constant 0 : index
    %55 = vector.load %arg8[%c289, %c0_74] : memref<332x8xbf16, #tpu.memory_space<vmem>>, vector<16x8xbf16>
    tpu.vector_store %arg8[%c289, %c0_74], %54 {strides = array<i32>} : memref<332x8xbf16, #tpu.memory_space<vmem>>, vector<16x8xbf16>,
    %c0_75 = arith.constant 0 : index
    %c0_76 = arith.constant 0 : index
    %56 = vector.load %arg10[%c0_75, %c0_76] : memref<288x64xf32, #tpu.memory_space<vmem>>, vector<288x64xf32>
    %c0_77 = arith.constant 0 : index
    %c0_78 = arith.constant 0 : index
    %57 = vector.load %arg8[%c0_77, %c0_78] : memref<332x8xbf16, #tpu.memory_space<vmem>>, vector<288x8xbf16>
    %c0_79 = arith.constant 0 : index
    %c0_80 = arith.constant 0 : index
    %c0_81 = arith.constant 0 : index
    %58 = vector.load %arg2[%c0_79, %c0_80, %c0_81] : memref<9x8x64xbf16, #tpu.memory_space<vmem>>, vector<1x8x64xbf16>
    %59 = vector.shape_cast %58 : vector<1x8x64xbf16> to vector<8x64xbf16>
    %cst_82 = arith.constant dense<0.000000e+00> : vector<288x64xf32>
    %60 = tpu.matmul %57, %59, %cst_82 {dimension_numbers = #tpu.dot_dimension_numbers<[1], [0], [0], [1], [0, 0, 1, 1], [], []>} : vector<288x8xbf16>, vector<8x64xbf16>, vector<288x64xf32> -> vector<288x64xf32>
    %61 = arith.addf %56, %60 : vector<288x64xf32>
    %c0_83 = arith.constant 0 : index
    %c0_84 = arith.constant 0 : index
    %62 = vector.load %arg10[%c0_83, %c0_84] : memref<288x64xf32, #tpu.memory_space<vmem>>, vector<288x64xf32>
    tpu.vector_store %arg10[%c0_83, %c0_84], %61 {strides = array<i32>} : memref<288x64xf32, #tpu.memory_space<vmem>>, vector<288x64xf32>,
    %c0_85 = arith.constant 0 : index
    %c0_86 = arith.constant 0 : index
    %63 = vector.load %arg10[%c0_85, %c0_86] : memref<288x64xf32, #tpu.memory_space<vmem>>, vector<288x64xf32>
    %c1_87 = arith.constant 1 : index
    %c0_88 = arith.constant 0 : index
    %64 = vector.load %arg8[%c1_87, %c0_88] : memref<332x8xbf16, #tpu.memory_space<vmem>>, vector<288x8xbf16>
    %c1_89 = arith.constant 1 : index
    %c0_90 = arith.constant 0 : index
    %c0_91 = arith.constant 0 : index
    %65 = vector.load %arg2[%c1_89, %c0_90, %c0_91] : memref<9x8x64xbf16, #tpu.memory_space<vmem>>, vector<1x8x64xbf16>
    %66 = vector.shape_cast %65 : vector<1x8x64xbf16> to vector<8x64xbf16>
    %cst_92 = arith.constant dense<0.000000e+00> : vector<288x64xf32>
    %67 = tpu.matmul %64, %66, %cst_92 {dimension_numbers = #tpu.dot_dimension_numbers<[1], [0], [0], [1], [0, 0, 1, 1], [], []>} : vector<288x8xbf16>, vector<8x64xbf16>, vector<288x64xf32> -> vector<288x64xf32>
    %68 = arith.addf %63, %67 : vector<288x64xf32>
    %c0_93 = arith.constant 0 : index
    %c0_94 = arith.constant 0 : index
    %69 = vector.load %arg10[%c0_93, %c0_94] : memref<288x64xf32, #tpu.memory_space<vmem>>, vector<288x64xf32>
    tpu.vector_store %arg10[%c0_93, %c0_94], %68 {strides = array<i32>} : memref<288x64xf32, #tpu.memory_space<vmem>>, vector<288x64xf32>,
    %c0_95 = arith.constant 0 : index
    %c0_96 = arith.constant 0 : index
    %70 = vector.load %arg10[%c0_95, %c0_96] : memref<288x64xf32, #tpu.memory_space<vmem>>, vector<288x64xf32>
    %c2_97 = arith.constant 2 : index
    %c0_98 = arith.constant 0 : index
    %71 = vector.load %arg8[%c2_97, %c0_98] : memref<332x8xbf16, #tpu.memory_space<vmem>>, vector<288x8xbf16>
    %c2_99 = arith.constant 2 : index
    %c0_100 = arith.constant 0 : index
    %c0_101 = arith.constant 0 : index
    %72 = vector.load %arg2[%c2_99, %c0_100, %c0_101] : memref<9x8x64xbf16, #tpu.memory_space<vmem>>, vector<1x8x64xbf16>
    %73 = vector.shape_cast %72 : vector<1x8x64xbf16> to vector<8x64xbf16>
    %cst_102 = arith.constant dense<0.000000e+00> : vector<288x64xf32>
    %74 = tpu.matmul %71, %73, %cst_102 {dimension_numbers = #tpu.dot_dimension_numbers<[1], [0], [0], [1], [0, 0, 1, 1], [], []>} : vector<288x8xbf16>, vector<8x64xbf16>, vector<288x64xf32> -> vector<288x64xf32>
    %75 = arith.addf %70, %74 : vector<288x64xf32>
    %c0_103 = arith.constant 0 : index
    %c0_104 = arith.constant 0 : index
    %76 = vector.load %arg10[%c0_103, %c0_104] : memref<288x64xf32, #tpu.memory_space<vmem>>, vector<288x64xf32>
    tpu.vector_store %arg10[%c0_103, %c0_104], %75 {strides = array<i32>} : memref<288x64xf32, #tpu.memory_space<vmem>>, vector<288x64xf32>,
    %c0_105 = arith.constant 0 : index
    %c0_106 = arith.constant 0 : index
    %77 = vector.load %arg10[%c0_105, %c0_106] : memref<288x64xf32, #tpu.memory_space<vmem>>, vector<288x64xf32>
    %c18 = arith.constant 18 : index
    %c0_107 = arith.constant 0 : index
    %78 = vector.load %arg8[%c18, %c0_107] : memref<332x8xbf16, #tpu.memory_space<vmem>>, vector<288x8xbf16>
    %c3_108 = arith.constant 3 : index
    %c0_109 = arith.constant 0 : index
    %c0_110 = arith.constant 0 : index
    %79 = vector.load %arg2[%c3_108, %c0_109, %c0_110] : memref<9x8x64xbf16, #tpu.memory_space<vmem>>, vector<1x8x64xbf16>
    %80 = vector.shape_cast %79 : vector<1x8x64xbf16> to vector<8x64xbf16>
    %cst_111 = arith.constant dense<0.000000e+00> : vector<288x64xf32>
    %81 = tpu.matmul %78, %80, %cst_111 {dimension_numbers = #tpu.dot_dimension_numbers<[1], [0], [0], [1], [0, 0, 1, 1], [], []>} : vector<288x8xbf16>, vector<8x64xbf16>, vector<288x64xf32> -> vector<288x64xf32>
    %82 = arith.addf %77, %81 : vector<288x64xf32>
    %c0_112 = arith.constant 0 : index
    %c0_113 = arith.constant 0 : index
    %83 = vector.load %arg10[%c0_112, %c0_113] : memref<288x64xf32, #tpu.memory_space<vmem>>, vector<288x64xf32>
    tpu.vector_store %arg10[%c0_112, %c0_113], %82 {strides = array<i32>} : memref<288x64xf32, #tpu.memory_space<vmem>>, vector<288x64xf32>,
    %c0_114 = arith.constant 0 : index
    %c0_115 = arith.constant 0 : index
    %84 = vector.load %arg10[%c0_114, %c0_115] : memref<288x64xf32, #tpu.memory_space<vmem>>, vector<288x64xf32>
    %c19_116 = arith.constant 19 : index
    %c0_117 = arith.constant 0 : index
    %85 = vector.load %arg8[%c19_116, %c0_117] : memref<332x8xbf16, #tpu.memory_space<vmem>>, vector<288x8xbf16>
    %c4_118 = arith.constant 4 : index
    %c0_119 = arith.constant 0 : index
    %c0_120 = arith.constant 0 : index
    %86 = vector.load %arg2[%c4_118, %c0_119, %c0_120] : memref<9x8x64xbf16, #tpu.memory_space<vmem>>, vector<1x8x64xbf16>
    %87 = vector.shape_cast %86 : vector<1x8x64xbf16> to vector<8x64xbf16>
    %cst_121 = arith.constant dense<0.000000e+00> : vector<288x64xf32>
    %88 = tpu.matmul %85, %87, %cst_121 {dimension_numbers = #tpu.dot_dimension_numbers<[1], [0], [0], [1], [0, 0, 1, 1], [], []>} : vector<288x8xbf16>, vector<8x64xbf16>, vector<288x64xf32> -> vector<288x64xf32>
    %89 = arith.addf %84, %88 : vector<288x64xf32>
    %c0_122 = arith.constant 0 : index
    %c0_123 = arith.constant 0 : index
    %90 = vector.load %arg10[%c0_122, %c0_123] : memref<288x64xf32, #tpu.memory_space<vmem>>, vector<288x64xf32>
    tpu.vector_store %arg10[%c0_122, %c0_123], %89 {strides = array<i32>} : memref<288x64xf32, #tpu.memory_space<vmem>>, vector<288x64xf32>,
    %c0_124 = arith.constant 0 : index
    %c0_125 = arith.constant 0 : index
    %91 = vector.load %arg10[%c0_124, %c0_125] : memref<288x64xf32, #tpu.memory_space<vmem>>, vector<288x64xf32>
    %c20 = arith.constant 20 : index
    %c0_126 = arith.constant 0 : index
    %92 = vector.load %arg8[%c20, %c0_126] : memref<332x8xbf16, #tpu.memory_space<vmem>>, vector<288x8xbf16>
    %c5_127 = arith.constant 5 : index
    %c0_128 = arith.constant 0 : index
    %c0_129 = arith.constant 0 : index
    %93 = vector.load %arg2[%c5_127, %c0_128, %c0_129] : memref<9x8x64xbf16, #tpu.memory_space<vmem>>, vector<1x8x64xbf16>
    %94 = vector.shape_cast %93 : vector<1x8x64xbf16> to vector<8x64xbf16>
    %cst_130 = arith.constant dense<0.000000e+00> : vector<288x64xf32>
    %95 = tpu.matmul %92, %94, %cst_130 {dimension_numbers = #tpu.dot_dimension_numbers<[1], [0], [0], [1], [0, 0, 1, 1], [], []>} : vector<288x8xbf16>, vector<8x64xbf16>, vector<288x64xf32> -> vector<288x64xf32>
    %96 = arith.addf %91, %95 : vector<288x64xf32>
    %c0_131 = arith.constant 0 : index
    %c0_132 = arith.constant 0 : index
    %97 = vector.load %arg10[%c0_131, %c0_132] : memref<288x64xf32, #tpu.memory_space<vmem>>, vector<288x64xf32>
    tpu.vector_store %arg10[%c0_131, %c0_132], %96 {strides = array<i32>} : memref<288x64xf32, #tpu.memory_space<vmem>>, vector<288x64xf32>,
    %c0_133 = arith.constant 0 : index
    %c0_134 = arith.constant 0 : index
    %98 = vector.load %arg10[%c0_133, %c0_134] : memref<288x64xf32, #tpu.memory_space<vmem>>, vector<288x64xf32>
    %c36 = arith.constant 36 : index
    %c0_135 = arith.constant 0 : index
    %99 = vector.load %arg8[%c36, %c0_135] : memref<332x8xbf16, #tpu.memory_space<vmem>>, vector<288x8xbf16>
    %c6_136 = arith.constant 6 : index
    %c0_137 = arith.constant 0 : index
    %c0_138 = arith.constant 0 : index
    %100 = vector.load %arg2[%c6_136, %c0_137, %c0_138] : memref<9x8x64xbf16, #tpu.memory_space<vmem>>, vector<1x8x64xbf16>
    %101 = vector.shape_cast %100 : vector<1x8x64xbf16> to vector<8x64xbf16>
    %cst_139 = arith.constant dense<0.000000e+00> : vector<288x64xf32>
    %102 = tpu.matmul %99, %101, %cst_139 {dimension_numbers = #tpu.dot_dimension_numbers<[1], [0], [0], [1], [0, 0, 1, 1], [], []>} : vector<288x8xbf16>, vector<8x64xbf16>, vector<288x64xf32> -> vector<288x64xf32>
    %103 = arith.addf %98, %102 : vector<288x64xf32>
    %c0_140 = arith.constant 0 : index
    %c0_141 = arith.constant 0 : index
    %104 = vector.load %arg10[%c0_140, %c0_141] : memref<288x64xf32, #tpu.memory_space<vmem>>, vector<288x64xf32>
    tpu.vector_store %arg10[%c0_140, %c0_141], %103 {strides = array<i32>} : memref<288x64xf32, #tpu.memory_space<vmem>>, vector<288x64xf32>,
    %c0_142 = arith.constant 0 : index
    %c0_143 = arith.constant 0 : index
    %105 = vector.load %arg10[%c0_142, %c0_143] : memref<288x64xf32, #tpu.memory_space<vmem>>, vector<288x64xf32>
    %c37_144 = arith.constant 37 : index
    %c0_145 = arith.constant 0 : index
    %106 = vector.load %arg8[%c37_144, %c0_145] : memref<332x8xbf16, #tpu.memory_space<vmem>>, vector<288x8xbf16>
    %c7_146 = arith.constant 7 : index
    %c0_147 = arith.constant 0 : index
    %c0_148 = arith.constant 0 : index
    %107 = vector.load %arg2[%c7_146, %c0_147, %c0_148] : memref<9x8x64xbf16, #tpu.memory_space<vmem>>, vector<1x8x64xbf16>
    %108 = vector.shape_cast %107 : vector<1x8x64xbf16> to vector<8x64xbf16>
    %cst_149 = arith.constant dense<0.000000e+00> : vector<288x64xf32>
    %109 = tpu.matmul %106, %108, %cst_149 {dimension_numbers = #tpu.dot_dimension_numbers<[1], [0], [0], [1], [0, 0, 1, 1], [], []>} : vector<288x8xbf16>, vector<8x64xbf16>, vector<288x64xf32> -> vector<288x64xf32>
    %110 = arith.addf %105, %109 : vector<288x64xf32>
    %c0_150 = arith.constant 0 : index
    %c0_151 = arith.constant 0 : index
    %111 = vector.load %arg10[%c0_150, %c0_151] : memref<288x64xf32, #tpu.memory_space<vmem>>, vector<288x64xf32>
    tpu.vector_store %arg10[%c0_150, %c0_151], %110 {strides = array<i32>} : memref<288x64xf32, #tpu.memory_space<vmem>>, vector<288x64xf32>,
    %c0_152 = arith.constant 0 : index
    %c0_153 = arith.constant 0 : index
    %112 = vector.load %arg10[%c0_152, %c0_153] : memref<288x64xf32, #tpu.memory_space<vmem>>, vector<288x64xf32>
    %c38 = arith.constant 38 : index
    %c0_154 = arith.constant 0 : index
    %113 = vector.load %arg8[%c38, %c0_154] : memref<332x8xbf16, #tpu.memory_space<vmem>>, vector<288x8xbf16>
    %c8_155 = arith.constant 8 : index
    %c0_156 = arith.constant 0 : index
    %c0_157 = arith.constant 0 : index
    %114 = vector.load %arg2[%c8_155, %c0_156, %c0_157] : memref<9x8x64xbf16, #tpu.memory_space<vmem>>, vector<1x8x64xbf16>
    %115 = vector.shape_cast %114 : vector<1x8x64xbf16> to vector<8x64xbf16>
    %cst_158 = arith.constant dense<0.000000e+00> : vector<288x64xf32>
    %116 = tpu.matmul %113, %115, %cst_158 {dimension_numbers = #tpu.dot_dimension_numbers<[1], [0], [0], [1], [0, 0, 1, 1], [], []>} : vector<288x8xbf16>, vector<8x64xbf16>, vector<288x64xf32> -> vector<288x64xf32>
    %117 = arith.addf %112, %116 : vector<288x64xf32>
    %c0_159 = arith.constant 0 : index
    %c0_160 = arith.constant 0 : index
    %118 = vector.load %arg10[%c0_159, %c0_160] : memref<288x64xf32, #tpu.memory_space<vmem>>, vector<288x64xf32>
    tpu.vector_store %arg10[%c0_159, %c0_160], %117 {strides = array<i32>} : memref<288x64xf32, #tpu.memory_space<vmem>>, vector<288x64xf32>,
    %c0_161 = arith.constant 0 : index
    %c0_162 = arith.constant 0 : index
    %119 = vector.load %arg3[%c0_161, %c0_162] : memref<1x64xf32, #tpu.memory_space<vmem>>, vector<1x64xf32>
    %c0_163 = arith.constant 0 : index
    %c0_164 = arith.constant 0 : index
    %120 = vector.load %arg10[%c0_163, %c0_164] : memref<288x64xf32, #tpu.memory_space<vmem>>, vector<16x64xf32>
    %121 = vector.broadcast %119 : vector<1x64xf32> to vector<16x64xf32>
    %122 = arith.addf %120, %121 : vector<16x64xf32>
    %cst_165 = arith.constant 0.000000e+00 : f32
    %123 = vector.broadcast %cst_165 : f32 to vector<16x64xf32>
    %124 = arith.cmpf oge, %122, %123 : vector<16x64xf32>
    %cst_166 = arith.constant 1.000000e-01 : f32
    %125 = vector.broadcast %cst_166 : f32 to vector<16x64xf32>
    %126 = arith.mulf %125, %122 : vector<16x64xf32>
    %127 = arith.select %124, %122, %126 : vector<16x64xi1>, vector<16x64xf32>
    %128 = arith.truncf %127 : vector<16x64xf32> to vector<16x64xbf16>
    %c19_167 = arith.constant 19 : index
    %c0_168 = arith.constant 0 : index
    %129 = vector.load %arg9[%c19_167, %c0_168] : memref<332x64xbf16, #tpu.memory_space<vmem>>, vector<16x64xbf16>
    tpu.vector_store %arg9[%c19_167, %c0_168], %128 {strides = array<i32>} : memref<332x64xbf16, #tpu.memory_space<vmem>>, vector<16x64xbf16>,
    %c18_169 = arith.constant 18 : index
    %c0_170 = arith.constant 0 : index
    %130 = vector.load %arg10[%c18_169, %c0_170] : memref<288x64xf32, #tpu.memory_space<vmem>>, vector<16x64xf32>
    %131 = vector.broadcast %119 : vector<1x64xf32> to vector<16x64xf32>
    %132 = arith.addf %130, %131 : vector<16x64xf32>
    %cst_171 = arith.constant 0.000000e+00 : f32
    %133 = vector.broadcast %cst_171 : f32 to vector<16x64xf32>
    %134 = arith.cmpf oge, %132, %133 : vector<16x64xf32>
    %cst_172 = arith.constant 1.000000e-01 : f32
    %135 = vector.broadcast %cst_172 : f32 to vector<16x64xf32>
    %136 = arith.mulf %135, %132 : vector<16x64xf32>
    %137 = arith.select %134, %132, %136 : vector<16x64xi1>, vector<16x64xf32>
    %138 = arith.truncf %137 : vector<16x64xf32> to vector<16x64xbf16>
    %c37_173 = arith.constant 37 : index
    %c0_174 = arith.constant 0 : index
    %139 = vector.load %arg9[%c37_173, %c0_174] : memref<332x64xbf16, #tpu.memory_space<vmem>>, vector<16x64xbf16>
    tpu.vector_store %arg9[%c37_173, %c0_174], %138 {strides = array<i32>} : memref<332x64xbf16, #tpu.memory_space<vmem>>, vector<16x64xbf16>,
    %c36_175 = arith.constant 36 : index
    %c0_176 = arith.constant 0 : index
    %140 = vector.load %arg10[%c36_175, %c0_176] : memref<288x64xf32, #tpu.memory_space<vmem>>, vector<16x64xf32>
    %141 = vector.broadcast %119 : vector<1x64xf32> to vector<16x64xf32>
    %142 = arith.addf %140, %141 : vector<16x64xf32>
    %cst_177 = arith.constant 0.000000e+00 : f32
    %143 = vector.broadcast %cst_177 : f32 to vector<16x64xf32>
    %144 = arith.cmpf oge, %142, %143 : vector<16x64xf32>
    %cst_178 = arith.constant 1.000000e-01 : f32
    %145 = vector.broadcast %cst_178 : f32 to vector<16x64xf32>
    %146 = arith.mulf %145, %142 : vector<16x64xf32>
    %147 = arith.select %144, %142, %146 : vector<16x64xi1>, vector<16x64xf32>
    %148 = arith.truncf %147 : vector<16x64xf32> to vector<16x64xbf16>
    %c55_179 = arith.constant 55 : index
    %c0_180 = arith.constant 0 : index
    %149 = vector.load %arg9[%c55_179, %c0_180] : memref<332x64xbf16, #tpu.memory_space<vmem>>, vector<16x64xbf16>
    tpu.vector_store %arg9[%c55_179, %c0_180], %148 {strides = array<i32>} : memref<332x64xbf16, #tpu.memory_space<vmem>>, vector<16x64xbf16>,
    %c54 = arith.constant 54 : index
    %c0_181 = arith.constant 0 : index
    %150 = vector.load %arg10[%c54, %c0_181] : memref<288x64xf32, #tpu.memory_space<vmem>>, vector<16x64xf32>
    %151 = vector.broadcast %119 : vector<1x64xf32> to vector<16x64xf32>
    %152 = arith.addf %150, %151 : vector<16x64xf32>
    %cst_182 = arith.constant 0.000000e+00 : f32
    %153 = vector.broadcast %cst_182 : f32 to vector<16x64xf32>
    %154 = arith.cmpf oge, %152, %153 : vector<16x64xf32>
    %cst_183 = arith.constant 1.000000e-01 : f32
    %155 = vector.broadcast %cst_183 : f32 to vector<16x64xf32>
    %156 = arith.mulf %155, %152 : vector<16x64xf32>
    %157 = arith.select %154, %152, %156 : vector<16x64xi1>, vector<16x64xf32>
    %158 = arith.truncf %157 : vector<16x64xf32> to vector<16x64xbf16>
    %c73_184 = arith.constant 73 : index
    %c0_185 = arith.constant 0 : index
    %159 = vector.load %arg9[%c73_184, %c0_185] : memref<332x64xbf16, #tpu.memory_space<vmem>>, vector<16x64xbf16>
    tpu.vector_store %arg9[%c73_184, %c0_185], %158 {strides = array<i32>} : memref<332x64xbf16, #tpu.memory_space<vmem>>, vector<16x64xbf16>,
    %c72 = arith.constant 72 : index
    %c0_186 = arith.constant 0 : index
    %160 = vector.load %arg10[%c72, %c0_186] : memref<288x64xf32, #tpu.memory_space<vmem>>, vector<16x64xf32>
    %161 = vector.broadcast %119 : vector<1x64xf32> to vector<16x64xf32>
    %162 = arith.addf %160, %161 : vector<16x64xf32>
    %cst_187 = arith.constant 0.000000e+00 : f32
    %163 = vector.broadcast %cst_187 : f32 to vector<16x64xf32>
    %164 = arith.cmpf oge, %162, %163 : vector<16x64xf32>
    %cst_188 = arith.constant 1.000000e-01 : f32
    %165 = vector.broadcast %cst_188 : f32 to vector<16x64xf32>
    %166 = arith.mulf %165, %162 : vector<16x64xf32>
    %167 = arith.select %164, %162, %166 : vector<16x64xi1>, vector<16x64xf32>
    %168 = arith.truncf %167 : vector<16x64xf32> to vector<16x64xbf16>
    %c91_189 = arith.constant 91 : index
    %c0_190 = arith.constant 0 : index
    %169 = vector.load %arg9[%c91_189, %c0_190] : memref<332x64xbf16, #tpu.memory_space<vmem>>, vector<16x64xbf16>
    tpu.vector_store %arg9[%c91_189, %c0_190], %168 {strides = array<i32>} : memref<332x64xbf16, #tpu.memory_space<vmem>>, vector<16x64xbf16>,
    %c90 = arith.constant 90 : index
    %c0_191 = arith.constant 0 : index
    %170 = vector.load %arg10[%c90, %c0_191] : memref<288x64xf32, #tpu.memory_space<vmem>>, vector<16x64xf32>
    %171 = vector.broadcast %119 : vector<1x64xf32> to vector<16x64xf32>
    %172 = arith.addf %170, %171 : vector<16x64xf32>
    %cst_192 = arith.constant 0.000000e+00 : f32
    %173 = vector.broadcast %cst_192 : f32 to vector<16x64xf32>
    %174 = arith.cmpf oge, %172, %173 : vector<16x64xf32>
    %cst_193 = arith.constant 1.000000e-01 : f32
    %175 = vector.broadcast %cst_193 : f32 to vector<16x64xf32>
    %176 = arith.mulf %175, %172 : vector<16x64xf32>
    %177 = arith.select %174, %172, %176 : vector<16x64xi1>, vector<16x64xf32>
    %178 = arith.truncf %177 : vector<16x64xf32> to vector<16x64xbf16>
    %c109_194 = arith.constant 109 : index
    %c0_195 = arith.constant 0 : index
    %179 = vector.load %arg9[%c109_194, %c0_195] : memref<332x64xbf16, #tpu.memory_space<vmem>>, vector<16x64xbf16>
    tpu.vector_store %arg9[%c109_194, %c0_195], %178 {strides = array<i32>} : memref<332x64xbf16, #tpu.memory_space<vmem>>, vector<16x64xbf16>,
    %c108 = arith.constant 108 : index
    %c0_196 = arith.constant 0 : index
    %180 = vector.load %arg10[%c108, %c0_196] : memref<288x64xf32, #tpu.memory_space<vmem>>, vector<16x64xf32>
    %181 = vector.broadcast %119 : vector<1x64xf32> to vector<16x64xf32>
    %182 = arith.addf %180, %181 : vector<16x64xf32>
    %cst_197 = arith.constant 0.000000e+00 : f32
    %183 = vector.broadcast %cst_197 : f32 to vector<16x64xf32>
    %184 = arith.cmpf oge, %182, %183 : vector<16x64xf32>
    %cst_198 = arith.constant 1.000000e-01 : f32
    %185 = vector.broadcast %cst_198 : f32 to vector<16x64xf32>
    %186 = arith.mulf %185, %182 : vector<16x64xf32>
    %187 = arith.select %184, %182, %186 : vector<16x64xi1>, vector<16x64xf32>
    %188 = arith.truncf %187 : vector<16x64xf32> to vector<16x64xbf16>
    %c127_199 = arith.constant 127 : index
    %c0_200 = arith.constant 0 : index
    %189 = vector.load %arg9[%c127_199, %c0_200] : memref<332x64xbf16, #tpu.memory_space<vmem>>, vector<16x64xbf16>
    tpu.vector_store %arg9[%c127_199, %c0_200], %188 {strides = array<i32>} : memref<332x64xbf16, #tpu.memory_space<vmem>>, vector<16x64xbf16>,
    %c126 = arith.constant 126 : index
    %c0_201 = arith.constant 0 : index
    %190 = vector.load %arg10[%c126, %c0_201] : memref<288x64xf32, #tpu.memory_space<vmem>>, vector<16x64xf32>
    %191 = vector.broadcast %119 : vector<1x64xf32> to vector<16x64xf32>
    %192 = arith.addf %190, %191 : vector<16x64xf32>
    %cst_202 = arith.constant 0.000000e+00 : f32
    %193 = vector.broadcast %cst_202 : f32 to vector<16x64xf32>
    %194 = arith.cmpf oge, %192, %193 : vector<16x64xf32>
    %cst_203 = arith.constant 1.000000e-01 : f32
    %195 = vector.broadcast %cst_203 : f32 to vector<16x64xf32>
    %196 = arith.mulf %195, %192 : vector<16x64xf32>
    %197 = arith.select %194, %192, %196 : vector<16x64xi1>, vector<16x64xf32>
    %198 = arith.truncf %197 : vector<16x64xf32> to vector<16x64xbf16>
    %c145_204 = arith.constant 145 : index
    %c0_205 = arith.constant 0 : index
    %199 = vector.load %arg9[%c145_204, %c0_205] : memref<332x64xbf16, #tpu.memory_space<vmem>>, vector<16x64xbf16>
    tpu.vector_store %arg9[%c145_204, %c0_205], %198 {strides = array<i32>} : memref<332x64xbf16, #tpu.memory_space<vmem>>, vector<16x64xbf16>,
    %c144 = arith.constant 144 : index
    %c0_206 = arith.constant 0 : index
    %200 = vector.load %arg10[%c144, %c0_206] : memref<288x64xf32, #tpu.memory_space<vmem>>, vector<16x64xf32>
    %201 = vector.broadcast %119 : vector<1x64xf32> to vector<16x64xf32>
    %202 = arith.addf %200, %201 : vector<16x64xf32>
    %cst_207 = arith.constant 0.000000e+00 : f32
    %203 = vector.broadcast %cst_207 : f32 to vector<16x64xf32>
    %204 = arith.cmpf oge, %202, %203 : vector<16x64xf32>
    %cst_208 = arith.constant 1.000000e-01 : f32
    %205 = vector.broadcast %cst_208 : f32 to vector<16x64xf32>
    %206 = arith.mulf %205, %202 : vector<16x64xf32>
    %207 = arith.select %204, %202, %206 : vector<16x64xi1>, vector<16x64xf32>
    %208 = arith.truncf %207 : vector<16x64xf32> to vector<16x64xbf16>
    %c163_209 = arith.constant 163 : index
    %c0_210 = arith.constant 0 : index
    %209 = vector.load %arg9[%c163_209, %c0_210] : memref<332x64xbf16, #tpu.memory_space<vmem>>, vector<16x64xbf16>
    tpu.vector_store %arg9[%c163_209, %c0_210], %208 {strides = array<i32>} : memref<332x64xbf16, #tpu.memory_space<vmem>>, vector<16x64xbf16>,
    %c162 = arith.constant 162 : index
    %c0_211 = arith.constant 0 : index
    %210 = vector.load %arg10[%c162, %c0_211] : memref<288x64xf32, #tpu.memory_space<vmem>>, vector<16x64xf32>
    %211 = vector.broadcast %119 : vector<1x64xf32> to vector<16x64xf32>
    %212 = arith.addf %210, %211 : vector<16x64xf32>
    %cst_212 = arith.constant 0.000000e+00 : f32
    %213 = vector.broadcast %cst_212 : f32 to vector<16x64xf32>
    %214 = arith.cmpf oge, %212, %213 : vector<16x64xf32>
    %cst_213 = arith.constant 1.000000e-01 : f32
    %215 = vector.broadcast %cst_213 : f32 to vector<16x64xf32>
    %216 = arith.mulf %215, %212 : vector<16x64xf32>
    %217 = arith.select %214, %212, %216 : vector<16x64xi1>, vector<16x64xf32>
    %218 = arith.truncf %217 : vector<16x64xf32> to vector<16x64xbf16>
    %c181_214 = arith.constant 181 : index
    %c0_215 = arith.constant 0 : index
    %219 = vector.load %arg9[%c181_214, %c0_215] : memref<332x64xbf16, #tpu.memory_space<vmem>>, vector<16x64xbf16>
    tpu.vector_store %arg9[%c181_214, %c0_215], %218 {strides = array<i32>} : memref<332x64xbf16, #tpu.memory_space<vmem>>, vector<16x64xbf16>,
    %c180 = arith.constant 180 : index
    %c0_216 = arith.constant 0 : index
    %220 = vector.load %arg10[%c180, %c0_216] : memref<288x64xf32, #tpu.memory_space<vmem>>, vector<16x64xf32>
    %221 = vector.broadcast %119 : vector<1x64xf32> to vector<16x64xf32>
    %222 = arith.addf %220, %221 : vector<16x64xf32>
    %cst_217 = arith.constant 0.000000e+00 : f32
    %223 = vector.broadcast %cst_217 : f32 to vector<16x64xf32>
    %224 = arith.cmpf oge, %222, %223 : vector<16x64xf32>
    %cst_218 = arith.constant 1.000000e-01 : f32
    %225 = vector.broadcast %cst_218 : f32 to vector<16x64xf32>
    %226 = arith.mulf %225, %222 : vector<16x64xf32>
    %227 = arith.select %224, %222, %226 : vector<16x64xi1>, vector<16x64xf32>
    %228 = arith.truncf %227 : vector<16x64xf32> to vector<16x64xbf16>
    %c199_219 = arith.constant 199 : index
    %c0_220 = arith.constant 0 : index
    %229 = vector.load %arg9[%c199_219, %c0_220] : memref<332x64xbf16, #tpu.memory_space<vmem>>, vector<16x64xbf16>
    tpu.vector_store %arg9[%c199_219, %c0_220], %228 {strides = array<i32>} : memref<332x64xbf16, #tpu.memory_space<vmem>>, vector<16x64xbf16>,
    %c198 = arith.constant 198 : index
    %c0_221 = arith.constant 0 : index
    %230 = vector.load %arg10[%c198, %c0_221] : memref<288x64xf32, #tpu.memory_space<vmem>>, vector<16x64xf32>
    %231 = vector.broadcast %119 : vector<1x64xf32> to vector<16x64xf32>
    %232 = arith.addf %230, %231 : vector<16x64xf32>
    %cst_222 = arith.constant 0.000000e+00 : f32
    %233 = vector.broadcast %cst_222 : f32 to vector<16x64xf32>
    %234 = arith.cmpf oge, %232, %233 : vector<16x64xf32>
    %cst_223 = arith.constant 1.000000e-01 : f32
    %235 = vector.broadcast %cst_223 : f32 to vector<16x64xf32>
    %236 = arith.mulf %235, %232 : vector<16x64xf32>
    %237 = arith.select %234, %232, %236 : vector<16x64xi1>, vector<16x64xf32>
    %238 = arith.truncf %237 : vector<16x64xf32> to vector<16x64xbf16>
    %c217_224 = arith.constant 217 : index
    %c0_225 = arith.constant 0 : index
    %239 = vector.load %arg9[%c217_224, %c0_225] : memref<332x64xbf16, #tpu.memory_space<vmem>>, vector<16x64xbf16>
    tpu.vector_store %arg9[%c217_224, %c0_225], %238 {strides = array<i32>} : memref<332x64xbf16, #tpu.memory_space<vmem>>, vector<16x64xbf16>,
    %c216 = arith.constant 216 : index
    %c0_226 = arith.constant 0 : index
    %240 = vector.load %arg10[%c216, %c0_226] : memref<288x64xf32, #tpu.memory_space<vmem>>, vector<16x64xf32>
    %241 = vector.broadcast %119 : vector<1x64xf32> to vector<16x64xf32>
    %242 = arith.addf %240, %241 : vector<16x64xf32>
    %cst_227 = arith.constant 0.000000e+00 : f32
    %243 = vector.broadcast %cst_227 : f32 to vector<16x64xf32>
    %244 = arith.cmpf oge, %242, %243 : vector<16x64xf32>
    %cst_228 = arith.constant 1.000000e-01 : f32
    %245 = vector.broadcast %cst_228 : f32 to vector<16x64xf32>
    %246 = arith.mulf %245, %242 : vector<16x64xf32>
    %247 = arith.select %244, %242, %246 : vector<16x64xi1>, vector<16x64xf32>
    %248 = arith.truncf %247 : vector<16x64xf32> to vector<16x64xbf16>
    %c235_229 = arith.constant 235 : index
    %c0_230 = arith.constant 0 : index
    %249 = vector.load %arg9[%c235_229, %c0_230] : memref<332x64xbf16, #tpu.memory_space<vmem>>, vector<16x64xbf16>
    tpu.vector_store %arg9[%c235_229, %c0_230], %248 {strides = array<i32>} : memref<332x64xbf16, #tpu.memory_space<vmem>>, vector<16x64xbf16>,
    %c234 = arith.constant 234 : index
    %c0_231 = arith.constant 0 : index
    %250 = vector.load %arg10[%c234, %c0_231] : memref<288x64xf32, #tpu.memory_space<vmem>>, vector<16x64xf32>
    %251 = vector.broadcast %119 : vector<1x64xf32> to vector<16x64xf32>
    %252 = arith.addf %250, %251 : vector<16x64xf32>
    %cst_232 = arith.constant 0.000000e+00 : f32
    %253 = vector.broadcast %cst_232 : f32 to vector<16x64xf32>
    %254 = arith.cmpf oge, %252, %253 : vector<16x64xf32>
    %cst_233 = arith.constant 1.000000e-01 : f32
    %255 = vector.broadcast %cst_233 : f32 to vector<16x64xf32>
    %256 = arith.mulf %255, %252 : vector<16x64xf32>
    %257 = arith.select %254, %252, %256 : vector<16x64xi1>, vector<16x64xf32>
    %258 = arith.truncf %257 : vector<16x64xf32> to vector<16x64xbf16>
    %c253_234 = arith.constant 253 : index
    %c0_235 = arith.constant 0 : index
    %259 = vector.load %arg9[%c253_234, %c0_235] : memref<332x64xbf16, #tpu.memory_space<vmem>>, vector<16x64xbf16>
    tpu.vector_store %arg9[%c253_234, %c0_235], %258 {strides = array<i32>} : memref<332x64xbf16, #tpu.memory_space<vmem>>, vector<16x64xbf16>,
    %c252 = arith.constant 252 : index
    %c0_236 = arith.constant 0 : index
    %260 = vector.load %arg10[%c252, %c0_236] : memref<288x64xf32, #tpu.memory_space<vmem>>, vector<16x64xf32>
    %261 = vector.broadcast %119 : vector<1x64xf32> to vector<16x64xf32>
    %262 = arith.addf %260, %261 : vector<16x64xf32>
    %cst_237 = arith.constant 0.000000e+00 : f32
    %263 = vector.broadcast %cst_237 : f32 to vector<16x64xf32>
    %264 = arith.cmpf oge, %262, %263 : vector<16x64xf32>
    %cst_238 = arith.constant 1.000000e-01 : f32
    %265 = vector.broadcast %cst_238 : f32 to vector<16x64xf32>
    %266 = arith.mulf %265, %262 : vector<16x64xf32>
    %267 = arith.select %264, %262, %266 : vector<16x64xi1>, vector<16x64xf32>
    %268 = arith.truncf %267 : vector<16x64xf32> to vector<16x64xbf16>
    %c271_239 = arith.constant 271 : index
    %c0_240 = arith.constant 0 : index
    %269 = vector.load %arg9[%c271_239, %c0_240] : memref<332x64xbf16, #tpu.memory_space<vmem>>, vector<16x64xbf16>
    tpu.vector_store %arg9[%c271_239, %c0_240], %268 {strides = array<i32>} : memref<332x64xbf16, #tpu.memory_space<vmem>>, vector<16x64xbf16>,
    %c270 = arith.constant 270 : index
    %c0_241 = arith.constant 0 : index
    %270 = vector.load %arg10[%c270, %c0_241] : memref<288x64xf32, #tpu.memory_space<vmem>>, vector<16x64xf32>
    %271 = vector.broadcast %119 : vector<1x64xf32> to vector<16x64xf32>
    %272 = arith.addf %270, %271 : vector<16x64xf32>
    %cst_242 = arith.constant 0.000000e+00 : f32
    %273 = vector.broadcast %cst_242 : f32 to vector<16x64xf32>
    %274 = arith.cmpf oge, %272, %273 : vector<16x64xf32>
    %cst_243 = arith.constant 1.000000e-01 : f32
    %275 = vector.broadcast %cst_243 : f32 to vector<16x64xf32>
    %276 = arith.mulf %275, %272 : vector<16x64xf32>
    %277 = arith.select %274, %272, %276 : vector<16x64xi1>, vector<16x64xf32>
    %278 = arith.truncf %277 : vector<16x64xf32> to vector<16x64xbf16>
    %c289_244 = arith.constant 289 : index
    %c0_245 = arith.constant 0 : index
    %279 = vector.load %arg9[%c289_244, %c0_245] : memref<332x64xbf16, #tpu.memory_space<vmem>>, vector<16x64xbf16>
    tpu.vector_store %arg9[%c289_244, %c0_245], %278 {strides = array<i32>} : memref<332x64xbf16, #tpu.memory_space<vmem>>, vector<16x64xbf16>,
    %c0_246 = arith.constant 0 : index
    %c0_247 = arith.constant 0 : index
    %280 = vector.load %arg11[%c0_246, %c0_247] : memref<288x128xf32, #tpu.memory_space<vmem>>, vector<288x128xf32>
    %c0_248 = arith.constant 0 : index
    %c0_249 = arith.constant 0 : index
    %281 = vector.load %arg9[%c0_248, %c0_249] : memref<332x64xbf16, #tpu.memory_space<vmem>>, vector<288x64xbf16>
    %c0_250 = arith.constant 0 : index
    %c0_251 = arith.constant 0 : index
    %c0_252 = arith.constant 0 : index
    %282 = vector.load %arg4[%c0_250, %c0_251, %c0_252] : memref<9x64x128xbf16, #tpu.memory_space<vmem>>, vector<1x64x128xbf16>
    %283 = vector.shape_cast %282 : vector<1x64x128xbf16> to vector<64x128xbf16>
    %cst_253 = arith.constant dense<0.000000e+00> : vector<288x128xf32>
    %284 = tpu.matmul %281, %283, %cst_253 {dimension_numbers = #tpu.dot_dimension_numbers<[1], [0], [0], [1], [0, 0, 1, 1], [], []>} : vector<288x64xbf16>, vector<64x128xbf16>, vector<288x128xf32> -> vector<288x128xf32>
    %285 = arith.addf %280, %284 : vector<288x128xf32>
    %c0_254 = arith.constant 0 : index
    %c0_255 = arith.constant 0 : index
    %286 = vector.load %arg11[%c0_254, %c0_255] : memref<288x128xf32, #tpu.memory_space<vmem>>, vector<288x128xf32>
    tpu.vector_store %arg11[%c0_254, %c0_255], %285 {strides = array<i32>} : memref<288x128xf32, #tpu.memory_space<vmem>>, vector<288x128xf32>,
    %c0_256 = arith.constant 0 : index
    %c0_257 = arith.constant 0 : index
    %287 = vector.load %arg11[%c0_256, %c0_257] : memref<288x128xf32, #tpu.memory_space<vmem>>, vector<288x128xf32>
    %c1_258 = arith.constant 1 : index
    %c0_259 = arith.constant 0 : index
    %288 = vector.load %arg9[%c1_258, %c0_259] : memref<332x64xbf16, #tpu.memory_space<vmem>>, vector<288x64xbf16>
    %c1_260 = arith.constant 1 : index
    %c0_261 = arith.constant 0 : index
    %c0_262 = arith.constant 0 : index
    %289 = vector.load %arg4[%c1_260, %c0_261, %c0_262] : memref<9x64x128xbf16, #tpu.memory_space<vmem>>, vector<1x64x128xbf16>
    %290 = vector.shape_cast %289 : vector<1x64x128xbf16> to vector<64x128xbf16>
    %cst_263 = arith.constant dense<0.000000e+00> : vector<288x128xf32>
    %291 = tpu.matmul %288, %290, %cst_263 {dimension_numbers = #tpu.dot_dimension_numbers<[1], [0], [0], [1], [0, 0, 1, 1], [], []>} : vector<288x64xbf16>, vector<64x128xbf16>, vector<288x128xf32> -> vector<288x128xf32>
    %292 = arith.addf %287, %291 : vector<288x128xf32>
    %c0_264 = arith.constant 0 : index
    %c0_265 = arith.constant 0 : index
    %293 = vector.load %arg11[%c0_264, %c0_265] : memref<288x128xf32, #tpu.memory_space<vmem>>, vector<288x128xf32>
    tpu.vector_store %arg11[%c0_264, %c0_265], %292 {strides = array<i32>} : memref<288x128xf32, #tpu.memory_space<vmem>>, vector<288x128xf32>,
    %c0_266 = arith.constant 0 : index
    %c0_267 = arith.constant 0 : index
    %294 = vector.load %arg11[%c0_266, %c0_267] : memref<288x128xf32, #tpu.memory_space<vmem>>, vector<288x128xf32>
    %c2_268 = arith.constant 2 : index
    %c0_269 = arith.constant 0 : index
    %295 = vector.load %arg9[%c2_268, %c0_269] : memref<332x64xbf16, #tpu.memory_space<vmem>>, vector<288x64xbf16>
    %c2_270 = arith.constant 2 : index
    %c0_271 = arith.constant 0 : index
    %c0_272 = arith.constant 0 : index
    %296 = vector.load %arg4[%c2_270, %c0_271, %c0_272] : memref<9x64x128xbf16, #tpu.memory_space<vmem>>, vector<1x64x128xbf16>
    %297 = vector.shape_cast %296 : vector<1x64x128xbf16> to vector<64x128xbf16>
    %cst_273 = arith.constant dense<0.000000e+00> : vector<288x128xf32>
    %298 = tpu.matmul %295, %297, %cst_273 {dimension_numbers = #tpu.dot_dimension_numbers<[1], [0], [0], [1], [0, 0, 1, 1], [], []>} : vector<288x64xbf16>, vector<64x128xbf16>, vector<288x128xf32> -> vector<288x128xf32>
    %299 = arith.addf %294, %298 : vector<288x128xf32>
    %c0_274 = arith.constant 0 : index
    %c0_275 = arith.constant 0 : index
    %300 = vector.load %arg11[%c0_274, %c0_275] : memref<288x128xf32, #tpu.memory_space<vmem>>, vector<288x128xf32>
    tpu.vector_store %arg11[%c0_274, %c0_275], %299 {strides = array<i32>} : memref<288x128xf32, #tpu.memory_space<vmem>>, vector<288x128xf32>,
    %c0_276 = arith.constant 0 : index
    %c0_277 = arith.constant 0 : index
    %301 = vector.load %arg11[%c0_276, %c0_277] : memref<288x128xf32, #tpu.memory_space<vmem>>, vector<288x128xf32>
    %c18_278 = arith.constant 18 : index
    %c0_279 = arith.constant 0 : index
    %302 = vector.load %arg9[%c18_278, %c0_279] : memref<332x64xbf16, #tpu.memory_space<vmem>>, vector<288x64xbf16>
    %c3_280 = arith.constant 3 : index
    %c0_281 = arith.constant 0 : index
    %c0_282 = arith.constant 0 : index
    %303 = vector.load %arg4[%c3_280, %c0_281, %c0_282] : memref<9x64x128xbf16, #tpu.memory_space<vmem>>, vector<1x64x128xbf16>
    %304 = vector.shape_cast %303 : vector<1x64x128xbf16> to vector<64x128xbf16>
    %cst_283 = arith.constant dense<0.000000e+00> : vector<288x128xf32>
    %305 = tpu.matmul %302, %304, %cst_283 {dimension_numbers = #tpu.dot_dimension_numbers<[1], [0], [0], [1], [0, 0, 1, 1], [], []>} : vector<288x64xbf16>, vector<64x128xbf16>, vector<288x128xf32> -> vector<288x128xf32>
    %306 = arith.addf %301, %305 : vector<288x128xf32>
    %c0_284 = arith.constant 0 : index
    %c0_285 = arith.constant 0 : index
    %307 = vector.load %arg11[%c0_284, %c0_285] : memref<288x128xf32, #tpu.memory_space<vmem>>, vector<288x128xf32>
    tpu.vector_store %arg11[%c0_284, %c0_285], %306 {strides = array<i32>} : memref<288x128xf32, #tpu.memory_space<vmem>>, vector<288x128xf32>,
    %c0_286 = arith.constant 0 : index
    %c0_287 = arith.constant 0 : index
    %308 = vector.load %arg11[%c0_286, %c0_287] : memref<288x128xf32, #tpu.memory_space<vmem>>, vector<288x128xf32>
    %c19_288 = arith.constant 19 : index
    %c0_289 = arith.constant 0 : index
    %309 = vector.load %arg9[%c19_288, %c0_289] : memref<332x64xbf16, #tpu.memory_space<vmem>>, vector<288x64xbf16>
    %c4_290 = arith.constant 4 : index
    %c0_291 = arith.constant 0 : index
    %c0_292 = arith.constant 0 : index
    %310 = vector.load %arg4[%c4_290, %c0_291, %c0_292] : memref<9x64x128xbf16, #tpu.memory_space<vmem>>, vector<1x64x128xbf16>
    %311 = vector.shape_cast %310 : vector<1x64x128xbf16> to vector<64x128xbf16>
    %cst_293 = arith.constant dense<0.000000e+00> : vector<288x128xf32>
    %312 = tpu.matmul %309, %311, %cst_293 {dimension_numbers = #tpu.dot_dimension_numbers<[1], [0], [0], [1], [0, 0, 1, 1], [], []>} : vector<288x64xbf16>, vector<64x128xbf16>, vector<288x128xf32> -> vector<288x128xf32>
    %313 = arith.addf %308, %312 : vector<288x128xf32>
    %c0_294 = arith.constant 0 : index
    %c0_295 = arith.constant 0 : index
    %314 = vector.load %arg11[%c0_294, %c0_295] : memref<288x128xf32, #tpu.memory_space<vmem>>, vector<288x128xf32>
    tpu.vector_store %arg11[%c0_294, %c0_295], %313 {strides = array<i32>} : memref<288x128xf32, #tpu.memory_space<vmem>>, vector<288x128xf32>,
    %c0_296 = arith.constant 0 : index
    %c0_297 = arith.constant 0 : index
    %315 = vector.load %arg11[%c0_296, %c0_297] : memref<288x128xf32, #tpu.memory_space<vmem>>, vector<288x128xf32>
    %c20_298 = arith.constant 20 : index
    %c0_299 = arith.constant 0 : index
    %316 = vector.load %arg9[%c20_298, %c0_299] : memref<332x64xbf16, #tpu.memory_space<vmem>>, vector<288x64xbf16>
    %c5_300 = arith.constant 5 : index
    %c0_301 = arith.constant 0 : index
    %c0_302 = arith.constant 0 : index
    %317 = vector.load %arg4[%c5_300, %c0_301, %c0_302] : memref<9x64x128xbf16, #tpu.memory_space<vmem>>, vector<1x64x128xbf16>
    %318 = vector.shape_cast %317 : vector<1x64x128xbf16> to vector<64x128xbf16>
    %cst_303 = arith.constant dense<0.000000e+00> : vector<288x128xf32>
    %319 = tpu.matmul %316, %318, %cst_303 {dimension_numbers = #tpu.dot_dimension_numbers<[1], [0], [0], [1], [0, 0, 1, 1], [], []>} : vector<288x64xbf16>, vector<64x128xbf16>, vector<288x128xf32> -> vector<288x128xf32>
    %320 = arith.addf %315, %319 : vector<288x128xf32>
    %c0_304 = arith.constant 0 : index
    %c0_305 = arith.constant 0 : index
    %321 = vector.load %arg11[%c0_304, %c0_305] : memref<288x128xf32, #tpu.memory_space<vmem>>, vector<288x128xf32>
    tpu.vector_store %arg11[%c0_304, %c0_305], %320 {strides = array<i32>} : memref<288x128xf32, #tpu.memory_space<vmem>>, vector<288x128xf32>,
    %c0_306 = arith.constant 0 : index
    %c0_307 = arith.constant 0 : index
    %322 = vector.load %arg11[%c0_306, %c0_307] : memref<288x128xf32, #tpu.memory_space<vmem>>, vector<288x128xf32>
    %c36_308 = arith.constant 36 : index
    %c0_309 = arith.constant 0 : index
    %323 = vector.load %arg9[%c36_308, %c0_309] : memref<332x64xbf16, #tpu.memory_space<vmem>>, vector<288x64xbf16>
    %c6_310 = arith.constant 6 : index
    %c0_311 = arith.constant 0 : index
    %c0_312 = arith.constant 0 : index
    %324 = vector.load %arg4[%c6_310, %c0_311, %c0_312] : memref<9x64x128xbf16, #tpu.memory_space<vmem>>, vector<1x64x128xbf16>
    %325 = vector.shape_cast %324 : vector<1x64x128xbf16> to vector<64x128xbf16>
    %cst_313 = arith.constant dense<0.000000e+00> : vector<288x128xf32>
    %326 = tpu.matmul %323, %325, %cst_313 {dimension_numbers = #tpu.dot_dimension_numbers<[1], [0], [0], [1], [0, 0, 1, 1], [], []>} : vector<288x64xbf16>, vector<64x128xbf16>, vector<288x128xf32> -> vector<288x128xf32>
    %327 = arith.addf %322, %326 : vector<288x128xf32>
    %c0_314 = arith.constant 0 : index
    %c0_315 = arith.constant 0 : index
    %328 = vector.load %arg11[%c0_314, %c0_315] : memref<288x128xf32, #tpu.memory_space<vmem>>, vector<288x128xf32>
    tpu.vector_store %arg11[%c0_314, %c0_315], %327 {strides = array<i32>} : memref<288x128xf32, #tpu.memory_space<vmem>>, vector<288x128xf32>,
    %c0_316 = arith.constant 0 : index
    %c0_317 = arith.constant 0 : index
    %329 = vector.load %arg11[%c0_316, %c0_317] : memref<288x128xf32, #tpu.memory_space<vmem>>, vector<288x128xf32>
    %c37_318 = arith.constant 37 : index
    %c0_319 = arith.constant 0 : index
    %330 = vector.load %arg9[%c37_318, %c0_319] : memref<332x64xbf16, #tpu.memory_space<vmem>>, vector<288x64xbf16>
    %c7_320 = arith.constant 7 : index
    %c0_321 = arith.constant 0 : index
    %c0_322 = arith.constant 0 : index
    %331 = vector.load %arg4[%c7_320, %c0_321, %c0_322] : memref<9x64x128xbf16, #tpu.memory_space<vmem>>, vector<1x64x128xbf16>
    %332 = vector.shape_cast %331 : vector<1x64x128xbf16> to vector<64x128xbf16>
    %cst_323 = arith.constant dense<0.000000e+00> : vector<288x128xf32>
    %333 = tpu.matmul %330, %332, %cst_323 {dimension_numbers = #tpu.dot_dimension_numbers<[1], [0], [0], [1], [0, 0, 1, 1], [], []>} : vector<288x64xbf16>, vector<64x128xbf16>, vector<288x128xf32> -> vector<288x128xf32>
    %334 = arith.addf %329, %333 : vector<288x128xf32>
    %c0_324 = arith.constant 0 : index
    %c0_325 = arith.constant 0 : index
    %335 = vector.load %arg11[%c0_324, %c0_325] : memref<288x128xf32, #tpu.memory_space<vmem>>, vector<288x128xf32>
    tpu.vector_store %arg11[%c0_324, %c0_325], %334 {strides = array<i32>} : memref<288x128xf32, #tpu.memory_space<vmem>>, vector<288x128xf32>,
    %c0_326 = arith.constant 0 : index
    %c0_327 = arith.constant 0 : index
    %336 = vector.load %arg11[%c0_326, %c0_327] : memref<288x128xf32, #tpu.memory_space<vmem>>, vector<288x128xf32>
    %c38_328 = arith.constant 38 : index
    %c0_329 = arith.constant 0 : index
    %337 = vector.load %arg9[%c38_328, %c0_329] : memref<332x64xbf16, #tpu.memory_space<vmem>>, vector<288x64xbf16>
    %c8_330 = arith.constant 8 : index
    %c0_331 = arith.constant 0 : index
    %c0_332 = arith.constant 0 : index
    %338 = vector.load %arg4[%c8_330, %c0_331, %c0_332] : memref<9x64x128xbf16, #tpu.memory_space<vmem>>, vector<1x64x128xbf16>
    %339 = vector.shape_cast %338 : vector<1x64x128xbf16> to vector<64x128xbf16>
    %cst_333 = arith.constant dense<0.000000e+00> : vector<288x128xf32>
    %340 = tpu.matmul %337, %339, %cst_333 {dimension_numbers = #tpu.dot_dimension_numbers<[1], [0], [0], [1], [0, 0, 1, 1], [], []>} : vector<288x64xbf16>, vector<64x128xbf16>, vector<288x128xf32> -> vector<288x128xf32>
    %341 = arith.addf %336, %340 : vector<288x128xf32>
    %c0_334 = arith.constant 0 : index
    %c0_335 = arith.constant 0 : index
    %342 = vector.load %arg11[%c0_334, %c0_335] : memref<288x128xf32, #tpu.memory_space<vmem>>, vector<288x128xf32>
    tpu.vector_store %arg11[%c0_334, %c0_335], %341 {strides = array<i32>} : memref<288x128xf32, #tpu.memory_space<vmem>>, vector<288x128xf32>,
    %c0_336 = arith.constant 0 : index
    %c0_337 = arith.constant 0 : index
    %343 = vector.load %arg11[%c0_336, %c0_337] : memref<288x128xf32, #tpu.memory_space<vmem>>, vector<288x128xf32>
    %c19_338 = arith.constant 19 : index
    %c0_339 = arith.constant 0 : index
    %344 = vector.load %arg8[%c19_338, %c0_339] : memref<332x8xbf16, #tpu.memory_space<vmem>>, vector<288x8xbf16>
    %c0_340 = arith.constant 0 : index
    %c0_341 = arith.constant 0 : index
    %345 = vector.load %arg5[%c0_340, %c0_341] : memref<8x128xbf16, #tpu.memory_space<vmem>>, vector<8x128xbf16>
    %cst_342 = arith.constant dense<0.000000e+00> : vector<288x128xf32>
    %346 = tpu.matmul %344, %345, %cst_342 {dimension_numbers = #tpu.dot_dimension_numbers<[1], [0], [0], [1], [0, 0, 1, 1], [], []>} : vector<288x8xbf16>, vector<8x128xbf16>, vector<288x128xf32> -> vector<288x128xf32>
    %347 = arith.addf %343, %346 : vector<288x128xf32>
    %c0_343 = arith.constant 0 : index
    %c0_344 = arith.constant 0 : index
    %348 = vector.load %arg11[%c0_343, %c0_344] : memref<288x128xf32, #tpu.memory_space<vmem>>, vector<288x128xf32>
    tpu.vector_store %arg11[%c0_343, %c0_344], %347 {strides = array<i32>} : memref<288x128xf32, #tpu.memory_space<vmem>>, vector<288x128xf32>,
    %c0_345 = arith.constant 0 : index
    %c0_346 = arith.constant 0 : index
    %349 = vector.load %arg6[%c0_345, %c0_346] : memref<1x128xf32, #tpu.memory_space<vmem>>, vector<1x128xf32>
    %c0_347 = arith.constant 0 : index
    %c0_348 = arith.constant 0 : index
    %350 = vector.load %arg11[%c0_347, %c0_348] : memref<288x128xf32, #tpu.memory_space<vmem>>, vector<16x128xf32>
    %351 = vector.broadcast %349 : vector<1x128xf32> to vector<16x128xf32>
    %352 = arith.addf %350, %351 : vector<16x128xf32>
    %cst_349 = arith.constant 0.000000e+00 : f32
    %353 = vector.broadcast %cst_349 : f32 to vector<16x128xf32>
    %354 = arith.cmpf oge, %352, %353 : vector<16x128xf32>
    %cst_350 = arith.constant 1.000000e-01 : f32
    %355 = vector.broadcast %cst_350 : f32 to vector<16x128xf32>
    %356 = arith.mulf %355, %352 : vector<16x128xf32>
    %357 = arith.select %354, %352, %356 : vector<16x128xi1>, vector<16x128xf32>
    %358 = arith.truncf %357 : vector<16x128xf32> to vector<16x128xbf16>
    %c0_351 = arith.constant 0 : index
    %c0_352 = arith.constant 0 : index
    %c0_353 = arith.constant 0 : index
    %c0_354 = arith.constant 0 : index
    %359 = vector.load %arg7[%c0_351, %c0_352, %c0_353, %c0_354] : memref<1x16x16x128xbf16, #tpu.memory_space<vmem>>, vector<1x1x16x128xbf16>
    %360 = vector.shape_cast %359 : vector<1x1x16x128xbf16> to vector<16x128xbf16>
    %361 = vector.shape_cast %358 : vector<16x128xbf16> to vector<1x1x16x128xbf16>
    tpu.vector_store %arg7[%c0_351, %c0_352, %c0_353, %c0_354], %361 {strides = array<i32>} : memref<1x16x16x128xbf16, #tpu.memory_space<vmem>>, vector<1x1x16x128xbf16>,
    %c18_355 = arith.constant 18 : index
    %c0_356 = arith.constant 0 : index
    %362 = vector.load %arg11[%c18_355, %c0_356] : memref<288x128xf32, #tpu.memory_space<vmem>>, vector<16x128xf32>
    %363 = vector.broadcast %349 : vector<1x128xf32> to vector<16x128xf32>
    %364 = arith.addf %362, %363 : vector<16x128xf32>
    %cst_357 = arith.constant 0.000000e+00 : f32
    %365 = vector.broadcast %cst_357 : f32 to vector<16x128xf32>
    %366 = arith.cmpf oge, %364, %365 : vector<16x128xf32>
    %cst_358 = arith.constant 1.000000e-01 : f32
    %367 = vector.broadcast %cst_358 : f32 to vector<16x128xf32>
    %368 = arith.mulf %367, %364 : vector<16x128xf32>
    %369 = arith.select %366, %364, %368 : vector<16x128xi1>, vector<16x128xf32>
    %370 = arith.truncf %369 : vector<16x128xf32> to vector<16x128xbf16>
    %c0_359 = arith.constant 0 : index
    %c1_360 = arith.constant 1 : index
    %c0_361 = arith.constant 0 : index
    %c0_362 = arith.constant 0 : index
    %371 = vector.load %arg7[%c0_359, %c1_360, %c0_361, %c0_362] : memref<1x16x16x128xbf16, #tpu.memory_space<vmem>>, vector<1x1x16x128xbf16>
    %372 = vector.shape_cast %371 : vector<1x1x16x128xbf16> to vector<16x128xbf16>
    %373 = vector.shape_cast %370 : vector<16x128xbf16> to vector<1x1x16x128xbf16>
    tpu.vector_store %arg7[%c0_359, %c1_360, %c0_361, %c0_362], %373 {strides = array<i32>} : memref<1x16x16x128xbf16, #tpu.memory_space<vmem>>, vector<1x1x16x128xbf16>,
    %c36_363 = arith.constant 36 : index
    %c0_364 = arith.constant 0 : index
    %374 = vector.load %arg11[%c36_363, %c0_364] : memref<288x128xf32, #tpu.memory_space<vmem>>, vector<16x128xf32>
    %375 = vector.broadcast %349 : vector<1x128xf32> to vector<16x128xf32>
    %376 = arith.addf %374, %375 : vector<16x128xf32>
    %cst_365 = arith.constant 0.000000e+00 : f32
    %377 = vector.broadcast %cst_365 : f32 to vector<16x128xf32>
    %378 = arith.cmpf oge, %376, %377 : vector<16x128xf32>
    %cst_366 = arith.constant 1.000000e-01 : f32
    %379 = vector.broadcast %cst_366 : f32 to vector<16x128xf32>
    %380 = arith.mulf %379, %376 : vector<16x128xf32>
    %381 = arith.select %378, %376, %380 : vector<16x128xi1>, vector<16x128xf32>
    %382 = arith.truncf %381 : vector<16x128xf32> to vector<16x128xbf16>
    %c0_367 = arith.constant 0 : index
    %c2_368 = arith.constant 2 : index
    %c0_369 = arith.constant 0 : index
    %c0_370 = arith.constant 0 : index
    %383 = vector.load %arg7[%c0_367, %c2_368, %c0_369, %c0_370] : memref<1x16x16x128xbf16, #tpu.memory_space<vmem>>, vector<1x1x16x128xbf16>
    %384 = vector.shape_cast %383 : vector<1x1x16x128xbf16> to vector<16x128xbf16>
    %385 = vector.shape_cast %382 : vector<16x128xbf16> to vector<1x1x16x128xbf16>
    tpu.vector_store %arg7[%c0_367, %c2_368, %c0_369, %c0_370], %385 {strides = array<i32>} : memref<1x16x16x128xbf16, #tpu.memory_space<vmem>>, vector<1x1x16x128xbf16>,
    %c54_371 = arith.constant 54 : index
    %c0_372 = arith.constant 0 : index
    %386 = vector.load %arg11[%c54_371, %c0_372] : memref<288x128xf32, #tpu.memory_space<vmem>>, vector<16x128xf32>
    %387 = vector.broadcast %349 : vector<1x128xf32> to vector<16x128xf32>
    %388 = arith.addf %386, %387 : vector<16x128xf32>
    %cst_373 = arith.constant 0.000000e+00 : f32
    %389 = vector.broadcast %cst_373 : f32 to vector<16x128xf32>
    %390 = arith.cmpf oge, %388, %389 : vector<16x128xf32>
    %cst_374 = arith.constant 1.000000e-01 : f32
    %391 = vector.broadcast %cst_374 : f32 to vector<16x128xf32>
    %392 = arith.mulf %391, %388 : vector<16x128xf32>
    %393 = arith.select %390, %388, %392 : vector<16x128xi1>, vector<16x128xf32>
    %394 = arith.truncf %393 : vector<16x128xf32> to vector<16x128xbf16>
    %c0_375 = arith.constant 0 : index
    %c3_376 = arith.constant 3 : index
    %c0_377 = arith.constant 0 : index
    %c0_378 = arith.constant 0 : index
    %395 = vector.load %arg7[%c0_375, %c3_376, %c0_377, %c0_378] : memref<1x16x16x128xbf16, #tpu.memory_space<vmem>>, vector<1x1x16x128xbf16>
    %396 = vector.shape_cast %395 : vector<1x1x16x128xbf16> to vector<16x128xbf16>
    %397 = vector.shape_cast %394 : vector<16x128xbf16> to vector<1x1x16x128xbf16>
    tpu.vector_store %arg7[%c0_375, %c3_376, %c0_377, %c0_378], %397 {strides = array<i32>} : memref<1x16x16x128xbf16, #tpu.memory_space<vmem>>, vector<1x1x16x128xbf16>,
    %c72_379 = arith.constant 72 : index
    %c0_380 = arith.constant 0 : index
    %398 = vector.load %arg11[%c72_379, %c0_380] : memref<288x128xf32, #tpu.memory_space<vmem>>, vector<16x128xf32>
    %399 = vector.broadcast %349 : vector<1x128xf32> to vector<16x128xf32>
    %400 = arith.addf %398, %399 : vector<16x128xf32>
    %cst_381 = arith.constant 0.000000e+00 : f32
    %401 = vector.broadcast %cst_381 : f32 to vector<16x128xf32>
    %402 = arith.cmpf oge, %400, %401 : vector<16x128xf32>
    %cst_382 = arith.constant 1.000000e-01 : f32
    %403 = vector.broadcast %cst_382 : f32 to vector<16x128xf32>
    %404 = arith.mulf %403, %400 : vector<16x128xf32>
    %405 = arith.select %402, %400, %404 : vector<16x128xi1>, vector<16x128xf32>
    %406 = arith.truncf %405 : vector<16x128xf32> to vector<16x128xbf16>
    %c0_383 = arith.constant 0 : index
    %c4_384 = arith.constant 4 : index
    %c0_385 = arith.constant 0 : index
    %c0_386 = arith.constant 0 : index
    %407 = vector.load %arg7[%c0_383, %c4_384, %c0_385, %c0_386] : memref<1x16x16x128xbf16, #tpu.memory_space<vmem>>, vector<1x1x16x128xbf16>
    %408 = vector.shape_cast %407 : vector<1x1x16x128xbf16> to vector<16x128xbf16>
    %409 = vector.shape_cast %406 : vector<16x128xbf16> to vector<1x1x16x128xbf16>
    tpu.vector_store %arg7[%c0_383, %c4_384, %c0_385, %c0_386], %409 {strides = array<i32>} : memref<1x16x16x128xbf16, #tpu.memory_space<vmem>>, vector<1x1x16x128xbf16>,
    %c90_387 = arith.constant 90 : index
    %c0_388 = arith.constant 0 : index
    %410 = vector.load %arg11[%c90_387, %c0_388] : memref<288x128xf32, #tpu.memory_space<vmem>>, vector<16x128xf32>
    %411 = vector.broadcast %349 : vector<1x128xf32> to vector<16x128xf32>
    %412 = arith.addf %410, %411 : vector<16x128xf32>
    %cst_389 = arith.constant 0.000000e+00 : f32
    %413 = vector.broadcast %cst_389 : f32 to vector<16x128xf32>
    %414 = arith.cmpf oge, %412, %413 : vector<16x128xf32>
    %cst_390 = arith.constant 1.000000e-01 : f32
    %415 = vector.broadcast %cst_390 : f32 to vector<16x128xf32>
    %416 = arith.mulf %415, %412 : vector<16x128xf32>
    %417 = arith.select %414, %412, %416 : vector<16x128xi1>, vector<16x128xf32>
    %418 = arith.truncf %417 : vector<16x128xf32> to vector<16x128xbf16>
    %c0_391 = arith.constant 0 : index
    %c5_392 = arith.constant 5 : index
    %c0_393 = arith.constant 0 : index
    %c0_394 = arith.constant 0 : index
    %419 = vector.load %arg7[%c0_391, %c5_392, %c0_393, %c0_394] : memref<1x16x16x128xbf16, #tpu.memory_space<vmem>>, vector<1x1x16x128xbf16>
    %420 = vector.shape_cast %419 : vector<1x1x16x128xbf16> to vector<16x128xbf16>
    %421 = vector.shape_cast %418 : vector<16x128xbf16> to vector<1x1x16x128xbf16>
    tpu.vector_store %arg7[%c0_391, %c5_392, %c0_393, %c0_394], %421 {strides = array<i32>} : memref<1x16x16x128xbf16, #tpu.memory_space<vmem>>, vector<1x1x16x128xbf16>,
    %c108_395 = arith.constant 108 : index
    %c0_396 = arith.constant 0 : index
    %422 = vector.load %arg11[%c108_395, %c0_396] : memref<288x128xf32, #tpu.memory_space<vmem>>, vector<16x128xf32>
    %423 = vector.broadcast %349 : vector<1x128xf32> to vector<16x128xf32>
    %424 = arith.addf %422, %423 : vector<16x128xf32>
    %cst_397 = arith.constant 0.000000e+00 : f32
    %425 = vector.broadcast %cst_397 : f32 to vector<16x128xf32>
    %426 = arith.cmpf oge, %424, %425 : vector<16x128xf32>
    %cst_398 = arith.constant 1.000000e-01 : f32
    %427 = vector.broadcast %cst_398 : f32 to vector<16x128xf32>
    %428 = arith.mulf %427, %424 : vector<16x128xf32>
    %429 = arith.select %426, %424, %428 : vector<16x128xi1>, vector<16x128xf32>
    %430 = arith.truncf %429 : vector<16x128xf32> to vector<16x128xbf16>
    %c0_399 = arith.constant 0 : index
    %c6_400 = arith.constant 6 : index
    %c0_401 = arith.constant 0 : index
    %c0_402 = arith.constant 0 : index
    %431 = vector.load %arg7[%c0_399, %c6_400, %c0_401, %c0_402] : memref<1x16x16x128xbf16, #tpu.memory_space<vmem>>, vector<1x1x16x128xbf16>
    %432 = vector.shape_cast %431 : vector<1x1x16x128xbf16> to vector<16x128xbf16>
    %433 = vector.shape_cast %430 : vector<16x128xbf16> to vector<1x1x16x128xbf16>
    tpu.vector_store %arg7[%c0_399, %c6_400, %c0_401, %c0_402], %433 {strides = array<i32>} : memref<1x16x16x128xbf16, #tpu.memory_space<vmem>>, vector<1x1x16x128xbf16>,
    %c126_403 = arith.constant 126 : index
    %c0_404 = arith.constant 0 : index
    %434 = vector.load %arg11[%c126_403, %c0_404] : memref<288x128xf32, #tpu.memory_space<vmem>>, vector<16x128xf32>
    %435 = vector.broadcast %349 : vector<1x128xf32> to vector<16x128xf32>
    %436 = arith.addf %434, %435 : vector<16x128xf32>
    %cst_405 = arith.constant 0.000000e+00 : f32
    %437 = vector.broadcast %cst_405 : f32 to vector<16x128xf32>
    %438 = arith.cmpf oge, %436, %437 : vector<16x128xf32>
    %cst_406 = arith.constant 1.000000e-01 : f32
    %439 = vector.broadcast %cst_406 : f32 to vector<16x128xf32>
    %440 = arith.mulf %439, %436 : vector<16x128xf32>
    %441 = arith.select %438, %436, %440 : vector<16x128xi1>, vector<16x128xf32>
    %442 = arith.truncf %441 : vector<16x128xf32> to vector<16x128xbf16>
    %c0_407 = arith.constant 0 : index
    %c7_408 = arith.constant 7 : index
    %c0_409 = arith.constant 0 : index
    %c0_410 = arith.constant 0 : index
    %443 = vector.load %arg7[%c0_407, %c7_408, %c0_409, %c0_410] : memref<1x16x16x128xbf16, #tpu.memory_space<vmem>>, vector<1x1x16x128xbf16>
    %444 = vector.shape_cast %443 : vector<1x1x16x128xbf16> to vector<16x128xbf16>
    %445 = vector.shape_cast %442 : vector<16x128xbf16> to vector<1x1x16x128xbf16>
    tpu.vector_store %arg7[%c0_407, %c7_408, %c0_409, %c0_410], %445 {strides = array<i32>} : memref<1x16x16x128xbf16, #tpu.memory_space<vmem>>, vector<1x1x16x128xbf16>,
    %c144_411 = arith.constant 144 : index
    %c0_412 = arith.constant 0 : index
    %446 = vector.load %arg11[%c144_411, %c0_412] : memref<288x128xf32, #tpu.memory_space<vmem>>, vector<16x128xf32>
    %447 = vector.broadcast %349 : vector<1x128xf32> to vector<16x128xf32>
    %448 = arith.addf %446, %447 : vector<16x128xf32>
    %cst_413 = arith.constant 0.000000e+00 : f32
    %449 = vector.broadcast %cst_413 : f32 to vector<16x128xf32>
    %450 = arith.cmpf oge, %448, %449 : vector<16x128xf32>
    %cst_414 = arith.constant 1.000000e-01 : f32
    %451 = vector.broadcast %cst_414 : f32 to vector<16x128xf32>
    %452 = arith.mulf %451, %448 : vector<16x128xf32>
    %453 = arith.select %450, %448, %452 : vector<16x128xi1>, vector<16x128xf32>
    %454 = arith.truncf %453 : vector<16x128xf32> to vector<16x128xbf16>
    %c0_415 = arith.constant 0 : index
    %c8_416 = arith.constant 8 : index
    %c0_417 = arith.constant 0 : index
    %c0_418 = arith.constant 0 : index
    %455 = vector.load %arg7[%c0_415, %c8_416, %c0_417, %c0_418] : memref<1x16x16x128xbf16, #tpu.memory_space<vmem>>, vector<1x1x16x128xbf16>
    %456 = vector.shape_cast %455 : vector<1x1x16x128xbf16> to vector<16x128xbf16>
    %457 = vector.shape_cast %454 : vector<16x128xbf16> to vector<1x1x16x128xbf16>
    tpu.vector_store %arg7[%c0_415, %c8_416, %c0_417, %c0_418], %457 {strides = array<i32>} : memref<1x16x16x128xbf16, #tpu.memory_space<vmem>>, vector<1x1x16x128xbf16>,
    %c162_419 = arith.constant 162 : index
    %c0_420 = arith.constant 0 : index
    %458 = vector.load %arg11[%c162_419, %c0_420] : memref<288x128xf32, #tpu.memory_space<vmem>>, vector<16x128xf32>
    %459 = vector.broadcast %349 : vector<1x128xf32> to vector<16x128xf32>
    %460 = arith.addf %458, %459 : vector<16x128xf32>
    %cst_421 = arith.constant 0.000000e+00 : f32
    %461 = vector.broadcast %cst_421 : f32 to vector<16x128xf32>
    %462 = arith.cmpf oge, %460, %461 : vector<16x128xf32>
    %cst_422 = arith.constant 1.000000e-01 : f32
    %463 = vector.broadcast %cst_422 : f32 to vector<16x128xf32>
    %464 = arith.mulf %463, %460 : vector<16x128xf32>
    %465 = arith.select %462, %460, %464 : vector<16x128xi1>, vector<16x128xf32>
    %466 = arith.truncf %465 : vector<16x128xf32> to vector<16x128xbf16>
    %c0_423 = arith.constant 0 : index
    %c9_424 = arith.constant 9 : index
    %c0_425 = arith.constant 0 : index
    %c0_426 = arith.constant 0 : index
    %467 = vector.load %arg7[%c0_423, %c9_424, %c0_425, %c0_426] : memref<1x16x16x128xbf16, #tpu.memory_space<vmem>>, vector<1x1x16x128xbf16>
    %468 = vector.shape_cast %467 : vector<1x1x16x128xbf16> to vector<16x128xbf16>
    %469 = vector.shape_cast %466 : vector<16x128xbf16> to vector<1x1x16x128xbf16>
    tpu.vector_store %arg7[%c0_423, %c9_424, %c0_425, %c0_426], %469 {strides = array<i32>} : memref<1x16x16x128xbf16, #tpu.memory_space<vmem>>, vector<1x1x16x128xbf16>,
    %c180_427 = arith.constant 180 : index
    %c0_428 = arith.constant 0 : index
    %470 = vector.load %arg11[%c180_427, %c0_428] : memref<288x128xf32, #tpu.memory_space<vmem>>, vector<16x128xf32>
    %471 = vector.broadcast %349 : vector<1x128xf32> to vector<16x128xf32>
    %472 = arith.addf %470, %471 : vector<16x128xf32>
    %cst_429 = arith.constant 0.000000e+00 : f32
    %473 = vector.broadcast %cst_429 : f32 to vector<16x128xf32>
    %474 = arith.cmpf oge, %472, %473 : vector<16x128xf32>
    %cst_430 = arith.constant 1.000000e-01 : f32
    %475 = vector.broadcast %cst_430 : f32 to vector<16x128xf32>
    %476 = arith.mulf %475, %472 : vector<16x128xf32>
    %477 = arith.select %474, %472, %476 : vector<16x128xi1>, vector<16x128xf32>
    %478 = arith.truncf %477 : vector<16x128xf32> to vector<16x128xbf16>
    %c0_431 = arith.constant 0 : index
    %c10_432 = arith.constant 10 : index
    %c0_433 = arith.constant 0 : index
    %c0_434 = arith.constant 0 : index
    %479 = vector.load %arg7[%c0_431, %c10_432, %c0_433, %c0_434] : memref<1x16x16x128xbf16, #tpu.memory_space<vmem>>, vector<1x1x16x128xbf16>
    %480 = vector.shape_cast %479 : vector<1x1x16x128xbf16> to vector<16x128xbf16>
    %481 = vector.shape_cast %478 : vector<16x128xbf16> to vector<1x1x16x128xbf16>
    tpu.vector_store %arg7[%c0_431, %c10_432, %c0_433, %c0_434], %481 {strides = array<i32>} : memref<1x16x16x128xbf16, #tpu.memory_space<vmem>>, vector<1x1x16x128xbf16>,
    %c198_435 = arith.constant 198 : index
    %c0_436 = arith.constant 0 : index
    %482 = vector.load %arg11[%c198_435, %c0_436] : memref<288x128xf32, #tpu.memory_space<vmem>>, vector<16x128xf32>
    %483 = vector.broadcast %349 : vector<1x128xf32> to vector<16x128xf32>
    %484 = arith.addf %482, %483 : vector<16x128xf32>
    %cst_437 = arith.constant 0.000000e+00 : f32
    %485 = vector.broadcast %cst_437 : f32 to vector<16x128xf32>
    %486 = arith.cmpf oge, %484, %485 : vector<16x128xf32>
    %cst_438 = arith.constant 1.000000e-01 : f32
    %487 = vector.broadcast %cst_438 : f32 to vector<16x128xf32>
    %488 = arith.mulf %487, %484 : vector<16x128xf32>
    %489 = arith.select %486, %484, %488 : vector<16x128xi1>, vector<16x128xf32>
    %490 = arith.truncf %489 : vector<16x128xf32> to vector<16x128xbf16>
    %c0_439 = arith.constant 0 : index
    %c11_440 = arith.constant 11 : index
    %c0_441 = arith.constant 0 : index
    %c0_442 = arith.constant 0 : index
    %491 = vector.load %arg7[%c0_439, %c11_440, %c0_441, %c0_442] : memref<1x16x16x128xbf16, #tpu.memory_space<vmem>>, vector<1x1x16x128xbf16>
    %492 = vector.shape_cast %491 : vector<1x1x16x128xbf16> to vector<16x128xbf16>
    %493 = vector.shape_cast %490 : vector<16x128xbf16> to vector<1x1x16x128xbf16>
    tpu.vector_store %arg7[%c0_439, %c11_440, %c0_441, %c0_442], %493 {strides = array<i32>} : memref<1x16x16x128xbf16, #tpu.memory_space<vmem>>, vector<1x1x16x128xbf16>,
    %c216_443 = arith.constant 216 : index
    %c0_444 = arith.constant 0 : index
    %494 = vector.load %arg11[%c216_443, %c0_444] : memref<288x128xf32, #tpu.memory_space<vmem>>, vector<16x128xf32>
    %495 = vector.broadcast %349 : vector<1x128xf32> to vector<16x128xf32>
    %496 = arith.addf %494, %495 : vector<16x128xf32>
    %cst_445 = arith.constant 0.000000e+00 : f32
    %497 = vector.broadcast %cst_445 : f32 to vector<16x128xf32>
    %498 = arith.cmpf oge, %496, %497 : vector<16x128xf32>
    %cst_446 = arith.constant 1.000000e-01 : f32
    %499 = vector.broadcast %cst_446 : f32 to vector<16x128xf32>
    %500 = arith.mulf %499, %496 : vector<16x128xf32>
    %501 = arith.select %498, %496, %500 : vector<16x128xi1>, vector<16x128xf32>
    %502 = arith.truncf %501 : vector<16x128xf32> to vector<16x128xbf16>
    %c0_447 = arith.constant 0 : index
    %c12_448 = arith.constant 12 : index
    %c0_449 = arith.constant 0 : index
    %c0_450 = arith.constant 0 : index
    %503 = vector.load %arg7[%c0_447, %c12_448, %c0_449, %c0_450] : memref<1x16x16x128xbf16, #tpu.memory_space<vmem>>, vector<1x1x16x128xbf16>
    %504 = vector.shape_cast %503 : vector<1x1x16x128xbf16> to vector<16x128xbf16>
    %505 = vector.shape_cast %502 : vector<16x128xbf16> to vector<1x1x16x128xbf16>
    tpu.vector_store %arg7[%c0_447, %c12_448, %c0_449, %c0_450], %505 {strides = array<i32>} : memref<1x16x16x128xbf16, #tpu.memory_space<vmem>>, vector<1x1x16x128xbf16>,
    %c234_451 = arith.constant 234 : index
    %c0_452 = arith.constant 0 : index
    %506 = vector.load %arg11[%c234_451, %c0_452] : memref<288x128xf32, #tpu.memory_space<vmem>>, vector<16x128xf32>
    %507 = vector.broadcast %349 : vector<1x128xf32> to vector<16x128xf32>
    %508 = arith.addf %506, %507 : vector<16x128xf32>
    %cst_453 = arith.constant 0.000000e+00 : f32
    %509 = vector.broadcast %cst_453 : f32 to vector<16x128xf32>
    %510 = arith.cmpf oge, %508, %509 : vector<16x128xf32>
    %cst_454 = arith.constant 1.000000e-01 : f32
    %511 = vector.broadcast %cst_454 : f32 to vector<16x128xf32>
    %512 = arith.mulf %511, %508 : vector<16x128xf32>
    %513 = arith.select %510, %508, %512 : vector<16x128xi1>, vector<16x128xf32>
    %514 = arith.truncf %513 : vector<16x128xf32> to vector<16x128xbf16>
    %c0_455 = arith.constant 0 : index
    %c13_456 = arith.constant 13 : index
    %c0_457 = arith.constant 0 : index
    %c0_458 = arith.constant 0 : index
    %515 = vector.load %arg7[%c0_455, %c13_456, %c0_457, %c0_458] : memref<1x16x16x128xbf16, #tpu.memory_space<vmem>>, vector<1x1x16x128xbf16>
    %516 = vector.shape_cast %515 : vector<1x1x16x128xbf16> to vector<16x128xbf16>
    %517 = vector.shape_cast %514 : vector<16x128xbf16> to vector<1x1x16x128xbf16>
    tpu.vector_store %arg7[%c0_455, %c13_456, %c0_457, %c0_458], %517 {strides = array<i32>} : memref<1x16x16x128xbf16, #tpu.memory_space<vmem>>, vector<1x1x16x128xbf16>,
    %c252_459 = arith.constant 252 : index
    %c0_460 = arith.constant 0 : index
    %518 = vector.load %arg11[%c252_459, %c0_460] : memref<288x128xf32, #tpu.memory_space<vmem>>, vector<16x128xf32>
    %519 = vector.broadcast %349 : vector<1x128xf32> to vector<16x128xf32>
    %520 = arith.addf %518, %519 : vector<16x128xf32>
    %cst_461 = arith.constant 0.000000e+00 : f32
    %521 = vector.broadcast %cst_461 : f32 to vector<16x128xf32>
    %522 = arith.cmpf oge, %520, %521 : vector<16x128xf32>
    %cst_462 = arith.constant 1.000000e-01 : f32
    %523 = vector.broadcast %cst_462 : f32 to vector<16x128xf32>
    %524 = arith.mulf %523, %520 : vector<16x128xf32>
    %525 = arith.select %522, %520, %524 : vector<16x128xi1>, vector<16x128xf32>
    %526 = arith.truncf %525 : vector<16x128xf32> to vector<16x128xbf16>
    %c0_463 = arith.constant 0 : index
    %c14_464 = arith.constant 14 : index
    %c0_465 = arith.constant 0 : index
    %c0_466 = arith.constant 0 : index
    %527 = vector.load %arg7[%c0_463, %c14_464, %c0_465, %c0_466] : memref<1x16x16x128xbf16, #tpu.memory_space<vmem>>, vector<1x1x16x128xbf16>
    %528 = vector.shape_cast %527 : vector<1x1x16x128xbf16> to vector<16x128xbf16>
    %529 = vector.shape_cast %526 : vector<16x128xbf16> to vector<1x1x16x128xbf16>
    tpu.vector_store %arg7[%c0_463, %c14_464, %c0_465, %c0_466], %529 {strides = array<i32>} : memref<1x16x16x128xbf16, #tpu.memory_space<vmem>>, vector<1x1x16x128xbf16>,
    %c270_467 = arith.constant 270 : index
    %c0_468 = arith.constant 0 : index
    %530 = vector.load %arg11[%c270_467, %c0_468] : memref<288x128xf32, #tpu.memory_space<vmem>>, vector<16x128xf32>
    %531 = vector.broadcast %349 : vector<1x128xf32> to vector<16x128xf32>
    %532 = arith.addf %530, %531 : vector<16x128xf32>
    %cst_469 = arith.constant 0.000000e+00 : f32
    %533 = vector.broadcast %cst_469 : f32 to vector<16x128xf32>
    %534 = arith.cmpf oge, %532, %533 : vector<16x128xf32>
    %cst_470 = arith.constant 1.000000e-01 : f32
    %535 = vector.broadcast %cst_470 : f32 to vector<16x128xf32>
    %536 = arith.mulf %535, %532 : vector<16x128xf32>
    %537 = arith.select %534, %532, %536 : vector<16x128xi1>, vector<16x128xf32>
    %538 = arith.truncf %537 : vector<16x128xf32> to vector<16x128xbf16>
    %c0_471 = arith.constant 0 : index
    %c15_472 = arith.constant 15 : index
    %c0_473 = arith.constant 0 : index
    %c0_474 = arith.constant 0 : index
    %539 = vector.load %arg7[%c0_471, %c15_472, %c0_473, %c0_474] : memref<1x16x16x128xbf16, #tpu.memory_space<vmem>>, vector<1x1x16x128xbf16>
    %540 = vector.shape_cast %539 : vector<1x1x16x128xbf16> to vector<16x128xbf16>
    %541 = vector.shape_cast %538 : vector<16x128xbf16> to vector<1x1x16x128xbf16>
    tpu.vector_store %arg7[%c0_471, %c15_472, %c0_473, %c0_474], %541 {strides = array<i32>} : memref<1x16x16x128xbf16, #tpu.memory_space<vmem>>, vector<1x1x16x128xbf16>,
    return
  }
  func.func @transform_0(%arg0: i32) -> (i32, i32, i32, i32) {
    %c0_i32 = arith.constant 0 : i32
    %c0_i32_0 = arith.constant 0 : i32
    %c0_i32_1 = arith.constant 0 : i32
    %c0_i32_2 = arith.constant 0 : i32
    return %arg0, %c0_i32, %c0_i32_0, %c0_i32_1 : i32, i32, i32, i32
  }
  func.func @transform_1(%arg0: i32) -> (i32, i32, i32) {
    %c0_i32 = arith.constant 0 : i32
    %c0_i32_0 = arith.constant 0 : i32
    %c0_i32_1 = arith.constant 0 : i32
    %c0_i32_2 = arith.constant 0 : i32
    return %c0_i32, %c0_i32_0, %c0_i32_1 : i32, i32, i32
  }
  func.func @transform_2(%arg0: i32) -> (i32, i32) {
    %c0_i32 = arith.constant 0 : i32
    %c0_i32_0 = arith.constant 0 : i32
    %c0_i32_1 = arith.constant 0 : i32
    return %c0_i32, %c0_i32_0 : i32, i32
  }
  func.func @transform_3(%arg0: i32) -> (i32, i32, i32) {
    %c0_i32 = arith.constant 0 : i32
    %c0_i32_0 = arith.constant 0 : i32
    %c0_i32_1 = arith.constant 0 : i32
    %c0_i32_2 = arith.constant 0 : i32
    return %c0_i32, %c0_i32_0, %c0_i32_1 : i32, i32, i32
  }
  func.func @transform_4(%arg0: i32) -> (i32, i32) {
    %c0_i32 = arith.constant 0 : i32
    %c0_i32_0 = arith.constant 0 : i32
    %c0_i32_1 = arith.constant 0 : i32
    return %c0_i32, %c0_i32_0 : i32, i32
  }
  func.func @transform_5(%arg0: i32) -> (i32, i32) {
    %c0_i32 = arith.constant 0 : i32
    %c0_i32_0 = arith.constant 0 : i32
    %c0_i32_1 = arith.constant 0 : i32
    return %c0_i32, %c0_i32_0 : i32, i32
  }
  func.func @transform_6(%arg0: i32) -> (i32, i32, i32, i32) {
    %c0_i32 = arith.constant 0 : i32
    %c0_i32_0 = arith.constant 0 : i32
    %c0_i32_1 = arith.constant 0 : i32
    %c0_i32_2 = arith.constant 0 : i32
    return %arg0, %c0_i32, %c0_i32_0, %c0_i32_1 : i32, i32, i32, i32
  }
}

</mosaic_0001>

<bundles_post_ra>
// kernel: tpu_custom_call.1
= control target key start
LH: loop header
LB: loop body
LE: loop exit
PB: predicated region body
PF: predicated region fallthrough
CT: control target
= control target key end

     0   :  { %11 = vsyncpa [#allocation7], 0  ;;  %s18949_s0 = inlined_call_operand.vmem [shape: bf16[2,16,16,8], index: 0, kind: input, shape index: {}]   ;;  %s18950_s1 = inlined_call_operand.vmem [shape: bf16[9,8,64], index: 1, kind: input, shape index: {}]   ;;  %s18951_s2 = inlined_call_operand.vmem [shape: f32[1,64], index: 2, kind: input, shape index: {}]   ;;  %s18952_s3 = inlined_call_operand.vmem [shape: bf16[9,64,128], index: 3, kind: input, shape index: {}]   ;;  %s18953_s4 = inlined_call_operand.vmem [shape: bf16[8,128], index: 4, kind: input, shape index: {}]   ;;  %s18954_s5 = inlined_call_operand.vmem [shape: f32[1,128], index: 5, kind: input, shape index: {}]   ;;  %s18955_s6 = inlined_call_operand.hbm [shape: bf16[2,16,16,128], index: 6, kind: output, shape index: {}]  }
   0x1   :  { %13 = vsyncpa [#allocation7 + $0x1], 0  ;;  %s15698_s21 = smov 0   ;;  %s15700_s22 = smov 0  }
   0x2   :  { %s15702_s23 = smov 0   ;;  %s15704_s24 = smov 0  }
   0x3 LB: > { %s15719_s25 = sadd.s32 4294967295, %s15656_s24   ;;  %s12869_s26 = sadd.s32 4294967294, %s15656_s24   ;;  %s15656_s24 = sphi %s15704_s24, %s19365_s24   ;;  %s15652_s23 = sphi %s15702_s23, %s19364_s23   ;;  %s15648_s22 = sphi %s15700_s22, %s19363_s22   ;;  %s15644_s21 = sphi %s15698_s21, %s19362_s21  }
   0x4   : > { %s15723_s27 = sadd.s32 1, %s15656_s24   ;;  %s157_s28 = sadd.s32 1, %s15652_s23 }
   0x5   : > { %s154_s29 = ssub.s32 %s15656_s24, %s15723_s27  ;;  %p167_p0 = scmp.ne.s32.totalorder %s15652_s23, %s15648_s22 }
   0x6   : > { %p155_p1 = scmp.eq.s32.totalorder %s154_s29, 0  ;;  %p168_p2 = scmp.eq.s32.totalorder %s15719_s25, 1 }
   0x7   : > { %p173_p3 = scmp.ne.s32.totalorder %s15648_s22, %s15644_s21  ;;  %p174_p4 = scmp.eq.s32.totalorder %s12869_s26, 1 }
   0x8   : > { %s15734_s30 = scalar_select %p155_p1, %s15652_s23, %s157_s28  }
   0x9   : > { %p15736_p5 = por %p168_p2, %p167_p0  ;;  %p15740_p6 = por %p174_p4, %p173_p3 }
   0xa   : > { %p12872_p7 = scmp.ge.s32.totalorder %s15656_s24, 1  ;;  %p215_p8 = scmp.lt.s32.totalorder %s15656_s24, 3 }
   0xc   : > { %p216_p9 = pnand %p12872_p7, %p215_p8 }
   0xe   : > { %219 = sbr.rel (%p216_p9) target bundleno = 1240 (0x4d8), region = 44 }
  0x13   : > { %v1018_v0 = vld [vmem:[%s18950_s1] sm:$0xf]  ;;  %vm18960_vm0 = vcmask 1043456   ;;  %vm251_vm1 = vcmask 60416   ;;  %v15658_v2 = vmov 0   ;;  %p245_p10 = scmp.lt.s32.totalorder %s15719_s25, 1 }
  0x14   : > { %15143 = vmatprep.subr.msk.bf16.mxu0 %vm18960_vm0, %v1018_v0  ;;  %15144 = vmatprep.subr.msk.bf16.mxu1 %vm18960_vm0, %v1018_v0  ;;  %v1166_v1 = vsel %vm18960_vm0, %v1018_v0, 0  ;;  %252 = vst.msk [vmem:[#allocation2] sm:$0xf] %vm251_vm1, %v15658_v2  ;;  %253 = vst.msk [vmem:[#allocation2 + $0x4] sm:$0xf] %vm251_vm1, %v15658_v2  ;;  %vm293_vm2 = vcmask 58368  }
  0x15   : > { %254 = vst.msk [vmem:[#allocation2 + $0x8] sm:$0xf] %vm251_vm1, %v15658_v2  ;;  %255 = vst.msk [vmem:[#allocation2 + $0xc] sm:$0xf] %vm251_vm1, %v15658_v2  ;;  %14366 = vmatpush3.bf16.msra.mxu0 %v1166_v1  ;;  %15142 = vmatpush3.bf16.msra.mxu1 %v1166_v1  ;;  %s246_s11 = scalar_select %p245_p10, %s15719_s25, 1  ;;  %vm18965_vm4 = vcmask 64512  }
  0x16   : > { %256 = vst.msk [vmem:[#allocation2 + $0x10] sm:$0xf] %vm251_vm1, %v15658_v2  ;;  %257 = vst.msk [vmem:[#allocation2 + $0x14] sm:$0xf] %vm251_vm1, %v15658_v2  ;;  %vm18958_vm3 = vsmask.f32 1280 }
  0x17   : > { %258 = vst.msk [vmem:[#allocation2 + $0x18] sm:$0xf] %vm251_vm1, %v15658_v2  ;;  %259 = vst.msk [vmem:[#allocation2 + $0x1c] sm:$0xf] %vm251_vm1, %v15658_v2  ;;  %v12942_v3 = vld [vmem:[%s18950_s1 + $0x4] sm:$0xf] }
  0x18   : > { %260 = vst.msk [vmem:[#allocation2 + $0x20] sm:$0xf] %vm251_vm1, %v15658_v2  ;;  %261 = vst.msk [vmem:[#allocation2 + $0x24] sm:$0xf] %vm251_vm1, %v15658_v2  ;;  %s13816_s14 = sshll.u32 %s246_s11, 7  ;;  %15145 = vmatprep.subr.msk.bf16.mxu1 %vm18960_vm0, %v12942_v3  ;;  %vm439_vm7 = vcmask 60417  }
  0x19   : > { %262 = vst.msk [vmem:[#allocation2 + $0x28] sm:$0xf] %vm251_vm1, %v15658_v2  ;;  %263 = vst.msk [vmem:[#allocation2 + $0x2c] sm:$0xf] %vm251_vm1, %v15658_v2  ;;  %vm415_vm5 = vsmask.f32 5392  ;;  %s15843_s17 = scalar_lea.vmem %s18949_s0, %s13816_s14 }
  0x1a   : > { %264 = vst.msk [vmem:[#allocation2 + $0x30] sm:$0xf] %vm251_vm1, %v15658_v2  ;;  %265 = vst.msk [vmem:[#allocation2 + $0x34] sm:$0xf] %vm251_vm1, %v15658_v2  ;;  %vm18956_vm6 = vsmask.f32 7942 }
  0x1b   : > { %266 = vst.msk [vmem:[#allocation2 + $0x38] sm:$0xf] %vm251_vm1, %v15658_v2  ;;  %267 = vst.msk [vmem:[#allocation2 + $0x3c] sm:$0xf] %vm251_vm1, %v15658_v2  ;;  %vm18957_vm8 = vsmask.f32 256 }
  0x1c   : > { %268 = vst.msk [vmem:[#allocation2 + $0x40] sm:$0xf] %vm251_vm1, %v15658_v2  ;;  %269 = vst.msk [vmem:[#allocation2 + $0x44] sm:$0xf] %vm251_vm1, %v15658_v2  ;;  %vm563_vm9 = vcmask 57344   ;;  %v15197_v8 = vld [vmem:[#allocation2] sm:$0xff]  }
  0x1d   : > { %270 = vst.msk [vmem:[#allocation2 + $0x48] sm:$0xf] %vm251_vm1, %v15658_v2  ;;  %271 = vst.msk [vmem:[#allocation2 + $0x4c] sm:$0xf] %vm251_vm1, %v15658_v2  ;;  %v15848_v4 = vld [vmem:[%s18950_s1 + $0x8] sm:$0xf]  ;;  %14367 = vmatprep.mubr.msk.bf16.mxu0 %vm18965_vm4, %v15197_v8 }
  0x1e   : > { %272 = vst.msk [vmem:[#allocation2 + $0x50] sm:$0xf] %vm251_vm1, %v15658_v2  ;;  %273 = vst.msk [vmem:[#allocation2 + $0x54] sm:$0xf] %vm251_vm1, %v15658_v2  ;;  %v412_v5 = vld [vmem:[%s15843_s17] sm:$0xf]  ;;  %15146 = vmatprep.subr.msk.bf16.mxu0 %vm18960_vm0, %v15848_v4 }
  0x1f   : > { %274 = vst.msk [vmem:[#allocation2 + $0x58] sm:$0xf] %vm251_vm1, %v15658_v2  ;;  %275 = vst.msk [vmem:[#allocation2 + $0x5c] sm:$0xf] %vm251_vm1, %v15658_v2  ;;  %v413_v6 = vld [vmem:[%s15843_s17 + $0x4] sm:$0xf] }
  0x20   : > { %276 = vst.msk [vmem:[#allocation2 + $0x60] sm:$0xf] %vm251_vm1, %v15658_v2  ;;  %277 = vst.msk [vmem:[#allocation2 + $0x64] sm:$0xf] %vm251_vm1, %v15658_v2  ;;  %v15853_v7 = vld [vmem:[%s15843_s17 + $0x3c] sm:$0xf] }
  0x21   : > { %278 = vst.msk [vmem:[#allocation2 + $0x68] sm:$0xf] %vm251_vm1, %v15658_v2  ;;  %279 = vst.msk [vmem:[#allocation2 + $0x6c] sm:$0xf] %vm251_vm1, %v15658_v2  ;;  %v418_v9 = vshrl.u32 %v412_v5, 16  ;;  %v421_v10 = vshll.u32 %v412_v5, 16 }
  0x22   : > { %280 = vst.msk [vmem:[#allocation2 + $0x70] sm:$0xf] %vm251_vm1, %v15658_v2  ;;  %281 = vst.msk [vmem:[#allocation2 + $0x74] sm:$0xf] %vm251_vm1, %v15658_v2  ;;  %vm18959_vm10 = vsmask.f32 7946 }
  0x23   : > { %282 = vst.msk [vmem:[#allocation2 + $0x78] sm:$0xf] %vm251_vm1, %v15658_v2  ;;  %283 = vst.msk [vmem:[#allocation2 + $0x7c] sm:$0xf] %vm251_vm1, %v15658_v2  ;;  %v427_v11 = vshrl.u32 %v413_v6, 16  ;;  %v430_v12 = vshll.u32 %v413_v6, 16 }
  0x24   : > { %284 = vst.msk [vmem:[#allocation2 + $0x80] sm:$0xf] %vm251_vm1, %v15658_v2  ;;  %285 = vst.msk [vmem:[#allocation2 + $0x84] sm:$0xf] %vm251_vm1, %v15658_v2  ;;  %v676_v13 = vshrl.u32 %v15853_v7, 16  ;;  %v420_v14 = vrot.slane %v418_v9, 6 }
  0x25   : > { %286 = vst.msk [vmem:[#allocation2 + $0x88] sm:$0xf] %vm251_vm1, %v15658_v2  ;;  %287 = vst.msk [vmem:[#allocation2 + $0x8c] sm:$0xf] %vm251_vm1, %v15658_v2  ;;  %v442_v15 = vld [vmem:[#allocation2 + $0x8] sm:$0xe] }
  0x26   : > { %288 = vst.msk [vmem:[#allocation2 + $0x90] sm:$0xf] %vm251_vm1, %v15658_v2  ;;  %289 = vst.msk [vmem:[#allocation2 + $0x94] sm:$0xf] %vm251_vm1, %v15658_v2  ;;  %v12890_v16 = vld [vmem:[%s15843_s17 + $0x40] sm:$0xf] }
  0x27   : > { %290 = vst.msk [vmem:[#allocation2 + $0x98] sm:$0xf] %vm251_vm1, %v15658_v2  ;;  %291 = vst.msk [vmem:[#allocation2 + $0x9c] sm:$0xf] %vm251_vm1, %v15658_v2  ;;  %vm18961_vm11 = vsmask.f32 2304 }
  0x28   : > { %292 = vst.msk [vmem:[#allocation2 + $0xa0] sm:$0xf] %vm251_vm1, %v15658_v2  ;;  %vm455_vm12 = vsmask.f32 6416  ;;  %vm479_vm13 = vcmask 60418   ;;  %v423_v17 = vrot.slane %v421_v10, 7  ;;  %vm15862_vm14 = vmand %vm439_vm7, %vm18956_vm6 }
  0x29   : > { %v429_v18 = vrot.slane %v427_v11, 6  ;;  %v432_v19 = vrot.slane %v430_v12, 7  ;;  %v15866_v21 = vrot.slane %v676_v13, 7  ;;  %v12891_v22 = vld [vmem:[%s15843_s17 + $0x44] sm:$0xf]  ;;  %vm15871_vm15 = vmand %vm563_vm9, %vm18957_vm8  ;;  %v698_v25 = vshrl.u32 %v12890_v16, 16 }
  0x2a   : > { %v691_v24 = vld [vmem:[#allocation2 + $0x50] sm:$0x1]  ;;  %v701_v26 = vshll.u32 %v12890_v16, 16  ;;  %v707_v27 = vshrl.u32 %v12891_v22, 16  ;;  %v710_v28 = vshll.u32 %v12891_v22, 16  ;;  %v424_v29 = vor.u32 %v423_v17, %v420_v14  ;;  %vm15882_vm7 = vmor %vm18958_vm3, %vm415_vm5  ;;  %s242_s13 = sand.u32 1, %s15648_s22  }
  0x2b   : > { %v433_v30 = vor.u32 %v432_v19, %v429_v18  ;;  %v683_v31 = vrot.slane %v15866_v21, 4  ;;  %v12892_v32 = vld [vmem:[%s15843_s17 + $0x48] sm:$0xf]  ;;  %v15878_v33 = vsel %vm18960_vm0, %v12942_v3, 0  ;;  %v700_v35 = vrot.slane %v698_v25, 6  ;;  %vm15896_vm8 = vmand %vm293_vm2, %vm18958_vm3  ;;  %s12873_s14 = sshll.u32 %s242_s13, 7 }
  0x2c   : > { %v703_v36 = vrot.slane %v701_v26, 7  ;;  %v709_v37 = vrot.slane %v707_v27, 6  ;;  %v712_v38 = vrot.slane %v710_v28, 7  ;;  %v12893_v39 = vld [vmem:[%s15843_s17 + $0x4c] sm:$0xf]  ;;  %v425_v40 = vrot.slane %v424_v29, 4  ;;  %vm15906_vm2 = vmand %vm479_vm13, %vm18959_vm10 }
  0x2d   : > { %v443_v41 = vsel %vm15862_vm14, %v424_v29, %v442_v15  ;;  %v692_v42 = vsel %vm15871_vm15, %v683_v31, %v691_v24  ;;  %v719_v43 = vld [vmem:[#allocation2 + $0x50] sm:$0xe]  ;;  %v730_v44 = vshrl.u32 %v12892_v32, 16  ;;  %vm486_vm9 = vcmask 59392   ;;  %v12876_v49 = vld [vmem:[%s15843_s17 + $0x8] sm:$0xf]  ;;  %vm15921_vm13 = vmor %vm18961_vm11, %vm455_vm12 }
  0x2e   : > { %444 = vst [vmem:[#allocation2 + $0x8] sm:$0xe] %v443_v41  ;;  %693 = vst [vmem:[#allocation2 + $0x50] sm:$0x1] %v692_v42  ;;  %v704_v45 = vor.u32 %v703_v36, %v700_v35  ;;  %v713_v46 = vor.u32 %v712_v38, %v709_v37  ;;  %v733_v47 = vshll.u32 %v12892_v32, 16  ;;  %v739_v48 = vshrl.u32 %v12893_v39, 16 }
  0x2f   : > { %vm18963_vm5 = vsmask.f32 3328  ;;  %vm495_vm6 = vsmask.f32 7440  ;;  %v434_v50 = vsel %vm15882_vm7, %v425_v40, %v433_v30  ;;  %v723_v52 = vld [vmem:[#allocation2 + $0x58] sm:$0x3]  ;;  %vm15941_vm3 = vmand %vm486_vm9, %vm18961_vm11 }
  0x30   : > { %v732_v53 = vrot.slane %v730_v44, 5  ;;  %v742_v54 = vshll.u32 %v12893_v39, 16  ;;  %v448_v55 = vld [vmem:[#allocation2 + $0x10] sm:$0x3]  ;;  %445 = vst.msk [vmem:[#allocation2 + $0xc] sm:$0xf] %vm251_vm1, %v434_v50  ;;  %v720_v58 = vsel %vm15862_vm14, %v704_v45, %v719_v43  ;;  %vm15992_vm11 = vmand %vm251_vm1, %vm18963_vm5 }
  0x31   : > { %v705_v56 = vrot.slane %v704_v45, 4  ;;  %v715_v57 = vrot.slane %v713_v46, 4  ;;  %v735_v59 = vrot.slane %v733_v47, 6  ;;  %v12877_v60 = vld [vmem:[%s15843_s17 + $0xc] sm:$0xf]  ;;  %v741_v62 = vrot.slane %v739_v48, 5 }
  0x32   : > { %721 = vst [vmem:[#allocation2 + $0x50] sm:$0xe] %v720_v58  ;;  %v744_v63 = vrot.slane %v742_v54, 6  ;;  %v751_v0 = vld [vmem:[#allocation2 + $0x58] sm:$0xc]  ;;  %v435_v1 = vrot.slane %v433_v30, 4 }
  0x33   : > { %v458_v3 = vshrl.u32 %v12876_v49, 16  ;;  %v714_v5 = vsel %vm15882_vm7, %v705_v56, %v713_v46  ;;  %v724_v6 = vsel %vm15896_vm8, %v715_v57, %v723_v52  ;;  %v736_v8 = vor.u32 %v735_v59, %v732_v53  ;;  %v12878_v10 = vld [vmem:[%s15843_s17 + $0x10] sm:$0xf]  ;;  %v15916_v11 = vld [vmem:[%s15843_s17 + $0x14] sm:$0xf]  ;;  %s18816_s15 = scalar_lea.vmem [#allocation6], %s12873_s14 }
  0x34   : > { %v461_v9 = vshll.u32 %v12876_v49, 16  ;;  %722 = vst.msk [vmem:[#allocation2 + $0x54] sm:$0xf] %vm251_vm1, %v714_v5  ;;  %725 = vst [vmem:[#allocation2 + $0x58] sm:$0x3] %v724_v6  ;;  %v745_v13 = vor.u32 %v744_v63, %v741_v62  ;;  %v449_v14 = vsel %vm15896_vm8, %v435_v1, %v448_v55  ;;  %v467_v16 = vshrl.u32 %v12877_v60, 16 }
  0x35   : > { %v460_v15 = vrot.slane %v458_v3, 5  ;;  %v737_v17 = vrot.slane %v736_v8, 4  ;;  %v752_v18 = vsel %vm15906_vm2, %v736_v8, %v751_v0  ;;  %450 = vst [vmem:[#allocation2 + $0x10] sm:$0x3] %v449_v14  ;;  %v470_v22 = vshll.u32 %v12877_v60, 16  ;;  %s13881_s16 = sshll.u32 %s15719_s25, 11 }
  0x36   : > { %v463_v19 = vrot.slane %v461_v9, 6  ;;  %v482_v24 = vld [vmem:[#allocation2 + $0x10] sm:$0xc]  ;;  %753 = vst [vmem:[#allocation2 + $0x58] sm:$0xc] %v752_v18  ;;  %v469_v25 = vrot.slane %v467_v16, 5  ;;  %s18901_s20 = scalar_lea.hbm %s18955_s6, %s13881_s16 }
  0x37   : > { %v498_v26 = vshll.u32 %v12878_v10, 16  ;;  %v501_v27 = vshrl.u32 %v12878_v10, 16  ;;  %v507_v28 = vshll.u32 %v15916_v11, 16  ;;  %v746_v29 = vsel %vm15921_vm13, %v737_v17, %v745_v13  ;;  %v522_v35 = vld [vmem:[#allocation2 + $0x18] sm:$0x8]  ;;  %v15198_v38 = vld [vmem:[#allocation2 + $0x8] sm:$0xff]  }
  0x38   : > { %v2301_v30 = vsel %vm18960_vm0, %v15848_v4, 0  ;;  %v464_v31 = vor.u32 %v463_v19, %v460_v15  ;;  %v472_v32 = vrot.slane %v470_v22, 6  ;;  %v755_v36 = vld [vmem:[#allocation2 + $0x60] sm:$0x7]  ;;  %v12894_v37 = vld [vmem:[%s15843_s17 + $0x50] sm:$0xf]  ;;  %14368 = vmatmul.mubr.msk.bf16.vlgmr.msra.gmra.mxu0 %vm18965_vm4, %v15198_v38  ;;  %vm15949_vm0 = vmor %vm18963_vm5, %vm495_vm6 }
  0x39   : > { %754 = vst.msk [vmem:[#allocation2 + $0x5c] sm:$0xf] %vm251_vm1, %v746_v29  ;;  %v488_v39 = vld [vmem:[#allocation2 + $0x18] sm:$0x7]  ;;  %v500_v40 = vrot.slane %v498_v26, 5  ;;  %v503_v41 = vrot.slane %v501_v27, 4  ;;  %14442 = vmatpush3.bf16.msra.mxu0 %v2301_v30 }
  0x3a   : > { %v511_v42 = vshrl.u32 %v15916_v11, 16  ;;  %v465_v43 = vrot.slane %v464_v31, 4  ;;  %v473_v44 = vor.u32 %v472_v32, %v469_v25  ;;  %v483_v4 = vsel %vm15906_vm2, %v464_v31, %v482_v24  ;;  %v12895_v46 = vld [vmem:[%s15843_s17 + $0x54] sm:$0xf]  ;;  %v12896_v52 = vld [vmem:[%s15843_s17 + $0x58] sm:$0xf] }
  0x3b   : > { %vm519_vm10 = vcmask 60419   ;;  %484 = vst [vmem:[#allocation2 + $0x10] sm:$0xc] %v483_v4  ;;  %v18993_v47 = vmov 0  ;;  %v504_v48 = vor.u32 %v503_v41, %v500_v40  ;;  %v15953_v49 = vrot.slane %v507_v28, 5  ;;  %v15199_v53 = vld [vmem:[#allocation2 + $0x50] sm:$0xff]  }
  0x3c   : > { %v18994_v47 = vsel %vm15949_vm0, 4294967295, %v18993_v47  ;;  %vm18964_vm12 = vsmask.f32 7950  ;;  %v747_v50 = vrot.slane %v745_v13, 4  ;;  %v474_v54 = vsel %vm15921_vm13, %v465_v43, %v473_v44  ;;  %v783_v0 = vld [vmem:[#allocation2 + $0x60] sm:$0x8]  ;;  %14387 = vmatprep.mubr.msk.bf16.mxu1 %vm18965_vm4, %v15199_v53 }
  0x3d   : > { %v475_v55 = vrot.slane %v473_v44, 4  ;;  %vm15959_vm9 = vmand %vm519_vm10, %vm18964_vm12  ;;  %v762_v57 = vshll.u32 %v12894_v37, 16  ;;  %v765_v58 = vshrl.u32 %v12894_v37, 16  ;;  %485 = vst.msk [vmem:[#allocation2 + $0x14] sm:$0xf] %vm251_vm1, %v474_v54  ;;  %v505_v59 = vrot.slane %v504_v48, 4 }
  0x3e   : > { %v523_v60 = vsel %vm15959_vm9, %v500_v40, %v522_v35  ;;  %v756_v62 = vsel %vm15941_vm3, %v747_v50, %v755_v36  ;;  %v771_v63 = vshll.u32 %v12895_v46, 16  ;;  %v12880_v1 = vld [vmem:[%s15843_s17 + $0x18] sm:$0xf]  ;;  %v775_v8 = vshrl.u32 %v12895_v46, 16  ;;  %v813_v18 = vld [vmem:[#allocation2 + $0x6c] sm:$0xf] }
  0x3f   : > { %v489_v3 = vsel %vm15941_vm3, %v475_v55, %v488_v39  ;;  %524 = vst [vmem:[#allocation2 + $0x18] sm:$0x8] %v523_v60  ;;  %757 = vst [vmem:[#allocation2 + $0x60] sm:$0x7] %v756_v62  ;;  %v764_v5 = vrot.slane %v762_v57, 5  ;;  %v767_v6 = vrot.slane %v765_v58, 4  ;;  %v510_v9 = vsel %vm15949_vm0, %v505_v59, %v15953_v49 }
  0x40   : > { %490 = vst [vmem:[#allocation2 + $0x18] sm:$0x7] %v489_v3  ;;  %v773_v10 = vrot.slane %v771_v63, 5  ;;  %vm18962_vm6 = vsmask.f32 7938  ;;  %v794_v11 = vshrl.u32 %v12896_v52, 16 }
  0x41   : > { %v15200_v13 = vld [vmem:[#allocation2 + $0x58] sm:$0xff]   ;;  %525 = vst.msk [vmem:[#allocation2 + $0x1c] sm:$0xf] %vm251_vm1, %v510_v9  ;;  %v768_v14 = vor.u32 %v767_v6, %v764_v5  ;;  %v784_v15 = vsel %vm15959_vm9, %v764_v5, %v783_v0  ;;  %v777_v16 = vrot.slane %v775_v8, 4  ;;  %v797_v17 = vshll.u32 %v12896_v52, 16  ;;  %vm15984_vm10 = vmand %vm251_vm1, %vm18962_vm6  ;;  %v16273_v23 = vld [vmem:[#allocation2 + $0x50] sm:$0xff]  }
  0x42   : > { %785 = vst [vmem:[#allocation2 + $0x60] sm:$0x8] %v784_v15  ;;  %v787_v19 = vld [vmem:[#allocation2 + $0x68] sm:$0xf]  ;;  %v15978_v22 = vrot.slane %v794_v11, 7  ;;  %v513_v24 = vrot.slane %v511_v42, 4  ;;  %14388 = vmatmul.mubr.msk.bf16.vlgmr.msra.gmra.mxu1 %vm18965_vm4, %v15200_v13 }
  0x43   : > { %v538_v25 = vshrl.u32 %v12880_v1, 16  ;;  %v541_v26 = vshll.u32 %v12880_v1, 16  ;;  %v12881_v27 = vld [vmem:[%s15843_s17 + $0x1c] sm:$0xf]  ;;  %v769_v28 = vrot.slane %v768_v14, 4  ;;  %v778_v30 = vor.u32 %v777_v16, %v773_v10  ;;  %14404 = vmatpush3.bf16.msra.mxu1 %v15878_v33  ;;  %s18909_s25 = scalar_lea.sflag [#allocation7], %s242_s13 }
  0x44   : > { %v528_v31 = vld [vmem:[#allocation2 + $0x20] sm:$0xf]  ;;  %v546_v32 = vshrl.u32 %v12881_v27, 16  ;;  %v549_v35 = vshll.u32 %v12881_v27, 16  ;;  %v679_v36 = vshll.u32 %v15853_v7, 16  ;;  %v799_v38 = vor.u32 %v797_v17, %v15978_v22  ;;  %v15201_v43 = vld [vmem:[#allocation2 + $0x10] sm:$0xff]  }
  0x45   : > { %v514_v39 = vor.u32 %v513_v24, %v15953_v49  ;;  %v540_v40 = vrot.slane %v538_v25, 7  ;;  %v559_v41 = vld [vmem:[#allocation2 + $0x24] sm:$0xf]  ;;  %v12882_v42 = vld [vmem:[%s15843_s17 + $0x20] sm:$0xf]  ;;  %v774_v44 = vsel %vm15949_vm0, %v769_v28, %v773_v10  ;;  %v779_v4 = vrot.slane %v778_v30, 4  ;;  %14371 = vmatprep.mubr.msk.bf16.mxu0 %vm18965_vm4, %v15201_v43 }
  0x46   : > { %v548_v33 = vrot.slane %v546_v32, 7  ;;  %v572_v46 = vshrl.u32 %v12882_v42, 16  ;;  %vm19001_vm6 = vsmask.f32 4368  ;;  %vm19002_vm5 = vsmask.f32 256 }
  0x47   : > { %vm16003_vm12 = vmor %vm19002_vm5, %vm19001_vm6  ;;  %786 = vst.msk [vmem:[#allocation2 + $0x64] sm:$0xf] %vm251_vm1, %v774_v44  ;;  %v814_v49 = vsel %vm15984_vm10, %v799_v38, %v813_v18  ;;  %v515_v50 = vrot.slane %v514_v39, 4  ;;  %v543_v52 = vor.u32 %v541_v26, %v540_v40  ;;  %v544_v53 = vrot.slane %v540_v40, 4  ;;  %v565_v54 = vld [vmem:[#allocation2 + $0x2c] sm:$0x1] }
  0x48   : > { %v12897_v55 = vld [vmem:[%s15843_s17 + $0x5c] sm:$0xf]  ;;  %v788_v57 = vsel %vm15992_vm11, %v779_v4, %v787_v19  ;;  %815 = vst [vmem:[#allocation2 + $0x6c] sm:$0xf] %v814_v49  ;;  %v551_v58 = vor.u32 %v549_v35, %v548_v33  ;;  %v553_v59 = vrot.slane %v548_v33, 4  ;;  %v574_v60 = vrot.slane %v572_v46, 6 }
  0x49   : > { %v15202_v62 = vld [vmem:[#allocation2 + $0x18] sm:$0xff]   ;;  %789 = vst [vmem:[#allocation2 + $0x68] sm:$0xf] %v788_v57  ;;  %v529_v63 = vsel %vm15992_vm11, %v515_v50, %v528_v31  ;;  %v560_v0 = vsel %vm15984_vm10, %v543_v52, %v559_v41  ;;  %v575_v1 = vshll.u32 %v12882_v42, 16  ;;  %v802_v3 = vshrl.u32 %v12897_v55, 16  ;;  %s15660_s28 = smov [#allocation6]  }
  0x4a   : > { %530 = vst [vmem:[#allocation2 + $0x20] sm:$0xf] %v529_v63  ;;  %561 = vst [vmem:[#allocation2 + $0x24] sm:$0xf] %v560_v0  ;;  %v552_v5 = vsel %vm16003_vm12, %v544_v53, %v551_v58  ;;  %v566_v6 = vsel %vm15871_vm15, %v553_v59, %v565_v54  ;;  %v800_v8 = vrot.slane %v15978_v22, 4  ;;  %v805_v9 = vshll.u32 %v12897_v55, 16  ;;  %14372 = vmatmul.mubr.msk.bf16.gmra.mxu0 %vm18965_vm4, %v15202_v62 }
  0x4b   : > { %v12898_v10 = vld [vmem:[%s15843_s17 + $0x60] sm:$0xf]  ;;  %562 = vst.msk [vmem:[#allocation2 + $0x28] sm:$0xf] %vm251_vm1, %v552_v5  ;;  %567 = vst [vmem:[#allocation2 + $0x2c] sm:$0x1] %v566_v6 }
  0x4c   : > { %v577_v11 = vrot.slane %v575_v1, 7  ;;  %v593_v13 = vld [vmem:[#allocation2 + $0x2c] sm:$0xe]  ;;  %v804_v14 = vrot.slane %v802_v3, 7  ;;  %v824_v15 = vshrl.u32 %v12898_v10, 16  ;;  %v827_v16 = vshll.u32 %v12898_v10, 16 }
  0x4d   : > { %v817_v17 = vld [vmem:[#allocation2 + $0x74] sm:$0x1]  ;;  %v12899_v18 = vld [vmem:[%s15843_s17 + $0x64] sm:$0xf]  ;;  %v12900_v19 = vld [vmem:[%s15843_s17 + $0x68] sm:$0xf] }
  0x4e   : > { %v16028_v24 = vor.u32 %v577_v11, %v574_v60  ;;  %v807_v25 = vor.u32 %v805_v9, %v804_v14  ;;  %v809_v22 = vrot.slane %v804_v14, 4  ;;  %v826_v26 = vrot.slane %v824_v15, 6  ;;  %v845_v27 = vld [vmem:[#allocation2 + $0x74] sm:$0xe]  ;;  %v15203_v28 = vld [vmem:[#allocation2 + $0x60] sm:$0xff]   ;;  %s15600_s29 = sshll.u32 %s15660_s28, 4  ;;  %s15601_s29 = int_to_ptr.vmem [resolvable:$false] %s15600_s29 }
  0x4f   : > { %v829_v30 = vrot.slane %v827_v16, 7  ;;  %v833_v31 = vshrl.u32 %v12899_v18, 16  ;;  %v836_v32 = vshll.u32 %v12899_v18, 16  ;;  %v856_v40 = vshrl.u32 %v12900_v19, 16  ;;  %v12883_v41 = vld [vmem:[%s15843_s17 + $0x24] sm:$0xf]  ;;  %14391 = vmatprep.mubr.msk.bf16.mxu1 %vm18965_vm4, %v15203_v28 }
  0x50   : > { %v594_v35 = vsel %vm15862_vm14, %v16028_v24, %v593_v13  ;;  %v808_v38 = vsel %vm16003_vm12, %v800_v8, %v807_v25  ;;  %v818_v39 = vsel %vm15871_vm15, %v809_v22, %v817_v17  ;;  %v15204_v42 = vld [vmem:[#allocation2 + $0x68] sm:$0xff]   ;;  %v859_v33 = vshll.u32 %v12900_v19, 16  ;;  %v849_v49 = vld [vmem:[#allocation2 + $0x7c] sm:$0x3]  ;;  %v877_v58 = vld [vmem:[#allocation2 + $0x7c] sm:$0xc] }
  0x51   : > { %595 = vst [vmem:[#allocation2 + $0x2c] sm:$0xe] %v594_v35  ;;  %816 = vst.msk [vmem:[#allocation2 + $0x70] sm:$0xf] %vm251_vm1, %v808_v38  ;;  %v830_v43 = vor.u32 %v829_v30, %v826_v26  ;;  %v835_v44 = vrot.slane %v833_v31, 6  ;;  %v838_v4 = vrot.slane %v836_v32, 7  ;;  %14392 = vmatmul.mubr.msk.bf16.gmra.mxu1 %vm18965_vm4, %v15204_v42 }
  0x52   : > { %819 = vst [vmem:[#allocation2 + $0x74] sm:$0x1] %v818_v39  ;;  %v15205_v46 = vld [vmem:[#allocation2 + $0x20] sm:$0xff]   ;;  %v858_v50 = vrot.slane %v856_v40, 5  ;;  %v861_v55 = vrot.slane %v859_v33, 6  ;;  %v579_v59 = vrot.slane %v16028_v24, 4 }
  0x53   : > { %v846_v52 = vsel %vm15862_vm14, %v830_v43, %v845_v27  ;;  %v831_v53 = vrot.slane %v830_v43, 4  ;;  %v839_v54 = vor.u32 %v838_v4, %v835_v44  ;;  %v12884_v57 = vld [vmem:[%s15843_s17 + $0x28] sm:$0xf]  ;;  %14375 = vmatprep.mubr.msk.bf16.mxu0 %vm18965_vm4, %v15205_v46  ;;  %v581_v60 = vshrl.u32 %v12883_v41, 16  ;;  %v12885_v5 = vld [vmem:[%s15843_s17 + $0x2c] sm:$0xf] }
  0x54   : > { %847 = vst [vmem:[#allocation2 + $0x74] sm:$0xe] %v846_v52  ;;  %v584_v62 = vshll.u32 %v12883_v41, 16  ;;  %v604_v63 = vshrl.u32 %v12884_v57, 16  ;;  %v16048_v1 = vor.u32 %v861_v55, %v858_v50  ;;  %v607_v3 = vshll.u32 %v12884_v57, 16  ;;  %s15602_s9 = scalar_lea.vmem %s15601_s29, 4096 }
  0x55   : > { %v840_v0 = vsel %vm15882_vm7, %v831_v53, %v839_v54  ;;  %v841_v20 = vrot.slane %v839_v54, 4  ;;  %v583_v6 = vrot.slane %v581_v60, 6  ;;  %v613_v10 = vshrl.u32 %v12885_v5, 16  ;;  %v16053_v11 = vld [vmem:[%s15843_s17 + $0x30] sm:$0xf] }
  0x56   : > { %848 = vst.msk [vmem:[#allocation2 + $0x78] sm:$0xf] %vm251_vm1, %v840_v0  ;;  %v586_v8 = vrot.slane %v584_v62, 7  ;;  %v606_v9 = vrot.slane %v604_v63, 5  ;;  %v878_v14 = vsel %vm15906_vm2, %v16048_v1, %v877_v58  ;;  %v597_v15 = vld [vmem:[#allocation2 + $0x34] sm:$0x3]  ;;  %v681_v63 = vor.u32 %v679_v36, %v15866_v21 }
  0x57   : > { %v850_v13 = vsel %vm15896_vm8, %v841_v20, %v849_v49  ;;  %v609_v16 = vrot.slane %v607_v3, 6  ;;  %v625_v17 = vld [vmem:[#allocation2 + $0x34] sm:$0xc]  ;;  %v616_v18 = vshll.u32 %v12885_v5, 16  ;;  %v12901_v19 = vld [vmem:[%s15843_s17 + $0x6c] sm:$0xf] }
  0x58   : > { %v15206_v24 = vld [vmem:[#allocation2 + $0x28] sm:$0xff]   ;;  %851 = vst [vmem:[#allocation2 + $0x7c] sm:$0x3] %v850_v13  ;;  %879 = vst [vmem:[#allocation2 + $0x7c] sm:$0xc] %v878_v14  ;;  %v587_v25 = vor.u32 %v586_v8, %v583_v6  ;;  %v615_v22 = vrot.slane %v613_v10, 5 }
  0x59   : > { %v610_v26 = vor.u32 %v609_v16, %v606_v9  ;;  %v618_v27 = vrot.slane %v616_v18, 6  ;;  %v636_v28 = vshll.u32 %v16053_v11, 16  ;;  %v639_v30 = vshrl.u32 %v16053_v11, 16  ;;  %v657_v31 = vld [vmem:[#allocation2 + $0x3c] sm:$0x8]  ;;  %14376 = vmatmul.mubr.msk.bf16.gmra.mxu0 %vm18965_vm4, %v15206_v24 }
  0x5a   : > { %v588_v32 = vsel %vm15882_vm7, %v579_v59, %v587_v25  ;;  %v589_v35 = vrot.slane %v587_v25, 4  ;;  %v629_v38 = vld [vmem:[#allocation2 + $0x3c] sm:$0x7]  ;;  %v863_v39 = vrot.slane %v16048_v1, 4  ;;  %v865_v40 = vshrl.u32 %v12901_v19, 16 }
  0x5b   : > { %v12902_v41 = vld [vmem:[%s15843_s17 + $0x70] sm:$0xf]  ;;  %596 = vst.msk [vmem:[#allocation2 + $0x30] sm:$0xf] %vm251_vm1, %v588_v32  ;;  %v626_v43 = vsel %vm15906_vm2, %v610_v26, %v625_v17  ;;  %v611_v44 = vrot.slane %v610_v26, 4  ;;  %v619_v4 = vor.u32 %v618_v27, %v615_v22  ;;  %v638_v33 = vrot.slane %v636_v28, 5 }
  0x5c   : > { %v15207_v42 = vld [vmem:[#allocation2 + $0x70] sm:$0xff]   ;;  %v598_v46 = vsel %vm15896_vm8, %v589_v35, %v597_v15  ;;  %627 = vst [vmem:[#allocation2 + $0x34] sm:$0xc] %v626_v43  ;;  %v867_v49 = vrot.slane %v865_v40, 5  ;;  %v868_v50 = vshll.u32 %v12901_v19, 16  ;;  %v888_v52 = vshll.u32 %v12902_v41, 16 }
  0x5d   : > { %v909_v53 = vld [vmem:[#allocation2 + $0x84] sm:$0x8]  ;;  %14395 = vmatprep.mubr.msk.bf16.mxu1 %vm18965_vm4, %v15207_v42  ;;  %599 = vst [vmem:[#allocation2 + $0x34] sm:$0x3] %v598_v46  ;;  %v620_v61 = vsel %vm15921_vm13, %v611_v44, %v619_v4  ;;  %v621_v54 = vrot.slane %v619_v4, 4  ;;  %v658_v55 = vsel %vm15959_vm9, %v638_v33, %v657_v31  ;;  %v891_v57 = vshrl.u32 %v12902_v41, 16 }
  0x5e   : > { %v12903_v58 = vld [vmem:[%s15843_s17 + $0x74] sm:$0xf]  ;;  %628 = vst.msk [vmem:[#allocation2 + $0x38] sm:$0xf] %vm251_vm1, %v620_v61  ;;  %659 = vst [vmem:[#allocation2 + $0x3c] sm:$0x8] %v658_v55 }
  0x5f   : > { %v870_v51 = vrot.slane %v868_v50, 6  ;;  %v890_v59 = vrot.slane %v888_v52, 5  ;;  %v897_v60 = vshll.u32 %v12903_v58, 16  ;;  %v901_v62 = vshrl.u32 %v12903_v58, 16  ;;  %v15208_v0 = vld [vmem:[#allocation2 + $0x78] sm:$0xff]   ;;  %v15215_v15 = vld [vmem:[#allocation2] sm:$0xff]  }
  0x60   : > { %v630_v20 = vsel %vm15941_vm3, %v621_v54, %v629_v38  ;;  %v893_v1 = vrot.slane %v891_v57, 4  ;;  %v12887_v3 = vld [vmem:[%s15843_s17 + $0x34] sm:$0xf]  ;;  %v881_v6 = vld [vmem:[#allocation2 + $0x84] sm:$0x7]  ;;  %14396 = vmatmul.mubr.msk.bf16.gmra.mxu1 %vm18965_vm4, %v15208_v0  ;;  %v641_v36 = vrot.slane %v639_v30, 4 }
  0x61   : > { %631 = vst [vmem:[#allocation2 + $0x3c] sm:$0x7] %v630_v20  ;;  %v871_v5 = vor.u32 %v870_v51, %v867_v49  ;;  %v910_v8 = vsel %vm15959_vm9, %v890_v59, %v909_v53  ;;  %v899_v9 = vrot.slane %v897_v60, 5  ;;  %v903_v10 = vrot.slane %v901_v62, 4  ;;  %v12888_v11 = vld [vmem:[%s15843_s17 + $0x38] sm:$0xf] }
  0x62   : > { %911 = vst [vmem:[#allocation2 + $0x84] sm:$0x8] %v910_v8  ;;  %v894_v7 = vor.u32 %v893_v1, %v890_v59  ;;  %v913_v21 = vld [vmem:[#allocation2 + $0x8c] sm:$0xf]  ;;  %v645_v13 = vshll.u32 %v12887_v3, 16  ;;  %v649_v14 = vshrl.u32 %v12887_v3, 16  ;;  %v642_v24 = vor.u32 %v641_v36, %v638_v33 }
  0x63   : > { %v872_v16 = vsel %vm15921_vm13, %v863_v39, %v871_v5  ;;  %v873_v17 = vrot.slane %v871_v5, 4  ;;  %v904_v18 = vor.u32 %v903_v10, %v899_v9  ;;  %v668_v19 = vshrl.u32 %v12888_v11, 16  ;;  %v687_v26 = vld [vmem:[#allocation2 + $0x48] sm:$0xf]  ;;  %v15217_v38 = vld [vmem:[#allocation2 + $0x10] sm:$0xff]   ;;  %v15220_v59 = vld [vmem:[#allocation2 + $0x18] sm:$0xff]  }
  0x64   : > { %880 = vst.msk [vmem:[#allocation2 + $0x80] sm:$0xf] %vm251_vm1, %v872_v16  ;;  %v895_v56 = vrot.slane %v894_v7, 4  ;;  %v647_v25 = vrot.slane %v645_v13, 5  ;;  %v651_v22 = vrot.slane %v649_v14, 4  ;;  %v15216_v27 = vld [vmem:[#allocation2 + $0x8] sm:$0xff]  }
  0x65   : > { %v15209_v28 = vld [vmem:[#allocation2 + $0x30] sm:$0xff]   ;;  %v882_v30 = vsel %vm15941_vm3, %v873_v17, %v881_v6  ;;  %v905_v31 = vrot.slane %v904_v18, 4  ;;  %v670_v32 = vrot.slane %v668_v19, 7  ;;  %v671_v35 = vshll.u32 %v12888_v11, 16  ;;  %v661_v45 = vld [vmem:[#allocation2 + $0x44] sm:$0xf] }
  0x66   : > { %883 = vst [vmem:[#allocation2 + $0x84] sm:$0x7] %v882_v30  ;;  %v900_v39 = vsel %vm15949_vm0, %v895_v56, %v899_v9  ;;  %v643_v40 = vrot.slane %v642_v24, 4  ;;  %v652_v41 = vor.u32 %v651_v22, %v647_v25  ;;  %v1589_v42 = vshll.u32 %v15215_v15, 16  ;;  %14379 = vmatprep.mubr.msk.bf16.mxu0 %vm18965_vm4, %v15209_v28  ;;  %v16101_v46 = vld [vmem:[#allocation2 + $0x8] sm:$0xff]   ;;  %v15221_v6 = vld [vmem:[#allocation2 + $0x10] sm:$0xff]  }
  0x67   : > { %912 = vst.msk [vmem:[#allocation2 + $0x88] sm:$0xf] %vm251_vm1, %v900_v39  ;;  %v914_v43 = vsel %vm15992_vm11, %v905_v31, %v913_v21  ;;  %v673_v44 = vor.u32 %v671_v35, %v670_v32  ;;  %v674_v4 = vrot.slane %v670_v32, 4  ;;  %v1587_v33 = vshrl.u32 %v15215_v15, 16  ;;  %v13018_v57 = vld [vmem:[%s18950_s1 + $0xc] sm:$0xf] }
  0x68   : > { %v15210_v49 = vld [vmem:[#allocation2 + $0x38] sm:$0xff]   ;;  %915 = vst [vmem:[#allocation2 + $0x8c] sm:$0xf] %v914_v43  ;;  %v648_v50 = vsel %vm15949_vm0, %v643_v40, %v647_v25  ;;  %v653_v52 = vrot.slane %v652_v41, 4  ;;  %v1591_v53 = vrot.slane %v1589_v42, 1  ;;  %v1594_v61 = vshll.u32 %v15216_v27, 16 }
  0x69   : > { %660 = vst.msk [vmem:[#allocation2 + $0x40] sm:$0xf] %vm251_vm1, %v648_v50  ;;  %v682_v54 = vsel %vm16003_vm12, %v674_v4, %v681_v63  ;;  %v688_v55 = vsel %vm15984_vm10, %v673_v44, %v687_v26  ;;  %vm18973_vm3 = vsmask.f32 7424  ;;  %14380 = vmatmul.mubr.msk.bf16.gmra.mxu0 %vm18965_vm4, %v15210_v49  ;;  %v1598_v51 = vshrl.u32 %v15216_v27, 16  ;;  %v15222_v10 = vld [vmem:[#allocation2 + $0x20] sm:$0xff]  }
  0x6a   : > { %v662_v58 = vsel %vm15992_vm11, %v653_v52, %v661_v45  ;;  %689 = vst [vmem:[#allocation2 + $0x48] sm:$0xf] %v688_v55  ;;  %690 = vst.msk [vmem:[#allocation2 + $0x4c] sm:$0xf] %vm251_vm1, %v682_v54  ;;  %vm19005_vm8 = vcmask 1043456   ;;  %v1592_v60 = vor.u32 %v1591_v53, %v1587_v33  ;;  %v1596_v62 = vrot.slane %v1594_v61, 1 }
  0x6b   : > { %15147 = vmatprep.subr.msk.bf16.mxu1 %vm19005_vm8, %v13018_v57  ;;  %663 = vst [vmem:[#allocation2 + $0x44] sm:$0xf] %v662_v58  ;;  %v1602_v63 = vshll.u32 %v15217_v38, 16  ;;  %v15218_v0 = vld [vmem:[#allocation2] sm:$0xfe]   ;;  %v2210_v1 = vrot.slane %v16101_v46, 1  ;;  %vm19006_vm14 = vmmov %vm19005_vm8 }
  0x6c   : > { %v2209_v3 = vrot.slane %v15218_v0, 1  ;;  %v1606_v5 = vshrl.u32 %v15217_v38, 16  ;;  %v1597_v8 = vsel %vm18973_vm3, %v1592_v60, %v1596_v62  ;;  %v1610_v9 = vshll.u32 %v15220_v59, 16  ;;  %v15223_v21 = vld [vmem:[#allocation2 + $0x18] sm:$0xff]   ;;  %v15224_v36 = vld [vmem:[#allocation2 + $0x28] sm:$0xff]   ;;  %vm19007_vm5 = vmmov %vm19005_vm8 }
  0x6d   : > { %v15211_v20 = vld [vmem:[#allocation2 + $0x80] sm:$0xff]   ;;  %vm18970_vm11 = vcmask 1046528   ;;  %v1604_v7 = vrot.slane %v1602_v63, 1  ;;  %v1600_v14 = vor.u32 %v1598_v51, %v1596_v62  ;;  %v13056_v18 = vld [vmem:[%s18950_s1 + $0x10] sm:$0xf]  ;;  %v2812_v19 = vsel %vm19006_vm14, %v13018_v57, 0  ;;  %vm19008_vm2 = vmmov %vm19007_vm5 }
  0x6e   : > { %14399 = vmatprep.mubr.msk.bf16.mxu1 %vm18965_vm4, %v15211_v20  ;;  %v1612_v15 = vrot.slane %v1610_v9, 1  ;;  %v2211_v16 = vsel %vm18970_vm11, %v2209_v3, %v2210_v1  ;;  %v2212_v56 = vrot.slane %v15221_v6, 1  ;;  %15148 = vmatprep.subr.msk.bf16.mxu0 %vm19007_vm5, %v13056_v18  ;;  %v1614_v24 = vshrl.u32 %v15220_v59, 16  ;;  %v15225_v31 = vld [vmem:[#allocation2 + $0x20] sm:$0xff]   ;;  %v15226_v35 = vld [vmem:[#allocation2 + $0x30] sm:$0xff]   ;;  %v15227_v41 = vld [vmem:[#allocation2 + $0x28] sm:$0xff]  }
  0x6f   : > { %v15212_v37 = vld [vmem:[#allocation2 + $0x88] sm:$0xff]   ;;  %v1608_v17 = vor.u32 %v1606_v5, %v1604_v7  ;;  %v1618_v25 = vshll.u32 %v15222_v10, 16  ;;  %v1605_v22 = vsel %vm18973_vm3, %v1600_v14, %v1604_v7  ;;  %v2214_v27 = vrot.slane %v15223_v21, 1  ;;  %v15228_v44 = vld [vmem:[#allocation2 + $0x38] sm:$0xff]   ;;  %v15229_v51 = vld [vmem:[#allocation2 + $0x30] sm:$0xff]  }
  0x70   : > { %14400 = vmatmul.mubr.msk.bf16.gmra.mxu1 %vm18965_vm4, %v15212_v37  ;;  %v1622_v28 = vshrl.u32 %v15222_v10, 16  ;;  %v1626_v30 = vshll.u32 %v15224_v36, 16  ;;  %v2213_v38 = vsel %vm18970_vm11, %v2210_v1, %v2212_v56  ;;  %v1616_v39 = vor.u32 %v1614_v24, %v1612_v15  ;;  %v15231_v0 = vld [vmem:[#allocation2 + $0x38] sm:$0xff]   ;;  %v15234_v7 = vld [vmem:[#allocation2 + $0x50] sm:$0xff]   ;;  %vm19009_vm9 = vmmov %vm19008_vm2 }
  0x71   : > { %v15214_v11 = vld [vmem:[#allocation2 + $0x48] sm:$0xff]   ;;  %14405 = vmatprep.mubr.msk.bf16.mxu1 %vm18965_vm4, %v1597_v8  ;;  %v1613_v26 = vsel %vm18973_vm3, %v1608_v17, %v1612_v15  ;;  %v1620_v32 = vrot.slane %v1618_v25, 1  ;;  %v3457_v40 = vsel %vm19008_vm2, %v13056_v18, 0  ;;  %v2215_v42 = vsel %vm18970_vm11, %v2212_v56, %v2214_v27  ;;  %v15236_v15 = vld [vmem:[#allocation2 + $0x58] sm:$0xff]   ;;  %vm19010_vm6 = vmmov %vm19008_vm2 }
  0x72   : > { %v15213_v13 = vld [vmem:[#allocation2 + $0x40] sm:$0xff]   ;;  %v1628_v45 = vrot.slane %v1626_v30, 1  ;;  %v1634_v4 = vshll.u32 %v15226_v35, 16  ;;  %v2216_v46 = vrot.slane %v15225_v31, 1  ;;  %v1630_v49 = vshrl.u32 %v15224_v36, 16  ;;  %v15232_v59 = vld [vmem:[#allocation2 + $0x48] sm:$0xff]   ;;  %vm19011_vm8 = vmmov %vm19008_vm2 }
  0x73   : > { %14383 = vmatprep.mubr.msk.bf16.mxu0 %vm18965_vm4, %v15213_v13  ;;  %v1624_v43 = vor.u32 %v1622_v28, %v1620_v32  ;;  %v1621_v33 = vsel %vm18973_vm3, %v1616_v39, %v1620_v32  ;;  %v2218_v52 = vrot.slane %v15227_v41, 1  ;;  %v1638_v53 = vshrl.u32 %v15226_v35, 16  ;;  %v15230_v55 = vld [vmem:[#allocation2 + $0x40] sm:$0xff]   ;;  %v15235_v14 = vld [vmem:[#allocation2 + $0x48] sm:$0xff]   ;;  %v15239_v32 = vld [vmem:[#allocation2 + $0x58] sm:$0xff]  }
  0x74   : > { %14384 = vmatmul.mubr.msk.bf16.gmra.mxu0 %vm18965_vm4, %v15214_v11  ;;  %v1642_v61 = vshll.u32 %v15228_v44, 16  ;;  %v1636_v54 = vrot.slane %v1634_v4, 1  ;;  %v2217_v57 = vsel %vm18970_vm11, %v2214_v27, %v2216_v46  ;;  %v1632_v58 = vor.u32 %v1630_v49, %v1628_v45  ;;  %v15233_v10 = vld [vmem:[#allocation2 + $0x40] sm:$0xff]   ;;  %v12904_v41 = vld [vmem:[%s15843_s17 + $0x78] sm:$0xf]  ;;  %vm19012_vm14 = vmmov %vm19008_vm2 }
  0x75   : > { %14443 = vmatprep.mubr.msk.bf16.mxu0 %vm18965_vm4, %v2211_v16  ;;  %v1629_v50 = vsel %vm18973_vm3, %v1624_v43, %v1628_v45  ;;  %v2219_v60 = vsel %vm18970_vm11, %v2216_v46, %v2218_v52  ;;  %v1646_v20 = vshrl.u32 %v15228_v44, 16  ;;  %v1650_v1 = vshll.u32 %v15230_v55, 16  ;;  %v15238_v30 = vld [vmem:[#allocation2 + $0x60] sm:$0xff]   ;;  %v15240_v44 = vld [vmem:[#allocation2 + $0x68] sm:$0xff]   ;;  %vm19013_vm5 = vmmov %vm19008_vm2 }
  0x76   : > { %v1640_v62 = vor.u32 %v1638_v53, %v1636_v54  ;;  %v1644_v63 = vrot.slane %v1642_v61, 1  ;;  %v1637_v3 = vsel %vm18973_vm3, %v1632_v58, %v1636_v54  ;;  %v2220_v5 = vrot.slane %v15229_v51, 1  ;;  %v939_v53 = vld [vmem:[#allocation2 + $0x90] sm:$0xf]  ;;  %v16174_v58 = vld [vmem:[%s18950_s1 + $0x14] sm:$0xf] }
  0x77   : > { %v1658_v6 = vshll.u32 %v15232_v59, 16  ;;  %v2222_v8 = vrot.slane %v15231_v0, 1  ;;  %v1654_v9 = vshrl.u32 %v15230_v55, 16  ;;  %v1652_v11 = vrot.slane %v1650_v1, 1  ;;  %v15241_v0 = vld [vmem:[#allocation2 + $0x60] sm:$0xff]  }
  0x78   : > { %14406 = vmatmul.mubr.msk.bf16.vlgmr.msra.gmra.mxu1 %vm18965_vm4, %v1605_v22  ;;  %v1645_v37 = vsel %vm18973_vm3, %v1640_v62, %v1644_v63  ;;  %v2221_v21 = vsel %vm18970_vm11, %v2218_v52, %v2220_v5  ;;  %v1648_v36 = vor.u32 %v1646_v20, %v1644_v63  ;;  %v1662_v18 = vshrl.u32 %v15232_v59, 16  ;;  %v15237_v22 = vld [vmem:[#allocation2 + $0x50] sm:$0xff]   ;;  %v15243_v20 = vld [vmem:[#allocation2 + $0x68] sm:$0xff]  }
  0x79   : > { %14480 = vmatpush3.bf16.msra.mxu1 %v2812_v19  ;;  %14409 = vmatprep.mubr.msk.bf16.mxu1 %vm18965_vm4, %v1613_v26  ;;  %v1660_v13 = vrot.slane %v1658_v6, 1  ;;  %v2223_v16 = vsel %vm18970_vm11, %v2220_v5, %v2222_v8  ;;  %v1656_v17 = vor.u32 %v1654_v9, %v1652_v11  ;;  %v2224_v19 = vrot.slane %v15233_v10, 1  ;;  %v15242_v59 = vld [vmem:[#allocation2 + $0x70] sm:$0xff]   ;;  %v15244_v6 = vld [vmem:[#allocation2 + $0x78] sm:$0xff]  }
  0x7a   : > { %v1666_v56 = vshll.u32 %v15234_v7, 16  ;;  %v1653_v24 = vsel %vm18973_vm3, %v1648_v36, %v1652_v11  ;;  %v2226_v25 = vrot.slane %v15235_v14, 1  ;;  %v1670_v27 = vshrl.u32 %v15234_v7, 16  ;;  %15149 = vmatprep.subr.msk.bf16.mxu1 %vm19009_vm9, %v16174_v58  ;;  %v16191_v36 = vld [vmem:[%s18950_s1 + $0x18] sm:$0xf] }
  0x7b   : > { %v1661_v26 = vsel %vm18973_vm3, %v1656_v17, %v1660_v13  ;;  %v1674_v28 = vshll.u32 %v15236_v15, 16  ;;  %v2225_v35 = vsel %vm18970_vm11, %v2222_v8, %v2224_v19  ;;  %v1678_v45 = vshrl.u32 %v15236_v15, 16  ;;  %v15245_v15 = vld [vmem:[#allocation2 + $0x70] sm:$0xff]  }
  0x7c   : > { %14444 = vmatmul.mubr.msk.bf16.vlgmr.msra.gmra.mxu0 %vm18965_vm4, %v2213_v38  ;;  %v1668_v31 = vrot.slane %v1666_v56, 1  ;;  %v1664_v38 = vor.u32 %v1662_v18, %v1660_v13  ;;  %v2227_v39 = vsel %vm18970_vm11, %v2224_v19, %v2226_v25  ;;  %v920_v4 = vshrl.u32 %v12904_v41, 16  ;;  %v15246_v13 = vld [vmem:[#allocation2 + $0x80] sm:$0xff]   ;;  %v15247_v18 = vld [vmem:[#allocation2 + $0x78] sm:$0xff]  }
  0x7d   : > { %14518 = vmatpush3.bf16.msra.mxu0 %v3457_v40  ;;  %14447 = vmatprep.mubr.msk.bf16.mxu0 %vm18965_vm4, %v2215_v42  ;;  %v2228_v40 = vrot.slane %v15237_v22, 1  ;;  %v1676_v43 = vrot.slane %v1674_v28, 1  ;;  %v923_v46 = vshll.u32 %v12904_v41, 16  ;;  %v2230_v49 = vrot.slane %v15239_v32, 1 }
  0x7e   : > { %v1672_v42 = vor.u32 %v1670_v27, %v1668_v31  ;;  %v1669_v52 = vsel %vm18973_vm3, %v1664_v38, %v1668_v31  ;;  %v1686_v54 = vshrl.u32 %v15238_v30, 16  ;;  %v1690_v55 = vshll.u32 %v15240_v44, 16  ;;  %15150 = vmatprep.subr.msk.bf16.mxu0 %vm19010_vm6, %v16191_v36  ;;  %v15249_v38 = vld [vmem:[#allocation2 + $0x80] sm:$0xff]  }
  0x7f   : > { %v2229_v62 = vsel %vm18970_vm11, %v2226_v25, %v2228_v40  ;;  %v1680_v63 = vor.u32 %v1678_v45, %v1676_v43  ;;  %v2231_v1 = vsel %vm18970_vm11, %v2228_v40, %v2230_v49  ;;  %v2232_v29 = vrot.slane %v15241_v0, 1  ;;  %v15248_v25 = vld [vmem:[#allocation2 + $0x88] sm:$0xff]  }
  0x80   : > { %14410 = vmatmul.mubr.msk.bf16.gmra.mxu1 %vm18965_vm4, %v1621_v33  ;;  %v1682_v33 = vshll.u32 %v15238_v30, 16  ;;  %v1677_v61 = vsel %vm18973_vm3, %v1672_v42, %v1676_v43  ;;  %v1692_v5 = vrot.slane %v1690_v55, 1  ;;  %v1694_v9 = vshrl.u32 %v15240_v44, 16  ;;  %v15251_v40 = vld [vmem:[#allocation2 + $0x88] sm:$0xff]   ;;  %v15257_v43 = vld [vmem:[#allocation2 + $0x10] sm:$0xff]  }
  0x81   : > { %14413 = vmatprep.mubr.msk.bf16.mxu1 %vm18965_vm4, %v1629_v50  ;;  %v16165_v50 = vrot.slane %v920_v4, 7  ;;  %v2234_v10 = vrot.slane %v15243_v20, 1  ;;  %v1702_v7 = vshrl.u32 %v15242_v59, 16  ;;  %v1714_v22 = vshll.u32 %v15246_v13, 16  ;;  %v15259_v20 = vld [vmem:[#allocation2 + $0x18] sm:$0xff]  }
  0x82   : > { %v1684_v51 = vrot.slane %v1682_v33, 1  ;;  %v1696_v17 = vor.u32 %v1694_v9, %v1692_v5  ;;  %v1710_v27 = vshrl.u32 %v15244_v6, 16  ;;  %v2238_v30 = vrot.slane %v15247_v18, 1  ;;  %v15258_v18 = vld [vmem:[#allocation2 + $0x20] sm:$0xff]  }
  0x83   : > { %v2235_v19 = vsel %vm18970_vm11, %v2232_v29, %v2234_v10  ;;  %v1718_v31 = vshrl.u32 %v15246_v13, 16  ;;  %v15255_v13 = vld [vmem:[#allocation2 + $0x18] sm:$0xff]  }
  0x84   : > { %14448 = vmatmul.mubr.msk.bf16.gmra.mxu0 %vm18965_vm4, %v2217_v57  ;;  %v925_v57 = vor.u32 %v923_v46, %v16165_v50  ;;  %v1685_v8 = vsel %vm18973_vm3, %v1680_v63, %v1684_v51  ;;  %v1726_v46 = vshrl.u32 %v15248_v25, 16 }
  0x85   : > { %14451 = vmatprep.mubr.msk.bf16.mxu0 %vm18965_vm4, %v2219_v60 }
  0x86   : > { %v940_v60 = vsel %vm15984_vm10, %v925_v57, %v939_v53  ;;  %v15254_v53 = vld [vmem:[#allocation2 + $0x10] sm:$0xff]   ;;  %v2242_v57 = vrot.slane %v15251_v40, 1  ;;  %vm18969_vm10 = vsmask.f32 6400 }
  0x87   : > { %941 = vst [vmem:[#allocation2 + $0x90] sm:$0xf] %v940_v60 }
  0x88   : > { %14414 = vmatmul.mubr.msk.bf16.gmra.mxu1 %vm18965_vm4, %v1637_v3  ;;  %v1688_v3 = vor.u32 %v1686_v54, %v1684_v51  ;;  %v15253_v54 = vld [vmem:[#allocation2 + $0x8] sm:$0xfe]   ;;  %v3241_v51 = vshrl.u32 %v15257_v43, 16 }
  0x89   : > { %14417 = vmatprep.mubr.msk.bf16.mxu1 %vm18965_vm4, %v1645_v37  ;;  %v1698_v37 = vshll.u32 %v15242_v59, 16  ;;  %v3244_v59 = vshll.u32 %v15257_v43, 16 }
  0x8a   : > { %v1693_v11 = vsel %vm18973_vm3, %v1688_v3, %v1692_v5  ;;  %v2721_v3 = vrot.slane %v15254_v53, 1  ;;  %v15267_v53 = vld [vmem:[#allocation2 + $0x38] sm:$0xff]  }
  0x8b   : > { %v1700_v14 = vrot.slane %v1698_v37, 1 }
  0x8c   : > { %14452 = vmatmul.mubr.msk.bf16.gmra.mxu0 %vm18965_vm4, %v2221_v21  ;;  %v1706_v21 = vshll.u32 %v15244_v6, 16 }
  0x8d   : > { %14455 = vmatprep.mubr.msk.bf16.mxu0 %vm18965_vm4, %v2223_v16  ;;  %v2233_v16 = vsel %vm18970_vm11, %v2230_v49, %v2232_v29  ;;  %v1704_v56 = vor.u32 %v1702_v7, %v1700_v14  ;;  %v1701_v28 = vsel %vm18973_vm3, %v1696_v17, %v1700_v14  ;;  %v15256_v49 = vld [vmem:[#allocation2 + $0x8] sm:$0xfe]   ;;  %v15261_v7 = vld [vmem:[#allocation2 + $0x20] sm:$0xff]   ;;  %v3253_v14 = vshll.u32 %v15259_v20, 16 }
  0x8e   : > { %v15250_v42 = vld [vmem:[#allocation2 + $0x90] ss:$0 sps:$4 sm:$0x11]   ;;  %v3236_v63 = vshll.u32 %v15256_v49, 16 }
  0x8f   : > { %v1730_v55 = vshll.u32 %v15250_v42, 16  ;;  %v15252_v0 = vld [vmem:[#allocation2 + $0x90] ss:$0 sps:$4 sm:$0x11]  }
  0x90   : > { %14418 = vmatmul.mubr.msk.bf16.gmra.mxu1 %vm18965_vm4, %v1653_v24  ;;  %v1708_v24 = vrot.slane %v1706_v21, 1  ;;  %v3250_v21 = vshrl.u32 %v15259_v20, 16  ;;  %v16224_v42 = vld [vmem:[#allocation2 + $0x30] sm:$0xff]  }
  0x91   : > { %14421 = vmatprep.mubr.msk.bf16.mxu1 %vm18965_vm4, %v1661_v26  ;;  %v2236_v26 = vrot.slane %v15245_v15, 1  ;;  %v1732_v37 = vrot.slane %v1730_v55, 1  ;;  %v2729_v55 = vrot.slane %v16224_v42, 1 }
  0x92   : > { %v1709_v32 = vsel %vm18973_vm3, %v1704_v56, %v1708_v24  ;;  %v1712_v41 = vor.u32 %v1710_v27, %v1708_v24  ;;  %v3259_v24 = vshrl.u32 %v15261_v7, 16  ;;  %v15263_v27 = vld [vmem:[#allocation2 + $0x28] sm:$0xff]  }
  0x93   : > { %v2237_v45 = vsel %vm18970_vm11, %v2234_v10, %v2236_v26  ;;  %v2239_v44 = vsel %vm18970_vm11, %v2236_v26, %v2238_v30  ;;  %v3238_v10 = vrot.slane %v3236_v63, 2  ;;  %v3255_v26 = vrot.slane %v3253_v14, 2 }
  0x94   : > { %14456 = vmatmul.mubr.msk.bf16.gmra.mxu0 %vm18965_vm4, %v2225_v35  ;;  %v1722_v35 = vshll.u32 %v15248_v25, 16  ;;  %v3262_v25 = vshll.u32 %v15261_v7, 16  ;;  %v3268_v43 = vshrl.u32 %v15263_v27, 16  ;;  %v16246_v7 = vld [vmem:[#allocation2 + $0x40] sm:$0xff]  }
  0x95   : > { %14459 = vmatprep.mubr.msk.bf16.mxu0 %vm18965_vm4, %v2227_v39  ;;  %v1716_v39 = vrot.slane %v1714_v22, 1  ;;  %v3252_v22 = vrot.slane %v3250_v21, 1 }
  0x96   : > { %v1724_v33 = vrot.slane %v1722_v35, 1 }
  0x97   : > { %v1720_v4 = vor.u32 %v1718_v31, %v1716_v39  ;;  %v2725_v31 = vrot.slane %v15258_v18, 1  ;;  %v3256_v40 = vor.u32 %v3255_v26, %v3252_v22  ;;  %v16256_v18 = vld [vmem:[#allocation2 + $0x48] sm:$0xff]   ;;  %v16264_v22 = vld [vmem:[#allocation2 + $0x50] sm:$0xff]  }
  0x98   : > { %14422 = vmatmul.mubr.msk.bf16.gmra.mxu1 %vm18965_vm4, %v1669_v52  ;;  %v2240_v52 = vrot.slane %v15249_v38, 1  ;;  %v1728_v6 = vor.u32 %v1726_v46, %v1724_v33  ;;  %v3261_v38 = vrot.slane %v3259_v24, 1  ;;  %v3969_v46 = vsel %vm19011_vm8, %v16174_v58, 0 }
  0x99   : > { %14425 = vmatprep.mubr.msk.bf16.mxu1 %vm18965_vm4, %v1677_v61  ;;  %v1717_v61 = vsel %vm18973_vm3, %v1712_v41, %v1716_v39  ;;  %v1725_v60 = vsel %vm18973_vm3, %v1720_v4, %v1724_v33  ;;  %v3264_v39 = vrot.slane %v3262_v25, 2  ;;  %v15260_v41 = vld [vmem:[#allocation2 + $0x28] sm:$0xff]   ;;  %v4480_v58 = vsel %vm19012_vm14, %v16191_v36, 0 }
  0x9a   : > { %v2241_v5 = vsel %vm18970_vm11, %v2238_v30, %v2240_v52  ;;  %v2243_v29 = vsel %vm18970_vm11, %v2240_v52, %v2242_v57  ;;  %v1733_v15 = vsel %vm18973_vm3, %v1728_v6, %v1732_v37  ;;  %v2723_v30 = vrot.slane %v15255_v13, 1 }
  0x9b   : > { %v3265_v52 = vor.u32 %v3264_v39, %v3261_v38  ;;  %v3289_v6 = vshll.u32 %v15267_v53, 16  ;;  %v3307_v39 = vshll.u32 %v16256_v18, 16  ;;  %vm18967_vm8 = vsmask.f32 5376 }
  0x9c   : > { %14460 = vmatmul.mubr.msk.bf16.gmra.mxu0 %vm18965_vm4, %v2229_v62  ;;  %v3233_v62 = vshrl.u32 %v15256_v49, 16  ;;  %v2726_v49 = vsel %vm18970_vm11, %v2723_v30, %v2725_v31  ;;  %vm18966_vm14 = vcmask 1044480  }
  0x9d   : > { %14463 = vmatprep.mubr.msk.bf16.mxu0 %vm18965_vm4, %v2231_v1  ;;  %v2720_v1 = vrot.slane %v15253_v54, 1  ;;  %v2727_v54 = vrot.slane %v15260_v41, 1  ;;  %v3266_v63 = vsel %vm18969_vm10, %v3256_v40, %v3265_v52  ;;  %v3291_v25 = vrot.slane %v3289_v6, 2  ;;  %v16283_v41 = vld [vmem:[%s18950_s1 + $0x20] sm:$0xf] }
  0x9e   : > { %v3235_v9 = vrot.slane %v3233_v62, 1 }
  0x9f   : > { %v2722_v17 = vsel %vm18970_vm11, %v2720_v1, %v2721_v3  ;;  %v2728_v37 = vsel %vm18970_vm11, %v2725_v31, %v2727_v54  ;;  %v2730_v36 = vsel %vm18970_vm11, %v2727_v54, %v2729_v55  ;;  %v16270_v31 = vld [vmem:[#allocation2 + $0x48] sm:$0xff]   ;;  %v2737_v54 = vrot.slane %v16273_v23, 1 }
  0xa0   : > { %14426 = vmatmul.mubr.msk.bf16.gmra.mxu1 %vm18965_vm4, %v1685_v8  ;;  %v3243_v8 = vrot.slane %v3241_v51, 1  ;;  %v3270_v51 = vrot.slane %v3268_v43, 1 }
  0xa1   : > { %14429 = vmatprep.mubr.msk.bf16.mxu1 %vm18965_vm4, %v1693_v11  ;;  %v3246_v11 = vrot.slane %v3244_v59, 2 }
  0xa3   : > { %v3247_v56 = vor.u32 %v3246_v11, %v3243_v8  ;;  %v926_v8 = vrot.slane %v16165_v50, 4  ;;  %v943_v11 = vld [vmem:[#allocation2 + $0x98] sm:$0x1]  ;;  %v16251_v50 = vld [vmem:[%s18950_s1 + $0x1c] sm:$0xf] }
  0xa4   : > { %14464 = vmatmul.mubr.msk.bf16.gmra.mxu0 %vm18965_vm4, %v2233_v16  ;;  %v2244_v16 = vrot.slane %v15252_v0, 1  ;;  %v15269_v0 = vld [vmem:[#allocation2 + $0x40] sm:$0xff]  }
  0xa5   : > { %14467 = vmatprep.mubr.msk.bf16.mxu0 %vm18965_vm4, %v2235_v19  ;;  %v3239_v19 = vor.u32 %v3238_v10, %v3235_v9  ;;  %v3295_v21 = vshrl.u32 %v15269_v0, 16  ;;  %v3298_v13 = vshll.u32 %v15269_v0, 16 }
  0xa7   : > { %v3248_v35 = vsel %vm18969_vm10, %v3239_v19, %v3247_v56 }
  0xa8   : > { %14430 = vmatmul.mubr.msk.bf16.gmra.mxu1 %vm18965_vm4, %v1701_v28  ;;  %v2245_v28 = vsel %vm18970_vm11, %v2242_v57, %v2244_v16  ;;  %v12905_v57 = vld [vmem:[%s15843_s17 + $0x7c] sm:$0xf]  ;;  %s12807_s17 = sshll.u32 %s18816_s15, 4  ;;  %s18903_s17 = int_to_ptr.vmem [resolvable:$true] %s12807_s17 }
  0xa9   : > { %14433 = vmatprep.mubr.msk.bf16.mxu1 %vm18965_vm4, %v1709_v32  ;;  %v15265_v32 = vld [vmem:[#allocation2 + $0x30] sm:$0xff]   ;;  %v928_v20 = vshrl.u32 %v12905_v57, 16  ;;  %v931_v1 = vshll.u32 %v12905_v57, 16  ;;  %s15596_s26 = scalar_lea.vmem %s18903_s17, 2048  ;;  %p15603_p0 = scmp.lt.s32.totalorder %s18903_s17, %s15601_s29 }
  0xaa   : > { %v3277_v4 = vshrl.u32 %v15265_v32, 16  ;;  %v3280_v33 = vshll.u32 %v15265_v32, 16  ;;  %v3304_v32 = vshrl.u32 %v16256_v18, 16  ;;  %p15597_p11 = scmp.ne.s32.totalorder %s18903_s17, %s15596_s26  ;;  %p15604_p1 = scmp.lt.s32.totalorder %s15602_s9, %s15596_s26 }
  0xac   : > { %14468 = vmatmul.mubr.msk.bf16.gmra.mxu0 %vm18965_vm4, %v2237_v45  ;;  %v3271_v45 = vshll.u32 %v15263_v27, 16  ;;  %v3282_v62 = vrot.slane %v3280_v33, 2  ;;  %v2733_v27 = vrot.slane %v16246_v7, 1  ;;  %p15598_p12 = pnand %p15597_p11, %p15736_p5  ;;  %p15605_p2 = por %p15604_p1, %p15603_p0 }
  0xad   : > { %14471 = vmatprep.mubr.msk.bf16.mxu0 %vm18965_vm4, %v2239_v44  ;;  %v2724_v44 = vsel %vm18970_vm11, %v2721_v3, %v2723_v30  ;;  %v15264_v3 = vld [vmem:[#allocation2 + $0x38] sm:$0xff]   ;;  %v3300_v30 = vrot.slane %v3298_v13, 2  ;;  %v15278_v13 = vld [vmem:[#allocation2 + $0x70] sm:$0xff]  }
  0xae   : > { %v3273_v59 = vrot.slane %v3271_v45, 2  ;;  %v2731_v16 = vrot.slane %v15264_v3, 1  ;;  %v3316_v45 = vshll.u32 %v16264_v22, 16  ;;  %p15599_p13 = pneg %p15598_p12 }
  0xb0   : > { %14434 = vmatmul.mubr.msk.bf16.gmra.mxu1 %vm18965_vm4, %v1717_v61  ;;  %v3257_v61 = vsel %vm18969_vm10, %v3247_v56, %v3256_v40  ;;  %v3274_v9 = vor.u32 %v3273_v59, %v3270_v51  ;;  %v3313_v40 = vshrl.u32 %v16264_v22, 16  ;;  %v2734_v42 = vsel %vm18970_vm11, %v2731_v16, %v2733_v27  ;;  %v15272_v59 = vld [vmem:[#allocation2 + $0x58] sm:$0xff]   ;;  %p15606_p3 = pnand %p15605_p2, %p15599_p13 }
  0xb1   : > { %14437 = vmatprep.mubr.msk.bf16.mxu1 %vm18965_vm4, %v1725_v60  ;;  %v3279_v60 = vrot.slane %v3277_v4, 1  ;;  %v15659_v4 = vmov 0.0   ;;  %v3318_v57 = vrot.slane %v3316_v45, 2  ;;  %v2745_v22 = vrot.slane %v15278_v13, 1 }
  0xb2   : > { %v3275_v24 = vsel %vm18969_vm10, %v3265_v52, %v3274_v9  ;;  %v15275_v52 = vld [vmem:[#allocation2 + $0x58] sm:$0xff]  }
  0xb3   : > { %v16244_v10 = vor.u32 %v3282_v62, %v3279_v60  ;;  %v15274_v60 = vld [vmem:[#allocation2 + $0x60] sm:$0xff]  }
  0xb4   : > { %14472 = vmatmul.mubr.msk.bf16.gmra.mxu0 %vm18965_vm4, %v2241_v5  ;;  %v3286_v5 = vshrl.u32 %v15267_v53, 16  ;;  %v15277_v53 = vld [vmem:[#allocation2 + $0x60] sm:$0xff]   ;;  %v2741_v6 = vrot.slane %v15274_v60, 1 }
  0xb5   : > { %14475 = vmatprep.mubr.msk.bf16.mxu0 %vm18965_vm4, %v2243_v29  ;;  %v930_v29 = vrot.slane %v928_v20, 7  ;;  %v3284_v26 = vsel %vm18969_vm10, %v3274_v9, %v16244_v10  ;;  %v3331_v0 = vshrl.u32 %v15277_v53, 16  ;;  %v3334_v3 = vshll.u32 %v15277_v53, 16  ;;  %v15276_v9 = vld [vmem:[#allocation2 + $0x68] sm:$0xff]  }
  0xb7   : > { %v933_v14 = vor.u32 %v931_v1, %v930_v29  ;;  %v3336_v7 = vrot.slane %v3334_v3, 2 }
  0xb8   : > { %14438 = vmatmul.mubr.msk.bf16.gmra.mxu1 %vm18965_vm4, %v1733_v15  ;;  %v935_v15 = vrot.slane %v930_v29, 4 }
  0xb9   : > { %14481 = vmatprep.mubr.msk.bf16.mxu1 %vm18965_vm4, %v2722_v17  ;;  %v3288_v17 = vrot.slane %v3286_v5, 1  ;;  %v934_v19 = vsel %vm16003_vm12, %v926_v8, %v933_v14  ;;  %v2739_v5 = vrot.slane %v15272_v59, 1 }
  0xba   : > { %v944_v56 = vsel %vm15871_vm15, %v935_v15, %v943_v11  ;;  %942 = vst.msk [vmem:[#allocation2 + $0x94] sm:$0xf] %vm251_vm1, %v934_v19  ;;  %vm19014_vm1 = vmmov %vm19008_vm2  ;;  %vm18974_vm15 = vcmask 523264   ;;  %vm18968_vm2 = vcmask 1045504  }
  0xbb   : > { %945 = vst [vmem:[#allocation2 + $0x98] sm:$0x1] %v944_v56  ;;  %v3292_v38 = vor.u32 %v3291_v25, %v3288_v17  ;;  %342 = vst.msk [vmem:[#allocation4 + $0x10] sm:$0xff] %vm18974_vm15, %v15659_v4  ;;  %v2740_v15 = vsel %vm18970_vm11, %v2737_v54, %v2739_v5  ;;  %v2742_v18 = vsel %vm18970_vm11, %v2739_v5, %v2741_v6  ;;  %v2743_v25 = vrot.slane %v15276_v9, 1 }
  0xbc   : > { %14476 = vmatmul.mubr.msk.bf16.gmra.mxu0 %vm18965_vm4, %v2245_v28  ;;  %v3297_v28 = vrot.slane %v3295_v21, 1  ;;  %340 = vst.msk [vmem:[#allocation4] sm:$0xff] %vm18974_vm15, %v15659_v4  ;;  %341 = vst.msk [vmem:[#allocation4 + $0x8] sm:$0xff] %vm18974_vm15, %v15659_v4  ;;  %v15281_v21 = vld [vmem:[#allocation2 + $0x70] sm:$0xff]  }
  0xbd   : > { %14519 = vmatprep.mubr.msk.bf16.mxu0 %vm18965_vm4, %v3248_v35  ;;  %v2732_v35 = vsel %vm18970_vm11, %v2729_v55, %v2731_v16  ;;  %343 = vst.msk [vmem:[#allocation4 + $0x18] sm:$0xff] %vm18974_vm15, %v15659_v4  ;;  %344 = vst.msk [vmem:[#allocation4 + $0x20] sm:$0xff] %vm18974_vm15, %v15659_v4  ;;  %v3293_v33 = vsel %vm18969_vm10, %v16244_v10, %v3292_v38  ;;  %v3315_v55 = vrot.slane %v3313_v40, 1  ;;  %v3333_v10 = vrot.slane %v3331_v0, 1 }
  0xbe   : > { %v16288_v43 = vor.u32 %v3300_v30, %v3297_v28  ;;  %345 = vst.msk [vmem:[#allocation4 + $0x28] sm:$0xff] %vm18974_vm15, %v15659_v4  ;;  %346 = vst.msk [vmem:[#allocation4 + $0x30] sm:$0xff] %vm18974_vm15, %v15659_v4  ;;  %v3349_v56 = vshrl.u32 %v15281_v21, 16 }
  0xbf   : > { %347 = vst.msk [vmem:[#allocation4 + $0x38] sm:$0xff] %vm18974_vm15, %v15659_v4  ;;  %348 = vst.msk [vmem:[#allocation4 + $0x40] sm:$0xff] %vm18974_vm15, %v15659_v4  ;;  %v3319_v1 = vor.u32 %v3318_v57, %v3315_v55  ;;  %v3337_v19 = vor.u32 %v3336_v7, %v3333_v10 }
  0xc0   : > { %14482 = vmatmul.mubr.msk.bf16.vlgmr.msra.gmra.mxu1 %vm18965_vm4, %v2724_v44  ;;  %v2735_v44 = vrot.slane %v16270_v31, 1  ;;  %349 = vst.msk [vmem:[#allocation4 + $0x48] sm:$0xff] %vm18974_vm15, %v15659_v4  ;;  %350 = vst.msk [vmem:[#allocation4 + $0x50] sm:$0xff] %vm18974_vm15, %v15659_v4  ;;  %v15285_v31 = vld [vmem:[#allocation2 + $0x80] sm:$0xff]  }
  0xc1   : > { %14556 = vmatpush3.bf16.msra.mxu1 %v3969_v46  ;;  %14485 = vmatprep.mubr.msk.bf16.mxu1 %vm18965_vm4, %v2726_v49  ;;  %351 = vst.msk [vmem:[#allocation4 + $0x58] sm:$0xff] %vm18974_vm15, %v15659_v4  ;;  %352 = vst.msk [vmem:[#allocation4 + $0x60] sm:$0xff] %vm18974_vm15, %v15659_v4  ;;  %v3306_v46 = vrot.slane %v3304_v32, 1  ;;  %v3309_v49 = vrot.slane %v3307_v39, 2  ;;  %v3351_v32 = vrot.slane %v3349_v56, 1  ;;  %v15282_v39 = vld [vmem:[#allocation2 + $0x80] sm:$0xff]  }
  0xc2   : > { %15151 = vmatprep.subr.msk.bf16.mxu1 %vm19013_vm5, %v16251_v50  ;;  %353 = vst.msk [vmem:[#allocation4 + $0x68] sm:$0xff] %vm18974_vm15, %v15659_v4  ;;  %354 = vst.msk [vmem:[#allocation4 + $0x70] sm:$0xff] %vm18974_vm15, %v15659_v4  ;;  %v2736_v51 = vsel %vm18970_vm11, %v2733_v27, %v2735_v44  ;;  %v2738_v20 = vsel %vm18970_vm11, %v2735_v44, %v2737_v54  ;;  %v15283_v27 = vld [vmem:[#allocation2 + $0x78] sm:$0xff]   ;;  %v3367_v44 = vshrl.u32 %v15285_v31, 16  ;;  %v15289_v60 = vld [vmem:[#allocation2 + $0x90] sm:$0xff]   ;;  %vm18972_vm5 = vcmask 519168  }
  0xc3   : > { %355 = vst.msk [vmem:[#allocation4 + $0x78] sm:$0xff] %vm18974_vm15, %v15659_v4  ;;  %356 = vst.msk [vmem:[#allocation4 + $0x80] sm:$0xff] %vm18974_vm15, %v15659_v4  ;;  %v3310_v62 = vor.u32 %v3309_v49, %v3306_v46  ;;  %v3358_v40 = vshrl.u32 %v15283_v27, 16  ;;  %v3361_v45 = vshll.u32 %v15283_v27, 16  ;;  %v3370_v46 = vshll.u32 %v15285_v31, 16  ;;  %v15286_v5 = vld [vmem:[#allocation2 + $0x90] sm:$0xff]  }
  0xc4   : > { %14520 = vmatmul.mubr.msk.bf16.vlgmr.msra.gmra.mxu0 %vm18965_vm4, %v3257_v61  ;;  %357 = vst.msk [vmem:[#allocation4 + $0x88] sm:$0xff] %vm18974_vm15, %v15659_v4  ;;  %358 = vst.msk [vmem:[#allocation4 + $0x90] sm:$0xff] %vm18974_vm15, %v15659_v4  ;;  %v3302_v61 = vsel %vm18969_vm10, %v3292_v38, %v16288_v43  ;;  %v15280_v38 = vld [vmem:[#allocation2 + $0x78] sm:$0xff]   ;;  %v3369_v57 = vrot.slane %v3367_v44, 1  ;;  %v2753_v7 = vrot.slane %v15286_v5, 1 }
  0xc5   : > { %14594 = vmatpush3.bf16.msra.mxu0 %v4480_v58  ;;  %14523 = vmatprep.mubr.msk.bf16.mxu0 %vm18965_vm4, %v3266_v63  ;;  %359 = vst.msk [vmem:[#allocation4 + $0x98] sm:$0xff] %vm18974_vm15, %v15659_v4  ;;  %360 = vst.msk [vmem:[#allocation4 + $0xa0] sm:$0xff] %vm18974_vm15, %v15659_v4  ;;  %v3322_v58 = vshrl.u32 %v15275_v52, 16  ;;  %v3325_v63 = vshll.u32 %v15275_v52, 16  ;;  %v3311_v8 = vsel %vm18969_vm10, %v16288_v43, %v3310_v62  ;;  %v2747_v49 = vrot.slane %v15280_v38, 1  ;;  %v948_v38 = vld [vmem:[#allocation4 + $0x10] sm:$0xff] }
  0xc6   : > { %15152 = vmatprep.subr.msk.bf16.mxu0 %vm19014_vm1, %v16283_v41  ;;  %361 = vst.msk [vmem:[#allocation4 + $0xa8] sm:$0xff] %vm18974_vm15, %v15659_v4  ;;  %362 = vst.msk [vmem:[#allocation4 + $0xb0] sm:$0xff] %vm18974_vm15, %v15659_v4  ;;  %v3320_v11 = vsel %vm18969_vm10, %v3310_v62, %v3319_v1  ;;  %v2749_v52 = vrot.slane %v15282_v39, 1  ;;  %v3360_v53 = vrot.slane %v3358_v40, 1  ;;  %v3363_v55 = vrot.slane %v3361_v45, 2  ;;  %v15284_v62 = vld [vmem:[#allocation2 + $0x88] sm:$0xff]  }
  0xc7   : > { %363 = vst.msk [vmem:[#allocation4 + $0xb8] sm:$0xff] %vm18974_vm15, %v15659_v4  ;;  %364 = vst.msk [vmem:[#allocation4 + $0xc0] sm:$0xff] %vm18974_vm15, %v15659_v4  ;;  %v3324_v29 = vrot.slane %v3322_v58, 1  ;;  %v3372_v59 = vrot.slane %v3370_v46, 2  ;;  %v946_v46 = vld [vmem:[#allocation4] sm:$0xff] }
  0xc8   : > { %14486 = vmatmul.mubr.msk.bf16.gmra.mxu1 %vm18965_vm4, %v2728_v37  ;;  %365 = vst.msk [vmem:[#allocation4 + $0xc8] sm:$0xff] %vm18974_vm15, %v15659_v4  ;;  %366 = vst.msk [vmem:[#allocation4 + $0xd0] sm:$0xff] %vm18974_vm15, %v15659_v4  ;;  %v15279_v37 = vld [vmem:[#allocation2 + $0x68] sm:$0xff]   ;;  %v3364_v0 = vor.u32 %v3363_v55, %v3360_v53  ;;  %v15290_v10 = vld [vmem:[#allocation2 + $0x98] ss:$0 sps:$4 sm:$0x33]  }
  0xc9   : > { %14489 = vmatprep.mubr.msk.bf16.mxu1 %vm18965_vm4, %v2730_v36  ;;  %367 = vst.msk [vmem:[#allocation4 + $0xd8] sm:$0xff] %vm18974_vm15, %v15659_v4  ;;  %368 = vst.msk [vmem:[#allocation4 + $0xe0] sm:$0xff] %vm18974_vm15, %v15659_v4  ;;  %v3327_v36 = vrot.slane %v3325_v63, 2  ;;  %v3340_v14 = vshrl.u32 %v15279_v37, 16  ;;  %v3343_v17 = vshll.u32 %v15279_v37, 16  ;;  %v2748_v63 = vsel %vm18970_vm11, %v2745_v22, %v2747_v49  ;;  %v949_v53 = vld [vmem:[#allocation4 + $0x18] sm:$0xff] }
  0xca   : > { %369 = vst.msk [vmem:[#allocation4 + $0xe8] sm:$0xff] %vm18974_vm15, %v15659_v4  ;;  %370 = vst.msk [vmem:[#allocation4 + $0xf0] sm:$0xff] %vm18974_vm15, %v15659_v4  ;;  %v3373_v3 = vor.u32 %v3372_v59, %v3369_v57  ;;  %v3388_v37 = vshll.u32 %v15289_v60, 16  ;;  %v15297_v55 = vld [vmem:[#allocation2 + $0x20] sm:$0xff]  }
  0xcb   : > { %371 = vst.msk [vmem:[#allocation4 + $0xf8] sm:$0xff] %vm18974_vm15, %v15659_v4  ;;  %372 = vst.msk [vmem:[#allocation4 + $0x100] sm:$0xff] %vm18974_vm15, %v15659_v4  ;;  %v3328_v16 = vor.u32 %v3327_v36, %v3324_v29  ;;  %v3345_v30 = vrot.slane %v3343_v17, 2 }
  0xcc   : > { %14524 = vmatmul.mubr.msk.bf16.gmra.mxu0 %vm18965_vm4, %v3275_v24  ;;  %373 = vst.msk [vmem:[#allocation4 + $0x108] sm:$0xff] %vm18974_vm15, %v15659_v4  ;;  %374 = vst.msk [vmem:[#allocation4 + $0x110] sm:$0xff] %vm18974_vm15, %v15659_v4  ;;  %v3352_v24 = vshll.u32 %v15281_v21, 16  ;;  %v15288_v21 = vld [vmem:[#allocation2 + $0x98] ss:$0 sps:$4 sm:$0x11]  }
  0xcd   : > { %14527 = vmatprep.mubr.msk.bf16.mxu0 %vm18965_vm4, %v3284_v26  ;;  %375 = vst.msk [vmem:[#allocation4 + $0x118] sm:$0xff] %vm18974_vm15, %v15659_v4  ;;  %v3342_v26 = vrot.slane %v3340_v14, 1  ;;  %v3329_v28 = vsel %vm18969_vm10, %v3319_v1, %v3328_v16  ;;  %v3338_v23 = vsel %vm18969_vm10, %v3328_v16, %v3337_v19  ;;  %v2746_v4 = vsel %vm18970_vm11, %v2743_v25, %v2745_v22  ;;  %vm19015_vm9 = vmmov %vm19014_vm1 }
  0xce   : > { %v2750_v1 = vsel %vm18970_vm11, %v2747_v49, %v2749_v52  ;;  %v3390_v14 = vrot.slane %v3388_v37, 2  ;;  %v2755_v22 = vrot.slane %v15288_v21, 1  ;;  %v15301_v21 = vld [vmem:[#allocation2 + $0x30] sm:$0xff]   ;;  %vm19016_vm6 = vmmov %vm19014_vm1  ;;  %298 = vst.msk [vmem:[#allocation3 + $0x8] sm:$0xf] %vm18972_vm5, %v15658_v2  ;;  %vm337_vm1 = vcmask 517120  }
  0xcf   : > { %v3346_v43 = vor.u32 %v3345_v30, %v3342_v26  ;;  %296 = vst.msk [vmem:[#allocation3] sm:$0xf] %vm18972_vm5, %v15658_v2  ;;  %297 = vst.msk [vmem:[#allocation3 + $0x4] sm:$0xf] %vm18972_vm5, %v15658_v2 }
  0xd0   : > { %14490 = vmatmul.mubr.msk.bf16.gmra.mxu1 %vm18965_vm4, %v2732_v35  ;;  %v3354_v35 = vrot.slane %v3352_v24, 2  ;;  %v2756_v39 = vsel %vm18970_vm11, %v2753_v7, %v2755_v22  ;;  %v952_v22 = vld [vmem:[#allocation4 + $0x30] sm:$0xff]  ;;  %299 = vst.msk [vmem:[#allocation3 + $0xc] sm:$0xf] %vm18972_vm5, %v15658_v2  ;;  %300 = vst.msk [vmem:[#allocation3 + $0x10] sm:$0xf] %vm18972_vm5, %v15658_v2 }
  0xd1   : > { %14493 = vmatprep.mubr.msk.bf16.mxu1 %vm18965_vm4, %v2734_v42  ;;  %v2744_v42 = vsel %vm18970_vm11, %v2741_v6, %v2743_v25  ;;  %v3347_v54 = vsel %vm18969_vm10, %v3337_v19, %v3346_v43  ;;  %v3385_v6 = vshrl.u32 %v15289_v60, 16  ;;  %v3397_v19 = vshll.u32 %v15290_v10, 16  ;;  %v15291_v25 = vld [vmem:[#allocation2 + $0x8] sm:$0xfc]   ;;  %301 = vst.msk [vmem:[#allocation3 + $0x14] sm:$0xf] %vm18972_vm5, %v15658_v2 }
  0xd2   : > { %v16392_v60 = vld [vmem:[#allocation2 + $0x28] sm:$0xff]   ;;  %302 = vst.msk [vmem:[#allocation3 + $0x18] sm:$0xf] %vm18972_vm5, %v15658_v2  ;;  %303 = vst.msk [vmem:[#allocation3 + $0x1c] sm:$0xf] %vm18972_vm5, %v15658_v2 }
  0xd3   : > { %v3387_v13 = vrot.slane %v3385_v6, 1  ;;  %v3399_v30 = vrot.slane %v3397_v19, 2  ;;  %v4391_v6 = vrot.slane %v15297_v55, 2  ;;  %v16412_v19 = vld [vmem:[#allocation2 + $0x38] sm:$0xff]   ;;  %v16430_v55 = vld [vmem:[#allocation2 + $0x48] sm:$0xff]  }
  0xd4   : > { %14528 = vmatmul.mubr.msk.bf16.gmra.mxu0 %vm18965_vm4, %v3293_v33  ;;  %v3355_v33 = vor.u32 %v3354_v35, %v3351_v32  ;;  %v15294_v32 = vld [vmem:[#allocation2 + $0x10] sm:$0xfc]   ;;  %v15295_v35 = vld [vmem:[#allocation2 + $0x18] sm:$0xff]   ;;  %304 = vst.msk [vmem:[#allocation3 + $0x20] sm:$0xf] %vm18972_vm5, %v15658_v2 }
  0xd5   : > { %14531 = vmatprep.mubr.msk.bf16.mxu0 %vm18965_vm4, %v3302_v61  ;;  %v15287_v61 = vld [vmem:[#allocation2 + $0x88] sm:$0xff]   ;;  %v3391_v24 = vor.u32 %v3390_v14, %v3387_v13  ;;  %v4388_v45 = vrot.slane %v15294_v32, 2  ;;  %v4389_v44 = vrot.slane %v15295_v35, 2  ;;  %305 = vst.msk [vmem:[#allocation3 + $0x24] sm:$0xf] %vm18972_vm5, %v15658_v2 }
  0xd6   : > { %v3376_v58 = vshrl.u32 %v15287_v61, 16  ;;  %v3365_v36 = vsel %vm18969_vm10, %v3355_v33, %v3364_v0  ;;  %306 = vst.msk [vmem:[#allocation3 + $0x28] sm:$0xf] %vm18972_vm5, %v15658_v2  ;;  %307 = vst.msk [vmem:[#allocation3 + $0x2c] sm:$0xf] %vm18972_vm5, %v15658_v2 }
  0xd7   : > { %v4392_v14 = vsel %vm18968_vm2, %v4389_v44, %v4391_v6  ;;  %308 = vst.msk [vmem:[#allocation3 + $0x30] sm:$0xf] %vm18972_vm5, %v15658_v2  ;;  %309 = vst.msk [vmem:[#allocation3 + $0x34] sm:$0xf] %vm18972_vm5, %v15658_v2 }
  0xd8   : > { %14494 = vmatmul.mubr.msk.bf16.gmra.mxu1 %vm18965_vm4, %v2736_v51  ;;  %v3356_v51 = vsel %vm18969_vm10, %v3346_v43, %v3355_v33  ;;  %v3378_v29 = vrot.slane %v3376_v58, 1  ;;  %v947_v58 = vld [vmem:[#allocation4 + $0x8] sm:$0xff]  ;;  %310 = vst.msk [vmem:[#allocation3 + $0x38] sm:$0xf] %vm18972_vm5, %v15658_v2  ;;  %311 = vst.msk [vmem:[#allocation3 + $0x3c] sm:$0xf] %vm18972_vm5, %v15658_v2 }
  0xd9   : > { %14497 = vmatprep.mubr.msk.bf16.mxu1 %vm18965_vm4, %v2738_v20  ;;  %v3379_v20 = vshll.u32 %v15287_v61, 16  ;;  %312 = vst.msk [vmem:[#allocation3 + $0x40] sm:$0xf] %vm18972_vm5, %v15658_v2  ;;  %313 = vst.msk [vmem:[#allocation3 + $0x44] sm:$0xf] %vm18972_vm5, %v15658_v2 }
  0xda   : > { %314 = vst.msk [vmem:[#allocation3 + $0x48] sm:$0xf] %vm18972_vm5, %v15658_v2  ;;  %315 = vst.msk [vmem:[#allocation3 + $0x4c] sm:$0xf] %vm18972_vm5, %v15658_v2 }
  0xdb   : > { %v3381_v9 = vrot.slane %v3379_v20, 2  ;;  %v5125_v20 = vsel %vm19015_vm9, %v16251_v50, 0  ;;  %316 = vst.msk [vmem:[#allocation3 + $0x50] sm:$0xf] %vm18972_vm5, %v15658_v2  ;;  %317 = vst.msk [vmem:[#allocation3 + $0x54] sm:$0xf] %vm18972_vm5, %v15658_v2 }
  0xdc   : > { %14532 = vmatmul.mubr.msk.bf16.gmra.mxu0 %vm18965_vm4, %v3311_v8  ;;  %v2751_v8 = vrot.slane %v15284_v62, 1  ;;  %318 = vst.msk [vmem:[#allocation3 + $0x58] sm:$0xf] %vm18972_vm5, %v15658_v2  ;;  %319 = vst.msk [vmem:[#allocation3 + $0x5c] sm:$0xf] %vm18972_vm5, %v15658_v2 }
  0xdd   : > { %14535 = vmatprep.mubr.msk.bf16.mxu0 %vm18965_vm4, %v3320_v11  ;;  %v3374_v11 = vsel %vm18969_vm10, %v3364_v0, %v3373_v3  ;;  %v3382_v17 = vor.u32 %v3381_v9, %v3378_v29  ;;  %v4393_v9 = vrot.slane %v16392_v60, 2  ;;  %320 = vst.msk [vmem:[#allocation3 + $0x60] sm:$0xf] %vm18972_vm5, %v15658_v2  ;;  %321 = vst.msk [vmem:[#allocation3 + $0x64] sm:$0xf] %vm18972_vm5, %v15658_v2 }
  0xde   : > { %v2752_v16 = vsel %vm18970_vm11, %v2749_v52, %v2751_v8  ;;  %v2754_v56 = vsel %vm18970_vm11, %v2751_v8, %v2753_v7  ;;  %v966_v8 = vld [vmem:[#allocation4 + $0xa0] sm:$0xff]  ;;  %v969_v7 = vld [vmem:[#allocation4 + $0xb8] sm:$0xff]  ;;  %322 = vst.msk [vmem:[#allocation3 + $0x68] sm:$0xf] %vm18972_vm5, %v15658_v2  ;;  %323 = vst.msk [vmem:[#allocation3 + $0x6c] sm:$0xf] %vm18972_vm5, %v15658_v2 }
  0xdf   : > { %v3383_v27 = vsel %vm18969_vm10, %v3373_v3, %v3382_v17  ;;  %v3392_v31 = vsel %vm18969_vm10, %v3382_v17, %v3391_v24  ;;  %324 = vst.msk [vmem:[#allocation3 + $0x70] sm:$0xf] %vm18972_vm5, %v15658_v2  ;;  %325 = vst.msk [vmem:[#allocation3 + $0x74] sm:$0xf] %vm18972_vm5, %v15658_v2 }
  0xe0   : > { %14498 = vmatmul.mubr.msk.bf16.gmra.mxu1 %vm18965_vm4, %v2740_v15  ;;  %v15292_v15 = vld [vmem:[#allocation2 + $0x10] sm:$0xff]   ;;  %326 = vst.msk [vmem:[#allocation3 + $0x78] sm:$0xf] %vm18972_vm5, %v15658_v2  ;;  %327 = vst.msk [vmem:[#allocation3 + $0x7c] sm:$0xf] %vm18972_vm5, %v15658_v2 }
  0xe1   : > { %14501 = vmatprep.mubr.msk.bf16.mxu1 %vm18965_vm4, %v2742_v18  ;;  %v3394_v18 = vshrl.u32 %v15290_v10, 16  ;;  %v3878_v26 = vrot.slane %v15292_v15, 2  ;;  %v16403_v10 = vld [vmem:[#allocation2 + $0x30] sm:$0xff]   ;;  %328 = vst.msk [vmem:[#allocation3 + $0x80] sm:$0xf] %vm18972_vm5, %v15658_v2 }
  0xe2   : > { %329 = vst.msk [vmem:[#allocation3 + $0x84] sm:$0xf] %vm18972_vm5, %v15658_v2  ;;  %330 = vst.msk [vmem:[#allocation3 + $0x88] sm:$0xf] %vm18972_vm5, %v15658_v2 }
  0xe3   : > { %331 = vst.msk [vmem:[#allocation3 + $0x8c] sm:$0xf] %vm18972_vm5, %v15658_v2  ;;  %332 = vst.msk [vmem:[#allocation3 + $0x90] sm:$0xf] %vm18972_vm5, %v15658_v2 }
  0xe4   : > { %14536 = vmatmul.mubr.msk.bf16.gmra.mxu0 %vm18965_vm4, %v3329_v28  ;;  %v3396_v28 = vrot.slane %v3394_v18, 1  ;;  %v967_v18 = vld [vmem:[#allocation4 + $0xa8] sm:$0xff]  ;;  %333 = vst.msk [vmem:[#allocation3 + $0x94] sm:$0xf] %vm18972_vm5, %v15658_v2  ;;  %334 = vst.msk [vmem:[#allocation3 + $0x98] sm:$0xf] %vm18972_vm5, %v15658_v2 }
  0xe5   : > { %14539 = vmatprep.mubr.msk.bf16.mxu0 %vm18965_vm4, %v3338_v23  ;;  %v3877_v23 = vrot.slane %v15291_v25, 2  ;;  %335 = vst.msk [vmem:[#allocation3 + $0x9c] sm:$0xf] %vm18972_vm5, %v15658_v2  ;;  %336 = vst.msk [vmem:[#allocation3 + $0xa0] sm:$0xf] %vm18972_vm5, %v15658_v2 }
  0xe6   : > { %v3400_v40 = vor.u32 %v3399_v30, %v3396_v28 }
  0xe7   : > { %v3879_v43 = vsel %vm18968_vm2, %v3877_v23, %v3878_v26  ;;  %v15302_v23 = vld [vmem:[#allocation2 + $0x38] sm:$0xff]  }
  0xe8   : > { %14502 = vmatmul.mubr.msk.bf16.gmra.mxu1 %vm18965_vm4, %v2744_v42  ;;  %v15293_v42 = vld [vmem:[#allocation2 + $0x18] sm:$0xff]   ;;  %v3401_v61 = vsel %vm18969_vm10, %v3391_v24, %v3400_v40  ;;  %v3886_v24 = vrot.slane %v16403_v10, 2 }
  0xe9   : > { %14505 = vmatprep.mubr.msk.bf16.mxu1 %vm18965_vm4, %v2746_v4  ;;  %v16384_v4 = vld [vmem:[#allocation2 + $0x20] sm:$0xff]  }
  0xea   : > { %v3882_v59 = vrot.slane %v16384_v4, 2 }
  0xec   : > { %14540 = vmatmul.mubr.msk.bf16.gmra.mxu0 %vm18965_vm4, %v3347_v54  ;;  %v3880_v54 = vrot.slane %v15293_v42, 2  ;;  %v953_v42 = vld [vmem:[#allocation4 + $0x38] sm:$0xff] }
  0xed   : > { %14543 = vmatprep.mubr.msk.bf16.mxu0 %vm18965_vm4, %v3356_v51  ;;  %v4390_v51 = vsel %vm18968_vm2, %v4388_v45, %v4389_v44  ;;  %v951_v44 = vld [vmem:[#allocation4 + $0x28] sm:$0xff] }
  0xee   : > { %v3881_v5 = vsel %vm18968_vm2, %v3878_v26, %v3880_v54 }
  0xf0   : > { %14506 = vmatmul.mubr.msk.bf16.gmra.mxu1 %vm18965_vm4, %v2748_v63  ;;  %v968_v63 = vld [vmem:[#allocation4 + $0xb0] sm:$0xff] }
  0xf1   : > { %14509 = vmatprep.mubr.msk.bf16.mxu1 %vm18965_vm4, %v2750_v1  ;;  %v15298_v1 = vld [vmem:[#allocation2 + $0x28] sm:$0xff]  }
  0xf2   : > { %v3884_v15 = vrot.slane %v15298_v1, 2 }
  0xf4   : > { %14544 = vmatmul.mubr.msk.bf16.gmra.mxu0 %vm18965_vm4, %v3365_v36  ;;  %v3883_v36 = vsel %vm18968_vm2, %v3880_v54, %v3882_v59  ;;  %v3885_v30 = vsel %vm18968_vm2, %v3882_v59, %v3884_v15  ;;  %v3887_v35 = vsel %vm18968_vm2, %v3884_v15, %v3886_v24 }
  0xf5   : > { %14547 = vmatprep.mubr.msk.bf16.mxu0 %vm18965_vm4, %v3374_v11 }
  0xf8   : > { %14510 = vmatmul.mubr.msk.bf16.gmra.mxu1 %vm18965_vm4, %v2752_v16  ;;  %v14369_v33 = vpop.f32.mrf.mxu0  ;;  %v5637_v16 = vsel %vm19016_vm6, %v16283_v41, 0  ;;  %v950_v41 = vld [vmem:[#allocation4 + $0x20] sm:$0xff]  ;;  %vm5933_vm6 = vcmask 519169  }
  0xf9   : > { %14513 = vmatprep.mubr.msk.bf16.mxu1 %vm18965_vm4, %v2754_v56  ;;  %v1347_v49 = vadd.f32 %v14369_v33, %v948_v38  ;;  %v4394_v56 = vsel %vm18968_vm2, %v4391_v6, %v4393_v9  ;;  %v4397_v38 = vrot.slane %v16412_v19, 2  ;;  %v3888_v33 = vrot.slane %v15302_v23, 2  ;;  %v16440_v6 = vld [vmem:[#allocation2 + $0x50] sm:$0xff]   ;;  %v957_v19 = vld [vmem:[#allocation4 + $0x58] sm:$0xff] }
  0xfa   : > { %v1202_v52 = vpop.f32.mrf.mxu0  ;;  %v3894_v15 = vrot.slane %v16440_v6, 2  ;;  %v974_v23 = vld [vmem:[#allocation4 + $0xe0] sm:$0xff] }
  0xfb   : > { %1383 = vst.msk [vmem:[#allocation4 + $0x10] sm:$0xff] %vm18974_vm15, %v1347_v49  ;;  %v1345_v57 = vadd.f32 %v1202_v52, %v946_v46  ;;  %v15305_v46 = vld [vmem:[#allocation2 + $0x40] sm:$0xff]  }
  0xfc   : > { %14548 = vmatmul.mubr.msk.bf16.gmra.mxu0 %vm18965_vm4, %v3383_v27  ;;  %v14370_v62 = vpop.f32.mrf.mxu0  ;;  %v972_v49 = vld [vmem:[#allocation4 + $0xd0] sm:$0xff] }
  0xfd   : > { %14551 = vmatprep.mubr.msk.bf16.mxu0 %vm18965_vm4, %v3392_v31  ;;  %1381 = vst.msk [vmem:[#allocation4] sm:$0xff] %vm18974_vm15, %v1345_v57  ;;  %v1348_v0 = vadd.f32 %v14370_v62, %v949_v53  ;;  %v4395_v31 = vrot.slane %v15301_v21, 2  ;;  %v3889_v62 = vsel %vm18968_vm2, %v3886_v24, %v3888_v33 }
  0xfe   : > { %v1205_v3 = vpop.f32.mrf.mxu0 }
  0xff   : > { %1384 = vst.msk [vmem:[#allocation4 + $0x18] sm:$0xff] %vm18974_vm15, %v1348_v0  ;;  %v1346_v29 = vadd.f32 %v1205_v3, %v947_v58  ;;  %v4396_v4 = vsel %vm18968_vm2, %v4393_v9, %v4395_v31  ;;  %v4398_v53 = vsel %vm18968_vm2, %v4395_v31, %v4397_v38  ;;  %v4399_v58 = vrot.slane %v15305_v46, 2  ;;  %v15309_v9 = vld [vmem:[#allocation2 + $0x50] sm:$0xff]  }
 0x100   : > { %14514 = vmatmul.mubr.msk.bf16.gmra.mxu1 %vm18965_vm4, %v2756_v39  ;;  %v15304_v39 = vld [vmem:[#allocation2 + $0x40] sm:$0xff]   ;;  %v4403_v24 = vrot.slane %v15309_v9, 2  ;;  %v16501_v9 = vld [vmem:[#allocation2 + $0x88] sm:$0xff]  }
 0x101   : > { %14557 = vmatprep.mubr.msk.bf16.mxu1 %vm18965_vm4, %v3879_v43  ;;  %1382 = vst.msk [vmem:[#allocation4 + $0x8] sm:$0xff] %vm18974_vm15, %v1346_v29  ;;  %v4400_v10 = vsel %vm18968_vm2, %v4397_v38, %v4399_v58  ;;  %v16463_v38 = vld [vmem:[#allocation2 + $0x68] sm:$0xff]  }
 0x102   : > { %v14389_v37 = vpop.f32.mrf.mxu1 }
 0x103   : > { %v1367_v11 = vadd.f32 %v14389_v37, %v968_v63  ;;  %v15306_v63 = vld [vmem:[#allocation2 + $0x48] sm:$0xff]  }
 0x104   : > { %14552 = vmatmul.mubr.msk.bf16.gmra.mxu0 %vm18965_vm4, %v3401_v61  ;;  %v1282_v50 = vpop.f32.mrf.mxu1  ;;  %v3890_v61 = vrot.slane %v15304_v39, 2 }
 0x105   : > { %14595 = vmatprep.mubr.msk.bf16.mxu0 %vm18965_vm4, %v4390_v51  ;;  %1403 = vst.msk [vmem:[#allocation4 + $0xb0] sm:$0xff] %vm18974_vm15, %v1367_v11  ;;  %v1365_v13 = vadd.f32 %v1282_v50, %v966_v8  ;;  %v970_v51 = vld [vmem:[#allocation4 + $0xc0] sm:$0xff]  ;;  %v971_v8 = vld [vmem:[#allocation4 + $0xc8] sm:$0xff]  ;;  %v3892_v11 = vrot.slane %v15306_v63, 2 }
 0x106   : > { %v14390_v17 = vpop.f32.mrf.mxu1  ;;  %v3891_v1 = vsel %vm18968_vm2, %v3888_v33, %v3890_v61 }
 0x107   : > { %1401 = vst.msk [vmem:[#allocation4 + $0xa0] sm:$0xff] %vm18974_vm15, %v1365_v13  ;;  %v1368_v25 = vadd.f32 %v14390_v17, %v969_v7  ;;  %v954_v7 = vld [vmem:[#allocation4 + $0x40] sm:$0xff] }
 0x108   : > { %14558 = vmatmul.mubr.msk.bf16.vlgmr.msra.gmra.mxu1 %vm18965_vm4, %v3881_v5  ;;  %v1285_v26 = vpop.f32.mrf.mxu1  ;;  %v4401_v5 = vrot.slane %v16430_v55, 2 }
 0x109   : > { %14632 = vmatpush3.bf16.msra.mxu1 %v5125_v20  ;;  %14561 = vmatprep.mubr.msk.bf16.mxu1 %vm18965_vm4, %v3883_v36  ;;  %1404 = vst.msk [vmem:[#allocation4 + $0xb8] sm:$0xff] %vm18974_vm15, %v1368_v25  ;;  %v1366_v27 = vadd.f32 %v1285_v26, %v967_v18  ;;  %v973_v20 = vld [vmem:[#allocation4 + $0xd8] sm:$0xff]  ;;  %v956_v36 = vld [vmem:[#allocation4 + $0x50] sm:$0xff] }
 0x10a   : > { %v14373_v28 = vpop.f32.mrf.mxu0  ;;  %v4402_v13 = vsel %vm18968_vm2, %v4399_v58, %v4401_v5  ;;  %v976_v25 = vld [vmem:[#allocation4 + $0xf0] sm:$0xff] }
 0x10b   : > { %v1351_v32 = vadd.f32 %v14373_v28, %v952_v22  ;;  %1402 = vst.msk [vmem:[#allocation4 + $0xa8] sm:$0xff] %vm18974_vm15, %v1366_v27  ;;  %v15310_v22 = vld [vmem:[#allocation2 + $0x58] sm:$0xff]   ;;  %v16456_v27 = vld [vmem:[#allocation2 + $0x60] sm:$0xff]   ;;  %v3895_v28 = vsel %vm18968_vm2, %v3892_v11, %v3894_v15 }
 0x10c   : > { %14596 = vmatmul.mubr.msk.bf16.vlgmr.msra.gmra.mxu0 %vm18965_vm4, %v4392_v14  ;;  %v1218_v40 = vpop.f32.mrf.mxu0  ;;  %v3898_v46 = vrot.slane %v16456_v27, 2 }
 0x10d   : > { %14670 = vmatpush3.bf16.msra.mxu0 %v5637_v16  ;;  %14599 = vmatprep.mubr.msk.bf16.mxu0 %vm18965_vm4, %v4394_v56  ;;  %1387 = vst.msk [vmem:[#allocation4 + $0x30] sm:$0xff] %vm18974_vm15, %v1351_v32  ;;  %v1349_v43 = vadd.f32 %v1218_v40, %v950_v41  ;;  %v16449_v16 = vld [vmem:[#allocation2 + $0x58] sm:$0xff]   ;;  %v3893_v56 = vsel %vm18968_vm2, %v3890_v61, %v3892_v11  ;;  %v16466_v40 = vld [vmem:[#allocation2 + $0x68] sm:$0xff]   ;;  %v958_v11 = vld [vmem:[#allocation4 + $0x60] sm:$0xff] }
 0x10e   : > { %v14374_v45 = vpop.f32.mrf.mxu0  ;;  %v4405_v31 = vrot.slane %v16449_v16, 2  ;;  %v4409_v58 = vrot.slane %v16466_v40, 2  ;;  %v15330_v16 = vld [vmem:[#allocation2 + $0x18] sm:$0xff]  }
 0x10f   : > { %1385 = vst.msk [vmem:[#allocation4 + $0x20] sm:$0xff] %vm18974_vm15, %v1349_v43  ;;  %v1352_v52 = vadd.f32 %v14374_v45, %v953_v42  ;;  %v16468_v42 = vld [vmem:[#allocation2 + $0x70] sm:$0xff]   ;;  %v4404_v43 = vsel %vm18968_vm2, %v4401_v5, %v4403_v24  ;;  %v960_v5 = vld [vmem:[#allocation4 + $0x70] sm:$0xff] }
 0x110   : > { %14562 = vmatmul.mubr.msk.bf16.gmra.mxu1 %vm18965_vm4, %v3885_v30  ;;  %v1221_v54 = vpop.f32.mrf.mxu0  ;;  %v955_v30 = vld [vmem:[#allocation4 + $0x48] sm:$0xff]  ;;  %v4406_v61 = vsel %vm18968_vm2, %v4403_v24, %v4405_v31  ;;  %v3902_v63 = vrot.slane %v16468_v42, 2  ;;  %v1419_v42 = vld [vmem:[#allocation4 + $0x10] sm:$0xff] }
 0x111   : > { %14565 = vmatprep.mubr.msk.bf16.mxu1 %vm18965_vm4, %v3887_v35  ;;  %v14393_v57 = vpop.f32.mrf.mxu1  ;;  %1388 = vst.msk [vmem:[#allocation4 + $0x38] sm:$0xff] %vm18974_vm15, %v1352_v52  ;;  %v1350_v59 = vadd.f32 %v1221_v54, %v951_v44  ;;  %v16461_v35 = vld [vmem:[#allocation2 + $0x60] sm:$0xff]   ;;  %v3896_v44 = vrot.slane %v15310_v22, 2  ;;  %v16476_v52 = vld [vmem:[#allocation2 + $0x78] sm:$0xff]  }
 0x112   : > { %v1371_v60 = vadd.f32 %v14393_v57, %v972_v49  ;;  %v16474_v49 = vld [vmem:[#allocation2 + $0x70] sm:$0xff]   ;;  %v16479_v54 = vld [vmem:[#allocation2 + $0x78] sm:$0xff]  }
 0x113   : > { %v1298_v0 = vpop.f32.mrf.mxu1  ;;  %1386 = vst.msk [vmem:[#allocation4 + $0x28] sm:$0xff] %vm18974_vm15, %v1350_v59  ;;  %v975_v57 = vld [vmem:[#allocation4 + $0xe8] sm:$0xff]  ;;  %v3900_v59 = vrot.slane %v16463_v38, 2  ;;  %v3899_v6 = vsel %vm18968_vm2, %v3896_v44, %v3898_v46 }
 0x114   : > { %14600 = vmatmul.mubr.msk.bf16.gmra.mxu0 %vm18965_vm4, %v4396_v4  ;;  %1407 = vst.msk [vmem:[#allocation4 + $0xd0] sm:$0xff] %vm18974_vm15, %v1371_v60  ;;  %v1369_v3 = vadd.f32 %v1298_v0, %v970_v51  ;;  %v977_v4 = vld [vmem:[#allocation4 + $0xf8] sm:$0xff]  ;;  %v4407_v51 = vrot.slane %v16461_v35, 2  ;;  %v16484_v60 = vld [vmem:[#allocation2 + $0x80] sm:$0xff]   ;;  %v16530_v38 = vld [vmem:[#allocation2 + $0x98] sm:$0xff]  }
 0x115   : > { %14603 = vmatprep.mubr.msk.bf16.mxu0 %vm18965_vm4, %v4398_v53  ;;  %v14394_v37 = vpop.f32.mrf.mxu1  ;;  %v16490_v0 = vld [vmem:[#allocation2 + $0x80] sm:$0xff]   ;;  %v16518_v22 = vld [vmem:[#allocation2 + $0x98] ss:$0 sps:$4 sm:$0x33]  }
 0x116   : > { %1405 = vst.msk [vmem:[#allocation4 + $0xc0] sm:$0xff] %vm18974_vm15, %v1369_v3  ;;  %v1372_v29 = vadd.f32 %v14394_v37, %v973_v20  ;;  %v16492_v20 = vld [vmem:[#allocation2 + $0x88] sm:$0xff]  }
 0x117   : > { %v1301_v50 = vpop.f32.mrf.mxu1 }
 0x118   : > { %14566 = vmatmul.mubr.msk.bf16.gmra.mxu1 %vm18965_vm4, %v3889_v62  ;;  %1408 = vst.msk [vmem:[#allocation4 + $0xd8] sm:$0xff] %vm18974_vm15, %v1372_v29  ;;  %v1370_v21 = vadd.f32 %v1301_v50, %v971_v8  ;;  %v4411_v8 = vrot.slane %v16474_v49, 2  ;;  %v3904_v29 = vrot.slane %v16476_v52, 2  ;;  %v3906_v50 = vrot.slane %v16484_v60, 2 }
 0x119   : > { %14569 = vmatprep.mubr.msk.bf16.mxu1 %vm18965_vm4, %v3891_v1  ;;  %v14377_v14 = vpop.f32.mrf.mxu0  ;;  %v3897_v1 = vsel %vm18968_vm2, %v3894_v15, %v3896_v44  ;;  %v16510_v15 = vld [vmem:[#allocation2 + $0x90] sm:$0xff]   ;;  %v4909_v44 = vshrl.u32 %v15330_v16, 16 }
 0x11a   : > { %v1355_v17 = vadd.f32 %v14377_v14, %v956_v36  ;;  %1406 = vst.msk [vmem:[#allocation4 + $0xc8] sm:$0xff] %vm18974_vm15, %v1370_v21  ;;  %v4413_v36 = vrot.slane %v16479_v54, 2  ;;  %v3908_v14 = vrot.slane %v16492_v20, 2 }
 0x11b   : > { %v1234_v18 = vpop.f32.mrf.mxu0 }
 0x11c   : > { %14604 = vmatmul.mubr.msk.bf16.gmra.mxu0 %vm18965_vm4, %v4400_v10  ;;  %1391 = vst.msk [vmem:[#allocation4 + $0x50] sm:$0xff] %vm18974_vm15, %v1355_v17  ;;  %v1353_v26 = vadd.f32 %v1234_v18, %v954_v7  ;;  %v16504_v7 = vld [vmem:[#allocation2 + $0x90] sm:$0xff]   ;;  %v4408_v18 = vsel %vm18968_vm2, %v4405_v31, %v4407_v51  ;;  %v3901_v31 = vsel %vm18968_vm2, %v3898_v46, %v3900_v59 }
 0x11d   : > { %14607 = vmatprep.mubr.msk.bf16.mxu0 %vm18965_vm4, %v4402_v13  ;;  %v14378_v41 = vpop.f32.mrf.mxu0  ;;  %v4415_v13 = vrot.slane %v16490_v0, 2  ;;  %v3910_v35 = vrot.slane %v16504_v7, 2  ;;  %v978_v46 = vld [vmem:[#allocation4 + $0x100] sm:$0xff]  ;;  %v16611_v0 = vld [vmem:[#allocation2 + $0x28] sm:$0xff]  }
 0x11e   : > { %1389 = vst.msk [vmem:[#allocation4 + $0x40] sm:$0xff] %vm18974_vm15, %v1353_v26  ;;  %v1356_v32 = vadd.f32 %v14378_v41, %v957_v19  ;;  %v961_v19 = vld [vmem:[#allocation4 + $0x78] sm:$0xff]  ;;  %v15331_v26 = vld [vmem:[#allocation2 + $0x20] sm:$0xff]   ;;  %v4417_v41 = vrot.slane %v16501_v9, 2 }
 0x11f   : > { %v1237_v39 = vpop.f32.mrf.mxu0 }
 0x120   : > { %14570 = vmatmul.mubr.msk.bf16.gmra.mxu1 %vm18965_vm4, %v3893_v56  ;;  %v14397_v45 = vpop.f32.mrf.mxu1  ;;  %1392 = vst.msk [vmem:[#allocation4 + $0x58] sm:$0xff] %vm18974_vm15, %v1356_v32  ;;  %v1354_v33 = vadd.f32 %v1237_v39, %v955_v30  ;;  %v15329_v56 = vld [vmem:[#allocation2 + $0x10] sm:$0xfc]   ;;  %v16521_v30 = vld [vmem:[#allocation2 + $0xa0] ss:$0 sps:$4 sm:$0x33]   ;;  %v3903_v32 = vsel %vm18968_vm2, %v3900_v59, %v3902_v63 }
 0x121   : > { %14573 = vmatprep.mubr.msk.bf16.mxu1 %vm18965_vm4, %v3895_v28  ;;  %v1375_v53 = vadd.f32 %v14397_v45, %v976_v25  ;;  %v4410_v25 = vsel %vm18968_vm2, %v4407_v51, %v4409_v58  ;;  %v959_v28 = vld [vmem:[#allocation4 + $0x68] sm:$0xff]  ;;  %v4901_v45 = vshrl.u32 %v15329_v56, 16  ;;  %v4921_v59 = vshll.u32 %v15331_v26, 16 }
 0x122   : > { %v1314_v55 = vpop.f32.mrf.mxu1  ;;  %1390 = vst.msk [vmem:[#allocation4 + $0x48] sm:$0xff] %vm18974_vm15, %v1354_v33  ;;  %v980_v33 = vld [vmem:[#allocation4 + $0x110] sm:$0xff] }
 0x123   : > { %1411 = vst.msk [vmem:[#allocation4 + $0xf0] sm:$0xff] %vm18974_vm15, %v1375_v53  ;;  %v1373_v62 = vadd.f32 %v1314_v55, %v974_v23  ;;  %v4904_v55 = vshll.u32 %v15329_v56, 16  ;;  %v962_v56 = vld [vmem:[#allocation4 + $0x80] sm:$0xff] }
 0x124   : > { %14608 = vmatmul.mubr.msk.bf16.gmra.mxu0 %vm18965_vm4, %v4404_v43  ;;  %v14398_v3 = vpop.f32.mrf.mxu1  ;;  %v4419_v43 = vrot.slane %v16510_v15, 2 }
 0x125   : > { %14611 = vmatprep.mubr.msk.bf16.mxu0 %vm18965_vm4, %v4406_v61  ;;  %1409 = vst.msk [vmem:[#allocation4 + $0xe0] sm:$0xff] %vm18974_vm15, %v1373_v62  ;;  %v1376_v37 = vadd.f32 %v14398_v3, %v977_v4  ;;  %v4912_v4 = vshll.u32 %v15330_v16, 16  ;;  %v3912_v61 = vrot.slane %v16518_v22, 2  ;;  %v16536_v62 = vld [vmem:[#allocation2 + $0x18] sm:$0xff]   ;;  %v16548_v16 = vrot.slane %v4901_v45, 2 }
 0x126   : > { %v1317_v10 = vpop.f32.mrf.mxu1  ;;  %v3905_v45 = vsel %vm18968_vm2, %v3902_v63, %v3904_v29 }
 0x127   : > { %1412 = vst.msk [vmem:[#allocation4 + $0xf8] sm:$0xff] %vm18974_vm15, %v1376_v37  ;;  %v1374_v21 = vadd.f32 %v1317_v10, %v975_v57  ;;  %v4918_v57 = vshrl.u32 %v15331_v26, 16  ;;  %v4423_v37 = vrot.slane %v16521_v30, 2 }
 0x128   : > { %14574 = vmatmul.mubr.msk.bf16.gmra.mxu1 %vm18965_vm4, %v3897_v1 }
 0x129   : > { %v14381_v17 = vpop.f32.mrf.mxu0  ;;  %14577 = vmatprep.mubr.msk.bf16.mxu1 %vm18965_vm4, %v3899_v6  ;;  %1410 = vst.msk [vmem:[#allocation4 + $0xe8] sm:$0xff] %vm18974_vm15, %v1374_v21  ;;  %v4421_v6 = vrot.slane %v16530_v38, 2  ;;  %v964_v21 = vld [vmem:[#allocation4 + $0x90] sm:$0xff]  ;;  %v16564_v26 = vrot.slane %v4918_v57, 2 }
 0x12a   : > { %v1359_v24 = vadd.f32 %v14381_v17, %v960_v5  ;;  %v4412_v5 = vsel %vm18968_vm2, %v4409_v58, %v4411_v8  ;;  %v16550_v17 = vrot.slane %v4909_v44, 2  ;;  %v979_v58 = vld [vmem:[#allocation4 + $0x108] sm:$0xff]  ;;  %v16578_v44 = vld [vmem:[#allocation2 + $0x10] sm:$0xf8]  }
 0x12b   : > { %v1250_v27 = vpop.f32.mrf.mxu0 }
 0x12c   : > { %1395 = vst.msk [vmem:[#allocation4 + $0x70] sm:$0xff] %vm18974_vm15, %v1359_v24  ;;  %14612 = vmatmul.mubr.msk.bf16.gmra.mxu0 %vm18965_vm4, %v4408_v18  ;;  %v1357_v23 = vadd.f32 %v1250_v27, %v958_v11  ;;  %v981_v11 = vld [vmem:[#allocation4 + $0x118] sm:$0xff]  ;;  %v16552_v18 = vrot.slane %v4912_v4, 3  ;;  %v4414_v24 = vsel %vm18968_vm2, %v4411_v8, %v4413_v36 }
 0x12d   : > { %v14382_v39 = vpop.f32.mrf.mxu0  ;;  %14615 = vmatprep.mubr.msk.bf16.mxu0 %vm18965_vm4, %v4410_v25  ;;  %v16562_v25 = vrot.slane %v4904_v55, 3 }
 0x12e   : > { %1393 = vst.msk [vmem:[#allocation4 + $0x60] sm:$0xff] %vm18974_vm15, %v1357_v23  ;;  %v1360_v53 = vadd.f32 %v14382_v39, %v961_v19  ;;  %v16554_v19 = vld [vmem:[#allocation2 + $0x28] sm:$0xff]  }
 0x12f   : > { %v1253_v51 = vpop.f32.mrf.mxu0  ;;  %v965_v39 = vld [vmem:[#allocation4 + $0x98] sm:$0xff]  ;;  %v4927_v57 = vshrl.u32 %v16554_v19, 16 }
 0x130   : > { %v14401_v1 = vpop.f32.mrf.mxu1  ;;  %14578 = vmatmul.mubr.msk.bf16.gmra.mxu1 %vm18965_vm4, %v3901_v31  ;;  %1396 = vst.msk [vmem:[#allocation4 + $0x78] sm:$0xff] %vm18974_vm15, %v1360_v53  ;;  %v1358_v3 = vadd.f32 %v1253_v51, %v959_v28  ;;  %v16567_v28 = vrot.slane %v4921_v59, 3  ;;  %v5546_v31 = vrot.slane %v16536_v62, 3  ;;  %v3907_v53 = vsel %vm18968_vm2, %v3904_v29, %v3906_v50 }
 0x131   : > { %v1379_v10 = vadd.f32 %v14401_v1, %v980_v33  ;;  %14581 = vmatprep.mubr.msk.bf16.mxu1 %vm18965_vm4, %v3903_v32  ;;  %v4416_v29 = vsel %vm18968_vm2, %v4413_v36, %v4415_v13 }
 0x132   : > { %v1330_v40 = vpop.f32.mrf.mxu1  ;;  %1394 = vst.msk [vmem:[#allocation4 + $0x68] sm:$0xff] %vm18974_vm15, %v1358_v3  ;;  %v4930_v3 = vshll.u32 %v16554_v19, 16  ;;  %v1420_v19 = vld [vmem:[#allocation4 + $0x18] sm:$0xff] }
 0x133   : > { %1415 = vst.msk [vmem:[#allocation4 + $0x110] sm:$0xff] %vm18974_vm15, %v1379_v10  ;;  %v1377_v27 = vadd.f32 %v1330_v40, %v978_v46  ;;  %v963_v46 = vld [vmem:[#allocation4 + $0x88] sm:$0xff]  ;;  %v1417_v10 = vld [vmem:[#allocation4] sm:$0xff]  ;;  %v4418_v40 = vsel %vm18968_vm2, %v4415_v13, %v4417_v41 }
 0x134   : > { %v14402_v23 = vpop.f32.mrf.mxu1  ;;  %v14385_v32 = vpop.f32.mrf.mxu0  ;;  %14616 = vmatmul.mubr.msk.bf16.gmra.mxu0 %vm18965_vm4, %v4412_v5  ;;  %v15336_v5 = vld [vmem:[#allocation2 + $0x30] sm:$0xff]  }
 0x135   : > { %1413 = vst.msk [vmem:[#allocation4 + $0x100] sm:$0xff] %vm18974_vm15, %v1377_v27  ;;  %v1380_v49 = vadd.f32 %v14402_v23, %v981_v11  ;;  %v1363_v8 = vadd.f32 %v14385_v32, %v964_v21  ;;  %14619 = vmatprep.mubr.msk.bf16.mxu0 %vm18965_vm4, %v4414_v24  ;;  %v16609_v23 = vrot.slane %v4927_v57, 2  ;;  %v3909_v32 = vsel %vm18968_vm2, %v3906_v50, %v3908_v14  ;;  %v1423_v50 = vld [vmem:[#allocation4 + $0x30] sm:$0xff] }
 0x136   : > { %v1333_v4 = vpop.f32.mrf.mxu1  ;;  %v1266_v33 = vpop.f32.mrf.mxu0  ;;  %v4939_v20 = vshll.u32 %v15336_v5, 16  ;;  %v4420_v57 = vsel %vm18968_vm2, %v4417_v41, %v4419_v43  ;;  %v5550_v41 = vrot.slane %v16611_v0, 3 }
 0x137   : > { %1416 = vst.msk [vmem:[#allocation4 + $0x118] sm:$0xff] %vm18974_vm15, %v1380_v49  ;;  %v1378_v55 = vadd.f32 %v1333_v4, %v979_v58  ;;  %1399 = vst.msk [vmem:[#allocation4 + $0x90] sm:$0xff] %vm18974_vm15, %v1363_v8  ;;  %v1361_v63 = vadd.f32 %v1266_v33, %v962_v56  ;;  %v5545_v58 = vrot.slane %v16578_v44, 3  ;;  %v16604_v56 = vld [vmem:[#allocation2 + $0x20] sm:$0xff]   ;;  %v16626_v4 = vrot.slane %v4930_v3, 3 }
 0x138   : > { %v14407_v51 = vpop.f32.mrf.mxu1  ;;  %14582 = vmatmul.mubr.msk.bf16.gmra.mxu1 %vm18965_vm4, %v3905_v45  ;;  %v14386_v59 = vpop.f32.mrf.mxu0  ;;  %v3911_v45 = vsel %vm18968_vm2, %v3908_v14, %v3910_v35  ;;  %v4936_v33 = vshrl.u32 %v15336_v5, 16  ;;  %v4907_v3 = vor.u32 %v16562_v25, %v16548_v16  ;;  %v16649_v5 = vor.u32 %v16552_v18, %v16550_v17  ;;  %v16661_v18 = vld [vmem:[#allocation2 + $0x40] sm:$0xff]  }
 0x139   : > { %1414 = vst.msk [vmem:[#allocation4 + $0x108] sm:$0xff] %vm18974_vm15, %v1378_v55  ;;  %v1970_v1 = vadd.f32 %v14407_v51, %v1419_v42  ;;  %1397 = vst.msk [vmem:[#allocation4 + $0x80] sm:$0xff] %vm18974_vm15, %v1361_v63  ;;  %v1364_v52 = vadd.f32 %v14386_v59, %v965_v39  ;;  %14585 = vmatprep.mubr.msk.bf16.mxu1 %vm18965_vm4, %v3907_v53  ;;  %v1418_v39 = vld [vmem:[#allocation4 + $0x8] sm:$0xff]  ;;  %v1421_v55 = vld [vmem:[#allocation4 + $0x20] sm:$0xff]  ;;  %v5548_v63 = vrot.slane %v16604_v56, 3  ;;  %v16658_v16 = vrot.slane %v4939_v20, 3 }
 0x13a   : > { %v1825_v11 = vpop.f32.mrf.mxu1  ;;  %v1269_v21 = vpop.f32.mrf.mxu0  ;;  %v4422_v51 = vsel %vm18968_vm2, %v4419_v43, %v4421_v6  ;;  %v16651_v9 = vrot.slane %v4936_v33, 2  ;;  %v16695_v30 = vor.u32 %v16626_v4, %v16609_v23  ;;  %v4954_v38 = vshrl.u32 %v16661_v18, 16  ;;  %v16704_v4 = vld [vmem:[#allocation2 + $0x48] sm:$0xff]  }
 0x13b   : > { %2006 = vst.msk [vmem:[#allocation4 + $0x10] sm:$0xff] %vm18974_vm15, %v1970_v1  ;;  %v1968_v54 = vadd.f32 %v1825_v11, %v1417_v10  ;;  %1400 = vst.msk [vmem:[#allocation4 + $0x98] sm:$0xff] %vm18974_vm15, %v1364_v52  ;;  %v1362_v36 = vadd.f32 %v1269_v21, %v963_v46  ;;  %v16628_v46 = vld [vmem:[#allocation2 + $0x38] sm:$0xff]   ;;  %v1424_v52 = vld [vmem:[#allocation4 + $0x38] sm:$0xff]  ;;  %v4957_v23 = vshll.u32 %v16661_v18, 16  ;;  %v4966_v62 = vshll.u32 %v16704_v4, 16 }
 0x13c   : > { %v14408_v24 = vpop.f32.mrf.mxu1  ;;  %v14445_v27 = vpop.f32.mrf.mxu0  ;;  %14620 = vmatmul.mubr.msk.bf16.gmra.mxu0 %vm18965_vm4, %v4416_v29  ;;  %v16654_v10 = vld [vmem:[#allocation2 + $0x30] sm:$0xff]   ;;  %v4945_v17 = vshrl.u32 %v16628_v46, 16 }
 0x13d   : > { %2004 = vst.msk [vmem:[#allocation4] sm:$0xff] %vm18974_vm15, %v1968_v54  ;;  %v1971_v13 = vadd.f32 %v14408_v24, %v1420_v19  ;;  %1398 = vst.msk [vmem:[#allocation4 + $0x88] sm:$0xff] %vm18974_vm15, %v1362_v36  ;;  %14623 = vmatprep.mubr.msk.bf16.mxu0 %vm18965_vm4, %v4418_v40  ;;  %v1422_v40 = vld [vmem:[#allocation4 + $0x28] sm:$0xff]  ;;  %v3913_v19 = vsel %vm18968_vm2, %v3910_v35, %v3912_v61  ;;  %v1425_v35 = vld [vmem:[#allocation4 + $0x40] sm:$0xff]  ;;  %v5552_v33 = vrot.slane %v16654_v10, 3 }
 0x13e   : > { %v1828_v49 = vpop.f32.mrf.mxu1  ;;  %v2337_v8 = vpop.f32.mrf.mxu0 }
 0x13f   : > { %2007 = vst.msk [vmem:[#allocation4 + $0x18] sm:$0xff] %vm18974_vm15, %v1971_v13  ;;  %v1969_v60 = vadd.f32 %v1828_v49, %v1418_v39  ;;  %v1427_v13 = vld [vmem:[#allocation4 + $0x50] sm:$0xff]  ;;  %v4916_v39 = vsel %vm18967_vm8, %v4907_v3, %v16649_v5  ;;  %v4948_v49 = vshll.u32 %v16628_v46, 16  ;;  %v1426_v3 = vld [vmem:[#allocation4 + $0x48] sm:$0xff] }
 0x140   : > { %v14411_v53 = vpop.f32.mrf.mxu1  ;;  %14586 = vmatmul.mubr.msk.bf16.gmra.mxu1 %vm18965_vm4, %v3909_v32  ;;  %v14446_v42 = vpop.f32.mrf.mxu0 }
 0x141   : > { %2005 = vst.msk [vmem:[#allocation4 + $0x8] sm:$0xff] %vm18974_vm15, %v1969_v60  ;;  %v1974_v14 = vadd.f32 %v14411_v53, %v1423_v50  ;;  %14589 = vmatprep.mubr.msk.bf16.mxu1 %vm18965_vm4, %v3911_v45  ;;  %v4424_v50 = vsel %vm18968_vm2, %v4421_v6, %v4423_v37  ;;  %v4924_v53 = vor.u32 %v16567_v28, %v16564_v26  ;;  %v16698_v6 = vld [vmem:[#allocation2 + $0x38] sm:$0xff]  }
 0x142   : > { %v2042_v59 = vld [vmem:[#allocation4 + $0x10] sm:$0xff]  ;;  %v1841_v1 = vpop.f32.mrf.mxu1  ;;  %v2340_v29 = vpop.f32.mrf.mxu0 }
 0x143   : > { %v2482_v15 = vadd.f32 %v14445_v27, %v2042_v59  ;;  %2010 = vst.msk [vmem:[#allocation4 + $0x30] sm:$0xff] %vm18974_vm15, %v1974_v14  ;;  %v1972_v43 = vadd.f32 %v1841_v1, %v1421_v55  ;;  %v5547_v14 = vsel %vm18966_vm14, %v5545_v58, %v5546_v31  ;;  %v4947_v58 = vrot.slane %v4945_v17, 2  ;;  %v16717_v17 = vld [vmem:[#allocation2 + $0x50] sm:$0xff]  }
 0x144   : > { %v2040_v11 = vld [vmem:[#allocation4] sm:$0xff]  ;;  %v14412_v21 = vpop.f32.mrf.mxu1  ;;  %v14449_v54 = vpop.f32.mrf.mxu0  ;;  %14624 = vmatmul.mubr.msk.bf16.gmra.mxu0 %vm18965_vm4, %v4420_v57  ;;  %v1428_v57 = vld [vmem:[#allocation4 + $0x58] sm:$0xff] }
 0x145   : > { %2518 = vst.msk [vmem:[#allocation4 + $0x10] sm:$0xff] %vm18974_vm15, %v2482_v15  ;;  %v2480_v25 = vadd.f32 %v2337_v8, %v2040_v11  ;;  %2008 = vst.msk [vmem:[#allocation4 + $0x20] sm:$0xff] %vm18974_vm15, %v1972_v43  ;;  %v1975_v36 = vadd.f32 %v14412_v21, %v1424_v52  ;;  %14627 = vmatprep.mubr.msk.bf16.mxu0 %vm18965_vm4, %v4422_v51  ;;  %v4925_v52 = vsel %vm18967_vm8, %v16649_v5, %v4924_v53 }
 0x146   : > { %v2043_v24 = vld [vmem:[#allocation4 + $0x18] sm:$0xff]  ;;  %v1844_v27 = vpop.f32.mrf.mxu1  ;;  %v2353_v32 = vpop.f32.mrf.mxu0  ;;  %v4934_v11 = vsel %vm18967_vm8, %v4924_v53, %v16695_v30  ;;  %v4950_v21 = vrot.slane %v4948_v49, 3  ;;  %v5549_v49 = vsel %vm18966_vm14, %v5546_v31, %v5548_v63 }
 0x147   : > { %2516 = vst.msk [vmem:[#allocation4] sm:$0xff] %vm18974_vm15, %v2480_v25  ;;  %v2483_v8 = vadd.f32 %v14446_v42, %v2043_v24  ;;  %2011 = vst.msk [vmem:[#allocation4 + $0x38] sm:$0xff] %vm18974_vm15, %v1975_v36  ;;  %v1973_v22 = vadd.f32 %v1844_v27, %v1422_v40  ;;  %v16713_v40 = vrot.slane %v4954_v38, 2  ;;  %v1431_v36 = vld [vmem:[#allocation4 + $0x70] sm:$0xff]  ;;  %v4959_v27 = vrot.slane %v4957_v23, 3  ;;  %v16756_v23 = vld [vmem:[#allocation2 + $0x48] sm:$0xff]  }
 0x148   : > { %v2041_v7 = vld [vmem:[#allocation4 + $0x8] sm:$0xff]  ;;  %v14415_v45 = vpop.f32.mrf.mxu1  ;;  %14590 = vmatmul.mubr.msk.bf16.gmra.mxu1 %vm18965_vm4, %v3913_v19  ;;  %v14450_v61 = vpop.f32.mrf.mxu0 }
 0x149   : > { %2519 = vst.msk [vmem:[#allocation4 + $0x18] sm:$0xff] %vm18974_vm15, %v2483_v8  ;;  %v2481_v60 = vadd.f32 %v2340_v29, %v2041_v7  ;;  %2009 = vst.msk [vmem:[#allocation4 + $0x28] sm:$0xff] %vm18974_vm15, %v1973_v22  ;;  %v1978_v46 = vadd.f32 %v14415_v45, %v1427_v13  ;;  %14633 = vmatprep.mubr.msk.bf16.mxu1 %vm18965_vm4, %v4916_v39  ;;  %v5554_v13 = vrot.slane %v16698_v6, 3  ;;  %v1429_v7 = vld [vmem:[#allocation4 + $0x60] sm:$0xff] }
 0x14a   : > { %v2046_v55 = vld [vmem:[#allocation4 + $0x30] sm:$0xff]  ;;  %v1857_v42 = vpop.f32.mrf.mxu1  ;;  %v2356_v20 = vpop.f32.mrf.mxu0  ;;  %v4942_v8 = vor.u32 %v16658_v16, %v16651_v9 }
 0x14b   : > { %2517 = vst.msk [vmem:[#allocation4 + $0x8] sm:$0xff] %vm18974_vm15, %v2481_v60  ;;  %v2486_v37 = vadd.f32 %v14449_v54, %v2046_v55  ;;  %2014 = vst.msk [vmem:[#allocation4 + $0x50] sm:$0xff] %vm18974_vm15, %v1978_v46  ;;  %v1976_v26 = vadd.f32 %v1857_v42, %v1425_v35  ;;  %v16715_v54 = vld [vmem:[#allocation2 + $0x40] sm:$0xff]   ;;  %v16738_v60 = vor.u32 %v4950_v21, %v4947_v58  ;;  %v4963_v46 = vshrl.u32 %v16704_v4, 16  ;;  %v16747_v42 = vld [vmem:[#allocation2 + $0x58] sm:$0xff]  }
 0x14c   : > { %v2044_v28 = vld [vmem:[#allocation4 + $0x20] sm:$0xff]  ;;  %v14416_v51 = vpop.f32.mrf.mxu1  ;;  %v14453_v44 = vpop.f32.mrf.mxu0  ;;  %14628 = vmatmul.mubr.msk.bf16.gmra.mxu0 %vm18965_vm4, %v4424_v50  ;;  %v1432_v50 = vld [vmem:[#allocation4 + $0x78] sm:$0xff]  ;;  %v5556_v56 = vrot.slane %v16715_v54, 3  ;;  %v4943_v38 = vsel %vm18967_vm8, %v16695_v30, %v4942_v8  ;;  %v4968_v58 = vrot.slane %v4966_v62, 3  ;;  %v5553_v21 = vsel %vm18966_vm14, %v5550_v41, %v5552_v33  ;;  %v1434_v62 = vld [vmem:[#allocation4 + $0x88] sm:$0xff] }
 0x14d   : > { %2522 = vst.msk [vmem:[#allocation4 + $0x30] sm:$0xff] %vm18974_vm15, %v2486_v37  ;;  %v2484_v59 = vadd.f32 %v2353_v32, %v2044_v28  ;;  %2012 = vst.msk [vmem:[#allocation4 + $0x40] sm:$0xff] %vm18974_vm15, %v1976_v26  ;;  %v1979_v1 = vadd.f32 %v14416_v51, %v1428_v57  ;;  %14671 = vmatprep.mubr.msk.bf16.mxu0 %vm18965_vm4, %v5547_v14  ;;  %v1430_v26 = vld [vmem:[#allocation4 + $0x68] sm:$0xff]  ;;  %v4952_v51 = vsel %vm18967_vm8, %v4942_v8, %v16738_v60 }
 0x14e   : > { %v2047_v29 = vld [vmem:[#allocation4 + $0x38] sm:$0xff]  ;;  %v1860_v15 = vpop.f32.mrf.mxu1  ;;  %v2369_v43 = vpop.f32.mrf.mxu0  ;;  %v4984_v0 = vshll.u32 %v16747_v42, 16 }
 0x14f   : > { %2520 = vst.msk [vmem:[#allocation4 + $0x20] sm:$0xff] %vm18974_vm15, %v2484_v59  ;;  %v2487_v18 = vadd.f32 %v14450_v61, %v2047_v29  ;;  %2015 = vst.msk [vmem:[#allocation4 + $0x58] sm:$0xff] %vm18974_vm15, %v1979_v1  ;;  %v1977_v5 = vadd.f32 %v1860_v15, %v1426_v3  ;;  %v5551_v61 = vsel %vm18966_vm14, %v5548_v63, %v5550_v41  ;;  %v4972_v63 = vshrl.u32 %v16717_v17, 16  ;;  %v1435_v1 = vld [vmem:[#allocation4 + $0x90] sm:$0xff] }
 0x150   : > { %v2045_v25 = vld [vmem:[#allocation4 + $0x28] sm:$0xff]  ;;  %v14419_v19 = vpop.f32.mrf.mxu1  ;;  %14634 = vmatmul.mubr.msk.bf16.vlgmr.msra.gmra.mxu1 %vm18965_vm4, %v4925_v52  ;;  %v14454_v24 = vpop.f32.mrf.mxu0  ;;  %v4975_v15 = vshll.u32 %v16717_v17, 16 }
 0x151   : > { %2523 = vst.msk [vmem:[#allocation4 + $0x38] sm:$0xff] %vm18974_vm15, %v2487_v18  ;;  %v2485_v32 = vadd.f32 %v2356_v20, %v2045_v25  ;;  %2013 = vst.msk [vmem:[#allocation4 + $0x48] sm:$0xff] %vm18974_vm15, %v1977_v5  ;;  %v1982_v39 = vadd.f32 %v14419_v19, %v1431_v36  ;;  %14637 = vmatprep.mubr.msk.bf16.mxu1 %vm18965_vm4, %v4934_v11  ;;  %v4974_v3 = vrot.slane %v4972_v63, 2  ;;  %v1433_v25 = vld [vmem:[#allocation4 + $0x80] sm:$0xff] }
 0x152   : > { %v2050_v22 = vld [vmem:[#allocation4 + $0x50] sm:$0xff]  ;;  %v1873_v45 = vpop.f32.mrf.mxu1  ;;  %v2372_v35 = vpop.f32.mrf.mxu0  ;;  %v4960_v18 = vor.u32 %v4959_v27, %v16713_v40  ;;  %v5555_v19 = vsel %vm18966_vm14, %v5552_v33, %v5554_v13  ;;  %v4977_v33 = vrot.slane %v4975_v15, 3 }
 0x153   : > { %2521 = vst.msk [vmem:[#allocation4 + $0x28] sm:$0xff] %vm18974_vm15, %v2485_v32  ;;  %v2490_v31 = vadd.f32 %v14453_v44, %v2050_v22  ;;  %2018 = vst.msk [vmem:[#allocation4 + $0x70] sm:$0xff] %vm18974_vm15, %v1982_v39  ;;  %v1980_v9 = vadd.f32 %v1873_v45, %v1429_v7  ;;  %v4965_v44 = vrot.slane %v4963_v46, 2  ;;  %v4981_v32 = vshrl.u32 %v16747_v42, 16  ;;  %v16780_v39 = vld [vmem:[#allocation2 + $0x60] sm:$0xff]   ;;  %v16786_v7 = vld [vmem:[#allocation2 + $0x68] sm:$0xff]  }
 0x154   : > { %v2048_v16 = vld [vmem:[#allocation4 + $0x40] sm:$0xff]  ;;  %v14420_v53 = vpop.f32.mrf.mxu1  ;;  %v14457_v55 = vpop.f32.mrf.mxu0  ;;  %14672 = vmatmul.mubr.msk.bf16.vlgmr.msra.gmra.mxu0 %vm18965_vm4, %v5549_v49  ;;  %v1436_v49 = vld [vmem:[#allocation4 + $0x98] sm:$0xff]  ;;  %v5558_v22 = vrot.slane %v16756_v23, 3  ;;  %v5002_v15 = vshll.u32 %v16786_v7, 16 }
 0x155   : > { %2526 = vst.msk [vmem:[#allocation4 + $0x50] sm:$0xff] %vm18974_vm15, %v2490_v31  ;;  %v2488_v20 = vadd.f32 %v2369_v43, %v2048_v16  ;;  %2016 = vst.msk [vmem:[#allocation4 + $0x60] sm:$0xff] %vm18974_vm15, %v1980_v9  ;;  %v1983_v14 = vadd.f32 %v14420_v53, %v1432_v50  ;;  %14675 = vmatprep.mubr.msk.bf16.mxu0 %vm18965_vm4, %v5551_v61  ;;  %v4961_v61 = vsel %vm18967_vm8, %v16738_v60, %v4960_v18  ;;  %v1439_v9 = vld [vmem:[#allocation4 + $0xb0] sm:$0xff] }
 0x156   : > { %v2051_v37 = vld [vmem:[#allocation4 + $0x58] sm:$0xff]  ;;  %v1876_v28 = vpop.f32.mrf.mxu1  ;;  %v2385_v57 = vpop.f32.mrf.mxu0  ;;  %v4983_v53 = vrot.slane %v4981_v32, 2 }
 0x157   : > { %2524 = vst.msk [vmem:[#allocation4 + $0x40] sm:$0xff] %vm18974_vm15, %v2488_v20  ;;  %v2491_v4 = vadd.f32 %v14454_v24, %v2051_v37  ;;  %2019 = vst.msk [vmem:[#allocation4 + $0x78] sm:$0xff] %vm18974_vm15, %v1983_v14  ;;  %v1981_v59 = vadd.f32 %v1876_v28, %v1430_v26  ;;  %v16776_v24 = vor.u32 %v4968_v58, %v4965_v44  ;;  %v1437_v14 = vld [vmem:[#allocation4 + $0xa0] sm:$0xff]  ;;  %v4990_v28 = vshrl.u32 %v16780_v39, 16 }
 0x158   : > { %v2049_v30 = vld [vmem:[#allocation4 + $0x48] sm:$0xff]  ;;  %v14423_v52 = vpop.f32.mrf.mxu1  ;;  %14638 = vmatmul.mubr.msk.bf16.gmra.mxu1 %vm18965_vm4, %v4943_v38  ;;  %v14458_v29 = vpop.f32.mrf.mxu0  ;;  %v4978_v37 = vor.u32 %v4977_v33, %v4974_v3  ;;  %v16798_v26 = vld [vmem:[#allocation2 + $0x50] sm:$0xff]   ;;  %v5557_v58 = vsel %vm18966_vm14, %v5554_v13, %v5556_v56  ;;  %v4999_v3 = vshrl.u32 %v16786_v7, 16 }
 0x159   : > { %2527 = vst.msk [vmem:[#allocation4 + $0x58] sm:$0xff] %vm18974_vm15, %v2491_v4  ;;  %v2489_v43 = vadd.f32 %v2372_v35, %v2049_v30  ;;  %2017 = vst.msk [vmem:[#allocation4 + $0x68] sm:$0xff] %vm18974_vm15, %v1981_v59  ;;  %v1986_v11 = vadd.f32 %v14423_v52, %v1435_v1  ;;  %14641 = vmatprep.mubr.msk.bf16.mxu1 %vm18965_vm4, %v4952_v51  ;;  %v4970_v50 = vsel %vm18967_vm8, %v4960_v18, %v16776_v24 }
 0x15a   : > { %v2054_v5 = vld [vmem:[#allocation4 + $0x70] sm:$0xff]  ;;  %v1889_v36 = vpop.f32.mrf.mxu1  ;;  %v2388_v17 = vpop.f32.mrf.mxu0  ;;  %v5559_v1 = vsel %vm18966_vm14, %v5556_v56, %v5558_v22  ;;  %v4979_v56 = vsel %vm18967_vm8, %v16776_v24, %v4978_v37  ;;  %v5560_v18 = vrot.slane %v16798_v26, 3 }
 0x15b   : > { %2525 = vst.msk [vmem:[#allocation4 + $0x48] sm:$0xff] %vm18974_vm15, %v2489_v43  ;;  %v2494_v41 = vadd.f32 %v14457_v55, %v2054_v5  ;;  %2022 = vst.msk [vmem:[#allocation4 + $0x90] sm:$0xff] %vm18974_vm15, %v1986_v11  ;;  %v1984_v40 = vadd.f32 %v1889_v36, %v1433_v25  ;;  %v4986_v55 = vrot.slane %v4984_v0, 3  ;;  %v1440_v11 = vld [vmem:[#allocation4 + $0xb8] sm:$0xff]  ;;  %v15352_v5 = vld [vmem:[#allocation2 + $0x70] sm:$0xff]  }
 0x15c   : > { %v2052_v27 = vld [vmem:[#allocation4 + $0x60] sm:$0xff]  ;;  %v14424_v8 = vpop.f32.mrf.mxu1  ;;  %v14461_v10 = vpop.f32.mrf.mxu0  ;;  %14676 = vmatmul.mubr.msk.bf16.gmra.mxu0 %vm18965_vm4, %v5553_v21  ;;  %v1438_v0 = vld [vmem:[#allocation4 + $0xa8] sm:$0xff] }
 0x15d   : > { %2530 = vst.msk [vmem:[#allocation4 + $0x70] sm:$0xff] %vm18974_vm15, %v2494_v41  ;;  %v2492_v45 = vadd.f32 %v2385_v57, %v2052_v27  ;;  %2020 = vst.msk [vmem:[#allocation4 + $0x80] sm:$0xff] %vm18974_vm15, %v1984_v40  ;;  %v1987_v35 = vadd.f32 %v14424_v8, %v1436_v49  ;;  %14679 = vmatprep.mubr.msk.bf16.mxu0 %vm18965_vm4, %v5555_v19  ;;  %v4993_v57 = vshll.u32 %v16780_v39, 16  ;;  %v5001_v27 = vrot.slane %v4999_v3, 2  ;;  %v15354_v8 = vld [vmem:[#allocation2 + $0x78] sm:$0xff]  }
 0x15e   : > { %v2055_v46 = vld [vmem:[#allocation4 + $0x78] sm:$0xff]  ;;  %v1892_v31 = vpop.f32.mrf.mxu1  ;;  %v2401_v16 = vpop.f32.mrf.mxu0  ;;  %v16815_v52 = vor.u32 %v4986_v55, %v4983_v53  ;;  %v5004_v49 = vrot.slane %v5002_v15, 3  ;;  %v5020_v26 = vshll.u32 %v15354_v8, 16  ;;  %v15356_v15 = vld [vmem:[#allocation2 + $0x80] sm:$0xff]  }
 0x15f   : > { %2528 = vst.msk [vmem:[#allocation4 + $0x60] sm:$0xff] %vm18974_vm15, %v2492_v45  ;;  %v2495_v63 = vadd.f32 %v14458_v29, %v2055_v46  ;;  %2023 = vst.msk [vmem:[#allocation4 + $0x98] sm:$0xff] %vm18974_vm15, %v1987_v35  ;;  %v1985_v42 = vadd.f32 %v1892_v31, %v1434_v62  ;;  %v16817_v29 = vld [vmem:[#allocation2 + $0x58] sm:$0xff]   ;;  %v4995_v19 = vrot.slane %v4993_v57, 3  ;;  %v1443_v45 = vld [vmem:[#allocation4 + $0xd0] sm:$0xff]  ;;  %v5008_v62 = vshrl.u32 %v15352_v5, 16 }
 0x160   : > { %v2053_v20 = vld [vmem:[#allocation4 + $0x68] sm:$0xff]  ;;  %v14427_v60 = vpop.f32.mrf.mxu1  ;;  %14642 = vmatmul.mubr.msk.bf16.gmra.mxu1 %vm18965_vm4, %v4961_v61  ;;  %v14462_v38 = vpop.f32.mrf.mxu0  ;;  %v4988_v24 = vsel %vm18967_vm8, %v4978_v37, %v16815_v52  ;;  %v5562_v40 = vrot.slane %v16817_v29, 3  ;;  %v16836_v46 = vld [vmem:[#allocation2 + $0x60] sm:$0xff]   ;;  %v5011_v31 = vshll.u32 %v15352_v5, 16  ;;  %v5017_v37 = vshrl.u32 %v15354_v8, 16  ;;  %v1444_v57 = vld [vmem:[#allocation4 + $0xd8] sm:$0xff] }
 0x161   : > { %2531 = vst.msk [vmem:[#allocation4 + $0x78] sm:$0xff] %vm18974_vm15, %v2495_v63  ;;  %v2493_v51 = vadd.f32 %v2388_v17, %v2053_v20  ;;  %2021 = vst.msk [vmem:[#allocation4 + $0x88] sm:$0xff] %vm18974_vm15, %v1985_v42  ;;  %v1990_v44 = vadd.f32 %v14427_v60, %v1439_v9  ;;  %14645 = vmatprep.mubr.msk.bf16.mxu1 %vm18965_vm4, %v4970_v50  ;;  %v4992_v17 = vrot.slane %v4990_v28, 2  ;;  %v1441_v63 = vld [vmem:[#allocation4 + $0xc0] sm:$0xff]  ;;  %v15358_v5 = vld [vmem:[#allocation2 + $0x88] sm:$0xff]   ;;  %v5029_v8 = vshll.u32 %v15356_v15, 16 }
 0x162   : > { %v2058_v4 = vld [vmem:[#allocation4 + $0x90] sm:$0xff]  ;;  %v1905_v59 = vpop.f32.mrf.mxu1  ;;  %v2404_v30 = vpop.f32.mrf.mxu0  ;;  %v5561_v50 = vsel %vm18966_vm14, %v5558_v22, %v5560_v18  ;;  %v5563_v60 = vsel %vm18966_vm14, %v5560_v18, %v5562_v40  ;;  %v5022_v18 = vrot.slane %v5020_v26, 3 }
 0x163   : > { %2529 = vst.msk [vmem:[#allocation4 + $0x68] sm:$0xff] %vm18974_vm15, %v2493_v51  ;;  %v2498_v6 = vadd.f32 %v14461_v10, %v2058_v4  ;;  %2026 = vst.msk [vmem:[#allocation4 + $0xb0] sm:$0xff] %vm18974_vm15, %v1990_v44  ;;  %v1988_v13 = vadd.f32 %v1905_v59, %v1437_v14  ;;  %v4996_v53 = vor.u32 %v4995_v19, %v4992_v17  ;;  %v5010_v4 = vrot.slane %v5008_v62, 2  ;;  %v1447_v17 = vld [vmem:[#allocation4 + $0xf0] sm:$0xff] }
 0x164   : > { %v2056_v43 = vld [vmem:[#allocation4 + $0x80] sm:$0xff]  ;;  %v14428_v21 = vpop.f32.mrf.mxu1  ;;  %v14465_v54 = vpop.f32.mrf.mxu0  ;;  %14680 = vmatmul.mubr.msk.bf16.gmra.mxu0 %vm18965_vm4, %v5557_v58  ;;  %v16847_v14 = vor.u32 %v5004_v49, %v5001_v27  ;;  %v5564_v58 = vrot.slane %v16836_v46, 3  ;;  %v5013_v59 = vrot.slane %v5011_v31, 3  ;;  %v5026_v49 = vshrl.u32 %v15356_v15, 16 }
 0x165   : > { %2534 = vst.msk [vmem:[#allocation4 + $0x90] sm:$0xff] %vm18974_vm15, %v2498_v6  ;;  %v2496_v25 = vadd.f32 %v2401_v16, %v2056_v43  ;;  %2024 = vst.msk [vmem:[#allocation4 + $0xa0] sm:$0xff] %vm18974_vm15, %v1988_v13  ;;  %v1991_v36 = vadd.f32 %v14428_v21, %v1440_v11  ;;  %14683 = vmatprep.mubr.msk.bf16.mxu0 %vm18965_vm4, %v5559_v1  ;;  %v4997_v3 = vsel %vm18967_vm8, %v16815_v52, %v4996_v53  ;;  %v1442_v13 = vld [vmem:[#allocation4 + $0xc8] sm:$0xff] }
 0x166   : > { %v2059_v32 = vld [vmem:[#allocation4 + $0x98] sm:$0xff]  ;;  %v1908_v39 = vpop.f32.mrf.mxu1  ;;  %v2417_v41 = vpop.f32.mrf.mxu0  ;;  %v5006_v21 = vsel %vm18967_vm8, %v4996_v53, %v16847_v14  ;;  %v5038_v46 = vshll.u32 %v15358_v5, 16  ;;  %v5031_v26 = vrot.slane %v5029_v8, 3 }
 0x167   : > { %2532 = vst.msk [vmem:[#allocation4 + $0x80] sm:$0xff] %vm18974_vm15, %v2496_v25  ;;  %v2499_v10 = vadd.f32 %v14462_v38, %v2059_v32  ;;  %2027 = vst.msk [vmem:[#allocation4 + $0xb8] sm:$0xff] %vm18974_vm15, %v1991_v36  ;;  %v1989_v33 = vadd.f32 %v1908_v39, %v1438_v0  ;;  %v16849_v38 = vld [vmem:[#allocation2 + $0x68] sm:$0xff]   ;;  %v5565_v0 = vsel %vm18966_vm14, %v5562_v40, %v5564_v58 }
 0x168   : > { %v2057_v7 = vld [vmem:[#allocation4 + $0x88] sm:$0xff]  ;;  %v14431_v35 = vpop.f32.mrf.mxu1  ;;  %14646 = vmatmul.mubr.msk.bf16.gmra.mxu1 %vm18965_vm4, %v4979_v56  ;;  %v14466_v61 = vpop.f32.mrf.mxu0  ;;  %v5019_v56 = vrot.slane %v5017_v37, 2  ;;  %v5014_v39 = vor.u32 %v5013_v59, %v5010_v4  ;;  %v5028_v37 = vrot.slane %v5026_v49, 2 }
 0x169   : > { %2535 = vst.msk [vmem:[#allocation4 + $0x98] sm:$0xff] %vm18974_vm15, %v2499_v10  ;;  %v2497_v9 = vadd.f32 %v2404_v30, %v2057_v7  ;;  %2025 = vst.msk [vmem:[#allocation4 + $0xa8] sm:$0xff] %vm18974_vm15, %v1989_v33  ;;  %v1994_v16 = vadd.f32 %v14431_v35, %v1443_v45  ;;  %14649 = vmatprep.mubr.msk.bf16.mxu1 %vm18965_vm4, %v4988_v24  ;;  %v1445_v33 = vld [vmem:[#allocation4 + $0xe0] sm:$0xff]  ;;  %v16879_v35 = vld [vmem:[#allocation2 + $0x78] sm:$0xff]  }
 0x16a   : > { %v2062_v55 = vld [vmem:[#allocation4 + $0xb0] sm:$0xff]  ;;  %v1921_v42 = vpop.f32.mrf.mxu1  ;;  %v2420_v20 = vpop.f32.mrf.mxu0  ;;  %v16877_v40 = vor.u32 %v5022_v18, %v5019_v56  ;;  %v15362_v4 = vld [vmem:[#allocation2 + $0x98] sm:$0xff]  }
 0x16b   : > { %2533 = vst.msk [vmem:[#allocation4 + $0x88] sm:$0xff] %vm18974_vm15, %v2497_v9  ;;  %v2502_v23 = vadd.f32 %v14465_v54, %v2062_v55  ;;  %2030 = vst.msk [vmem:[#allocation4 + $0xd0] sm:$0xff] %vm18974_vm15, %v1994_v16  ;;  %v1992_v22 = vadd.f32 %v1921_v42, %v1441_v63  ;;  %v5566_v54 = vrot.slane %v16849_v38, 3  ;;  %v1448_v16 = vld [vmem:[#allocation4 + $0xf8] sm:$0xff]  ;;  %v5015_v55 = vsel %vm18967_vm8, %v16847_v14, %v5014_v39  ;;  %v15360_v42 = vld [vmem:[#allocation2 + $0x90] sm:$0xff]  }
 0x16c   : > { %v2060_v28 = vld [vmem:[#allocation4 + $0xa0] sm:$0xff]  ;;  %v14432_v51 = vpop.f32.mrf.mxu1  ;;  %v14469_v44 = vpop.f32.mrf.mxu0  ;;  %14684 = vmatmul.mubr.msk.bf16.gmra.mxu0 %vm18965_vm4, %v5561_v50  ;;  %v5024_v14 = vsel %vm18967_vm8, %v5014_v39, %v16877_v40  ;;  %v5053_v39 = vshrl.u32 %v15362_v4, 16 }
 0x16d   : > { %2538 = vst.msk [vmem:[#allocation4 + $0xb0] sm:$0xff] %vm18974_vm15, %v2502_v23  ;;  %v2500_v30 = vadd.f32 %v2417_v41, %v2060_v28  ;;  %2028 = vst.msk [vmem:[#allocation4 + $0xc0] sm:$0xff] %vm18974_vm15, %v1992_v22  ;;  %v1995_v1 = vadd.f32 %v14432_v51, %v1444_v57  ;;  %14687 = vmatprep.mubr.msk.bf16.mxu0 %vm18965_vm4, %v5563_v60  ;;  %v16869_v41 = vld [vmem:[#allocation2 + $0x70] sm:$0xff]   ;;  %v5567_v29 = vsel %vm18966_vm14, %v5564_v58, %v5566_v54  ;;  %v1446_v22 = vld [vmem:[#allocation4 + $0xe8] sm:$0xff] }
 0x16e   : > { %v2063_v6 = vld [vmem:[#allocation4 + $0xb8] sm:$0xff]  ;;  %v1924_v43 = vpop.f32.mrf.mxu1  ;;  %v2433_v11 = vpop.f32.mrf.mxu0  ;;  %v5568_v63 = vrot.slane %v16869_v41, 3  ;;  %v5570_v51 = vrot.slane %v16879_v35, 3  ;;  %v5040_v58 = vrot.slane %v5038_v46, 3  ;;  %v5056_v41 = vshll.u32 %v15362_v4, 16  ;;  %v15367_v4 = vld [vmem:[%s18952_s3 + $0x18] sm:$0xff]  }
 0x16f   : > { %2536 = vst.msk [vmem:[#allocation4 + $0xa0] sm:$0xff] %vm18974_vm15, %v2500_v30  ;;  %v2503_v25 = vadd.f32 %v14466_v61, %v2063_v6  ;;  %2031 = vst.msk [vmem:[#allocation4 + $0xd8] sm:$0xff] %vm18974_vm15, %v1995_v1  ;;  %v1993_v52 = vadd.f32 %v1924_v43, %v1442_v13  ;;  %v5035_v61 = vshrl.u32 %v15358_v5, 16  ;;  %v16896_v13 = vld [vmem:[#allocation2 + $0x80] sm:$0xff]   ;;  %v5044_v43 = vshrl.u32 %v15360_v42, 16  ;;  %14707 = vmatprep.subr.bf16.mxu1 %v15367_v4 }
 0x170   : > { %v2061_v36 = vld [vmem:[#allocation4 + $0xa8] sm:$0xff]  ;;  %v14435_v19 = vpop.f32.mrf.mxu1  ;;  %14650 = vmatmul.mubr.msk.bf16.gmra.mxu1 %vm18965_vm4, %v4997_v3  ;;  %v14470_v32 = vpop.f32.mrf.mxu0  ;;  %v1451_v3 = vld [vmem:[#allocation4 + $0x110] sm:$0xff]  ;;  %v5569_v18 = vsel %vm18966_vm14, %v5566_v54, %v5568_v63  ;;  %v5032_v5 = vor.u32 %v5031_v26, %v5028_v37 }
 0x171   : > { %2539 = vst.msk [vmem:[#allocation4 + $0xb8] sm:$0xff] %vm18974_vm15, %v2503_v25  ;;  %v2501_v24 = vadd.f32 %v2420_v20, %v2061_v36  ;;  %2029 = vst.msk [vmem:[#allocation4 + $0xc8] sm:$0xff] %vm18974_vm15, %v1993_v52  ;;  %v1998_v27 = vadd.f32 %v14435_v19, %v1447_v17  ;;  %14653 = vmatprep.mubr.msk.bf16.mxu1 %vm18965_vm4, %v5006_v21  ;;  %v1449_v52 = vld [vmem:[#allocation4 + $0x100] sm:$0xff]  ;;  %v5571_v19 = vsel %vm18966_vm14, %v5568_v63, %v5570_v51  ;;  %v15364_v46 = vld [vmem:[#allocation2 + $0xa0] ss:$0 sps:$4 sm:$0x77]  }
 0x172   : > { %v2066_v10 = vld [vmem:[#allocation4 + $0xd0] sm:$0xff]  ;;  %v1937_v7 = vpop.f32.mrf.mxu1  ;;  %v2436_v45 = vpop.f32.mrf.mxu0  ;;  %v5058_v63 = vrot.slane %v5056_v41, 3  ;;  %14708 = vmatpush3.bf16.msra.mxu1 %v15367_v4 }
 0x173   : > { %2537 = vst.msk [vmem:[#allocation4 + $0xa8] sm:$0xff] %vm18974_vm15, %v2501_v24  ;;  %v2506_v62 = vadd.f32 %v14469_v44, %v2066_v10  ;;  %2034 = vst.msk [vmem:[#allocation4 + $0xf0] sm:$0xff] %vm18974_vm15, %v1998_v27  ;;  %v1996_v31 = vadd.f32 %v1937_v7, %v1445_v33  ;;  %v5037_v44 = vrot.slane %v5035_v61, 2  ;;  %v1452_v27 = vld [vmem:[#allocation4 + $0x118] sm:$0xff]  ;;  %v5572_v10 = vrot.slane %v16896_v13, 3 }
 0x174   : > { %v2064_v9 = vld [vmem:[#allocation4 + $0xc0] sm:$0xff]  ;;  %v14436_v50 = vpop.f32.mrf.mxu1  ;;  %v14473_v53 = vpop.f32.mrf.mxu0  ;;  %14688 = vmatmul.mubr.msk.bf16.gmra.mxu0 %vm18965_vm4, %v5565_v0  ;;  %v16909_v0 = vld [vmem:[#allocation2 + $0x88] sm:$0xff]   ;;  %v5046_v33 = vrot.slane %v5044_v43, 2  ;;  %v5033_v61 = vsel %vm18967_vm8, %v16877_v40, %v5032_v5 }
 0x175   : > { %2542 = vst.msk [vmem:[#allocation4 + $0xd0] sm:$0xff] %vm18974_vm15, %v2506_v62  ;;  %v2504_v20 = vadd.f32 %v2433_v11, %v2064_v9  ;;  %2032 = vst.msk [vmem:[#allocation4 + $0xe0] sm:$0xff] %vm18974_vm15, %v1996_v31  ;;  %v1999_v60 = vadd.f32 %v14436_v50, %v1448_v16  ;;  %14691 = vmatprep.mubr.msk.bf16.mxu0 %vm18965_vm4, %v5567_v29  ;;  %v5047_v11 = vshll.u32 %v15360_v42, 16  ;;  %v1450_v31 = vld [vmem:[#allocation4 + $0x108] sm:$0xff] }
 0x176   : > { %v2067_v23 = vld [vmem:[#allocation4 + $0xd8] sm:$0xff]  ;;  %v1940_v28 = vpop.f32.mrf.mxu1  ;;  %v2449_v57 = vpop.f32.mrf.mxu0 }
 0x177   : > { %2540 = vst.msk [vmem:[#allocation4 + $0xc0] sm:$0xff] %vm18974_vm15, %v2504_v20  ;;  %v2507_v59 = vadd.f32 %v14470_v32, %v2067_v23  ;;  %2035 = vst.msk [vmem:[#allocation4 + $0xf8] sm:$0xff] %vm18974_vm15, %v1999_v60  ;;  %v1997_v30 = vadd.f32 %v1940_v28, %v1446_v22  ;;  %v16907_v32 = vor.u32 %v5040_v58, %v5037_v44  ;;  %v5049_v7 = vrot.slane %v5047_v11, 3  ;;  %v2554_v60 = vld [vmem:[#allocation4 + $0x10] sm:$0xff]  ;;  %v16929_v28 = vld [vmem:[#allocation2 + $0x90] sm:$0xff]  }
 0x178   : > { %v2065_v1 = vld [vmem:[#allocation4 + $0xc8] sm:$0xff]  ;;  %v14439_v15 = vpop.f32.mrf.mxu1  ;;  %14654 = vmatmul.mubr.msk.bf16.gmra.mxu1 %vm18965_vm4, %v5015_v55  ;;  %v14474_v6 = vpop.f32.mrf.mxu0  ;;  %v5055_v55 = vrot.slane %v5053_v39, 2  ;;  %v5573_v23 = vsel %vm18966_vm14, %v5570_v51, %v5572_v10  ;;  %v5062_v44 = vshrl.u32 %v15364_v46, 16  ;;  %v5065_v58 = vshll.u32 %v15364_v46, 16  ;;  %v2555_v11 = vld [vmem:[#allocation4 + $0x18] sm:$0xff] }
 0x179   : > { %2543 = vst.msk [vmem:[#allocation4 + $0xd8] sm:$0xff] %vm18974_vm15, %v2507_v59  ;;  %v2505_v21 = vadd.f32 %v2436_v45, %v2065_v1  ;;  %2033 = vst.msk [vmem:[#allocation4 + $0xe8] sm:$0xff] %vm18974_vm15, %v1997_v30  ;;  %v2002_v56 = vadd.f32 %v14439_v15, %v1451_v3  ;;  %14657 = vmatprep.mubr.msk.bf16.mxu1 %vm18965_vm4, %v5024_v14  ;;  %v5042_v50 = vsel %vm18967_vm8, %v5032_v5, %v16907_v32  ;;  %v2552_v59 = vld [vmem:[#allocation4] sm:$0xff]  ;;  %v16942_v15 = vld [vmem:[#allocation2 + $0x98] sm:$0xff]  }
 0x17a   : > { %v2070_v25 = vld [vmem:[#allocation4 + $0xf0] sm:$0xff]  ;;  %v1953_v36 = vpop.f32.mrf.mxu1  ;;  %v2452_v17 = vpop.f32.mrf.mxu0  ;;  %v5050_v22 = vor.u32 %v5049_v7, %v5046_v33  ;;  %v16940_v3 = vor.u32 %v5058_v63, %v5055_v55  ;;  %v5576_v5 = vrot.slane %v16929_v28, 3  ;;  %v2553_v39 = vld [vmem:[#allocation4 + $0x8] sm:$0xff] }
 0x17b   : > { %2541 = vst.msk [vmem:[#allocation4 + $0xc8] sm:$0xff] %vm18974_vm15, %v2505_v21  ;;  %v2510_v38 = vadd.f32 %v14473_v53, %v2070_v25  ;;  %2038 = vst.msk [vmem:[#allocation4 + $0x110] sm:$0xff] %vm18974_vm15, %v2002_v56  ;;  %v2000_v54 = vadd.f32 %v1953_v36, %v1449_v52  ;;  %v5574_v53 = vrot.slane %v16909_v0, 3  ;;  %v5064_v36 = vrot.slane %v5062_v44, 2  ;;  %v15368_v0 = vld [vmem:[%s18952_s3 + $0x38] sm:$0xff]  }
 0x17c   : > { %v2068_v24 = vld [vmem:[#allocation4 + $0xe0] sm:$0xff]  ;;  %v14440_v49 = vpop.f32.mrf.mxu1  ;;  %v14477_v8 = vpop.f32.mrf.mxu0  ;;  %14692 = vmatmul.mubr.msk.bf16.gmra.mxu0 %vm18965_vm4, %v5569_v18  ;;  %v5051_v18 = vsel %vm18967_vm8, %v16907_v32, %v5050_v22  ;;  %v5060_v32 = vsel %vm18967_vm8, %v5050_v22, %v16940_v3  ;;  %v15366_v46 = vld [vmem:[#allocation2 + $0xa0] ss:$0 sps:$4 sm:$0x77]   ;;  %14751 = vmatprep.subr.bf16.mxu0 %v15368_v0  ;;  %v2557_v28 = vld [vmem:[#allocation4 + $0x28] sm:$0xff] }
 0x17d   : > { %2546 = vst.msk [vmem:[#allocation4 + $0xf0] sm:$0xff] %vm18974_vm15, %v2510_v38  ;;  %v2508_v45 = vadd.f32 %v2449_v57, %v2068_v24  ;;  %2036 = vst.msk [vmem:[#allocation4 + $0x100] sm:$0xff] %vm18974_vm15, %v2000_v54  ;;  %v2003_v29 = vadd.f32 %v14440_v49, %v1452_v27  ;;  %14695 = vmatprep.mubr.msk.bf16.mxu0 %vm18965_vm4, %v5571_v19  ;;  %v5575_v1 = vsel %vm18966_vm14, %v5572_v10, %v5574_v53 }
 0x17e   : > { %v2071_v62 = vld [vmem:[#allocation4 + $0xf8] sm:$0xff]  ;;  %v1956_v9 = vpop.f32.mrf.mxu1  ;;  %v2465_v16 = vpop.f32.mrf.mxu0  ;;  %v5578_v54 = vrot.slane %v16942_v15, 3  ;;  %14752 = vmatpush3.bf16.msra.mxu0 %v15368_v0  ;;  %v15370_v0 = vld [vmem:[%s18952_s3 + $0x30] sm:$0xff]  }
 0x17f   : > { %2544 = vst.msk [vmem:[#allocation4 + $0xe0] sm:$0xff] %vm18974_vm15, %v2508_v45  ;;  %v2511_v42 = vadd.f32 %v14474_v6, %v2071_v62  ;;  %2039 = vst.msk [vmem:[#allocation4 + $0x118] sm:$0xff] %vm18974_vm15, %v2003_v29  ;;  %v2001_v40 = vadd.f32 %v1956_v9, %v1450_v31  ;;  %v5577_v29 = vsel %vm18966_vm14, %v5574_v53, %v5576_v5  ;;  %v2556_v31 = vld [vmem:[#allocation4 + $0x20] sm:$0xff]  ;;  %v2559_v53 = vld [vmem:[#allocation4 + $0x38] sm:$0xff]  ;;  %14753 = vmatprep.subr.bf16.mxu0 %v15370_v0 }
 0x180   : > { %v2069_v20 = vld [vmem:[#allocation4 + $0xe8] sm:$0xff]  ;;  %v14483_v37 = vpop.f32.mrf.mxu1  ;;  %14658 = vmatmul.mubr.msk.bf16.gmra.mxu1 %vm18965_vm4, %v5033_v61  ;;  %v14478_v26 = vpop.f32.mrf.mxu0 }
 0x181   : > { %2547 = vst.msk [vmem:[#allocation4 + $0xf8] sm:$0xff] %vm18974_vm15, %v2511_v42  ;;  %v2509_v57 = vadd.f32 %v2452_v17, %v2069_v20  ;;  %2037 = vst.msk [vmem:[#allocation4 + $0x108] sm:$0xff] %vm18974_vm15, %v2001_v40  ;;  %v2993_v14 = vadd.f32 %v14483_v37, %v2554_v60  ;;  %14661 = vmatprep.mubr.msk.bf16.mxu1 %vm18965_vm4, %v5042_v50  ;;  %v5067_v17 = vrot.slane %v5065_v58, 3 }
 0x182   : > { %v2074_v35 = vld [vmem:[#allocation4 + $0x110] sm:$0xff]  ;;  %v2848_v51 = vpop.f32.mrf.mxu1  ;;  %v2468_v30 = vpop.f32.mrf.mxu0  ;;  %v5579_v50 = vsel %vm18966_vm14, %v5576_v5, %v5578_v54  ;;  %v2563_v5 = vld [vmem:[#allocation4 + $0x58] sm:$0xff]  ;;  %14754 = vmatpush3.bf16.msra.mxu0 %v15370_v0 }
 0x183   : > { %2545 = vst.msk [vmem:[#allocation4 + $0xe8] sm:$0xff] %vm18974_vm15, %v2509_v57  ;;  %v2514_v6 = vadd.f32 %v14477_v8, %v2074_v35  ;;  %3029 = vst.msk [vmem:[#allocation4 + $0x10] sm:$0xff] %vm18974_vm15, %v2993_v14  ;;  %v2991_v13 = vadd.f32 %v2848_v51, %v2552_v59  ;;  %v2558_v8 = vld [vmem:[#allocation4 + $0x30] sm:$0xff]  ;;  %v5068_v61 = vor.u32 %v5067_v17, %v5064_v36 }
 0x184   : > { %v2072_v43 = vld [vmem:[#allocation4 + $0x100] sm:$0xff]  ;;  %v14484_v21 = vpop.f32.mrf.mxu1  ;;  %v14521_v56 = vpop.f32.mrf.mxu0  ;;  %14696 = vmatmul.mubr.msk.bf16.gmra.mxu0 %vm18965_vm4, %v5573_v23  ;;  %v5580_v23 = vrot.slane %v15366_v46, 3  ;;  %v2562_v35 = vld [vmem:[#allocation4 + $0x50] sm:$0xff] }
 0x185   : > { %2550 = vst.msk [vmem:[#allocation4 + $0x110] sm:$0xff] %vm18974_vm15, %v2514_v6  ;;  %v2512_v25 = vadd.f32 %v2465_v16, %v2072_v43  ;;  %3027 = vst.msk [vmem:[#allocation4] sm:$0xff] %vm18974_vm15, %v2991_v13  ;;  %v2994_v52 = vadd.f32 %v14484_v21, %v2555_v11  ;;  %14699 = vmatprep.mubr.msk.bf16.mxu0 %vm18965_vm4, %v5575_v1  ;;  %v2560_v6 = vld [vmem:[#allocation4 + $0x40] sm:$0xff] }
 0x186   : > { %v2075_v19 = vld [vmem:[#allocation4 + $0x118] sm:$0xff]  ;;  %v2851_v41 = vpop.f32.mrf.mxu1  ;;  %v3493_v38 = vpop.f32.mrf.mxu0 }
 0x187   : > { %2548 = vst.msk [vmem:[#allocation4 + $0x100] sm:$0xff] %vm18974_vm15, %v2512_v25  ;;  %v2515_v24 = vadd.f32 %v14478_v26, %v2075_v19  ;;  %3030 = vst.msk [vmem:[#allocation4 + $0x18] sm:$0xff] %vm18974_vm15, %v2994_v52  ;;  %v2992_v27 = vadd.f32 %v2851_v41, %v2553_v39  ;;  %v5069_v26 = vsel %vm18967_vm8, %v16940_v3, %v5068_v61  ;;  %v2561_v39 = vld [vmem:[#allocation4 + $0x48] sm:$0xff] }
 0x188   : > { %v2073_v49 = vld [vmem:[#allocation4 + $0x108] sm:$0xff]  ;;  %v14487_v10 = vpop.f32.mrf.mxu1  ;;  %14662 = vmatmul.mubr.msk.bf16.gmra.mxu1 %vm18965_vm4, %v5051_v18  ;;  %v14522_v33 = vpop.f32.mrf.mxu0  ;;  %v5581_v3 = vsel %vm18966_vm14, %v5578_v54, %v5580_v23  ;;  %v2570_v23 = vld [vmem:[#allocation4 + $0x90] sm:$0xff] }
 0x189   : > { %2551 = vst.msk [vmem:[#allocation4 + $0x118] sm:$0xff] %vm18974_vm15, %v2515_v24  ;;  %v2513_v7 = vadd.f32 %v2468_v30, %v2073_v49  ;;  %3028 = vst.msk [vmem:[#allocation4 + $0x8] sm:$0xff] %vm18974_vm15, %v2992_v27  ;;  %v2997_v45 = vadd.f32 %v14487_v10, %v2558_v8  ;;  %14665 = vmatprep.mubr.msk.bf16.mxu1 %vm18965_vm4, %v5060_v32  ;;  %v2566_v27 = vld [vmem:[#allocation4 + $0x70] sm:$0xff] }
 0x18a   : > { %v3065_v62 = vld [vmem:[#allocation4 + $0x10] sm:$0xff]  ;;  %v2864_v9 = vpop.f32.mrf.mxu1  ;;  %v3496_v16 = vpop.f32.mrf.mxu0 }
 0x18b   : > { %2549 = vst.msk [vmem:[#allocation4 + $0x108] sm:$0xff] %vm18974_vm15, %v2513_v7  ;;  %v3638_v55 = vadd.f32 %v14521_v56, %v3065_v62  ;;  %3033 = vst.msk [vmem:[#allocation4 + $0x30] sm:$0xff] %vm18974_vm15, %v2997_v45  ;;  %v2995_v63 = vadd.f32 %v2864_v9, %v2556_v31  ;;  %v15369_v56 = vld [vmem:[%s18952_s3 + $0x10] sm:$0xff]   ;;  %v2567_v9 = vld [vmem:[#allocation4 + $0x78] sm:$0xff] }
 0x18c   : > { %v3063_v42 = vld [vmem:[#allocation4] sm:$0xff]  ;;  %v14488_v40 = vpop.f32.mrf.mxu1  ;;  %v14525_v20 = vpop.f32.mrf.mxu0  ;;  %14700 = vmatmul.mubr.msk.bf16.gmra.mxu0 %vm18965_vm4, %v5577_v29  ;;  %14709 = vmatprep.subr.bf16.mxu1 %v15369_v56 }
 0x18d   : > { %3674 = vst.msk [vmem:[#allocation4 + $0x10] sm:$0xff] %vm18974_vm15, %v3638_v55  ;;  %v3636_v60 = vadd.f32 %v3493_v38, %v3063_v42  ;;  %3031 = vst.msk [vmem:[#allocation4 + $0x20] sm:$0xff] %vm18974_vm15, %v2995_v63  ;;  %v2998_v37 = vadd.f32 %v14488_v40, %v2559_v53  ;;  %14703 = vmatprep.mubr.msk.bf16.mxu0 %vm18965_vm4, %v5579_v50  ;;  %14710 = vmatpush3.bf16.msra.mxu1 %v15369_v56  ;;  %v2564_v45 = vld [vmem:[#allocation4 + $0x60] sm:$0xff]  ;;  %v2565_v53 = vld [vmem:[#allocation4 + $0x68] sm:$0xff] }
 0x18e   : > { %v3066_v22 = vld [vmem:[#allocation4 + $0x18] sm:$0xff]  ;;  %v2867_v57 = vpop.f32.mrf.mxu1  ;;  %v3509_v14 = vpop.f32.mrf.mxu0 }
 0x18f   : > { %3672 = vst.msk [vmem:[#allocation4] sm:$0xff] %vm18974_vm15, %v3636_v60  ;;  %v3639_v44 = vadd.f32 %v14522_v33, %v3066_v22  ;;  %3034 = vst.msk [vmem:[#allocation4 + $0x38] sm:$0xff] %vm18974_vm15, %v2998_v37  ;;  %v2996_v58 = vadd.f32 %v2867_v57, %v2557_v28 }
 0x190   : > { %v3064_v4 = vld [vmem:[#allocation4 + $0x8] sm:$0xff]  ;;  %v14491_v59 = vpop.f32.mrf.mxu1  ;;  %14666 = vmatmul.mubr.msk.bf16.gmra.mxu1 %vm18965_vm4, %v5069_v26  ;;  %v14526_v51 = vpop.f32.mrf.mxu0 }
 0x191   : > { %3675 = vst.msk [vmem:[#allocation4 + $0x18] sm:$0xff] %vm18974_vm15, %v3639_v44  ;;  %v3637_v30 = vadd.f32 %v3496_v16, %v3064_v4  ;;  %3032 = vst.msk [vmem:[#allocation4 + $0x28] sm:$0xff] %vm18974_vm15, %v2996_v58  ;;  %v3001_v1 = vadd.f32 %v14491_v59, %v2562_v35  ;;  %v2568_v44 = vld [vmem:[#allocation4 + $0x80] sm:$0xff] }
 0x192   : > { %v3069_v15 = vld [vmem:[#allocation4 + $0x30] sm:$0xff]  ;;  %v2880_v13 = vpop.f32.mrf.mxu1  ;;  %v3512_v43 = vpop.f32.mrf.mxu0 }
 0x193   : > { %3673 = vst.msk [vmem:[#allocation4 + $0x8] sm:$0xff] %vm18974_vm15, %v3637_v30  ;;  %v3642_v11 = vadd.f32 %v14525_v20, %v3069_v15  ;;  %3037 = vst.msk [vmem:[#allocation4 + $0x50] sm:$0xff] %vm18974_vm15, %v3001_v1  ;;  %v2999_v21 = vadd.f32 %v2880_v13, %v2560_v6  ;;  %v2571_v30 = vld [vmem:[#allocation4 + $0x98] sm:$0xff] }
 0x194   : > { %v3067_v18 = vld [vmem:[#allocation4 + $0x20] sm:$0xff]  ;;  %v14492_v25 = vpop.f32.mrf.mxu1  ;;  %v14529_v52 = vpop.f32.mrf.mxu0  ;;  %14704 = vmatmul.mubr.msk.bf16.gmra.mxu0 %vm18965_vm4, %v5581_v3 }
 0x195   : > { %3678 = vst.msk [vmem:[#allocation4 + $0x30] sm:$0xff] %vm18974_vm15, %v3642_v11  ;;  %v3640_v36 = vadd.f32 %v3509_v14, %v3067_v18  ;;  %3035 = vst.msk [vmem:[#allocation4 + $0x40] sm:$0xff] %vm18974_vm15, %v2999_v21  ;;  %v3002_v17 = vadd.f32 %v14492_v25, %v2563_v5  ;;  %v2574_v25 = vld [vmem:[#allocation4 + $0xb0] sm:$0xff] }
 0x196   : > { %v3070_v19 = vld [vmem:[#allocation4 + $0x38] sm:$0xff]  ;;  %v2883_v41 = vpop.f32.mrf.mxu1  ;;  %v3525_v38 = vpop.f32.mrf.mxu0 }
 0x197   : > { %3676 = vst.msk [vmem:[#allocation4 + $0x20] sm:$0xff] %vm18974_vm15, %v3640_v36  ;;  %v3643_v32 = vadd.f32 %v14526_v51, %v3070_v19  ;;  %3038 = vst.msk [vmem:[#allocation4 + $0x58] sm:$0xff] %vm18974_vm15, %v3002_v17  ;;  %v3000_v54 = vadd.f32 %v2883_v41, %v2561_v39  ;;  %v2572_v41 = vld [vmem:[#allocation4 + $0xa0] sm:$0xff] }
 0x198   : > { %v3068_v24 = vld [vmem:[#allocation4 + $0x28] sm:$0xff]  ;;  %v14495_v49 = vpop.f32.mrf.mxu1  ;;  %v16993_v8 = vpop.f32.mrf.mxu0 }
 0x199   : > { %3679 = vst.msk [vmem:[#allocation4 + $0x38] sm:$0xff] %vm18974_vm15, %v3643_v32  ;;  %v3641_v10 = vadd.f32 %v3512_v43, %v3068_v24  ;;  %3036 = vst.msk [vmem:[#allocation4 + $0x48] sm:$0xff] %vm18974_vm15, %v3000_v54  ;;  %v3005_v33 = vadd.f32 %v14495_v49, %v2566_v27  ;;  %v2569_v43 = vld [vmem:[#allocation4 + $0x88] sm:$0xff]  ;;  %v2575_v49 = vld [vmem:[#allocation4 + $0xb8] sm:$0xff] }
 0x19a   : > { %v3073_v7 = vld [vmem:[#allocation4 + $0x50] sm:$0xff]  ;;  %v2896_v29 = vpop.f32.mrf.mxu1  ;;  %v16997_v61 = vpop.f32.mrf.mxu0 }
 0x19b   : > { %3677 = vst.msk [vmem:[#allocation4 + $0x28] sm:$0xff] %vm18974_vm15, %v3641_v10  ;;  %v3646_v46 = vadd.f32 %v14529_v52, %v3073_v7  ;;  %3041 = vst.msk [vmem:[#allocation4 + $0x70] sm:$0xff] %vm18974_vm15, %v3005_v33  ;;  %v3003_v62 = vadd.f32 %v2896_v29, %v2564_v45  ;;  %v2573_v29 = vld [vmem:[#allocation4 + $0xa8] sm:$0xff] }
 0x19c   : > { %v3071_v31 = vld [vmem:[#allocation4 + $0x40] sm:$0xff]  ;;  %v14496_v16 = vpop.f32.mrf.mxu1  ;;  %v17001_v50 = vpop.f32.mrf.mxu0 }
 0x19d   : > { %3682 = vst.msk [vmem:[#allocation4 + $0x50] sm:$0xff] %vm18974_vm15, %v3646_v46  ;;  %v3644_v55 = vadd.f32 %v3525_v38, %v3071_v31  ;;  %3039 = vst.msk [vmem:[#allocation4 + $0x60] sm:$0xff] %vm18974_vm15, %v3003_v62  ;;  %v3006_v63 = vadd.f32 %v14496_v16, %v2567_v9  ;;  %v2578_v16 = vld [vmem:[#allocation4 + $0xd0] sm:$0xff] }
 0x19e   : > { %v3074_v42 = vld [vmem:[#allocation4 + $0x58] sm:$0xff]  ;;  %v2899_v40 = vpop.f32.mrf.mxu1  ;;  %v17008_v20 = vpop.f32.mrf.mxu0 }
 0x19f   : > { %3680 = vst.msk [vmem:[#allocation4 + $0x40] sm:$0xff] %vm18974_vm15, %v3644_v55  ;;  %v3647_v60 = vadd.f32 %v16993_v8, %v3074_v42  ;;  %3042 = vst.msk [vmem:[#allocation4 + $0x78] sm:$0xff] %vm18974_vm15, %v3006_v63  ;;  %v3004_v37 = vadd.f32 %v2899_v40, %v2565_v53  ;;  %v2576_v53 = vld [vmem:[#allocation4 + $0xc0] sm:$0xff] }
 0x1a0   : > { %v3072_v26 = vld [vmem:[#allocation4 + $0x48] sm:$0xff]  ;;  %v14499_v22 = vpop.f32.mrf.mxu1  ;;  %v14534_v28 = vpop.f32.mrf.mxu0 }
 0x1a1   : > { %3683 = vst.msk [vmem:[#allocation4 + $0x58] sm:$0xff] %vm18974_vm15, %v3647_v60  ;;  %v3645_v57 = vadd.f32 %v16997_v61, %v3072_v26  ;;  %3040 = vst.msk [vmem:[#allocation4 + $0x68] sm:$0xff] %vm18974_vm15, %v3004_v37  ;;  %v3009_v2 = vadd.f32 %v14499_v22, %v2570_v23  ;;  %v2579_v23 = vld [vmem:[#allocation4 + $0xd8] sm:$0xff] }
 0x1a2   : > { %v3077_v14 = vld [vmem:[#allocation4 + $0x70] sm:$0xff]  ;;  %v2912_v58 = vpop.f32.mrf.mxu1  ;;  %v3544_v4 = vpop.f32.mrf.mxu0 }
 0x1a3   : > { %3681 = vst.msk [vmem:[#allocation4 + $0x48] sm:$0xff] %vm18974_vm15, %v3645_v57  ;;  %v3650_v35 = vadd.f32 %v17001_v50, %v3077_v14  ;;  %3045 = vst.msk [vmem:[#allocation4 + $0x90] sm:$0xff] %vm18974_vm15, %v3009_v2  ;;  %v3007_v59 = vadd.f32 %v2912_v58, %v2568_v44  ;;  %v2577_v44 = vld [vmem:[#allocation4 + $0xc8] sm:$0xff] }
 0x1a4   : > { %v3075_v51 = vld [vmem:[#allocation4 + $0x60] sm:$0xff]  ;;  %v14500_v1 = vpop.f32.mrf.mxu1  ;;  %v14537_v3 = vpop.f32.mrf.mxu0 }
 0x1a5   : > { %3686 = vst.msk [vmem:[#allocation4 + $0x70] sm:$0xff] %vm18974_vm15, %v3650_v35  ;;  %v3648_v15 = vadd.f32 %v17008_v20, %v3075_v51  ;;  %3043 = vst.msk [vmem:[#allocation4 + $0x80] sm:$0xff] %vm18974_vm15, %v3007_v59  ;;  %v3010_v6 = vadd.f32 %v14500_v1, %v2571_v30  ;;  %v2582_v30 = vld [vmem:[#allocation4 + $0xf0] sm:$0xff] }
 0x1a6   : > { %v3078_v13 = vld [vmem:[#allocation4 + $0x78] sm:$0xff]  ;;  %v2915_v11 = vpop.f32.mrf.mxu1  ;;  %v3557_v21 = vpop.f32.mrf.mxu0 }
 0x1a7   : > { %3684 = vst.msk [vmem:[#allocation4 + $0x60] sm:$0xff] %vm18974_vm15, %v3648_v15  ;;  %v3651_v56 = vadd.f32 %v14534_v28, %v3078_v13  ;;  %3046 = vst.msk [vmem:[#allocation4 + $0x98] sm:$0xff] %vm18974_vm15, %v3010_v6  ;;  %v3008_v18 = vadd.f32 %v2915_v11, %v2569_v43  ;;  %v15371_v13 = vld [vmem:[%s18952_s3 + $0x8] sm:$0xff]   ;;  %v2580_v11 = vld [vmem:[#allocation4 + $0xe0] sm:$0xff] }
 0x1a8   : > { %v3076_v5 = vld [vmem:[#allocation4 + $0x68] sm:$0xff]  ;;  %v14503_v52 = vpop.f32.mrf.mxu1  ;;  %v14538_v36 = vpop.f32.mrf.mxu0  ;;  %14711 = vmatprep.subr.bf16.mxu1 %v15371_v13 }
 0x1a9   : > { %3687 = vst.msk [vmem:[#allocation4 + $0x78] sm:$0xff] %vm18974_vm15, %v3651_v56  ;;  %v3649_v17 = vadd.f32 %v3544_v4, %v3076_v5  ;;  %3044 = vst.msk [vmem:[#allocation4 + $0x88] sm:$0xff] %vm18974_vm15, %v3008_v18  ;;  %v3013_v19 = vadd.f32 %v14503_v52, %v2574_v25  ;;  %v2583_v52 = vld [vmem:[#allocation4 + $0xf8] sm:$0xff]  ;;  %14712 = vmatpush3.bf16.msra.mxu1 %v15371_v13  ;;  %v15373_v13 = vld [vmem:[%s18952_s3] sm:$0xff]  }
 0x1aa   : > { %v3081_v39 = vld [vmem:[#allocation4 + $0x90] sm:$0xff]  ;;  %v2928_v38 = vpop.f32.mrf.mxu1  ;;  %v3560_v32 = vpop.f32.mrf.mxu0  ;;  %14713 = vmatprep.subr.bf16.mxu1 %v15373_v13 }
 0x1ab   : > { %3685 = vst.msk [vmem:[#allocation4 + $0x68] sm:$0xff] %vm18974_vm15, %v3649_v17  ;;  %v3654_v54 = vadd.f32 %v14537_v3, %v3081_v39  ;;  %3049 = vst.msk [vmem:[#allocation4 + $0xb0] sm:$0xff] %vm18974_vm15, %v3013_v19  ;;  %v3011_v24 = vadd.f32 %v2928_v38, %v2572_v41  ;;  %v2581_v38 = vld [vmem:[#allocation4 + $0xe8] sm:$0xff] }
 0x1ac   : > { %v3079_v27 = vld [vmem:[#allocation4 + $0x80] sm:$0xff]  ;;  %v14504_v8 = vpop.f32.mrf.mxu1  ;;  %v14541_v10 = vpop.f32.mrf.mxu0 }
 0x1ad   : > { %3690 = vst.msk [vmem:[#allocation4 + $0x90] sm:$0xff] %vm18974_vm15, %v3654_v54  ;;  %v3652_v33 = vadd.f32 %v3557_v21, %v3079_v27  ;;  %3047 = vst.msk [vmem:[#allocation4 + $0xa0] sm:$0xff] %vm18974_vm15, %v3011_v24  ;;  %v3014_v7 = vadd.f32 %v14504_v8, %v2575_v49  ;;  %v2586_v8 = vld [vmem:[#allocation4 + $0x110] sm:$0xff]  ;;  %14714 = vmatpush3.bf16.msra.mxu1 %v15373_v13 }
 0x1ae   : > { %v3082_v45 = vld [vmem:[#allocation4 + $0x98] sm:$0xff]  ;;  %v2931_v61 = vpop.f32.mrf.mxu1  ;;  %v3573_v46 = vpop.f32.mrf.mxu0  ;;  %v3722_v13 = vld [vmem:[#allocation4 + $0x70] sm:$0xff] }
 0x1af   : > { %3688 = vst.msk [vmem:[#allocation4 + $0x80] sm:$0xff] %vm18974_vm15, %v3652_v33  ;;  %v3655_v62 = vadd.f32 %v14538_v36, %v3082_v45  ;;  %3050 = vst.msk [vmem:[#allocation4 + $0xb8] sm:$0xff] %vm18974_vm15, %v3014_v7  ;;  %v3012_v31 = vadd.f32 %v2931_v61, %v2573_v29  ;;  %v2584_v61 = vld [vmem:[#allocation4 + $0x100] sm:$0xff] }
 0x1b0   : > { %v3080_v9 = vld [vmem:[#allocation4 + $0x88] sm:$0xff]  ;;  %v14507_v50 = vpop.f32.mrf.mxu1  ;;  %v14542_v55 = vpop.f32.mrf.mxu0 }
 0x1b1   : > { %3691 = vst.msk [vmem:[#allocation4 + $0x98] sm:$0xff] %vm18974_vm15, %v3655_v62  ;;  %v3653_v63 = vadd.f32 %v3560_v32, %v3080_v9  ;;  %3048 = vst.msk [vmem:[#allocation4 + $0xa8] sm:$0xff] %vm18974_vm15, %v3012_v31  ;;  %v3017_v0 = vadd.f32 %v14507_v50, %v2578_v16  ;;  %v2587_v50 = vld [vmem:[#allocation4 + $0x118] sm:$0xff] }
 0x1b2   : > { %v3085_v42 = vld [vmem:[#allocation4 + $0xb0] sm:$0xff]  ;;  %v2944_v40 = vpop.f32.mrf.mxu1  ;;  %v3576_v20 = vpop.f32.mrf.mxu0 }
 0x1b3   : > { %3689 = vst.msk [vmem:[#allocation4 + $0x88] sm:$0xff] %vm18974_vm15, %v3653_v63  ;;  %v3658_v60 = vadd.f32 %v14541_v10, %v3085_v42  ;;  %3053 = vst.msk [vmem:[#allocation4 + $0xd0] sm:$0xff] %vm18974_vm15, %v3017_v0  ;;  %v3015_v37 = vadd.f32 %v2944_v40, %v2576_v53  ;;  %v15372_v53 = vld [vmem:[%s18952_s3 + $0x28] sm:$0xff]  }
 0x1b4   : > { %v3083_v26 = vld [vmem:[#allocation4 + $0xa0] sm:$0xff]  ;;  %v14508_v22 = vpop.f32.mrf.mxu1  ;;  %v14545_v28 = vpop.f32.mrf.mxu0  ;;  %14755 = vmatprep.subr.bf16.mxu0 %v15372_v53 }
 0x1b5   : > { %3694 = vst.msk [vmem:[#allocation4 + $0xb0] sm:$0xff] %vm18974_vm15, %v3658_v60  ;;  %v3656_v57 = vadd.f32 %v3573_v46, %v3083_v26  ;;  %3051 = vst.msk [vmem:[#allocation4 + $0xc0] sm:$0xff] %vm18974_vm15, %v3015_v37  ;;  %v3018_v2 = vadd.f32 %v14508_v22, %v2579_v23  ;;  %14756 = vmatpush3.bf16.msra.mxu0 %v15372_v53 }
 0x1b6   : > { %v3086_v14 = vld [vmem:[#allocation4 + $0xb8] sm:$0xff]  ;;  %v2947_v58 = vpop.f32.mrf.mxu1  ;;  %v3589_v4 = vpop.f32.mrf.mxu0 }
 0x1b7   : > { %3692 = vst.msk [vmem:[#allocation4 + $0xa0] sm:$0xff] %vm18974_vm15, %v3656_v57  ;;  %v3659_v35 = vadd.f32 %v14542_v55, %v3086_v14  ;;  %3054 = vst.msk [vmem:[#allocation4 + $0xd8] sm:$0xff] %vm18974_vm15, %v3018_v2  ;;  %v3016_v59 = vadd.f32 %v2947_v58, %v2577_v44 }
 0x1b8   : > { %v3084_v51 = vld [vmem:[#allocation4 + $0xa8] sm:$0xff]  ;;  %v14511_v1 = vpop.f32.mrf.mxu1  ;;  %v14546_v3 = vpop.f32.mrf.mxu0 }
 0x1b9   : > { %3695 = vst.msk [vmem:[#allocation4 + $0xb8] sm:$0xff] %vm18974_vm15, %v3659_v35  ;;  %v3657_v15 = vadd.f32 %v3576_v20, %v3084_v51  ;;  %3052 = vst.msk [vmem:[#allocation4 + $0xc8] sm:$0xff] %vm18974_vm15, %v3016_v59  ;;  %v3021_v6 = vadd.f32 %v14511_v1, %v2582_v30  ;;  %v2585_v20 = vld [vmem:[#allocation4 + $0x108] sm:$0xff] }
 0x1ba   : > { %v3089_v43 = vld [vmem:[#allocation4 + $0xd0] sm:$0xff]  ;;  %v2960_v21 = vpop.f32.mrf.mxu1  ;;  %v3592_v56 = vpop.f32.mrf.mxu0 }
 0x1bb   : > { %3693 = vst.msk [vmem:[#allocation4 + $0xa8] sm:$0xff] %vm18974_vm15, %v3657_v15  ;;  %v3662_v18 = vadd.f32 %v14545_v28, %v3089_v43  ;;  %3057 = vst.msk [vmem:[#allocation4 + $0xf0] sm:$0xff] %vm18974_vm15, %v3021_v6  ;;  %v3019_v5 = vadd.f32 %v2960_v21, %v2580_v11  ;;  %v3710_v28 = vld [vmem:[#allocation4 + $0x10] sm:$0xff] }
 0x1bc   : > { %v3087_v25 = vld [vmem:[#allocation4 + $0xc0] sm:$0xff]  ;;  %v14512_v36 = vpop.f32.mrf.mxu1  ;;  %v14549_v17 = vpop.f32.mrf.mxu0 }
 0x1bd   : > { %3698 = vst.msk [vmem:[#allocation4 + $0xd0] sm:$0xff] %vm18974_vm15, %v3662_v18  ;;  %v3660_v19 = vadd.f32 %v3589_v4, %v3087_v25  ;;  %3055 = vst.msk [vmem:[#allocation4 + $0xe0] sm:$0xff] %vm18974_vm15, %v3019_v5  ;;  %v3022_v39 = vadd.f32 %v14512_v36, %v2583_v52  ;;  %v3708_v4 = vld [vmem:[#allocation4] sm:$0xff] }
 0x1be   : > { %v3090_v41 = vld [vmem:[#allocation4 + $0xd8] sm:$0xff]  ;;  %v2963_v32 = vpop.f32.mrf.mxu1  ;;  %v3605_v54 = vpop.f32.mrf.mxu0 }
 0x1bf   : > { %3696 = vst.msk [vmem:[#allocation4 + $0xc0] sm:$0xff] %vm18974_vm15, %v3660_v19  ;;  %v3663_v24 = vadd.f32 %v14546_v3, %v3090_v41  ;;  %3058 = vst.msk [vmem:[#allocation4 + $0xf8] sm:$0xff] %vm18974_vm15, %v3022_v39  ;;  %v3020_v27 = vadd.f32 %v2963_v32, %v2581_v38  ;;  %v3711_v3 = vld [vmem:[#allocation4 + $0x18] sm:$0xff] }
 0x1c0   : > { %v3088_v49 = vld [vmem:[#allocation4 + $0xc8] sm:$0xff]  ;;  %v14515_v10 = vpop.f32.mrf.mxu1  ;;  %v14550_v33 = vpop.f32.mrf.mxu0  ;;  %v15375_v32 = vld [vmem:[#allocation3] sm:$0xff]  }
 0x1c1   : > { %3699 = vst.msk [vmem:[#allocation4 + $0xd8] sm:$0xff] %vm18974_vm15, %v3663_v24  ;;  %v3661_v7 = vadd.f32 %v3592_v56, %v3088_v49  ;;  %3056 = vst.msk [vmem:[#allocation4 + $0xe8] sm:$0xff] %vm18974_vm15, %v3020_v27  ;;  %v3025_v45 = vadd.f32 %v14515_v10, %v2586_v8  ;;  %v3709_v56 = vld [vmem:[#allocation4 + $0x8] sm:$0xff]  ;;  %v3712_v24 = vld [vmem:[#allocation4 + $0x20] sm:$0xff]  ;;  %14715 = vmatprep.mubr.msk.bf16.mxu1 %vm18974_vm15, %v15375_v32 }
 0x1c2   : > { %v3093_v29 = vld [vmem:[#allocation4 + $0xf0] sm:$0xff]  ;;  %v2976_v46 = vpop.f32.mrf.mxu1  ;;  %v3608_v62 = vpop.f32.mrf.mxu0 }
 0x1c3   : > { %3697 = vst.msk [vmem:[#allocation4 + $0xc8] sm:$0xff] %vm18974_vm15, %v3661_v7  ;;  %v3666_v31 = vadd.f32 %v14549_v17, %v3093_v29  ;;  %3061 = vst.msk [vmem:[#allocation4 + $0x110] sm:$0xff] %vm18974_vm15, %v3025_v45  ;;  %v3023_v9 = vadd.f32 %v2976_v46, %v2584_v61  ;;  %v3714_v17 = vld [vmem:[#allocation4 + $0x30] sm:$0xff]  ;;  %v3715_v7 = vld [vmem:[#allocation4 + $0x38] sm:$0xff] }
 0x1c4   : > { %v3091_v16 = vld [vmem:[#allocation4 + $0xe0] sm:$0xff]  ;;  %v14516_v55 = vpop.f32.mrf.mxu1  ;;  %v14553_v63 = vpop.f32.mrf.mxu0 }
 0x1c5   : > { %3702 = vst.msk [vmem:[#allocation4 + $0xf0] sm:$0xff] %vm18974_vm15, %v3666_v31  ;;  %v3664_v0 = vadd.f32 %v3605_v54, %v3091_v16  ;;  %3059 = vst.msk [vmem:[#allocation4 + $0x100] sm:$0xff] %vm18974_vm15, %v3023_v9  ;;  %v3026_v42 = vadd.f32 %v14516_v55, %v2587_v50  ;;  %v3713_v31 = vld [vmem:[#allocation4 + $0x28] sm:$0xff] }
 0x1c6   : > { %v3094_v40 = vld [vmem:[#allocation4 + $0xf8] sm:$0xff]  ;;  %v2979_v60 = vpop.f32.mrf.mxu1  ;;  %v3621_v37 = vpop.f32.mrf.mxu0 }
 0x1c7   : > { %3700 = vst.msk [vmem:[#allocation4 + $0xe0] sm:$0xff] %vm18974_vm15, %v3664_v0  ;;  %v3667_v26 = vadd.f32 %v14550_v33, %v3094_v40  ;;  %3062 = vst.msk [vmem:[#allocation4 + $0x118] sm:$0xff] %vm18974_vm15, %v3026_v42  ;;  %v3024_v23 = vadd.f32 %v2979_v60, %v2585_v20  ;;  %v3718_v42 = vld [vmem:[#allocation4 + $0x50] sm:$0xff] }
 0x1c8   : > { %v3092_v22 = vld [vmem:[#allocation4 + $0xe8] sm:$0xff]  ;;  %v14559_v57 = vpop.f32.mrf.mxu1  ;;  %v14554_v2 = vpop.f32.mrf.mxu0 }
 0x1c9   : > { %3703 = vst.msk [vmem:[#allocation4 + $0xf8] sm:$0xff] %vm18974_vm15, %v3667_v26  ;;  %v3665_v14 = vadd.f32 %v3608_v62, %v3092_v22  ;;  %3060 = vst.msk [vmem:[#allocation4 + $0x108] sm:$0xff] %vm18974_vm15, %v3024_v23  ;;  %v4150_v44 = vadd.f32 %v14559_v57, %v3710_v28  ;;  %v3716_v26 = vld [vmem:[#allocation4 + $0x40] sm:$0xff] }
 0x1ca   : > { %v3097_v58 = vld [vmem:[#allocation4 + $0x110] sm:$0xff]  ;;  %v4005_v35 = vpop.f32.mrf.mxu1  ;;  %v3624_v59 = vpop.f32.mrf.mxu0 }
 0x1cb   : > { %3701 = vst.msk [vmem:[#allocation4 + $0xe8] sm:$0xff] %vm18974_vm15, %v3665_v14  ;;  %v3670_v51 = vadd.f32 %v14553_v63, %v3097_v58  ;;  %4186 = vst.msk [vmem:[#allocation4 + $0x10] sm:$0xff] %vm18974_vm15, %v4150_v44  ;;  %v4148_v30 = vadd.f32 %v4005_v35, %v3708_v4  ;;  %v15374_v63 = vld [vmem:[%s18952_s3 + $0x20] sm:$0xff]   ;;  %v3719_v14 = vld [vmem:[#allocation4 + $0x58] sm:$0xff] }
 0x1cc   : > { %v3095_v1 = vld [vmem:[#allocation4 + $0x100] sm:$0xff]  ;;  %v14560_v15 = vpop.f32.mrf.mxu1  ;;  %v14597_v6 = vpop.f32.mrf.mxu0  ;;  %14757 = vmatprep.subr.bf16.mxu0 %v15374_v63 }
 0x1cd   : > { %3706 = vst.msk [vmem:[#allocation4 + $0x110] sm:$0xff] %vm18974_vm15, %v3670_v51  ;;  %v3668_v43 = vadd.f32 %v3621_v37, %v3095_v1  ;;  %4184 = vst.msk [vmem:[#allocation4] sm:$0xff] %vm18974_vm15, %v4148_v30  ;;  %v4151_v11 = vadd.f32 %v14560_v15, %v3711_v3  ;;  %14758 = vmatpush3.bf16.msra.mxu0 %v15374_v63  ;;  %v3717_v51 = vld [vmem:[#allocation4 + $0x48] sm:$0xff] }
 0x1ce   : > { %v3098_v21 = vld [vmem:[#allocation4 + $0x118] sm:$0xff]  ;;  %v4008_v18 = vpop.f32.mrf.mxu1  ;;  %v4516_v5 = vpop.f32.mrf.mxu0 }
 0x1cf   : > { %3704 = vst.msk [vmem:[#allocation4 + $0x100] sm:$0xff] %vm18974_vm15, %v3668_v43  ;;  %v3671_v25 = vadd.f32 %v14554_v2, %v3098_v21  ;;  %4187 = vst.msk [vmem:[#allocation4 + $0x18] sm:$0xff] %vm18974_vm15, %v4151_v11  ;;  %v4149_v52 = vadd.f32 %v4008_v18, %v3709_v56 }
 0x1d0   : > { %v3096_v36 = vld [vmem:[#allocation4 + $0x108] sm:$0xff]  ;;  %v14563_v19 = vpop.f32.mrf.mxu1  ;;  %v14598_v39 = vpop.f32.mrf.mxu0 }
 0x1d1   : > { %3707 = vst.msk [vmem:[#allocation4 + $0x118] sm:$0xff] %vm18974_vm15, %v3671_v25  ;;  %v3669_v41 = vadd.f32 %v3624_v59, %v3096_v36  ;;  %4185 = vst.msk [vmem:[#allocation4 + $0x8] sm:$0xff] %vm18974_vm15, %v4149_v52  ;;  %v4154_v38 = vadd.f32 %v14563_v19, %v3714_v17 }
 0x1d2   : > { %v4222_v54 = vld [vmem:[#allocation4 + $0x10] sm:$0xff]  ;;  %v4021_v27 = vpop.f32.mrf.mxu1  ;;  %v4519_v49 = vpop.f32.mrf.mxu0 }
 0x1d3   : > { %3705 = vst.msk [vmem:[#allocation4 + $0x108] sm:$0xff] %vm18974_vm15, %v3669_v41  ;;  %v4661_v8 = vadd.f32 %v14597_v6, %v4222_v54  ;;  %4190 = vst.msk [vmem:[#allocation4 + $0x30] sm:$0xff] %vm18974_vm15, %v4154_v38  ;;  %v4152_v10 = vadd.f32 %v4021_v27, %v3712_v24  ;;  %v3721_v27 = vld [vmem:[#allocation4 + $0x68] sm:$0xff] }
 0x1d4   : > { %v4220_v33 = vld [vmem:[#allocation4] sm:$0xff]  ;;  %v14564_v45 = vpop.f32.mrf.mxu1  ;;  %v14601_v29 = vpop.f32.mrf.mxu0 }
 0x1d5   : > { %4697 = vst.msk [vmem:[#allocation4 + $0x10] sm:$0xff] %vm18974_vm15, %v4661_v8  ;;  %v4659_v61 = vadd.f32 %v4516_v5, %v4220_v33  ;;  %4188 = vst.msk [vmem:[#allocation4 + $0x20] sm:$0xff] %vm18974_vm15, %v4152_v10  ;;  %v4155_v46 = vadd.f32 %v14564_v45, %v3715_v7  ;;  %v3720_v5 = vld [vmem:[#allocation4 + $0x60] sm:$0xff]  ;;  %v17186_v7 = vld [vmem:[%s18952_s3 + $0x58] sm:$0xff]  }
 0x1d6   : > { %v4223_v62 = vld [vmem:[#allocation4 + $0x18] sm:$0xff]  ;;  %v4024_v9 = vpop.f32.mrf.mxu1  ;;  %v4532_v16 = vpop.f32.mrf.mxu0  ;;  %14795 = vmatprep.subr.bf16.mxu1 %v17186_v7 }
 0x1d7   : > { %4695 = vst.msk [vmem:[#allocation4] sm:$0xff] %vm18974_vm15, %v4659_v61  ;;  %v4662_v50 = vadd.f32 %v14598_v39, %v4223_v62  ;;  %4191 = vst.msk [vmem:[#allocation4 + $0x38] sm:$0xff] %vm18974_vm15, %v4155_v46  ;;  %v4153_v55 = vadd.f32 %v4024_v9, %v3713_v31  ;;  %v3723_v39 = vld [vmem:[#allocation4 + $0x78] sm:$0xff] }
 0x1d8   : > { %v4221_v0 = vld [vmem:[#allocation4 + $0x8] sm:$0xff]  ;;  %v14567_v53 = vpop.f32.mrf.mxu1  ;;  %v14602_v40 = vpop.f32.mrf.mxu0 }
 0x1d9   : > { %4698 = vst.msk [vmem:[#allocation4 + $0x18] sm:$0xff] %vm18974_vm15, %v4662_v50  ;;  %v4660_v20 = vadd.f32 %v4519_v49, %v4221_v0  ;;  %4189 = vst.msk [vmem:[#allocation4 + $0x28] sm:$0xff] %vm18974_vm15, %v4153_v55  ;;  %v4158_v60 = vadd.f32 %v14567_v53, %v3718_v42  ;;  %v3727_v53 = vld [vmem:[#allocation4 + $0x98] sm:$0xff] }
 0x1da   : > { %v4226_v37 = vld [vmem:[#allocation4 + $0x30] sm:$0xff]  ;;  %v4037_v23 = vpop.f32.mrf.mxu1  ;;  %v4535_v22 = vpop.f32.mrf.mxu0 }
 0x1db   : > { %4696 = vst.msk [vmem:[#allocation4 + $0x8] sm:$0xff] %vm18974_vm15, %v4660_v20  ;;  %v4665_v28 = vadd.f32 %v14601_v29, %v4226_v37  ;;  %4194 = vst.msk [vmem:[#allocation4 + $0x50] sm:$0xff] %vm18974_vm15, %v4158_v60  ;;  %v4156_v57 = vadd.f32 %v4037_v23, %v3716_v26  ;;  %v3726_v29 = vld [vmem:[#allocation4 + $0x90] sm:$0xff]  ;;  %v3725_v23 = vld [vmem:[#allocation4 + $0x88] sm:$0xff] }
 0x1dc   : > { %v4224_v2 = vld [vmem:[#allocation4 + $0x20] sm:$0xff]  ;;  %v14568_v44 = vpop.f32.mrf.mxu1  ;;  %v14605_v58 = vpop.f32.mrf.mxu0 }
 0x1dd   : > { %4701 = vst.msk [vmem:[#allocation4 + $0x30] sm:$0xff] %vm18974_vm15, %v4665_v28  ;;  %v4663_v4 = vadd.f32 %v4532_v16, %v4224_v2  ;;  %4192 = vst.msk [vmem:[#allocation4 + $0x40] sm:$0xff] %vm18974_vm15, %v4156_v57  ;;  %v4159_v35 = vadd.f32 %v14568_v44, %v3719_v14  ;;  %v3724_v16 = vld [vmem:[#allocation4 + $0x80] sm:$0xff]  ;;  %v3730_v44 = vld [vmem:[#allocation4 + $0xb0] sm:$0xff] }
 0x1de   : > { %v4227_v59 = vld [vmem:[#allocation4 + $0x38] sm:$0xff]  ;;  %v4040_v30 = vpop.f32.mrf.mxu1  ;;  %v4548_v1 = vpop.f32.mrf.mxu0 }
 0x1df   : > { %4699 = vst.msk [vmem:[#allocation4 + $0x20] sm:$0xff] %vm18974_vm15, %v4663_v4  ;;  %v4666_v3 = vadd.f32 %v14602_v40, %v4227_v59  ;;  %4195 = vst.msk [vmem:[#allocation4 + $0x58] sm:$0xff] %vm18974_vm15, %v4159_v35  ;;  %v4157_v15 = vadd.f32 %v4040_v30, %v3717_v51  ;;  %v3728_v30 = vld [vmem:[#allocation4 + $0xa0] sm:$0xff] }
 0x1e0   : > { %v4225_v6 = vld [vmem:[#allocation4 + $0x28] sm:$0xff]  ;;  %v14571_v43 = vpop.f32.mrf.mxu1  ;;  %v14606_v11 = vpop.f32.mrf.mxu0 }
 0x1e1   : > { %4702 = vst.msk [vmem:[#allocation4 + $0x38] sm:$0xff] %vm18974_vm15, %v4666_v3  ;;  %v4664_v21 = vadd.f32 %v4535_v22, %v4225_v6  ;;  %4193 = vst.msk [vmem:[#allocation4 + $0x48] sm:$0xff] %vm18974_vm15, %v4157_v15  ;;  %v4162_v56 = vadd.f32 %v14571_v43, %v3722_v13  ;;  %v3731_v43 = vld [vmem:[#allocation4 + $0xb8] sm:$0xff] }
 0x1e2   : > { %v4230_v18 = vld [vmem:[#allocation4 + $0x50] sm:$0xff]  ;;  %v4053_v25 = vpop.f32.mrf.mxu1  ;;  %v4551_v52 = vpop.f32.mrf.mxu0 }
 0x1e3   : > { %4700 = vst.msk [vmem:[#allocation4 + $0x28] sm:$0xff] %vm18974_vm15, %v4664_v21  ;;  %v4669_v36 = vadd.f32 %v14605_v58, %v4230_v18  ;;  %4198 = vst.msk [vmem:[#allocation4 + $0x70] sm:$0xff] %vm18974_vm15, %v4162_v56  ;;  %v4160_v17 = vadd.f32 %v4053_v25, %v3720_v5  ;;  %v3729_v25 = vld [vmem:[#allocation4 + $0xa8] sm:$0xff] }
 0x1e4   : > { %v4228_v19 = vld [vmem:[#allocation4 + $0x40] sm:$0xff]  ;;  %v14572_v41 = vpop.f32.mrf.mxu1  ;;  %v14609_v38 = vpop.f32.mrf.mxu0 }
 0x1e5   : > { %4705 = vst.msk [vmem:[#allocation4 + $0x50] sm:$0xff] %vm18974_vm15, %v4669_v36  ;;  %v4667_v32 = vadd.f32 %v4548_v1, %v4228_v19  ;;  %4196 = vst.msk [vmem:[#allocation4 + $0x60] sm:$0xff] %vm18974_vm15, %v4160_v17  ;;  %v4163_v54 = vadd.f32 %v14572_v41, %v3723_v39  ;;  %v3734_v41 = vld [vmem:[#allocation4 + $0xd0] sm:$0xff] }
 0x1e6   : > { %v4231_v24 = vld [vmem:[#allocation4 + $0x58] sm:$0xff]  ;;  %v4056_v49 = vpop.f32.mrf.mxu1  ;;  %v4564_v8 = vpop.f32.mrf.mxu0 }
 0x1e7   : > { %4703 = vst.msk [vmem:[#allocation4 + $0x40] sm:$0xff] %vm18974_vm15, %v4667_v32  ;;  %v4670_v10 = vadd.f32 %v14606_v11, %v4231_v24  ;;  %4199 = vst.msk [vmem:[#allocation4 + $0x78] sm:$0xff] %vm18974_vm15, %v4163_v54  ;;  %v4161_v33 = vadd.f32 %v4056_v49, %v3721_v27  ;;  %v3732_v49 = vld [vmem:[#allocation4 + $0xc0] sm:$0xff] }
 0x1e8   : > { %v4229_v45 = vld [vmem:[#allocation4 + $0x48] sm:$0xff]  ;;  %v14575_v61 = vpop.f32.mrf.mxu1  ;;  %v14610_v46 = vpop.f32.mrf.mxu0 }
 0x1e9   : > { %4706 = vst.msk [vmem:[#allocation4 + $0x58] sm:$0xff] %vm18974_vm15, %v4670_v10  ;;  %v4668_v62 = vadd.f32 %v4551_v52, %v4229_v45  ;;  %4197 = vst.msk [vmem:[#allocation4 + $0x68] sm:$0xff] %vm18974_vm15, %v4161_v33  ;;  %v4166_v31 = vadd.f32 %v14575_v61, %v3726_v29  ;;  %v3735_v61 = vld [vmem:[#allocation4 + $0xd8] sm:$0xff] }
 0x1ea   : > { %v4234_v9 = vld [vmem:[#allocation4 + $0x70] sm:$0xff]  ;;  %v4069_v50 = vpop.f32.mrf.mxu1  ;;  %v4567_v55 = vpop.f32.mrf.mxu0 }
 0x1eb   : > { %4704 = vst.msk [vmem:[#allocation4 + $0x48] sm:$0xff] %vm18974_vm15, %v4668_v62  ;;  %v4673_v63 = vadd.f32 %v14609_v38, %v4234_v9  ;;  %4202 = vst.msk [vmem:[#allocation4 + $0x90] sm:$0xff] %vm18974_vm15, %v4166_v31  ;;  %v4164_v0 = vadd.f32 %v4069_v50, %v3724_v16  ;;  %v3733_v50 = vld [vmem:[#allocation4 + $0xc8] sm:$0xff] }
 0x1ec   : > { %v4232_v42 = vld [vmem:[#allocation4 + $0x60] sm:$0xff]  ;;  %v14576_v40 = vpop.f32.mrf.mxu1  ;;  %v14613_v20 = vpop.f32.mrf.mxu0 }
 0x1ed   : > { %4709 = vst.msk [vmem:[#allocation4 + $0x70] sm:$0xff] %vm18974_vm15, %v4673_v63  ;;  %v4671_v60 = vadd.f32 %v4564_v8, %v4232_v42  ;;  %4200 = vst.msk [vmem:[#allocation4 + $0x80] sm:$0xff] %vm18974_vm15, %v4164_v0  ;;  %v4167_v37 = vadd.f32 %v14576_v40, %v3727_v53  ;;  %v15384_v0 = vld [vmem:[%s18952_s3 + $0x78] sm:$0xff]  }
 0x1ee   : > { %v4235_v26 = vld [vmem:[#allocation4 + $0x78] sm:$0xff]  ;;  %v4072_v22 = vpop.f32.mrf.mxu1  ;;  %v4580_v28 = vpop.f32.mrf.mxu0  ;;  %14839 = vmatprep.subr.bf16.mxu0 %v15384_v0 }
 0x1ef   : > { %4707 = vst.msk [vmem:[#allocation4 + $0x60] sm:$0xff] %vm18974_vm15, %v4671_v60  ;;  %v4674_v57 = vadd.f32 %v14610_v46, %v4235_v26  ;;  %4203 = vst.msk [vmem:[#allocation4 + $0x98] sm:$0xff] %vm18974_vm15, %v4167_v37  ;;  %v4165_v2 = vadd.f32 %v4072_v22, %v3725_v23 }
 0x1f0   : > { %v4233_v14 = vld [vmem:[#allocation4 + $0x68] sm:$0xff]  ;;  %v14579_v58 = vpop.f32.mrf.mxu1  ;;  %v14614_v4 = vpop.f32.mrf.mxu0 }
 0x1f1   : > { %4710 = vst.msk [vmem:[#allocation4 + $0x78] sm:$0xff] %vm18974_vm15, %v4674_v57  ;;  %v4672_v35 = vadd.f32 %v4567_v55, %v4233_v14  ;;  %4201 = vst.msk [vmem:[#allocation4 + $0x88] sm:$0xff] %vm18974_vm15, %v4165_v2  ;;  %v4170_v59 = vadd.f32 %v14579_v58, %v3730_v44 }
 0x1f2   : > { %v4238_v51 = vld [vmem:[#allocation4 + $0x90] sm:$0xff]  ;;  %v4085_v1 = vpop.f32.mrf.mxu1  ;;  %v4583_v3 = vpop.f32.mrf.mxu0 }
 0x1f3   : > { %4708 = vst.msk [vmem:[#allocation4 + $0x68] sm:$0xff] %vm18974_vm15, %v4672_v35  ;;  %v4677_v15 = vadd.f32 %v14613_v20, %v4238_v51  ;;  %4206 = vst.msk [vmem:[#allocation4 + $0xb0] sm:$0xff] %vm18974_vm15, %v4170_v59  ;;  %v4168_v6 = vadd.f32 %v4085_v1, %v3728_v30  ;;  %v3738_v20 = vld [vmem:[#allocation4 + $0xf0] sm:$0xff] }
 0x1f4   : > { %v4236_v13 = vld [vmem:[#allocation4 + $0x80] sm:$0xff]  ;;  %v14580_v11 = vpop.f32.mrf.mxu1  ;;  %v14617_v21 = vpop.f32.mrf.mxu0 }
 0x1f5   : > { %4713 = vst.msk [vmem:[#allocation4 + $0x90] sm:$0xff] %vm18974_vm15, %v4677_v15  ;;  %v4675_v56 = vadd.f32 %v4580_v28, %v4236_v13  ;;  %4204 = vst.msk [vmem:[#allocation4 + $0xa0] sm:$0xff] %vm18974_vm15, %v4168_v6  ;;  %v4171_v18 = vadd.f32 %v14580_v11, %v3731_v43  ;;  %v3736_v28 = vld [vmem:[#allocation4 + $0xe0] sm:$0xff] }
 0x1f6   : > { %v4239_v5 = vld [vmem:[#allocation4 + $0x98] sm:$0xff]  ;;  %v4088_v52 = vpop.f32.mrf.mxu1  ;;  %v4596_v36 = vpop.f32.mrf.mxu0 }
 0x1f7   : > { %4711 = vst.msk [vmem:[#allocation4 + $0x80] sm:$0xff] %vm18974_vm15, %v4675_v56  ;;  %v4678_v17 = vadd.f32 %v14614_v4, %v4239_v5  ;;  %4207 = vst.msk [vmem:[#allocation4 + $0xb8] sm:$0xff] %vm18974_vm15, %v4171_v18  ;;  %v4169_v19 = vadd.f32 %v4088_v52, %v3729_v25  ;;  %v3739_v4 = vld [vmem:[#allocation4 + $0xf8] sm:$0xff] }
 0x1f8   : > { %v4237_v39 = vld [vmem:[#allocation4 + $0x88] sm:$0xff]  ;;  %v14583_v38 = vpop.f32.mrf.mxu1  ;;  %v14618_v32 = vpop.f32.mrf.mxu0 }
 0x1f9   : > { %4714 = vst.msk [vmem:[#allocation4 + $0x98] sm:$0xff] %vm18974_vm15, %v4678_v17  ;;  %v4676_v54 = vadd.f32 %v4583_v3, %v4237_v39  ;;  %4205 = vst.msk [vmem:[#allocation4 + $0xa8] sm:$0xff] %vm18974_vm15, %v4169_v19  ;;  %v4174_v24 = vadd.f32 %v14583_v38, %v3734_v41  ;;  %v3737_v3 = vld [vmem:[#allocation4 + $0xe8] sm:$0xff] }
 0x1fa   : > { %v4242_v27 = vld [vmem:[#allocation4 + $0xb0] sm:$0xff]  ;;  %v4101_v8 = vpop.f32.mrf.mxu1  ;;  %v4599_v10 = vpop.f32.mrf.mxu0 }
 0x1fb   : > { %4712 = vst.msk [vmem:[#allocation4 + $0x88] sm:$0xff] %vm18974_vm15, %v4676_v54  ;;  %v4681_v33 = vadd.f32 %v14617_v21, %v4242_v27  ;;  %4210 = vst.msk [vmem:[#allocation4 + $0xd0] sm:$0xff] %vm18974_vm15, %v4174_v24  ;;  %v4172_v45 = vadd.f32 %v4101_v8, %v3732_v49  ;;  %v3742_v21 = vld [vmem:[#allocation4 + $0x110] sm:$0xff] }
 0x1fc   : > { %v4240_v29 = vld [vmem:[#allocation4 + $0xa0] sm:$0xff]  ;;  %v14584_v46 = vpop.f32.mrf.mxu1  ;;  %v14621_v62 = vpop.f32.mrf.mxu0 }
 0x1fd   : > { %4717 = vst.msk [vmem:[#allocation4 + $0xb0] sm:$0xff] %vm18974_vm15, %v4681_v33  ;;  %v4679_v31 = vadd.f32 %v4596_v36, %v4240_v29  ;;  %4208 = vst.msk [vmem:[#allocation4 + $0xc0] sm:$0xff] %vm18974_vm15, %v4172_v45  ;;  %v4175_v9 = vadd.f32 %v14584_v46, %v3735_v61  ;;  %v3740_v36 = vld [vmem:[#allocation4 + $0x100] sm:$0xff] }
 0x1fe   : > { %v4243_v16 = vld [vmem:[#allocation4 + $0xb8] sm:$0xff]  ;;  %v4104_v55 = vpop.f32.mrf.mxu1  ;;  %v4612_v63 = vpop.f32.mrf.mxu0 }
 0x1ff   : > { %4715 = vst.msk [vmem:[#allocation4 + $0xa0] sm:$0xff] %vm18974_vm15, %v4679_v31  ;;  %v4682_v42 = vadd.f32 %v14618_v32, %v4243_v16  ;;  %4211 = vst.msk [vmem:[#allocation4 + $0xd8] sm:$0xff] %vm18974_vm15, %v4175_v9  ;;  %v4173_v53 = vadd.f32 %v4104_v55, %v3733_v50  ;;  %v3743_v32 = vld [vmem:[#allocation4 + $0x118] sm:$0xff] }
 0x200   : > { %v4241_v40 = vld [vmem:[#allocation4 + $0xa8] sm:$0xff]  ;;  %v14587_v60 = vpop.f32.mrf.mxu1  ;;  %v14622_v37 = vpop.f32.mrf.mxu0 }
 0x201   : > { %4718 = vst.msk [vmem:[#allocation4 + $0xb8] sm:$0xff] %vm18974_vm15, %v4682_v42  ;;  %v4680_v26 = vadd.f32 %v4599_v10, %v4241_v40  ;;  %4209 = vst.msk [vmem:[#allocation4 + $0xc8] sm:$0xff] %vm18974_vm15, %v4173_v53  ;;  %v4178_v23 = vadd.f32 %v14587_v60, %v3738_v20  ;;  %v3741_v10 = vld [vmem:[#allocation4 + $0x108] sm:$0xff]  ;;  %v4734_v60 = vld [vmem:[#allocation4 + $0x18] sm:$0xff] }
 0x202   : > { %v4246_v22 = vld [vmem:[#allocation4 + $0xd0] sm:$0xff]  ;;  %v4117_v57 = vpop.f32.mrf.mxu1  ;;  %v4615_v2 = vpop.f32.mrf.mxu0 }
 0x203   : > { %4716 = vst.msk [vmem:[#allocation4 + $0xa8] sm:$0xff] %vm18974_vm15, %v4680_v26  ;;  %v4685_v14 = vadd.f32 %v14621_v62, %v4246_v22  ;;  %4214 = vst.msk [vmem:[#allocation4 + $0xf0] sm:$0xff] %vm18974_vm15, %v4178_v23  ;;  %v4176_v44 = vadd.f32 %v4117_v57, %v3736_v28  ;;  %v4733_v62 = vld [vmem:[#allocation4 + $0x10] sm:$0xff]  ;;  %v4732_v57 = vld [vmem:[#allocation4 + $0x8] sm:$0xff] }
 0x204   : > { %v4244_v58 = vld [vmem:[#allocation4 + $0xc0] sm:$0xff]  ;;  %v14588_v35 = vpop.f32.mrf.mxu1  ;;  %v14625_v59 = vpop.f32.mrf.mxu0 }
 0x205   : > { %4721 = vst.msk [vmem:[#allocation4 + $0xd0] sm:$0xff] %vm18974_vm15, %v4685_v14  ;;  %v4683_v51 = vadd.f32 %v4612_v63, %v4244_v58  ;;  %4212 = vst.msk [vmem:[#allocation4 + $0xe0] sm:$0xff] %vm18974_vm15, %v4176_v44  ;;  %v4179_v30 = vadd.f32 %v14588_v35, %v3739_v4  ;;  %v4731_v63 = vld [vmem:[#allocation4] sm:$0xff]  ;;  %v4737_v35 = vld [vmem:[#allocation4 + $0x30] sm:$0xff] }
 0x206   : > { %v4247_v1 = vld [vmem:[#allocation4 + $0xd8] sm:$0xff]  ;;  %v4120_v15 = vpop.f32.mrf.mxu1  ;;  %v4628_v6 = vpop.f32.mrf.mxu0 }
 0x207   : > { %4719 = vst.msk [vmem:[#allocation4 + $0xc0] sm:$0xff] %vm18974_vm15, %v4683_v51  ;;  %v4686_v13 = vadd.f32 %v14622_v37, %v4247_v1  ;;  %4215 = vst.msk [vmem:[#allocation4 + $0xf8] sm:$0xff] %vm18974_vm15, %v4179_v30  ;;  %v4177_v43 = vadd.f32 %v4120_v15, %v3737_v3  ;;  %v4735_v15 = vld [vmem:[#allocation4 + $0x20] sm:$0xff] }
 0x208   : > { %v4245_v11 = vld [vmem:[#allocation4 + $0xc8] sm:$0xff]  ;;  %v14591_v56 = vpop.f32.mrf.mxu1  ;;  %v14626_v18 = vpop.f32.mrf.mxu0 }
 0x209   : > { %4722 = vst.msk [vmem:[#allocation4 + $0xd8] sm:$0xff] %vm18974_vm15, %v4686_v13  ;;  %v4684_v5 = vadd.f32 %v4615_v2, %v4245_v11  ;;  %4213 = vst.msk [vmem:[#allocation4 + $0xe8] sm:$0xff] %vm18974_vm15, %v4177_v43  ;;  %v4182_v25 = vadd.f32 %v14591_v56, %v3742_v21  ;;  %v4738_v56 = vld [vmem:[#allocation4 + $0x38] sm:$0xff] }
 0x20a   : > { %v4250_v52 = vld [vmem:[#allocation4 + $0xf0] sm:$0xff]  ;;  %v4133_v17 = vpop.f32.mrf.mxu1  ;;  %v4631_v19 = vpop.f32.mrf.mxu0 }
 0x20b   : > { %4720 = vst.msk [vmem:[#allocation4 + $0xc8] sm:$0xff] %vm18974_vm15, %v4684_v5  ;;  %v4689_v39 = vadd.f32 %v14625_v59, %v4250_v52  ;;  %4218 = vst.msk [vmem:[#allocation4 + $0x110] sm:$0xff] %vm18974_vm15, %v4182_v25  ;;  %v4180_v41 = vadd.f32 %v4133_v17, %v3740_v36  ;;  %v4736_v17 = vld [vmem:[#allocation4 + $0x28] sm:$0xff] }
 0x20c   : > { %v4248_v38 = vld [vmem:[#allocation4 + $0xe0] sm:$0xff]  ;;  %v14592_v54 = vpop.f32.mrf.mxu1  ;;  %v14629_v24 = vpop.f32.mrf.mxu0 }
 0x20d   : > { %4725 = vst.msk [vmem:[#allocation4 + $0xf0] sm:$0xff] %vm18974_vm15, %v4689_v39  ;;  %v4687_v27 = vadd.f32 %v4628_v6, %v4248_v38  ;;  %4216 = vst.msk [vmem:[#allocation4 + $0x100] sm:$0xff] %vm18974_vm15, %v4180_v41  ;;  %v4183_v49 = vadd.f32 %v14592_v54, %v3743_v32  ;;  %v4741_v54 = vld [vmem:[#allocation4 + $0x50] sm:$0xff] }
 0x20e   : > { %v4251_v8 = vld [vmem:[#allocation4 + $0xf8] sm:$0xff]  ;;  %v4136_v33 = vpop.f32.mrf.mxu1  ;;  %v4644_v45 = vpop.f32.mrf.mxu0 }
 0x20f   : > { %4723 = vst.msk [vmem:[#allocation4 + $0xe0] sm:$0xff] %vm18974_vm15, %v4687_v27  ;;  %v4690_v29 = vadd.f32 %v14626_v18, %v4251_v8  ;;  %4219 = vst.msk [vmem:[#allocation4 + $0x118] sm:$0xff] %vm18974_vm15, %v4183_v49  ;;  %v4181_v61 = vadd.f32 %v4136_v33, %v3741_v10  ;;  %v4739_v33 = vld [vmem:[#allocation4 + $0x40] sm:$0xff] }
 0x210   : > { %v4249_v46 = vld [vmem:[#allocation4 + $0xe8] sm:$0xff]  ;;  %v14635_v31 = vpop.f32.mrf.mxu1  ;;  %v14630_v9 = vpop.f32.mrf.mxu0 }
 0x211   : > { %4726 = vst.msk [vmem:[#allocation4 + $0xf8] sm:$0xff] %vm18974_vm15, %v4690_v29  ;;  %v4688_v16 = vadd.f32 %v4631_v19, %v4249_v46  ;;  %4217 = vst.msk [vmem:[#allocation4 + $0x108] sm:$0xff] %vm18974_vm15, %v4181_v61  ;;  %v5306_v50 = vadd.f32 %v14635_v31, %v4733_v62  ;;  %v17255_v62 = vld [vmem:[%s18951_s2] ss:$0 sm:$0xff] }
 0x212   : > { %v4254_v55 = vld [vmem:[#allocation4 + $0x110] sm:$0xff]  ;;  %v5161_v0 = vpop.f32.mrf.mxu1  ;;  %v4647_v42 = vpop.f32.mrf.mxu0 }
 0x213   : > { %4724 = vst.msk [vmem:[#allocation4 + $0xe8] sm:$0xff] %vm18974_vm15, %v4688_v16  ;;  %v4693_v53 = vadd.f32 %v14629_v24, %v4254_v55  ;;  %5342 = vst.msk [vmem:[#allocation4 + $0x10] sm:$0xff] %vm18974_vm15, %v5306_v50  ;;  %v5304_v40 = vadd.f32 %v5161_v0, %v4731_v63 }
 0x214   : > { %v4252_v20 = vld [vmem:[#allocation4 + $0x100] sm:$0xff]  ;;  %v14636_v37 = vpop.f32.mrf.mxu1  ;;  %v14673_v26 = vpop.f32.mrf.mxu0 }
 0x215   : > { %4729 = vst.msk [vmem:[#allocation4 + $0x110] sm:$0xff] %vm18974_vm15, %v4693_v53  ;;  %v4691_v23 = vadd.f32 %v4644_v45, %v4252_v20  ;;  %5340 = vst.msk [vmem:[#allocation4] sm:$0xff] %vm18974_vm15, %v5304_v40  ;;  %v5307_v22 = vadd.f32 %v14636_v37, %v4734_v60  ;;  %v4740_v53 = vld [vmem:[#allocation4 + $0x48] sm:$0xff] }
 0x216   : > { %v4255_v28 = vld [vmem:[#allocation4 + $0x118] sm:$0xff]  ;;  %v5164_v2 = vpop.f32.mrf.mxu1  ;;  %v5673_v14 = vpop.f32.mrf.mxu0 }
 0x217   : > { %4727 = vst.msk [vmem:[#allocation4 + $0x100] sm:$0xff] %vm18974_vm15, %v4691_v23  ;;  %v4694_v44 = vadd.f32 %v14630_v9, %v4255_v28  ;;  %5343 = vst.msk [vmem:[#allocation4 + $0x18] sm:$0xff] %vm18974_vm15, %v5307_v22  ;;  %v5305_v58 = vadd.f32 %v5164_v2, %v4732_v57  ;;  %v4742_v9 = vld [vmem:[#allocation4 + $0x58] sm:$0xff] }
 0x218   : > { %v4253_v4 = vld [vmem:[#allocation4 + $0x108] sm:$0xff]  ;;  %v14639_v59 = vpop.f32.mrf.mxu1  ;;  %v14674_v51 = vpop.f32.mrf.mxu0  ;;  %v17262_v2 = vld [vmem:[#allocation3] sm:$0xff]  }
 0x219   : > { %4730 = vst.msk [vmem:[#allocation4 + $0x118] sm:$0xff] %vm18974_vm15, %v4694_v44  ;;  %v4692_v30 = vadd.f32 %v4647_v42, %v4253_v4  ;;  %5341 = vst.msk [vmem:[#allocation4 + $0x8] sm:$0xff] %vm18974_vm15, %v5305_v58  ;;  %v5310_v1 = vadd.f32 %v14639_v59, %v4737_v35  ;;  %v4745_v4 = vld [vmem:[#allocation4 + $0x70] sm:$0xff] }
 0x21a   : > { %v5378_v3 = vld [vmem:[#allocation4 + $0x10] sm:$0xff]  ;;  %v5177_v6 = vpop.f32.mrf.mxu1  ;;  %v5676_v13 = vpop.f32.mrf.mxu0 }
 0x21b   : > { %4728 = vst.msk [vmem:[#allocation4 + $0x108] sm:$0xff] %vm18974_vm15, %v4692_v30  ;;  %v5818_v43 = vadd.f32 %v14673_v26, %v5378_v3  ;;  %5346 = vst.msk [vmem:[#allocation4 + $0x30] sm:$0xff] %vm18974_vm15, %v5310_v1  ;;  %v5308_v11 = vadd.f32 %v5177_v6, %v4735_v15 }
 0x21c   : > { %v5376_v21 = vld [vmem:[#allocation4] sm:$0xff]  ;;  %v14640_v18 = vpop.f32.mrf.mxu1  ;;  %v14677_v5 = vpop.f32.mrf.mxu0 }
 0x21d   : > { %5854 = vst.msk [vmem:[#allocation4 + $0x10] sm:$0xff] %vm18974_vm15, %v5818_v43  ;;  %v5816_v25 = vadd.f32 %v5673_v14, %v5376_v21  ;;  %5344 = vst.msk [vmem:[#allocation4 + $0x20] sm:$0xff] %vm18974_vm15, %v5308_v11  ;;  %v5311_v52 = vadd.f32 %v14640_v18, %v4738_v56 }
 0x21e   : > { %v5379_v36 = vld [vmem:[#allocation4 + $0x18] sm:$0xff]  ;;  %v5180_v19 = vpop.f32.mrf.mxu1  ;;  %v5689_v39 = vpop.f32.mrf.mxu0 }
 0x21f   : > { %5852 = vst.msk [vmem:[#allocation4] sm:$0xff] %vm18974_vm15, %v5816_v25  ;;  %v5819_v41 = vadd.f32 %v14674_v51, %v5379_v36  ;;  %5347 = vst.msk [vmem:[#allocation4 + $0x38] sm:$0xff] %vm18974_vm15, %v5311_v52  ;;  %v5309_v38 = vadd.f32 %v5180_v19, %v4736_v17  ;;  %v7297_v25 = vshll.u32 %v17262_v2, 16  ;;  %v4746_v19 = vld [vmem:[#allocation4 + $0x78] sm:$0xff] }
 0x220   : > { %v5377_v32 = vld [vmem:[#allocation4 + $0x8] sm:$0xff]  ;;  %v14643_v24 = vpop.f32.mrf.mxu1  ;;  %v14678_v27 = vpop.f32.mrf.mxu0 }
 0x221   : > { %5855 = vst.msk [vmem:[#allocation4 + $0x18] sm:$0xff] %vm18974_vm15, %v5819_v41  ;;  %v5817_v49 = vadd.f32 %v5676_v13, %v5377_v32  ;;  %5345 = vst.msk [vmem:[#allocation4 + $0x28] sm:$0xff] %vm18974_vm15, %v5309_v38  ;;  %v5314_v8 = vadd.f32 %v14643_v24, %v4741_v54  ;;  %v4743_v13 = vld [vmem:[#allocation4 + $0x60] sm:$0xff] }
 0x222   : > { %v5382_v10 = vld [vmem:[#allocation4 + $0x30] sm:$0xff]  ;;  %v5193_v45 = vpop.f32.mrf.mxu1  ;;  %v5692_v29 = vpop.f32.mrf.mxu0 }
 0x223   : > { %5853 = vst.msk [vmem:[#allocation4 + $0x8] sm:$0xff] %vm18974_vm15, %v5817_v49  ;;  %v5822_v61 = vadd.f32 %v14677_v5, %v5382_v10  ;;  %5350 = vst.msk [vmem:[#allocation4 + $0x50] sm:$0xff] %vm18974_vm15, %v5314_v8  ;;  %v5312_v46 = vadd.f32 %v5193_v45, %v4739_v33 }
 0x224   : > { %v5380_v31 = vld [vmem:[#allocation4 + $0x20] sm:$0xff]  ;;  %v14644_v16 = vpop.f32.mrf.mxu1  ;;  %v14681_v50 = vpop.f32.mrf.mxu0 }
 0x225   : > { %5858 = vst.msk [vmem:[#allocation4 + $0x30] sm:$0xff] %vm18974_vm15, %v5822_v61  ;;  %v5820_v55 = vadd.f32 %v5689_v39, %v5380_v31  ;;  %5348 = vst.msk [vmem:[#allocation4 + $0x40] sm:$0xff] %vm18974_vm15, %v5312_v46  ;;  %v5315_v63 = vadd.f32 %v14644_v16, %v4742_v9 }
 0x226   : > { %v5889_v0 = vld [vmem:[#allocation4] sm:$0xff]  ;;  %v5383_v42 = vld [vmem:[#allocation4 + $0x38] sm:$0xff]  ;;  %v5196_v40 = vpop.f32.mrf.mxu1  ;;  %v5705_v20 = vpop.f32.mrf.mxu0 }
 0x227   : > { %v5897_v60 = vadd.f32 %v17255_v62, %v5889_v0  ;;  %5856 = vst.msk [vmem:[#allocation4 + $0x20] sm:$0xff] %vm18974_vm15, %v5820_v55  ;;  %v5823_v37 = vadd.f32 %v14678_v27, %v5383_v42  ;;  %5351 = vst.msk [vmem:[#allocation4 + $0x58] sm:$0xff] %vm18974_vm15, %v5315_v63  ;;  %v5313_v26 = vadd.f32 %v5196_v40, %v4740_v53  ;;  %v4744_v27 = vld [vmem:[#allocation4 + $0x68] sm:$0xff]  ;;  %v7295_v55 = vshrl.u32 %v17262_v2, 16  ;;  %v5935_v0 = vld [vmem:[#allocation3 + $0x8] sm:$0xe] }
 0x228   : > { %v5944_v23 = vld [vmem:[#allocation4 + $0x12] sm:$0xff]  ;;  %v5381_v22 = vld [vmem:[#allocation4 + $0x28] sm:$0xff]  ;;  %v14647_v28 = vpop.f32.mrf.mxu1  ;;  %v14682_v57 = vpop.f32.mrf.mxu0 }
 0x229   : > { %vm5899_vm9 = vcmp.ge.f32.partialorder %v5897_v60, 0.0  ;;  %v5901_v14 = vmul.f32 0.1, %v5897_v60  ;;  %v5946_v44 = vadd.f32 %v17255_v62, %v5944_v23  ;;  %5859 = vst.msk [vmem:[#allocation4 + $0x38] sm:$0xff] %vm18974_vm15, %v5823_v37  ;;  %v5821_v58 = vadd.f32 %v5692_v29, %v5381_v22  ;;  %5349 = vst.msk [vmem:[#allocation4 + $0x48] sm:$0xff] %vm18974_vm15, %v5313_v26 }
 0x22a   : > { %v5890_v35 = vld [vmem:[#allocation4 + $0x8] sm:$0xff]  ;;  %v5386_v59 = vld [vmem:[#allocation4 + $0x50] sm:$0xff]  ;;  %v5318_v51 = vadd.f32 %v14647_v28, %v4745_v4  ;;  %v5209_v30 = vpop.f32.mrf.mxu1  ;;  %v5708_v1 = vpop.f32.mrf.mxu0 }
 0x22b   : > { %v5903_v3 = vsel %vm5899_vm9, %v5897_v60, %v5901_v14  ;;  %vm5948_vm4 = vcmp.ge.f32.partialorder %v5946_v44, 0.0  ;;  %v5950_v15 = vmul.f32 0.1, %v5946_v44  ;;  %v5898_v6 = vadd.f32 %v17255_v62, %v5890_v35  ;;  %5857 = vst.msk [vmem:[#allocation4 + $0x28] sm:$0xff] %vm18974_vm15, %v5821_v58 }
 0x22c   : > { %v13817_v43 = vpack.c.bf16 %v5903_v3, %v5903_v3  ;;  %v5826_v11 = vadd.f32 %v14681_v50, %v5386_v59  ;;  %5354 = vst.msk [vmem:[#allocation4 + $0x70] sm:$0xff] %vm18974_vm15, %v5318_v51  ;;  %v5384_v21 = vld [vmem:[#allocation4 + $0x40] sm:$0xff]  ;;  %v5316_v56 = vadd.f32 %v5209_v30, %v4743_v13  ;;  %v14648_v18 = vpop.f32.mrf.mxu1  ;;  %v17270_v5 = vpop.f32.mrf.mxu0 }
 0x22d   : > { %v5952_v52 = vsel %vm5948_vm4, %v5946_v44, %v5950_v15  ;;  %vm5900_vm9 = vcmp.ge.f32.partialorder %v5898_v6, 0.0  ;;  %v5902_v36 = vmul.f32 0.1, %v5898_v6  ;;  %v5824_v17 = vadd.f32 %v5705_v20, %v5384_v21 }
 0x22e   : > { %v5912_v39 = vshrl.u32 %v13817_v43, 16  ;;  %v5915_v41 = vshll.u32 %v13817_v43, 16  ;;  %v17273_v38 = vpack.c.bf16 %v5952_v52, %v5952_v52  ;;  %v5945_v32 = vld [vmem:[#allocation4 + $0x1a] sm:$0xff]  ;;  %5862 = vst.msk [vmem:[#allocation4 + $0x50] sm:$0xff] %vm18974_vm15, %v5826_v11  ;;  %5352 = vst.msk [vmem:[#allocation4 + $0x60] sm:$0xff] %vm18974_vm15, %v5316_v56  ;;  %v5319_v24 = vadd.f32 %v14648_v18, %v4746_v19  ;;  %v5212_v49 = vpop.f32.mrf.mxu1  ;;  %v17277_v8 = vpop.f32.mrf.mxu0 }
 0x22f   : > { %v5387_v54 = vld [vmem:[#allocation4 + $0x58] sm:$0xff]  ;;  %v5904_v10 = vsel %vm5900_vm9, %v5898_v6, %v5902_v36  ;;  %v5947_v33 = vadd.f32 %v17255_v62, %v5945_v32  ;;  %5860 = vst.msk [vmem:[#allocation4 + $0x40] sm:$0xff] %vm18974_vm15, %v5824_v17  ;;  %v5317_v29 = vadd.f32 %v5212_v49, %v4744_v27  ;;  %vm19017_vm4 = vsmask.f32 7942 }
 0x230   : > { %v5827_v45 = vadd.f32 %v14682_v57, %v5387_v54  ;;  %v5914_v61 = vrot.slane %v5912_v39, 6  ;;  %v5917_v46 = vrot.slane %v5915_v41, 7  ;;  %v6042_v31 = vld [vmem:[#allocation4 + $0x36] sm:$0xff]  ;;  %5355 = vst.msk [vmem:[#allocation4 + $0x78] sm:$0xff] %vm18974_vm15, %v5319_v24  ;;  %v5385_v9 = vld [vmem:[#allocation4 + $0x48] sm:$0xff]  ;;  %v17282_v16 = vpop.f32.mrf.mxu1  ;;  %v17284_v50 = vpop.f32.mrf.mxu0  ;;  %vm17289_vm9 = vmand %vm5933_vm6, %vm19017_vm4  ;;  %v13818_v42 = vpack.c.bf16 %v5904_v10, %v5904_v10 }
 0x231   : > { %vm5949_vm14 = vcmp.ge.f32.partialorder %v5947_v33, 0.0  ;;  %v5951_v53 = vmul.f32 0.1, %v5947_v33  ;;  %v6044_v40 = vadd.f32 %v17255_v62, %v6042_v31  ;;  %5353 = vst.msk [vmem:[#allocation4 + $0x68] sm:$0xff] %vm18974_vm15, %v5317_v29  ;;  %v5961_v60 = vshrl.u32 %v17273_v38, 16 }
 0x232   : > { %5863 = vst.msk [vmem:[#allocation4 + $0x58] sm:$0xff] %vm18974_vm15, %v5827_v45  ;;  %v5918_v20 = vor.u32 %v5917_v46, %v5914_v61  ;;  %v5993_v37 = vld [vmem:[#allocation4 + $0x24] sm:$0xff]  ;;  %v5994_v26 = vld [vmem:[#allocation4 + $0x2c] sm:$0xff]  ;;  %v5825_v23 = vadd.f32 %v5708_v1, %v5385_v9  ;;  %v17297_v22 = vpop.f32.mrf.mxu1  ;;  %v17299_v28 = vpop.f32.mrf.mxu0  ;;  %v7299_v57 = vrot.slane %v7297_v25, 1  ;;  %v5921_v2 = vshrl.u32 %v13818_v42, 16 }
 0x233   : > { %v5924_v14 = vshll.u32 %v13818_v42, 16  ;;  %v5953_v44 = vsel %vm5949_vm14, %v5947_v33, %v5951_v53  ;;  %vm6046_vm6 = vcmp.ge.f32.partialorder %v6044_v40, 0.0  ;;  %v5964_v4 = vshll.u32 %v17273_v38, 16  ;;  %v5390_v38 = vld [vmem:[#allocation4 + $0x70] sm:$0xff] }
 0x234   : > { %v5936_v58 = vsel %vm17289_vm9, %v5918_v20, %v5935_v0  ;;  %v17304_v35 = vpack.c.bf16 %v5953_v44, %v5953_v44  ;;  %v6048_v59 = vmul.f32 0.1, %v6044_v40  ;;  %5861 = vst.msk [vmem:[#allocation4 + $0x48] sm:$0xff] %vm18974_vm15, %v5825_v23  ;;  %v17307_v51 = vpop.f32.mrf.mxu1  ;;  %v17309_v30 = vpop.f32.mrf.mxu0  ;;  %v5923_v1 = vrot.slane %v5921_v2, 6 }
 0x235   : > { %5937 = vst [vmem:[#allocation3 + $0x8] sm:$0xe] %v5936_v58  ;;  %v5926_v3 = vrot.slane %v5924_v14, 7  ;;  %v5995_v15 = vadd.f32 %v17255_v62, %v5993_v37  ;;  %v5996_v6 = vadd.f32 %v17255_v62, %v5994_v26  ;;  %v6089_v13 = vld [vmem:[#allocation4 + $0x50] sm:$0xff]  ;;  %v5919_v43 = vrot.slane %v5918_v20, 4 }
 0x236   : > { %v17313_v11 = vrot.slane %v5961_v60, 5  ;;  %v6050_v21 = vsel %vm6046_vm6, %v6044_v40, %v6048_v59  ;;  %v6091_v56 = vadd.f32 %v17255_v62, %v6089_v13  ;;  %v17317_v18 = vpop.f32.mrf.mxu1  ;;  %v17319_v25 = vpop.f32.mrf.mxu0  ;;  %v6043_v17 = vld [vmem:[#allocation4 + $0x3e] sm:$0xff]  ;;  %v17325_v19 = vrot.slane %v5964_v4, 6 }
 0x237   : > { %v17321_v52 = vor.u32 %v5926_v3, %v5923_v1  ;;  %v17323_v36 = vpack.c.bf16 %v6050_v21, %v6050_v21  ;;  %vm5997_vm14 = vcmp.ge.f32.partialorder %v5995_v15, 0.0  ;;  %vm5998_vm4 = vcmp.ge.f32.partialorder %v5996_v6, 0.0  ;;  %v4749_v3 = vld [vmem:[#allocation4 + $0x90] sm:$0xff] }
 0x238   : > { %v5999_v39 = vmul.f32 0.1, %v5995_v15  ;;  %v6000_v41 = vmul.f32 0.1, %v5996_v6  ;;  %v17327_v32 = vpop.f32.mrf.mxu1  ;;  %vm5982_vm6 = vcmask 519170   ;;  %v17329_v54 = vor.u32 %v7299_v57, %v7295_v55  ;;  %v17340_v46 = vpop.f32.mrf.mxu0 }
 0x239   : > { %v5928_v24 = vsel %vm15882_vm7, %v5919_v43, %v17321_v52  ;;  %v5970_v27 = vshrl.u32 %v17304_v35, 16  ;;  %v6059_v49 = vshrl.u32 %v17323_v36, 16  ;;  %vm6093_vm8 = vcmp.ge.f32.partialorder %v6091_v56, 0.0 }
 0x23a   : > { %5938 = vst.msk [vmem:[#allocation3 + $0xc] sm:$0xf] %vm18972_vm5, %v5928_v24  ;;  %v6001_v10 = vsel %vm5997_vm14, %v5995_v15, %v5999_v39  ;;  %v6002_v33 = vsel %vm5998_vm4, %v5996_v6, %v6000_v41  ;;  %v6095_v45 = vmul.f32 0.1, %v6091_v56  ;;  %v6045_v29 = vadd.f32 %v17255_v62, %v6043_v17  ;;  %v17338_v61 = vpop.f32.mrf.mxu1  ;;  %v17352_v58 = vpop.f32.mrf.mxu0  ;;  %v5388_v15 = vld [vmem:[#allocation4 + $0x60] sm:$0xff]  ;;  %v5391_v39 = vld [vmem:[#allocation4 + $0x78] sm:$0xff] }
 0x23b   : > { %v5973_v31 = vshll.u32 %v17304_v35, 16  ;;  %v13821_v9 = vpack.c.bf16 %v6001_v10, %v6001_v10  ;;  %v13822_v55 = vpack.c.bf16 %v6002_v33, %v6002_v33  ;;  %v6088_v0 = vld [vmem:[#allocation4 + $0x48] sm:$0xff]  ;;  %v5830_v42 = vadd.f32 %v17270_v5, %v5390_v38  ;;  %v17363_v6 = vld [vmem:[%s18952_s3 + $0x50] sm:$0xff]  }
 0x23c   : > { %v6097_v53 = vsel %vm6093_vm8, %v6091_v56, %v6095_v45  ;;  %vm6047_vm2 = vcmp.ge.f32.partialorder %v6045_v29, 0.0  ;;  %v6049_v40 = vmul.f32 0.1, %v6045_v29  ;;  %v6090_v20 = vadd.f32 %v17255_v62, %v6088_v0  ;;  %v17345_v60 = vpop.f32.mrf.mxu1  ;;  %v4747_v17 = vld [vmem:[#allocation4 + $0x80] sm:$0xff]  ;;  %v5389_v10 = vld [vmem:[#allocation4 + $0x68] sm:$0xff] }
 0x23d   : > { %v17347_v37 = vrot.slane %v5970_v27, 5  ;;  %v17349_v26 = vrot.slane %v6059_v49, 7  ;;  %v6010_v23 = vshll.u32 %v13821_v9, 16  ;;  %v6013_v57 = vshrl.u32 %v13821_v9, 16  ;;  %5866 = vst.msk [vmem:[#allocation4 + $0x70] sm:$0xff] %vm18974_vm15, %v5830_v42  ;;  %v4748_v0 = vld [vmem:[#allocation4 + $0x88] sm:$0xff]  ;;  %v17376_v42 = vpop.f32.mrf.mxu0 }
 0x23e   : > { %vm6031_vm14 = vcmask 519171   ;;  %v6019_v2 = vshll.u32 %v13822_v55, 16  ;;  %v6023_v14 = vshrl.u32 %v13822_v55, 16  ;;  %v13826_v44 = vpack.c.bf16 %v6097_v53, %v6097_v53  ;;  %v17354_v4 = vpop.f32.mrf.mxu1  ;;  %v4750_v55 = vld [vmem:[#allocation4 + $0x98] sm:$0xff] }
 0x23f   : > { %v6051_v5 = vsel %vm6047_vm2, %v6045_v29, %v6049_v40  ;;  %v17356_v35 = vrot.slane %v6010_v23, 5  ;;  %v6015_v59 = vrot.slane %v6013_v57, 4  ;;  %vm6092_vm8 = vcmp.ge.f32.partialorder %v6090_v20, 0.0 }
 0x240   : > { %v17358_v1 = vpack.c.bf16 %v6051_v5, %v6051_v5  ;;  %v17365_v13 = vrot.slane %v5973_v31, 6  ;;  %v6114_v21 = vshrl.u32 %v13826_v44, 16  ;;  %v6094_v56 = vmul.f32 0.1, %v6090_v20  ;;  %v14659_v41 = vpop.f32.mrf.mxu1  ;;  %v4752_v5 = vld [vmem:[#allocation4 + $0xa8] sm:$0xff] }
 0x241   : > { %vm5988_vm2 = vcmask 518144   ;;  %v6016_v38 = vor.u32 %v6015_v59, %v17356_v35  ;;  %v6117_v24 = vshll.u32 %v13826_v44, 16  ;;  %v5322_v49 = vadd.f32 %v17282_v16, %v4749_v3  ;;  %v15376_v33 = vld [vmem:[#allocation3 + $0x8] sm:$0xff]   ;;  %v4757_v3 = vld [vmem:[#allocation4 + $0xd0] sm:$0xff] }
 0x242   : > { %v6067_v27 = vshrl.u32 %v17358_v1, 16  ;;  %v17372_v29 = vrot.slane %v6019_v2, 5  ;;  %v6096_v31 = vsel %vm6092_vm8, %v6090_v20, %v6094_v56  ;;  %v5828_v9 = vadd.f32 %v17277_v8, %v5388_v15  ;;  %v5257_v53 = vpop.f32.mrf.mxu1  ;;  %v4753_v2 = vld [vmem:[#allocation4 + $0xb0] sm:$0xff]  ;;  %v4751_v44 = vld [vmem:[#allocation4 + $0xa0] sm:$0xff]  ;;  %v4754_v20 = vld [vmem:[#allocation4 + $0xb8] sm:$0xff]  ;;  %14716 = vmatmul.mubr.msk.bf16.vlgmr.msra.gmra.mxu1 %vm18974_vm15, %v15376_v33 }
 0x243   : > { %v17378_v40 = vrot.slane %v6023_v14, 4  ;;  %v6070_v16 = vshll.u32 %v17358_v1, 16  ;;  %5358 = vst.msk [vmem:[#allocation4 + $0x90] sm:$0xff] %vm18974_vm15, %v5322_v49  ;;  %v5320_v57 = vadd.f32 %v17297_v22, %v4747_v17  ;;  %vm19020_vm4 = vsmask.f32 7946  ;;  %14796 = vmatpush3.bf16.msra.mxu1 %v17186_v7  ;;  %v17401_v56 = vld [vmem:[%s18952_s3 + $0x48] sm:$0xff]   ;;  %v17429_v49 = vpop.f32.mrf.mxu0 }
 0x244   : > { %v17380_v23 = vrot.slane %v6067_v27, 7  ;;  %vm17388_vm8 = vmand %vm5982_vm6, %vm19020_vm4  ;;  %5864 = vst.msk [vmem:[#allocation4 + $0x60] sm:$0xff] %vm18974_vm15, %v5828_v9  ;;  %v5831_v14 = vadd.f32 %v17284_v50, %v5391_v39  ;;  %v5323_v59 = vadd.f32 %v17307_v51, %v4750_v55  ;;  %v5829_v22 = vadd.f32 %v17299_v28, %v5389_v10  ;;  %v14660_v15 = vpop.f32.mrf.mxu1  ;;  %v5984_v7 = vld [vmem:[#allocation3 + $0x10] sm:$0xc]  ;;  %14797 = vmatprep.subr.bf16.mxu1 %v17363_v6  ;;  %v4755_v10 = vld [vmem:[#allocation4 + $0xc0] sm:$0xff] }
 0x245   : > { %v5321_v1 = vadd.f32 %v17317_v18, %v4748_v0  ;;  %v17403_v17 = vrot.slane %v6016_v38, 4  ;;  %v17405_v27 = vrot.slane %v6114_v21, 6  ;;  %v17407_v50 = vrot.slane %v6117_v24, 7  ;;  %5356 = vst.msk [vmem:[#allocation4 + $0x80] sm:$0xff] %vm18974_vm15, %v5320_v57  ;;  %v17418_v18 = vld [vmem:[#allocation3 + $0x8] sm:$0xff]   ;;  %v4758_v57 = vld [vmem:[#allocation4 + $0xd8] sm:$0xff] }
 0x246   : > { %v17409_v51 = vpack.c.bf16 %v6096_v31, %v6096_v31  ;;  %vm19023_vm6 = vsmask.f32 1280  ;;  %5867 = vst.msk [vmem:[#allocation4 + $0x78] sm:$0xff] %vm18974_vm15, %v5831_v14  ;;  %5359 = vst.msk [vmem:[#allocation4 + $0x98] sm:$0xff] %vm18974_vm15, %v5323_v59  ;;  %v5326_v21 = vadd.f32 %v17327_v32, %v4753_v2  ;;  %v5324_v39 = vadd.f32 %v17338_v61, %v4751_v44  ;;  %v5260_v33 = vpop.f32.mrf.mxu1  ;;  %v4756_v14 = vld [vmem:[#allocation4 + $0xc8] sm:$0xff] }
 0x247   : > { %vm17414_vm4 = vmand %vm337_vm1, %vm19023_vm6  ;;  %5865 = vst.msk [vmem:[#allocation4 + $0x68] sm:$0xff] %vm18974_vm15, %v5829_v22  ;;  %v5327_v38 = vadd.f32 %v17345_v60, %v4754_v20  ;;  %v5325_v24 = vadd.f32 %v17354_v4, %v4752_v5  ;;  %v17432_v31 = vor.u32 %v6070_v16, %v17380_v23  ;;  %v5330_v55 = vadd.f32 %v14659_v41, %v4757_v3  ;;  %v5941_v32 = vld [vmem:[#allocation3 + $0x10] sm:$0x3]  ;;  %v4761_v41 = vld [vmem:[#allocation4 + $0xf0] sm:$0xff]  ;;  %v17464_v22 = vpop.f32.mrf.mxu0 }
 0x248   : > { %5357 = vst.msk [vmem:[#allocation4 + $0x88] sm:$0xff] %vm18974_vm15, %v5321_v1  ;;  %v5328_v0 = vadd.f32 %v5257_v53, %v4755_v10  ;;  %5362 = vst.msk [vmem:[#allocation4 + $0xb0] sm:$0xff] %vm18974_vm15, %v5326_v21  ;;  %v5331_v61 = vadd.f32 %v14660_v15, %v4758_v57  ;;  %v5329_v60 = vadd.f32 %v5260_v33, %v4756_v14  ;;  %v5929_v4 = vrot.slane %v17321_v52, 4  ;;  %v14663_v53 = vpop.f32.mrf.mxu1  ;;  %v17461_v20 = vld [vmem:[%s18952_s3 + $0x40] sm:$0xff]   ;;  %v4759_v3 = vld [vmem:[#allocation4 + $0xe0] sm:$0xff] }
 0x249   : > { %5360 = vst.msk [vmem:[#allocation4 + $0xa0] sm:$0xff] %vm18974_vm15, %v5324_v39  ;;  %5363 = vst.msk [vmem:[#allocation4 + $0xb8] sm:$0xff] %vm18974_vm15, %v5327_v38  ;;  %v5967_v16 = vor.u32 %v17325_v19, %v17313_v11  ;;  %14798 = vmatpush3.bf16.msra.mxu1 %v17363_v6  ;;  %vm19026_vm1 = vsmask.f32 7950  ;;  %v6105_v44 = vshrl.u32 %v17409_v51, 16  ;;  %v17454_v52 = vor.u32 %v17365_v13, %v17347_v37  ;;  %v4762_v57 = vld [vmem:[#allocation4 + $0xf8] sm:$0xff] }
 0x24a   : > { %5361 = vst.msk [vmem:[#allocation4 + $0xa8] sm:$0xff] %vm18974_vm15, %v5325_v24  ;;  %vm17445_vm6 = vmand %vm6031_vm14, %vm19026_vm1  ;;  %v5334_v11 = vadd.f32 %v14663_v53, %v4761_v41  ;;  %v7302_v19 = vshll.u32 %v17418_v18, 16  ;;  %v6033_v6 = vld [vmem:[#allocation3 + $0x18] sm:$0x8]  ;;  %14799 = vmatprep.subr.bf16.mxu1 %v17401_v56  ;;  %v6108_v5 = vshll.u32 %v17409_v51, 16  ;;  %v5942_v37 = vsel %vm17414_vm4, %v5929_v4, %v5941_v32  ;;  %v5273_v15 = vpop.f32.mrf.mxu1 }
 0x24b   : > { %5366 = vst.msk [vmem:[#allocation4 + $0xd0] sm:$0xff] %vm18974_vm15, %v5330_v55  ;;  %5364 = vst.msk [vmem:[#allocation4 + $0xc0] sm:$0xff] %vm18974_vm15, %v5328_v0  ;;  %v5394_v59 = vld [vmem:[#allocation4 + $0x90] sm:$0xff]  ;;  %v5968_v13 = vrot.slane %v5967_v16, 4  ;;  %v5985_v1 = vsel %vm17388_vm8, %v5967_v16, %v5984_v7  ;;  %v6133_v21 = vld [vmem:[#allocation4 + $0x5a] sm:$0xff]  ;;  %v5978_v38 = vrot.slane %v17454_v52, 4  ;;  %v5332_v10 = vadd.f32 %v5273_v15, %v4759_v3 }
 0x24c   : > { %5367 = vst.msk [vmem:[#allocation4 + $0xd8] sm:$0xff] %vm18974_vm15, %v5331_v61  ;;  %5365 = vst.msk [vmem:[#allocation4 + $0xc8] sm:$0xff] %vm18974_vm15, %v5329_v60  ;;  %v5834_v39 = vadd.f32 %v17309_v30, %v5394_v59  ;;  %v17475_v24 = vrot.slane %v7302_v19, 1  ;;  %vm19029_vm14 = vsmask.f32 2304  ;;  %v6135_v55 = vadd.f32 %v17255_v62, %v6133_v21  ;;  %v5392_v0 = vld [vmem:[#allocation4 + $0x80] sm:$0xff]  ;;  %v14664_v14 = vpop.f32.mrf.mxu1 }
 0x24d   : > { %5943 = vst [vmem:[#allocation3 + $0x10] sm:$0x3] %v5942_v37  ;;  %5986 = vst [vmem:[#allocation3 + $0x10] sm:$0xc] %v5985_v1  ;;  %v5990_v7 = vld [vmem:[#allocation3 + $0x18] sm:$0x7]  ;;  %v5977_v30 = vsel %vm15921_vm13, %v5968_v13, %v17454_v52  ;;  %v6022_v32 = vsel %vm15949_vm0, %v17403_v17, %v17372_v29  ;;  %v6034_v61 = vsel %vm17445_vm6, %v17356_v35, %v6033_v6  ;;  %14800 = vmatpush3.bf16.msra.mxu1 %v17401_v56  ;;  %v5756_v6 = vpop.f32.mrf.mxu0 }
 0x24e   : > { %5370 = vst.msk [vmem:[#allocation4 + $0xf0] sm:$0xff] %vm18974_vm15, %v5334_v11  ;;  %vm17479_vm1 = vmand %vm5988_vm2, %vm19029_vm14  ;;  %v15422_v60 = vld [vmem:[%s18952_s3 + $0x98] sm:$0xff]   ;;  %v17498_v4 = vrot.slane %v6105_v44, 6  ;;  %v6179_v16 = vld [vmem:[#allocation4 + $0x74] sm:$0xff]  ;;  %v5832_v52 = vadd.f32 %v17319_v25, %v5392_v0  ;;  %v7305_v35 = vsel %vm18973_vm3, %v17329_v54, %v17475_v24  ;;  %v5335_v56 = vadd.f32 %v14664_v14, %v4762_v57  ;;  %14801 = vmatprep.subr.bf16.mxu1 %v17461_v20 }
 0x24f   : > { %v6134_v41 = vld [vmem:[#allocation4 + $0x62] sm:$0xff]  ;;  %v6178_v53 = vld [vmem:[#allocation4 + $0x6c] sm:$0xff]  ;;  %5870 = vst.msk [vmem:[#allocation4 + $0x90] sm:$0xff] %vm18974_vm15, %v5834_v39  ;;  %5368 = vst.msk [vmem:[#allocation4 + $0xe0] sm:$0xff] %vm18974_vm15, %v5332_v10  ;;  %vm6137_vm2 = vcmp.ge.f32.partialorder %v6135_v55, 0.0  ;;  %v6181_v44 = vadd.f32 %v17255_v62, %v6179_v16  ;;  %14759 = vmatprep.mubr.msk.bf16.mxu0 %vm18974_vm15, %v7305_v35  ;;  %v5991_v15 = vsel %vm17479_vm1, %v5978_v38, %v5990_v7  ;;  %v14697_v14 = vpop.f32.mrf.mxu0 }
 0x250   : > { %5987 = vst.msk [vmem:[#allocation3 + $0x14] sm:$0xf] %vm18972_vm5, %v5977_v30  ;;  %6035 = vst [vmem:[#allocation3 + $0x18] sm:$0x8] %v6034_v61  ;;  %v6139_v17 = vmul.f32 0.1, %v6135_v55  ;;  %v6136_v25 = vadd.f32 %v17255_v62, %v6134_v41  ;;  %v6180_v54 = vadd.f32 %v17255_v62, %v6178_v53 }
 0x251   : > { %6036 = vst.msk [vmem:[#allocation3 + $0x1c] sm:$0xf] %vm18972_vm5, %v6022_v32  ;;  %v5395_v11 = vld [vmem:[#allocation4 + $0x98] sm:$0xff]  ;;  %v5393_v19 = vld [vmem:[#allocation4 + $0x88] sm:$0xff]  ;;  %v5398_v13 = vld [vmem:[#allocation4 + $0xb0] sm:$0xff]  ;;  %vm6183_vm14 = vcmp.ge.f32.partialorder %v6181_v44, 0.0  ;;  %14802 = vmatpush3.bf16.msra.mxu1 %v17461_v20 }
 0x252   : > { %5868 = vst.msk [vmem:[#allocation4 + $0x80] sm:$0xff] %vm18974_vm15, %v5832_v52  ;;  %v5835_v59 = vadd.f32 %v17340_v46, %v5395_v11  ;;  %v5833_v37 = vadd.f32 %v17352_v58, %v5393_v19  ;;  %v5396_v1 = vld [vmem:[#allocation4 + $0xa0] sm:$0xff]  ;;  %v5399_v3 = vld [vmem:[#allocation4 + $0xb8] sm:$0xff]  ;;  %5371 = vst.msk [vmem:[#allocation4 + $0xf8] sm:$0xff] %vm18974_vm15, %v5335_v56  ;;  %v6141_v21 = vsel %vm6137_vm2, %v6135_v55, %v6139_v17  ;;  %v6185_v39 = vmul.f32 0.1, %v6181_v44 }
 0x253   : > { %vm6138_vm10 = vcmp.ge.f32.partialorder %v6136_v25, 0.0  ;;  %v5397_v10 = vld [vmem:[#allocation4 + $0xa8] sm:$0xff]  ;;  %5992 = vst [vmem:[#allocation3 + $0x18] sm:$0x7] %v5991_v15  ;;  %v13827_v46 = vpack.c.bf16 %v6141_v21, %v6141_v21  ;;  %v6140_v0 = vmul.f32 0.1, %v6136_v25  ;;  %14883 = vmatprep.subr.bf16.mxu1 %v15422_v60  ;;  %v5838_v7 = vadd.f32 %v17376_v42, %v5398_v13 }
 0x254   : > { %vm6182_vm11 = vcmp.ge.f32.partialorder %v6180_v54, 0.0  ;;  %v6184_v58 = vmul.f32 0.1, %v6180_v54  ;;  %5871 = vst.msk [vmem:[#allocation4 + $0x98] sm:$0xff] %vm18974_vm15, %v5835_v59  ;;  %5869 = vst.msk [vmem:[#allocation4 + $0x88] sm:$0xff] %vm18974_vm15, %v5833_v37  ;;  %v5402_v30 = vld [vmem:[#allocation4 + $0xd0] sm:$0xff]  ;;  %v6187_v38 = vsel %vm6183_vm14, %v6181_v44, %v6185_v39  ;;  %v5836_v55 = vadd.f32 %v17429_v49, %v5396_v1 }
 0x255   : > { %v5839_v57 = vadd.f32 %v17464_v22, %v5399_v3  ;;  %v6150_v32 = vshrl.u32 %v13827_v46, 16  ;;  %v6153_v20 = vshll.u32 %v13827_v46, 16  ;;  %v13830_v61 = vpack.c.bf16 %v6187_v38, %v6187_v38  ;;  %v5400_v41 = vld [vmem:[#allocation4 + $0xc0] sm:$0xff]  ;;  %5874 = vst.msk [vmem:[#allocation4 + $0xb0] sm:$0xff] %vm18974_vm15, %v5838_v7  ;;  %v5403_v1 = vld [vmem:[#allocation4 + $0xd8] sm:$0xff] }
 0x256   : > { %v6142_v16 = vsel %vm6138_vm10, %v6136_v25, %v6140_v0  ;;  %v6186_v52 = vsel %vm6182_vm11, %v6180_v54, %v6184_v58  ;;  %v6266_v35 = vld [vmem:[#allocation4 + $0x90] sm:$0xff]  ;;  %5872 = vst.msk [vmem:[#allocation4 + $0xa0] sm:$0xff] %vm18974_vm15, %v5836_v55  ;;  %v5837_v42 = vadd.f32 %v5756_v6, %v5397_v10  ;;  %v5842_v49 = vadd.f32 %v14697_v14, %v5402_v30  ;;  %v5769_v6 = vpop.f32.mrf.mxu0  ;;  %v5404_v45 = vld [vmem:[#allocation4 + $0xe0] sm:$0xff] }
 0x257   : > { %v13828_v53 = vpack.c.bf16 %v6142_v16, %v6142_v16  ;;  %5875 = vst.msk [vmem:[#allocation4 + $0xb8] sm:$0xff] %vm18974_vm15, %v5839_v57  ;;  %v15378_v22 = vld [vmem:[#allocation3 + $0x10] sm:$0xff]   ;;  %v6110_v60 = vrot.slane %v6108_v5, 7  ;;  %v6204_v56 = vshll.u32 %v13830_v61, 16  ;;  %v6208_v17 = vshrl.u32 %v13830_v61, 16 }
 0x258   : > { %v7306_v44 = vshrl.u32 %v17418_v18, 16  ;;  %v13829_v19 = vpack.c.bf16 %v6186_v52, %v6186_v52  ;;  %v6268_v54 = vadd.f32 %v17255_v62, %v6266_v35  ;;  %5873 = vst.msk [vmem:[#allocation4 + $0xa8] sm:$0xff] %vm18974_vm15, %v5837_v42  ;;  %5878 = vst.msk [vmem:[#allocation4 + $0xd0] sm:$0xff] %vm18974_vm15, %v5842_v49  ;;  %14719 = vmatprep.mubr.msk.bf16.mxu1 %vm18974_vm15, %v15378_v22  ;;  %v17538_v37 = vrot.slane %v6150_v32, 5  ;;  %v14698_v14 = vpop.f32.mrf.mxu0 }
 0x259   : > { %v6159_v25 = vshrl.u32 %v13828_v53, 16  ;;  %v6162_v11 = vshll.u32 %v13828_v53, 16  ;;  %v6223_v59 = vld [vmem:[#allocation4 + $0x7e] sm:$0xff]  ;;  %v17540_v51 = vrot.slane %v6153_v20, 6  ;;  %v5840_v13 = vadd.f32 %v5769_v6, %v5400_v41 }
 0x25a   : > { %v6225_v5 = vadd.f32 %v17255_v62, %v6223_v59  ;;  %v15382_v3 = vld [vmem:[#allocation3 + $0x18] sm:$0xff]   ;;  %v17543_v15 = vrot.slane %v6204_v56, 5  ;;  %v17545_v21 = vrot.slane %v6208_v17, 4  ;;  %vm6270_vm11 = vcmp.ge.f32.partialorder %v6268_v54, 0.0 }
 0x25b   : > { %v6161_v39 = vrot.slane %v6159_v25, 5  ;;  %v6164_v10 = vrot.slane %v6162_v11, 6  ;;  %v6267_v46 = vld [vmem:[#allocation4 + $0x98] sm:$0xff]  ;;  %v6224_v0 = vld [vmem:[#allocation4 + $0x86] sm:$0xff]  ;;  %v6272_v58 = vmul.f32 0.1, %v6268_v54  ;;  %14720 = vmatmul.mubr.msk.bf16.gmra.mxu1 %vm18974_vm15, %v15382_v3  ;;  %v17550_v38 = vor.u32 %v6110_v60, %v17498_v4 }
 0x25c   : > { %vm6227_vm10 = vcmp.ge.f32.partialorder %v6225_v5, 0.0  ;;  %v6229_v30 = vmul.f32 0.1, %v6225_v5  ;;  %5876 = vst.msk [vmem:[#allocation4 + $0xc0] sm:$0xff] %vm18974_vm15, %v5840_v13  ;;  %v6195_v7 = vshll.u32 %v13829_v19, 16  ;;  %v6198_v55 = vshrl.u32 %v13829_v19, 16 }
 0x25d   : > { %v6269_v57 = vadd.f32 %v17255_v62, %v6267_v46  ;;  %v6274_v32 = vsel %vm6270_vm11, %v6268_v54, %v6272_v58  ;;  %v6226_v61 = vadd.f32 %v17255_v62, %v6224_v0  ;;  %v5843_v41 = vadd.f32 %v14698_v14, %v5403_v1  ;;  %v17568_v3 = vld [vmem:[#allocation3 + $0x10] sm:$0xff]   ;;  %v5772_v58 = vpop.f32.mrf.mxu0 }
 0x25e   : > { %v6231_v20 = vsel %vm6227_vm10, %v6225_v5, %v6229_v30  ;;  %v6356_v16 = vld [vmem:[#allocation4 + $0xb4] sm:$0xff]  ;;  %v17554_v53 = vor.u32 %v6164_v10, %v6161_v39  ;;  %v13833_v52 = vpack.c.bf16 %v6274_v32, %v6274_v32  ;;  %v17560_v22 = vrot.slane %v6195_v7, 5 }
 0x25f   : > { %v17556_v35 = vpack.c.bf16 %v6231_v20, %v6231_v20  ;;  %vm6271_vm2 = vcmp.ge.f32.partialorder %v6269_v57, 0.0  ;;  %v6273_v42 = vmul.f32 0.1, %v6269_v57  ;;  %vm6228_vm14 = vcmp.ge.f32.partialorder %v6226_v61, 0.0  ;;  %5879 = vst.msk [vmem:[#allocation4 + $0xd8] sm:$0xff] %vm18974_vm15, %v5843_v41  ;;  %v6311_v25 = vld [vmem:[#allocation4 + $0xa2] sm:$0xff] }
 0x260   : > { %v6230_v4 = vmul.f32 0.1, %v6226_v61  ;;  %v6358_v49 = vadd.f32 %v17255_v62, %v6356_v16  ;;  %v6283_v60 = vshrl.u32 %v13833_v52, 16  ;;  %v6286_v56 = vshll.u32 %v13833_v52, 16  ;;  %v6312_v11 = vld [vmem:[#allocation4 + $0xaa] sm:$0xff] }
 0x261   : > { %v6240_v17 = vshrl.u32 %v17556_v35, 16  ;;  %v6275_v19 = vsel %vm6271_vm2, %v6269_v57, %v6273_v42  ;;  %v17564_v5 = vrot.slane %v6198_v55, 4  ;;  %v6313_v46 = vadd.f32 %v17255_v62, %v6311_v25  ;;  %v14701_v25 = vpop.f32.mrf.mxu0 }
 0x262   : > { %v6232_v54 = vsel %vm6228_vm14, %v6226_v61, %v6230_v4  ;;  %vm6360_vm11 = vcmp.ge.f32.partialorder %v6358_v49, 0.0  ;;  %v6362_v59 = vmul.f32 0.1, %v6358_v49  ;;  %v13834_v1 = vpack.c.bf16 %v6275_v19, %v6275_v19 }
 0x263   : > { %v17566_v13 = vrot.slane %v6240_v17, 7  ;;  %v17570_v39 = vpack.c.bf16 %v6232_v54, %v6232_v54  ;;  %v6314_v0 = vadd.f32 %v17255_v62, %v6312_v11  ;;  %v17574_v30 = vrot.slane %v6283_v60, 6  ;;  %v6357_v61 = vld [vmem:[#allocation4 + $0xbc] sm:$0xff]  ;;  %v5276_v17 = vpop.f32.mrf.mxu1 }
 0x264   : > { %v6364_v10 = vsel %vm6360_vm11, %v6358_v49, %v6362_v59  ;;  %v17576_v7 = vrot.slane %v6286_v56, 7  ;;  %v6292_v57 = vshrl.u32 %v13834_v1, 16  ;;  %v6295_v14 = vshll.u32 %v13834_v1, 16  ;;  %v5401_v1 = vld [vmem:[#allocation4 + $0xc8] sm:$0xff] }
 0x265   : > { %v6248_v32 = vshrl.u32 %v17570_v39, 16  ;;  %v13837_v20 = vpack.c.bf16 %v6364_v10, %v6364_v10  ;;  %vm6315_vm10 = vcmp.ge.f32.partialorder %v6313_v46, 0.0  ;;  %vm6316_vm2 = vcmp.ge.f32.partialorder %v6314_v0, 0.0  ;;  %v14667_v6 = vpop.f32.mrf.mxu1 }
 0x266   : > { %v6317_v52 = vmul.f32 0.1, %v6313_v46  ;;  %v6444_v42 = vld [vmem:[#allocation4 + $0xd8] sm:$0xff]  ;;  %v17582_v4 = vrot.slane %v6292_v57, 6  ;;  %v6318_v56 = vmul.f32 0.1, %v6314_v0  ;;  %v6359_v19 = vadd.f32 %v17255_v62, %v6357_v61 }
 0x267   : > { %v6373_v49 = vshll.u32 %v13837_v20, 16  ;;  %v6376_v60 = vshrl.u32 %v13837_v20, 16  ;;  %v6446_v54 = vadd.f32 %v17255_v62, %v6444_v42  ;;  %v7310_v59 = vshll.u32 %v17568_v3, 16 }
 0x268   : > { %19032 = vst [vmem:[#allocation9_spill] sm:$0xff] %v17582_v4  ;;  %v6319_v11 = vsel %vm6315_vm10, %v6313_v46, %v6317_v52  ;;  %v17587_v10 = vrot.slane %v6295_v14, 7  ;;  %v17589_v16 = vrot.slane %v6248_v32, 7  ;;  %v6320_v57 = vsel %vm6316_vm2, %v6314_v0, %v6318_v56  ;;  %v4760_v52 = vld [vmem:[#allocation4 + $0xe8] sm:$0xff]  ;;  %v5785_v32 = vpop.f32.mrf.mxu0 }
 0x269   : > { %v7308_v20 = vor.u32 %v7306_v44, %v17475_v24  ;;  %v13835_v41 = vpack.c.bf16 %v6319_v11, %v6319_v11  ;;  %v13836_v46 = vpack.c.bf16 %v6320_v57, %v6320_v57  ;;  %vm6361_vm11 = vcmp.ge.f32.partialorder %v6359_v19, 0.0  ;;  %v5406_v24 = vld [vmem:[#allocation4 + $0xf0] sm:$0xff]  ;;  %v15394_v44 = vld [vmem:[%s18952_s3 + $0x70] sm:$0xff]  }
 0x26a   : > { %19033 = vst [vmem:[#allocation10_spill] sm:$0xff] %v17587_v10  ;;  %v6363_v61 = vmul.f32 0.1, %v6359_v19  ;;  %vm6448_vm10 = vcmp.ge.f32.partialorder %v6446_v54, 0.0  ;;  %v6450_v62 = vmul.f32 0.1, %v6446_v54  ;;  %v5841_v14 = vadd.f32 %v5772_v58, %v5401_v1 }
 0x26b   : > { %v17595_v42 = vrot.slane %v7310_v59, 1  ;;  %v17597_v9 = vrot.slane %v6373_v49, 5  ;;  %v17599_v0 = vrot.slane %v6376_v60, 4  ;;  %v6328_v56 = vshrl.u32 %v13835_v41, 16  ;;  %v6079_v1 = vld [vmem:[#allocation3 + $0x24] sm:$0xf] }
 0x26c   : > { %v6331_v18 = vshll.u32 %v13835_v41, 16  ;;  %v6365_v11 = vsel %vm6361_vm11, %v6359_v19, %v6363_v61  ;;  %v6452_v57 = vsel %vm6448_vm10, %v6446_v54, %v6450_v62  ;;  %5877 = vst.msk [vmem:[#allocation4 + $0xc8] sm:$0xff] %vm18974_vm15, %v5841_v14  ;;  %v5333_v58 = vadd.f32 %v5276_v17, %v4760_v52  ;;  %v4765_v49 = vld [vmem:[#allocation4 + $0x110] sm:$0xff]  ;;  %v17617_v54 = vld [vmem:[%s18952_s3 + $0x68] sm:$0xff]   ;;  %v15592_v14 = vld [vmem:[%s18952_s3 + $0x78] sm:$0xff]  }
 0x26d   : > { %19034 = vst [vmem:[#allocation11_spill] sm:$0xff] %v17597_v9  ;;  %19035 = vst [vmem:[#allocation12_spill] sm:$0xff] %v17599_v0  ;;  %v7313_v59 = vsel %vm18973_vm3, %v7308_v20, %v17595_v42  ;;  %v6330_v60 = vrot.slane %v6328_v56, 5  ;;  %v6337_v43 = vshrl.u32 %v13836_v46, 16  ;;  %v6340_v41 = vshll.u32 %v13836_v46, 16  ;;  %v5289_v56 = vpop.f32.mrf.mxu1  ;;  %v4763_v10 = vld [vmem:[#allocation4 + $0x100] sm:$0xff] }
 0x26e   : > { %v6333_v55 = vrot.slane %v6331_v18, 6  ;;  %14760 = vmatmul.mubr.msk.bf16.vlgmr.msra.gmra.mxu0 %vm18974_vm15, %v7313_v59  ;;  %vm19036_vm2 = vsmask.f32 7938  ;;  %v13838_v17 = vpack.c.bf16 %v6365_v11, %v6365_v11  ;;  %v13841_v20 = vpack.c.bf16 %v6452_v57, %v6452_v57  ;;  %5369 = vst.msk [vmem:[#allocation4 + $0xe8] sm:$0xff] %vm18974_vm15, %v5333_v58  ;;  %v6039_v61 = vld [vmem:[#allocation3 + $0x20] sm:$0xf]  ;;  %v14702_v11 = vpop.f32.mrf.mxu0 }
 0x26f   : > { %vm17610_vm14 = vmand %vm18972_vm5, %vm19036_vm2  ;;  %v6026_v46 = vor.u32 %v17378_v40, %v17372_v29  ;;  %v19039_v52 = vshll.u32 %v17323_v36, 16  ;;  %14840 = vmatpush3.bf16.msra.mxu0 %v15592_v14  ;;  %v17628_v18 = vld [vmem:[#allocation3 + $0x18] sm:$0xff]   ;;  %v19040_v57 = vshll.u32 %v17556_v35, 16  ;;  %v5846_v40 = vadd.f32 %v14701_v25, %v5406_v24 }
 0x270   : > { %v17635_v29 = vor.u32 %v6333_v55, %v6330_v60  ;;  %v5338_v58 = vadd.f32 %v14667_v6, %v4765_v49  ;;  %14841 = vmatprep.subr.bf16.mxu0 %v15394_v44  ;;  %v6382_v36 = vshll.u32 %v13838_v17, 16  ;;  %v6461_v0 = vshrl.u32 %v13841_v20, 16 }
 0x271   : > { %v6064_v62 = vor.u32 %v19039_v52, %v17349_v26  ;;  %v17633_v59 = vor.u32 %v19040_v57, %v17566_v13  ;;  %v6386_v52 = vshrl.u32 %v13838_v17, 16  ;;  %v6464_v9 = vshll.u32 %v13841_v20, 16  ;;  %5882 = vst.msk [vmem:[#allocation4 + $0xf0] sm:$0xff] %vm18974_vm15, %v5846_v40  ;;  %v4766_v17 = vld [vmem:[#allocation4 + $0x118] sm:$0xff]  ;;  %v14668_v20 = vpop.f32.mrf.mxu1  ;;  %v15416_v40 = vld [vmem:[%s18952_s3 + $0x60] sm:$0xff]  }
 0x272   : > { %vm19041_vm11 = vsmask.f32 3328  ;;  %v17643_v4 = vrot.slane %v6337_v43, 5  ;;  %v6027_v35 = vrot.slane %v6026_v46, 4  ;;  %5374 = vst.msk [vmem:[#allocation4 + $0x110] sm:$0xff] %vm18974_vm15, %v5338_v58  ;;  %v5844_v6 = vadd.f32 %v5785_v32, %v5404_v45  ;;  %v5407_v43 = vld [vmem:[#allocation4 + $0xf8] sm:$0xff]  ;;  %v5788_v46 = vpop.f32.mrf.mxu0 }
 0x273   : > { %vm17639_vm10 = vmand %vm18972_vm5, %vm19041_vm11  ;;  %v6080_v55 = vsel %vm17610_vm14, %v6064_v62, %v6079_v1  ;;  %v17650_v24 = vrot.slane %v6340_v41, 6  ;;  %v17652_v49 = vrot.slane %v6382_v36, 5  ;;  %v17654_v60 = vrot.slane %v6386_v52, 4  ;;  %14842 = vmatpush3.bf16.msra.mxu0 %v15394_v44  ;;  %v6401_v1 = vld [vmem:[#allocation4 + $0xc6] sm:$0xff]  ;;  %v6402_v62 = vld [vmem:[#allocation4 + $0xce] sm:$0xff] }
 0x274   : > { %6081 = vst [vmem:[#allocation3 + $0x24] sm:$0xf] %v6080_v55  ;;  %v6040_v57 = vsel %vm17639_vm10, %v6027_v35, %v6039_v61  ;;  %5880 = vst.msk [vmem:[#allocation4 + $0xe0] sm:$0xff] %vm18974_vm15, %v5844_v6  ;;  %v5336_v45 = vadd.f32 %v5289_v56, %v4763_v10  ;;  %v7314_v32 = vshrl.u32 %v17568_v3, 16  ;;  %v7318_v41 = vshll.u32 %v17628_v18, 16  ;;  %14843 = vmatprep.subr.bf16.mxu0 %v17617_v54 }
 0x275   : > { %vm19044_vm2 = vsmask.f32 256  ;;  %vm19045_vm11 = vcmask 516096   ;;  %v17671_v61 = vrot.slane %v6461_v0, 6  ;;  %v17673_v58 = vrot.slane %v6464_v9, 7  ;;  %v5405_v55 = vld [vmem:[#allocation4 + $0xe8] sm:$0xff] }
 0x276   : > { %vm17667_vm5 = vmand %vm19045_vm11, %vm19044_vm2  ;;  %v17678_v3 = vld [vmem:[%s18951_s2] ss:$0 sm:$0xff]  ;;  %6041 = vst [vmem:[#allocation3 + $0x20] sm:$0xf] %v6040_v57  ;;  %v7316_v36 = vor.u32 %v7314_v32, %v17595_v42  ;;  %v7320_v52 = vrot.slane %v7318_v41, 1  ;;  %v5847_v35 = vadd.f32 %v14702_v11, %v5407_v43  ;;  %v5339_v0 = vadd.f32 %v14668_v20, %v4766_v17 }
 0x277   : > { %19048 = vst [vmem:[#allocation13_spill] sm:$0xff] %v17671_v61  ;;  %19049 = vst [vmem:[#allocation14_spill] sm:$0xff] %v17673_v58  ;;  %v6403_v10 = vadd.f32 %v17678_v3, %v6401_v1  ;;  %v6404_v56 = vadd.f32 %v17678_v3, %v6402_v62  ;;  %v6085_v9 = vld [vmem:[#allocation3 + $0x2c] sm:$0x1]  ;;  %v6126_v6 = vld [vmem:[#allocation3 + $0x2c] sm:$0xe]  ;;  %v6389_v25 = vor.u32 %v17654_v60, %v17652_v49  ;;  %v5292_v1 = vpop.f32.mrf.mxu1  ;;  %v14705_v61 = vpop.f32.mrf.mxu0  ;;  %14844 = vmatpush3.bf16.msra.mxu0 %v17617_v54 }
 0x278   : > { %5372 = vst.msk [vmem:[#allocation4 + $0x100] sm:$0xff] %vm18974_vm15, %v5336_v45  ;;  %v7321_v57 = vsel %vm18973_vm3, %v7316_v36, %v7320_v52  ;;  %v7322_v42 = vshrl.u32 %v17628_v18, 16  ;;  %5883 = vst.msk [vmem:[#allocation4 + $0xf8] sm:$0xff] %vm18974_vm15, %v5847_v35  ;;  %v5845_v11 = vadd.f32 %v5788_v46, %v5405_v55  ;;  %14845 = vmatprep.subr.bf16.mxu0 %v15416_v40  ;;  %v15431_v60 = vld [vmem:[%s18952_s3 + $0xb8] sm:$0xff]   ;;  %v19050_v54 = vrot.slane %v17349_v26, 4 }
 0x279   : > { %vm6405_vm2 = vcmp.ge.f32.partialorder %v6403_v10, 0.0  ;;  %vm6406_vm11 = vcmp.ge.f32.partialorder %v6404_v56, 0.0  ;;  %v6407_v58 = vmul.f32 0.1, %v6403_v10  ;;  %v6408_v62 = vmul.f32 0.1, %v6404_v56  ;;  %14763 = vmatprep.mubr.msk.bf16.mxu0 %vm18974_vm15, %v7321_v57 }
 0x27a   : > { %5375 = vst.msk [vmem:[#allocation4 + $0x118] sm:$0xff] %vm18974_vm15, %v5339_v0  ;;  %v6073_v17 = vsel %vm16003_vm12, %v19050_v54, %v17432_v31  ;;  %v19051_v18 = vrot.slane %v17380_v23, 4  ;;  %v6127_v46 = vsel %vm17289_vm9, %v17550_v38, %v6126_v6  ;;  %v4764_v45 = vld [vmem:[#allocation4 + $0x108] sm:$0xff]  ;;  %v5410_v32 = vld [vmem:[#allocation4 + $0x110] sm:$0xff]  ;;  %5881 = vst.msk [vmem:[#allocation4 + $0xe8] sm:$0xff] %vm18974_vm15, %v5845_v11  ;;  %v6112_v55 = vrot.slane %v17550_v38, 4  ;;  %v5801_v6 = vpop.f32.mrf.mxu0 }
 0x27b   : > { %v6409_v43 = vsel %vm6405_vm2, %v6403_v10, %v6407_v58  ;;  %v6175_v41 = vld [vmem:[#allocation3 + $0x3c] sm:$0x7]  ;;  %v6410_v58 = vsel %vm6406_vm11, %v6404_v56, %v6408_v62  ;;  %vm19052_vm2 = vcmask 519168   ;;  %6128 = vst [vmem:[#allocation3 + $0x2c] sm:$0xe] %v6127_v46  ;;  %v5337_v26 = vadd.f32 %v5292_v1, %v4764_v45  ;;  %v6445_v0 = vld [vmem:[#allocation4 + $0xe0] sm:$0xff]  ;;  %14846 = vmatpush3.bf16.msra.mxu0 %v15416_v40 }
 0x27c   : > { %v6086_v20 = vsel %vm17667_vm5, %v19051_v18, %v6085_v9  ;;  %v17708_v10 = vpack.c.bf16 %v6409_v43, %v6409_v43  ;;  %6082 = vst.msk [vmem:[#allocation3 + $0x28] sm:$0xf] %vm19052_vm2, %v6073_v17  ;;  %v5850_v23 = vadd.f32 %v14705_v61, %v5410_v32  ;;  %v6130_v31 = vld [vmem:[#allocation3 + $0x34] sm:$0x3]  ;;  %v6171_v36 = vld [vmem:[#allocation3 + $0x34] sm:$0xc]  ;;  %v17712_v35 = vpack.c.bf16 %v6410_v58, %v6410_v58  ;;  %v14706_v45 = vpop.f32.mrf.mxu0 }
 0x27d   : > { %6087 = vst [vmem:[#allocation3 + $0x2c] sm:$0x1] %v6086_v20  ;;  %v6120_v56 = vor.u32 %v17407_v50, %v17405_v27  ;;  %v6156_v9 = vor.u32 %v17540_v51, %v17538_v37  ;;  %v17719_v62 = vrot.slane %v6389_v25, 4  ;;  %v15383_v61 = vld [vmem:[#allocation3 + $0x20] sm:$0xff]   ;;  %v6447_v57 = vadd.f32 %v17678_v3, %v6445_v0  ;;  %5373 = vst.msk [vmem:[#allocation4 + $0x108] sm:$0xff] %vm18974_vm15, %v5337_v26 }
 0x27e   : > { %v6418_v1 = vshrl.u32 %v17708_v10, 16  ;;  %v17723_v11 = vld [vmem:[#allocation3 + $0x20] sm:$0xff]   ;;  %5886 = vst.msk [vmem:[#allocation4 + $0x110] sm:$0xff] %vm18974_vm15, %v5850_v23  ;;  %v19053_v27 = vrot.slane %v17554_v53, 4  ;;  %14927 = vmatprep.subr.bf16.mxu0 %v15431_v60  ;;  %v6421_v37 = vshll.u32 %v17708_v10, 16  ;;  %v7324_v51 = vor.u32 %v7322_v42, %v7320_v52  ;;  %14723 = vmatprep.mubr.msk.bf16.mxu1 %vm18974_vm15, %v15383_v61 }
 0x27f   : > { %v6121_v38 = vsel %vm15882_vm7, %v6112_v55, %v6120_v56  ;;  %v6122_v25 = vrot.slane %v6120_v56, 4  ;;  %v6426_v40 = vshrl.u32 %v17712_v35, 16  ;;  %vm6449_vm11 = vcmp.ge.f32.partialorder %v6447_v57, 0.0  ;;  %v5408_v17 = vld [vmem:[#allocation4 + $0x100] sm:$0xff]  ;;  %v6490_v42 = vld [vmem:[#allocation4 + $0xf2] sm:$0xff] }
 0x280   : > { %v6176_v50 = vsel %vm17479_vm1, %v19053_v27, %v6175_v41  ;;  %v6451_v43 = vmul.f32 0.1, %v6447_v57  ;;  %v7326_v54 = vshll.u32 %v17723_v11, 16  ;;  %6129 = vst.msk [vmem:[#allocation3 + $0x30] sm:$0xf] %vm19052_vm2, %v6121_v38  ;;  %v17738_v60 = vrot.slane %v6418_v1, 7 }
 0x281   : > { %6177 = vst [vmem:[#allocation3 + $0x3c] sm:$0x7] %v6176_v50  ;;  %v6429_v52 = vshll.u32 %v17712_v35, 16  ;;  %v6131_v18 = vsel %vm17414_vm4, %v6122_v25, %v6130_v31  ;;  %v6172_v20 = vsel %vm17388_vm8, %v6156_v9, %v6171_v36  ;;  %v5411_v46 = vld [vmem:[#allocation4 + $0x118] sm:$0xff]  ;;  %v6492_v41 = vadd.f32 %v17678_v3, %v6490_v42  ;;  %v6489_v0 = vld [vmem:[#allocation4 + $0xea] sm:$0xff] }
 0x282   : > { %v6453_v32 = vsel %vm6449_vm11, %v6447_v57, %v6451_v43  ;;  %v7328_v58 = vrot.slane %v7326_v54, 1  ;;  %6132 = vst [vmem:[#allocation3 + $0x34] sm:$0x3] %v6131_v18  ;;  %v6157_v26 = vrot.slane %v6156_v9, 4  ;;  %6173 = vst [vmem:[#allocation3 + $0x34] sm:$0xc] %v6172_v20  ;;  %v5848_v56 = vadd.f32 %v5801_v6, %v5408_v17 }
 0x283   : > { %v13842_v23 = vpack.c.bf16 %v6453_v32, %v6453_v32  ;;  %v7330_v55 = vshrl.u32 %v17723_v11, 16  ;;  %v5851_v1 = vadd.f32 %v14706_v45, %v5411_v46  ;;  %v6216_v61 = vld [vmem:[#allocation3 + $0x3c] sm:$0x8]  ;;  %vm6494_vm2 = vcmp.ge.f32.partialorder %v6492_v41, 0.0  ;;  %v5804_v11 = vpop.f32.mrf.mxu0  ;;  %v19077_v35 = vld [vmem:[#allocation14_spill] sm:$0xff] }
 0x284   : > { %v6496_v31 = vmul.f32 0.1, %v6492_v41  ;;  %v7329_v36 = vsel %vm18973_vm3, %v7324_v51, %v7328_v58  ;;  %v6491_v27 = vadd.f32 %v17678_v3, %v6489_v0  ;;  %v15387_v57 = vld [vmem:[#allocation3 + $0x28] sm:$0xff]   ;;  %v19054_v50 = vshll.u32 %v17570_v39, 16  ;;  %5884 = vst.msk [vmem:[#allocation4 + $0x100] sm:$0xff] %vm18974_vm15, %v5848_v56  ;;  %v5409_v6 = vld [vmem:[#allocation4 + $0x108] sm:$0xff] }
 0x285   : > { %v6470_v9 = vshrl.u32 %v13842_v23, 16  ;;  %v6473_v25 = vshll.u32 %v13842_v23, 16  ;;  %14764 = vmatmul.mubr.msk.bf16.gmra.mxu0 %vm18974_vm15, %v7329_v36  ;;  %v15390_v43 = vld [vmem:[#allocation3 + $0x28] sm:$0xff]   ;;  %5887 = vst.msk [vmem:[#allocation4 + $0x118] sm:$0xff] %vm18974_vm15, %v5851_v1  ;;  %v6166_v51 = vsel %vm15921_vm13, %v6157_v26, %v17554_v53  ;;  %14724 = vmatmul.mubr.msk.bf16.gmra.mxu1 %vm18974_vm15, %v15387_v57  ;;  %v5849_v39 = vadd.f32 %v5804_v11, %v5409_v6 }
 0x286   : > { %v6253_v38 = vor.u32 %v19054_v50, %v17589_v16  ;;  %v6498_v54 = vsel %vm6494_vm2, %v6492_v41, %v6496_v31  ;;  %vm6493_vm11 = vcmp.ge.f32.partialorder %v6491_v27, 0.0  ;;  %v6495_v17 = vmul.f32 0.1, %v6491_v27 }
 0x287   : > { %vm19055_vm3 = vcmask 519168   ;;  %v6472_v42 = vrot.slane %v6470_v9, 6  ;;  %v6475_v18 = vrot.slane %v6473_v25, 7  ;;  %v13844_v20 = vpack.c.bf16 %v6498_v54, %v6498_v54  ;;  %5885 = vst.msk [vmem:[#allocation4 + $0x108] sm:$0xff] %vm18974_vm15, %v5849_v39  ;;  %v6220_v9 = vld [vmem:[#allocation3 + $0x44] sm:$0xf] }
 0x288   : > { %6174 = vst.msk [vmem:[#allocation3 + $0x38] sm:$0xf] %vm19055_vm3, %v6166_v51  ;;  %v7334_v46 = vshll.u32 %v15390_v43, 16  ;;  %v6497_v45 = vsel %vm6493_vm11, %v6491_v27, %v6495_v17  ;;  %v7332_v32 = vor.u32 %v7330_v55, %v7328_v58  ;;  %v6217_v53 = vsel %vm17445_vm6, %v17560_v22, %v6216_v61  ;;  %vm19058_vm11 = vmmov %vm19055_vm3 }
 0x289   : > { %v6201_v41 = vor.u32 %v17564_v5, %v17560_v22  ;;  %v17766_v26 = vor.u32 %v6475_v18, %v6472_v42  ;;  %v6515_v23 = vshrl.u32 %v13844_v20, 16  ;;  %v6518_v0 = vshll.u32 %v13844_v20, 16  ;;  %v15389_v1 = vld [vmem:[#allocation3 + $0x30] sm:$0xff]   ;;  %6218 = vst [vmem:[#allocation3 + $0x3c] sm:$0x8] %v6217_v53 }
 0x28a   : > { %v13843_v56 = vpack.c.bf16 %v6497_v45, %v6497_v45  ;;  %v17768_v31 = vld [vmem:[#allocation3 + $0x30] sm:$0xff]   ;;  %v7336_v36 = vrot.slane %v7334_v46, 1  ;;  %v6211_v55 = vor.u32 %v17545_v21, %v17543_v15  ;;  %v19056_v27 = vrot.slane %v17566_v13, 4  ;;  %14727 = vmatprep.mubr.msk.bf16.mxu1 %vm18974_vm15, %v15389_v1 }
 0x28b   : > { %v6202_v58 = vrot.slane %v6201_v41, 4  ;;  %v17778_v22 = vrot.slane %v6426_v40, 7  ;;  %v6478_v5 = vrot.slane %v17766_v26, 4  ;;  %v17781_v57 = vrot.slane %v6515_v23, 5  ;;  %v6534_v25 = vld [vmem:[#allocation4 + $0xfc] sm:$0xff] }
 0x28c   : > { %v6254_v61 = vsel %vm16003_vm12, %v19056_v27, %v6253_v38  ;;  %v7338_v50 = vshrl.u32 %v15390_v43, 16  ;;  %v17787_v21 = vor.u32 %v17650_v24, %v17643_v4  ;;  %v6506_v13 = vshrl.u32 %v13843_v56, 16  ;;  %v6580_v40 = vld [vmem:[#allocation4 + $0x116] sm:$0xff]  ;;  %v6259_v24 = vld [vmem:[#allocation3 + $0x48] sm:$0xf] }
 0x28d   : > { %6262 = vst.msk [vmem:[#allocation3 + $0x4c] sm:$0xf] %vm19055_vm3, %v6254_v61  ;;  %vm19057_vm2 = vsmask.f32 7424  ;;  %v7342_v6 = vshll.u32 %v17768_v31, 16  ;;  %v17791_v11 = vrot.slane %v6518_v0, 6  ;;  %v6536_v43 = vadd.f32 %v17678_v3, %v6534_v25 }
 0x28e   : > { %v7337_v38 = vsel %vm19057_vm2, %v7332_v32, %v7336_v36  ;;  %v6582_v51 = vadd.f32 %v17678_v3, %v6580_v40  ;;  %v6207_v4 = vsel %vm15949_vm0, %v6202_v58, %v17543_v15  ;;  %v6509_v54 = vshll.u32 %v13843_v56, 16  ;;  %v6535_v32 = vld [vmem:[#allocation4 + $0x104] sm:$0xff]  ;;  %v6579_v53 = vld [vmem:[#allocation4 + $0x10e] sm:$0xff] }
 0x28f   : > { %14767 = vmatprep.mubr.msk.bf16.mxu0 %vm18974_vm15, %v7337_v38  ;;  %v7340_v17 = vor.u32 %v7338_v50, %v7336_v36  ;;  %v7344_v39 = vrot.slane %v7342_v6, 1  ;;  %v6212_v42 = vrot.slane %v6211_v55, 4  ;;  %6219 = vst.msk [vmem:[#allocation3 + $0x40] sm:$0xf] %vm19058_vm11, %v6207_v4  ;;  %vm6538_vm3 = vcmp.ge.f32.partialorder %v6536_v43, 0.0 }
 0x290   : > { %v6540_v18 = vmul.f32 0.1, %v6536_v43  ;;  %vm6584_vm2 = vcmp.ge.f32.partialorder %v6582_v51, 0.0  ;;  %v6586_v20 = vmul.f32 0.1, %v6582_v51  ;;  %v6508_v46 = vrot.slane %v6506_v13, 5 }
 0x291   : > { %vm19059_vm15 = vsmask.f32 7424  ;;  %v6221_v41 = vsel %vm17639_vm10, %v6212_v42, %v6220_v9  ;;  %v7346_v15 = vshrl.u32 %v17768_v31, 16  ;;  %vm19060_vm0 = vcmask 523264   ;;  %v15392_v36 = vld [vmem:[#allocation3 + $0x38] sm:$0xff]  }
 0x292   : > { %v7345_v45 = vsel %vm19059_vm15, %v7340_v17, %v7344_v39  ;;  %v6542_v23 = vsel %vm6538_vm3, %v6536_v43, %v6540_v18  ;;  %v6588_v0 = vsel %vm6584_vm2, %v6582_v51, %v6586_v20  ;;  %v6537_v56 = vadd.f32 %v17678_v3, %v6535_v32  ;;  %6222 = vst [vmem:[#allocation3 + $0x44] sm:$0xf] %v6221_v41  ;;  %v15395_v58 = vld [vmem:[#allocation3 + $0x38] sm:$0xff]   ;;  %v6263_v50 = vld [vmem:[#allocation3 + $0x50] sm:$0x1] }
 0x293   : > { %14768 = vmatmul.mubr.msk.bf16.gmra.mxu0 %vm19060_vm0, %v7345_v45  ;;  %v6581_v1 = vadd.f32 %v17678_v3, %v6579_v53  ;;  %v13845_v55 = vpack.c.bf16 %v6542_v23, %v6542_v23  ;;  %v17807_v27 = vpack.c.bf16 %v6588_v0, %v6588_v0  ;;  %v6260_v61 = vsel %vm17610_vm14, %v17633_v59, %v6259_v24 }
 0x294   : > { %v6255_v31 = vrot.slane %v17589_v16, 4  ;;  %vm6539_vm15 = vcmp.ge.f32.partialorder %v6537_v56, 0.0  ;;  %v6541_v9 = vmul.f32 0.1, %v6537_v56  ;;  %vm19061_vm11 = vcmask 523264  }
 0x295   : > { %vm6583_vm0 = vcmp.ge.f32.partialorder %v6581_v1, 0.0  ;;  %v6585_v13 = vmul.f32 0.1, %v6581_v1  ;;  %14728 = vmatmul.mubr.msk.bf16.gmra.mxu1 %vm19061_vm11, %v15392_v36  ;;  %6261 = vst [vmem:[#allocation3 + $0x48] sm:$0xf] %v6260_v61  ;;  %v6511_v3 = vrot.slane %v6509_v54, 6  ;;  %v7348_v51 = vor.u32 %v7346_v15, %v7344_v39  ;;  %vm19063_vm2 = vmmov %vm19061_vm11 }
 0x296   : > { %v6551_v38 = vshll.u32 %v13845_v55, 16  ;;  %v6554_v25 = vshrl.u32 %v13845_v55, 16  ;;  %v6604_v40 = vshrl.u32 %v17807_v27, 16  ;;  %v6543_v6 = vsel %vm6539_vm15, %v6537_v56, %v6541_v9  ;;  %vm19064_vm15 = vmmov %vm19063_vm2  ;;  %v6349_v55 = vld [vmem:[#allocation3 + $0x58] sm:$0xc]  ;;  %v19065_v9 = vld [vmem:[#allocation9_spill] sm:$0xff] }
 0x297   : > { %v6587_v43 = vsel %vm6583_vm0, %v6581_v1, %v6585_v13  ;;  %v7350_v4 = vshll.u32 %v15395_v58, 16  ;;  %v13846_v17 = vpack.c.bf16 %v6543_v6, %v6543_v6  ;;  %v6264_v54 = vsel %vm17667_vm5, %v6255_v31, %v6263_v50  ;;  %v19066_v13 = vld [vmem:[#allocation10_spill] sm:$0xff]  ;;  %vm19067_vm0 = vmmov %vm19063_vm2 }
 0x298   : > { %v17815_v59 = vrot.slane %v6551_v38, 5  ;;  %v6556_v16 = vrot.slane %v6554_v25, 4  ;;  %v17817_v24 = vrot.slane %v6604_v40, 7  ;;  %v17819_v42 = vpack.c.bf16 %v6587_v43, %v6587_v43  ;;  %6265 = vst [vmem:[#allocation3 + $0x50] sm:$0x1] %v6264_v54 }
 0x299   : > { %v7352_v18 = vrot.slane %v7350_v4, 1  ;;  %v6289_v20 = vor.u32 %v17576_v7, %v17574_v30  ;;  %v17828_v39 = vor.u32 %v6421_v37, %v17738_v60  ;;  %v17830_v45 = vor.u32 %v6511_v3, %v6508_v46  ;;  %v15393_v53 = vld [vmem:[#allocation3 + $0x40] sm:$0xff]   ;;  %v6304_v30 = vld [vmem:[#allocation3 + $0x50] sm:$0xe]  ;;  %v6398_v40 = vld [vmem:[#allocation3 + $0x68] sm:$0xf] }
 0x29a   : > { %v6560_v32 = vshll.u32 %v13846_v17, 16  ;;  %v7354_v41 = vshrl.u32 %v15395_v58, 16  ;;  %v15396_v15 = vld [vmem:[#allocation3 + $0x40] sm:$0xff]   ;;  %v6557_v23 = vor.u32 %v6556_v16, %v17815_v59  ;;  %v6611_v0 = vrot.slane %v17817_v24, 4  ;;  %14731 = vmatprep.mubr.msk.bf16.mxu1 %vm19063_vm2, %v15393_v53  ;;  %v6308_v58 = vld [vmem:[#allocation3 + $0x58] sm:$0x3] }
 0x29b   : > { %v6564_v56 = vshrl.u32 %v13846_v17, 16  ;;  %vm19062_vm3 = vsmask.f32 7424  ;;  %v6596_v10 = vshrl.u32 %v17819_v42, 16  ;;  %v7358_v46 = vshll.u32 %v15396_v15, 16 }
 0x29c   : > { %v7353_v1 = vsel %vm19062_vm3, %v7348_v51, %v7352_v18  ;;  %v17835_v7 = vrot.slane %v6560_v32, 5  ;;  %v7356_v37 = vor.u32 %v7354_v41, %v7352_v18  ;;  %v15397_v36 = vld [vmem:[#allocation3 + $0x48] sm:$0xff]   ;;  %v6599_v31 = vshll.u32 %v17819_v42, 16  ;;  %v6394_v25 = vld [vmem:[#allocation3 + $0x60] sm:$0x8] }
 0x29d   : > { %14771 = vmatprep.mubr.msk.bf16.mxu0 %vm19064_vm15, %v7353_v1  ;;  %v6566_v61 = vrot.slane %v6564_v56, 4  ;;  %v6290_v50 = vrot.slane %v6289_v20, 4  ;;  %v6298_v3 = vor.u32 %v19066_v13, %v19065_v9  ;;  %v17843_v38 = vld [vmem:[#allocation3 + $0x48] sm:$0xff]   ;;  %v7360_v6 = vrot.slane %v7358_v46, 1  ;;  %14732 = vmatmul.mubr.msk.bf16.gmra.mxu1 %vm19067_vm0, %v15397_v36  ;;  %v6353_v17 = vld [vmem:[#allocation3 + $0x60] sm:$0x7]  ;;  %vm19071_vm15 = vmmov %vm19067_vm0 }
 0x29e   : > { %v6305_v43 = vsel %vm17289_vm9, %v6289_v20, %v6304_v30  ;;  %v7362_v51 = vshrl.u32 %v15396_v15, 16  ;;  %v19068_v4 = vrot.slane %v17635_v29, 4  ;;  %v6437_v42 = vld [vmem:[#allocation3 + $0x6c] sm:$0xf]  ;;  %v17853_v18 = vrot.slane %v6557_v23, 4  ;;  %v19072_v9 = vld [vmem:[#allocation11_spill] sm:$0xff]  ;;  %vm19074_vm0 = vmmov %vm19062_vm3 }
 0x29f   : > { %v6567_v54 = vor.u32 %v6566_v61, %v17835_v7  ;;  %v6299_v32 = vsel %vm15882_vm7, %v6290_v50, %v6298_v3  ;;  %v6300_v53 = vrot.slane %v6298_v3, 4  ;;  %6306 = vst [vmem:[#allocation3 + $0x50] sm:$0xe] %v6305_v43  ;;  %vm19069_vm11 = vcmask 519168   ;;  %v6486_v23 = vld [vmem:[#allocation3 + $0x7c] sm:$0x3] }
 0x2a0   : > { %v6344_v16 = vsel %vm15921_vm13, %v19068_v4, %v17787_v21  ;;  %v17859_v20 = vrot.slane %v6596_v10, 7  ;;  %v7361_v41 = vsel %vm19062_vm3, %v7356_v37, %v7360_v6  ;;  %vm19070_vm2 = vmmov %vm19069_vm11  ;;  %v7364_v15 = vor.u32 %v7362_v51, %v7360_v6  ;;  %v6527_v1 = vld [vmem:[#allocation3 + $0x7c] sm:$0xc]  ;;  %v6441_v37 = vld [vmem:[#allocation3 + $0x74] sm:$0x1] }
 0x2a1   : > { %6352 = vst.msk [vmem:[#allocation3 + $0x5c] sm:$0xf] %vm19069_vm11, %v6344_v16  ;;  %v7366_v56 = vshll.u32 %v17843_v38, 16  ;;  %v6568_v30 = vrot.slane %v6567_v54, 4  ;;  %14772 = vmatmul.mubr.msk.bf16.gmra.mxu0 %vm19071_vm15, %v7361_v41  ;;  %v6309_v46 = vsel %vm17414_vm4, %v6300_v53, %v6308_v58  ;;  %v6350_v10 = vsel %vm17388_vm8, %v17635_v29, %v6349_v55  ;;  %v6572_v61 = vld [vmem:[#allocation3 + $0x84] sm:$0x8]  ;;  %vm19075_vm11 = vmmov %vm19071_vm15 }
 0x2a2   : > { %6307 = vst.msk [vmem:[#allocation3 + $0x54] sm:$0xf] %vm19070_vm2, %v6299_v32  ;;  %v6345_v36 = vrot.slane %v17787_v21, 4  ;;  %6310 = vst [vmem:[#allocation3 + $0x58] sm:$0x3] %v6309_v46  ;;  %v19073_v13 = vld [vmem:[#allocation12_spill] sm:$0xff]  ;;  %v6395_v6 = vsel %vm17445_vm6, %v19072_v9, %v6394_v25  ;;  %v6399_v58 = vsel %vm17639_vm10, %v17719_v62, %v6398_v40  ;;  %v6438_v21 = vsel %vm17610_vm14, %v17828_v39, %v6437_v42 }
 0x2a3   : > { %v7368_v50 = vrot.slane %v7366_v56, 1  ;;  %6351 = vst [vmem:[#allocation3 + $0x58] sm:$0xc] %v6350_v10  ;;  %v6379_v3 = vor.u32 %v19073_v13, %v19072_v9  ;;  %v6482_v43 = vld [vmem:[#allocation3 + $0x74] sm:$0xe]  ;;  %v6424_v55 = vrot.slane %v17738_v60, 4  ;;  %v6431_v25 = vor.u32 %v6429_v52, %v17778_v22 }
 0x2a4   : > { %v6354_v29 = vsel %vm17479_vm1, %v6345_v36, %v6353_v17  ;;  %6396 = vst [vmem:[#allocation3 + $0x60] sm:$0x8] %v6395_v6  ;;  %6400 = vst [vmem:[#allocation3 + $0x68] sm:$0xf] %v6399_v58  ;;  %v6576_v51 = vld [vmem:[#allocation3 + $0x8c] sm:$0xf]  ;;  %v6601_v62 = vor.u32 %v6599_v31, %v17859_v20  ;;  %v6487_v31 = vsel %vm17414_vm4, %v6478_v5, %v6486_v23  ;;  %vm19078_vm3 = vnez %v18994_v47 }
 0x2a5   : > { %v6615_v4 = vld [vmem:[#allocation3 + $0x90] sm:$0xf]  ;;  %v7369_v40 = vsel %vm19074_vm0, %v7364_v15, %v7368_v50  ;;  %6355 = vst [vmem:[#allocation3 + $0x60] sm:$0x7] %v6354_v29  ;;  %v6380_v16 = vrot.slane %v6379_v3, 4  ;;  %v6433_v17 = vrot.slane %v17778_v22, 4  ;;  %v6432_v60 = vsel %vm16003_vm12, %v6424_v55, %v6431_v25  ;;  %vm19080_vm4 = vmmov %vm19070_vm2 }
 0x2a6   : > { %6439 = vst [vmem:[#allocation3 + $0x6c] sm:$0xf] %v6438_v21  ;;  %v6619_v54 = vld [vmem:[#allocation3 + $0x98] sm:$0x1]  ;;  %14775 = vmatprep.mubr.msk.bf16.mxu0 %vm19075_vm11, %v7369_v40  ;;  %v19076_v39 = vld [vmem:[#allocation13_spill] sm:$0xff]  ;;  %v6528_v42 = vsel %vm17388_vm8, %v17830_v45, %v6527_v1  ;;  %v6521_v28 = vor.u32 %v17791_v11, %v17781_v57  ;;  %v6573_v8 = vsel %vm17445_vm6, %v17815_v59, %v6572_v61  ;;  %vm19079_vm8 = vmmov %vm19070_vm2  ;;  %v7370_v2 = vshrl.u32 %v17843_v38, 16 }
 0x2a7   : > { %v6467_v52 = vor.u32 %v19077_v35, %v19076_v39  ;;  %v6531_v32 = vld [vmem:[#allocation3 + $0x84] sm:$0x7]  ;;  %v6385_v22 = vsel %vm19078_vm3, %v6380_v16, %v17652_v49  ;;  %6440 = vst.msk [vmem:[#allocation3 + $0x70] sm:$0xf] %vm19070_vm2, %v6432_v60  ;;  %v6442_v53 = vsel %vm17667_vm5, %v6433_v17, %v6441_v37  ;;  %6488 = vst [vmem:[#allocation3 + $0x7c] sm:$0x3] %v6487_v31 }
 0x2a8   : > { %6529 = vst [vmem:[#allocation3 + $0x7c] sm:$0xc] %v6528_v42  ;;  %6397 = vst.msk [vmem:[#allocation3 + $0x64] sm:$0xf] %vm19079_vm8, %v6385_v22  ;;  %v6563_v15 = vsel %vm19078_vm3, %v17853_v18, %v17835_v7  ;;  %v6577_v57 = vsel %vm17639_vm10, %v6568_v30, %v6576_v51  ;;  %v6513_v59 = vrot.slane %v17830_v45, 4  ;;  %v6523_v56 = vrot.slane %v6521_v28, 4 }
 0x2a9   : > { %v15398_v5 = vld [vmem:[#allocation3 + $0x50] sm:$0xff]   ;;  %6443 = vst [vmem:[#allocation3 + $0x74] sm:$0x1] %v6442_v53  ;;  %v6468_v41 = vrot.slane %v6467_v52, 4  ;;  %v6483_v49 = vsel %vm17289_vm9, %v6467_v52, %v6482_v43  ;;  %6574 = vst [vmem:[#allocation3 + $0x84] sm:$0x8] %v6573_v8  ;;  %v6616_v63 = vsel %vm17610_vm14, %v6601_v62, %v6615_v4  ;;  %v6620_v45 = vsel %vm17667_vm5, %v6611_v0, %v6619_v54 }
 0x2aa   : > { %v15401_v11 = vld [vmem:[#allocation3 + $0x50] sm:$0xff]   ;;  %6484 = vst [vmem:[#allocation3 + $0x74] sm:$0xe] %v6483_v49  ;;  %6575 = vst.msk [vmem:[#allocation3 + $0x88] sm:$0xf] %vm19080_vm4, %v6563_v15  ;;  %v15402_v47 = vld [vmem:[#allocation3 + $0x58] sm:$0xff]   ;;  %v7372_v7 = vor.u32 %v7370_v2, %v7368_v50  ;;  %v6522_v19 = vsel %vm15921_vm13, %v6513_v59, %v6521_v28  ;;  %v6532_v23 = vsel %vm17479_vm1, %v6523_v56, %v6531_v32 }
 0x2ab   : > { %6578 = vst [vmem:[#allocation3 + $0x8c] sm:$0xf] %v6577_v57  ;;  %vm19081_vm9 = vmmov %vm19075_vm11  ;;  %v6477_v14 = vsel %vm15882_vm7, %v6468_v41, %v17766_v26  ;;  %v7374_v38 = vshll.u32 %v15401_v11, 16  ;;  %v15404_v18 = vld [vmem:[#allocation3 + $0x58] sm:$0xff]   ;;  %v7378_v44 = vshrl.u32 %v15401_v11, 16  ;;  %v15419_v22 = vld [vmem:[#allocation3 + $0x8] sm:$0xff]  }
 0x2ac   : > { %14735 = vmatprep.mubr.msk.bf16.mxu1 %vm19081_vm9, %v15398_v5  ;;  %6617 = vst [vmem:[#allocation3 + $0x90] sm:$0xf] %v6616_v63  ;;  %vm19082_vm6 = vmmov %vm19070_vm2  ;;  %v7382_v26 = vshll.u32 %v15404_v18, 16  ;;  %v7386_v12 = vshrl.u32 %v15404_v18, 16  ;;  %v15418_v31 = vld [vmem:[#allocation3] sm:$0xfe]  }
 0x2ad   : > { %6485 = vst.msk [vmem:[#allocation3 + $0x78] sm:$0xf] %vm19082_vm6, %v6477_v14  ;;  %6621 = vst [vmem:[#allocation3 + $0x98] sm:$0x1] %v6620_v45  ;;  %v7376_v34 = vrot.slane %v7374_v38, 1  ;;  %v15409_v0 = vld [vmem:[#allocation3 + $0x68] sm:$0xff]  }
 0x2ae   : > { %vm19083_vm14 = vmmov %vm19081_vm9  ;;  %6533 = vst [vmem:[#allocation3 + $0x84] sm:$0x7] %v6532_v23  ;;  %v7384_v10 = vrot.slane %v7382_v26, 1  ;;  %v7398_v36 = vshll.u32 %v15409_v0, 16  ;;  %v15407_v13 = vld [vmem:[#allocation3 + $0x68] sm:$0xff]   ;;  %v7402_v16 = vshrl.u32 %v15409_v0, 16 }
 0x2af   : > { %14736 = vmatmul.mubr.msk.bf16.gmra.mxu1 %vm19083_vm14, %v15402_v47  ;;  %vm19084_vm7 = vmmov %vm19070_vm2  ;;  %v15403_v30 = vld [vmem:[#allocation3 + $0x60] sm:$0xff]   ;;  %v7380_v46 = vor.u32 %v7378_v44, %v7376_v34  ;;  %v7944_v5 = vrot.slane %v15418_v31, 1  ;;  %v7945_v15 = vrot.slane %v15419_v22, 1  ;;  %v15423_v57 = vld [vmem:[#allocation3 + $0x10] sm:$0xff]  }
 0x2b0   : > { %6530 = vst.msk [vmem:[#allocation3 + $0x80] sm:$0xf] %vm19084_vm7, %v6522_v19  ;;  %vm19085_vm5 = vmmov %vm19074_vm0  ;;  %v15406_v33 = vld [vmem:[#allocation3 + $0x60] sm:$0xff]   ;;  %v7388_v50 = vor.u32 %v7386_v12, %v7384_v10  ;;  %v7400_v58 = vrot.slane %v7398_v36, 1  ;;  %v15426_v47 = vld [vmem:[#allocation3 + $0x18] sm:$0xff]   ;;  %v7947_v38 = vrot.slane %v15423_v57, 1 }
 0x2b1   : > { %v7377_v1 = vsel %vm19085_vm5, %v7372_v7, %v7376_v34  ;;  %vm19086_vm10 = vmmov %vm19081_vm9  ;;  %v15411_v61 = vld [vmem:[#allocation3 + $0x70] sm:$0xff]   ;;  %v7390_v9 = vshll.u32 %v15406_v33, 16  ;;  %v7394_v6 = vshrl.u32 %v15406_v33, 16  ;;  %v7949_v44 = vrot.slane %v15426_v47, 1  ;;  %v15424_v26 = vld [vmem:[#allocation3 + $0x8] sm:$0xfe]  }
 0x2b2   : > { %14776 = vmatmul.mubr.msk.bf16.gmra.mxu0 %vm19086_vm10, %v7377_v1  ;;  %vm19087_vm13 = vmmov %vm19081_vm9  ;;  %v15408_v3 = vld [vmem:[#allocation3 + $0x70] sm:$0xff]   ;;  %v7406_v43 = vshll.u32 %v15411_v61, 16  ;;  %v7410_v60 = vshrl.u32 %v15411_v61, 16  ;;  %v15420_v35 = vld [vmem:[#allocation3 + $0x88] sm:$0xff]   ;;  %v7404_v52 = vor.u32 %v7402_v16, %v7400_v58 }
 0x2b3   : > { %14739 = vmatprep.mubr.msk.bf16.mxu1 %vm19087_vm13, %v15403_v30  ;;  %vm19088_vm1 = vmmov %vm19074_vm0  ;;  %v7392_v29 = vrot.slane %v7390_v9, 1  ;;  %v7430_v28 = vshll.u32 %v15420_v35, 16  ;;  %v15417_v49 = vld [vmem:[#allocation3 + $0x88] sm:$0xff]   ;;  %v15421_v56 = vld [vmem:[#allocation3 + $0x90] ss:$0 sps:$4 sm:$0x11]  }
 0x2b4   : > { %v7385_v37 = vsel %vm19088_vm1, %v7380_v46, %v7384_v10  ;;  %vm19089_vm15 = vmmov %vm19081_vm9  ;;  %v15414_v21 = vld [vmem:[#allocation3 + $0x78] sm:$0xff]   ;;  %v7408_v62 = vrot.slane %v7406_v43, 1  ;;  %v7434_v19 = vshrl.u32 %v15420_v35, 16  ;;  %v7438_v23 = vshll.u32 %v15421_v56, 16  ;;  %v15425_v34 = vld [vmem:[#allocation3 + $0x10] sm:$0xff]  }
 0x2b5   : > { %14779 = vmatprep.mubr.msk.bf16.mxu0 %vm19089_vm15, %v7385_v37  ;;  %vm19090_vm0 = vmmov %vm19081_vm9  ;;  %v7396_v25 = vor.u32 %v7394_v6, %v7392_v29  ;;  %v7414_v51 = vshll.u32 %v15414_v21, 16  ;;  %v15412_v17 = vld [vmem:[#allocation3 + $0x78] sm:$0xff]   ;;  %v7418_v2 = vshrl.u32 %v15414_v21, 16  ;;  %v7432_v59 = vrot.slane %v7430_v28, 1  ;;  %v15428_v1 = vld [vmem:[#allocation3 + $0x20] sm:$0xff]  }
 0x2b6   : > { %vm19091_vm11 = vmmov %vm19090_vm0  ;;  %v7412_v42 = vor.u32 %v7410_v60, %v7408_v62  ;;  %v15436_v30 = vld [vmem:[%s18952_s3 + $0x90] sm:$0xff]   ;;  %v6607_v46 = vshll.u32 %v17807_v27, 16  ;;  %v7440_v10 = vrot.slane %v7438_v23, 1  ;;  %v8484_v33 = vrot.slane %v15425_v34, 1  ;;  %v15427_v6 = vld [vmem:[#allocation3 + $0x18] sm:$0xff]  }
 0x2b7   : > { %14740 = vmatmul.mubr.msk.bf16.gmra.mxu1 %vm19090_vm0, %v15407_v13  ;;  %vm19092_vm3 = vmmov %vm19088_vm1  ;;  %v15415_v40 = vld [vmem:[#allocation3 + $0x80] sm:$0xff]   ;;  %v7416_v39 = vrot.slane %v7414_v51, 1  ;;  %v7436_v0 = vor.u32 %v7434_v19, %v7432_v59  ;;  %v15430_v36 = vld [vmem:[#allocation3 + $0x28] sm:$0xff]   ;;  %v8483_v9 = vrot.slane %v15424_v26, 1 }
 0x2b8   : > { %14743 = vmatprep.mubr.msk.bf16.mxu1 %vm19091_vm11, %v15408_v3  ;;  %v7393_v55 = vsel %vm19092_vm3, %v7388_v50, %v7392_v29  ;;  %vm19093_vm2 = vmmov %vm19090_vm0  ;;  %v15413_v54 = vld [vmem:[#allocation3 + $0x80] sm:$0xff]   ;;  %v7422_v32 = vshll.u32 %v15415_v40, 16  ;;  %v7426_v11 = vshrl.u32 %v15415_v40, 16  ;;  %v15594_v50 = vld [vmem:[%s18952_s3 + $0x98] sm:$0xff]   ;;  %v6609_v27 = vor.u32 %v6607_v46, %v17817_v24 }
 0x2b9   : > { %vm19094_vm8 = vmmov %vm19088_vm1  ;;  %v7420_v63 = vor.u32 %v7418_v2, %v7416_v39  ;;  %v15446_v13 = vld [vmem:[%s18952_s3 + $0x88] sm:$0xff]   ;;  %v6602_v3 = vrot.slane %v17859_v20, 4  ;;  %v7953_v21 = vrot.slane %v15430_v36, 1  ;;  %v15456_v24 = vld [vmem:[%s18952_s3 + $0x80] sm:$0xff]   ;;  %v8486_v20 = vrot.slane %v15427_v6, 1 }
 0x2ba   : > { %14780 = vmatmul.mubr.msk.bf16.gmra.mxu0 %vm19093_vm2, %v7393_v55  ;;  %v7401_v4 = vsel %vm19094_vm8, %v7396_v25, %v7400_v58  ;;  %vm19095_vm4 = vmmov %vm19090_vm0  ;;  %v7424_v41 = vrot.slane %v7422_v32, 1  ;;  %v7951_v58 = vrot.slane %v15428_v1, 1  ;;  %v15429_v29 = vld [vmem:[#allocation3 + $0x20] sm:$0xff]   ;;  %v15433_v51 = vld [vmem:[#allocation3 + $0x30] sm:$0xff]  }
 0x2bb   : > { %14783 = vmatprep.mubr.msk.bf16.mxu0 %vm19095_vm4, %v7401_v4  ;;  %vm19096_vm9 = vmmov %vm19090_vm0  ;;  %v6610_v55 = vsel %vm16003_vm12, %v6602_v3, %v6609_v27  ;;  %v8488_v4 = vrot.slane %v15429_v29, 1  ;;  %v15441_v40 = vld [vmem:[%s18952_s3 + $0xb0] sm:$0xff]   ;;  %v18004_v60 = vld [vmem:[%s18952_s3 + $0xd8] sm:$0xff]  }
 0x2bc   : > { %vm19097_vm6 = vmmov %vm19090_vm0  ;;  %v7428_v45 = vor.u32 %v7426_v11, %v7424_v41  ;;  %v15434_v35 = vld [vmem:[#allocation3 + $0x30] sm:$0xff]   ;;  %v15439_v11 = vld [vmem:[#allocation3 + $0x40] sm:$0xff]  }
 0x2bd   : > { %vm19098_vm14 = vmmov %vm19088_vm1  ;;  %v15595_v31 = vld [vmem:[%s18952_s3 + $0xb8] sm:$0xff]   ;;  %v8492_v28 = vrot.slane %v15434_v35, 1  ;;  %v15447_v36 = vld [vmem:[#allocation3 + $0x58] sm:$0xff]  }
 0x2be   : > { %v7417_v53 = vsel %vm19098_vm14, %v7412_v42, %v7416_v39  ;;  %vm19099_vm7 = vmmov %vm19088_vm1  ;;  %vm19103_vm1 = vcmask 1046528   ;;  %v15451_v42 = vld [vmem:[%s18952_s3 + $0xa8] sm:$0xff]   ;;  %v15443_v56 = vld [vmem:[#allocation3 + $0x50] sm:$0xff]  }
 0x2bf   : > { %14744 = vmatmul.mubr.msk.bf16.gmra.mxu1 %vm19096_vm9, %v15412_v17  ;;  %v7409_v8 = vsel %vm19099_vm7, %v7404_v52, %v7408_v62  ;;  %vm19100_vm5 = vmmov %vm19090_vm0  ;;  %v7946_v14 = vsel %vm19103_vm1, %v7944_v5, %v7945_v15  ;;  %v7952_v25 = vsel %vm19103_vm1, %v7949_v44, %v7951_v58  ;;  %v15435_v62 = vld [vmem:[#allocation3 + $0x38] sm:$0xff]   ;;  %v15432_v17 = vld [vmem:[#allocation3 + $0x28] sm:$0xff]   ;;  %v7963_v19 = vrot.slane %v15443_v56, 1 }
 0x2c0   : > { %14747 = vmatprep.mubr.msk.bf16.mxu1 %vm19097_vm6, %v15413_v54  ;;  %vm19101_vm10 = vmmov %vm19090_vm0  ;;  %v7955_v54 = vrot.slane %v15433_v51, 1  ;;  %v7957_v52 = vrot.slane %v15435_v62, 1  ;;  %v8490_v32 = vrot.slane %v15432_v17, 1  ;;  %v15440_v5 = vld [vmem:[#allocation3 + $0x48] sm:$0xff]   ;;  %v15453_v3 = vld [vmem:[#allocation3 + $0x70] sm:$0xff]  }
 0x2c1   : > { %vm19102_vm13 = vmmov %vm19090_vm0  ;;  %v15460_v62 = vld [vmem:[#allocation3 + $0x88] sm:$0xff]   ;;  %v15466_v17 = vld [vmem:[#allocation3 + $0x10] sm:$0xff]  }
 0x2c2   : > { %14784 = vmatmul.mubr.msk.bf16.gmra.mxu0 %vm19100_vm5, %v7409_v8  ;;  %vm19104_vm15 = vmmov %vm19090_vm0 }
 0x2c3   : > { %14787 = vmatprep.mubr.msk.bf16.mxu0 %vm19101_vm10, %v7417_v53  ;;  %vm19105_vm0 = vmmov %vm19092_vm3  ;;  %v15438_v53 = vld [vmem:[#allocation3 + $0x40] sm:$0xff]  }
 0x2c4   : > { %v7433_v7 = vsel %vm19105_vm0, %v7428_v45, %v7432_v59  ;;  %vm19106_vm11 = vmmov %vm19105_vm0  ;;  %v7959_v57 = vrot.slane %v15438_v53, 1  ;;  %v7961_v59 = vrot.slane %v15440_v5, 1  ;;  %v8496_v45 = vrot.slane %v15439_v11, 1 }
 0x2c5   : > { %v7425_v18 = vsel %vm19106_vm11, %v7420_v63, %v7424_v41  ;;  %vm19107_vm3 = vmmov %vm19093_vm2  ;;  %v15462_v41 = vld [vmem:[%s18952_s3 + $0xa0] sm:$0xff]   ;;  %v18030_v63 = vld [vmem:[%s18952_s3 + $0xf8] sm:$0xff]   ;;  %v9034_v53 = vshll.u32 %v15466_v17, 16 }
 0x2c6   : > { %vm19108_vm8 = vmmov %vm19103_vm1 }
 0x2c7   : > { %14748 = vmatmul.mubr.msk.bf16.gmra.mxu1 %vm19102_vm13, %v15417_v49  ;;  %v7948_v12 = vsel %vm19108_vm8, %v7945_v15, %v7947_v38  ;;  %vm19109_vm4 = vmmov %vm19093_vm2  ;;  %vm19116_vm13 = vcmask 519168   ;;  %v15437_v15 = vld [vmem:[#allocation3 + $0x38] sm:$0xff]   ;;  %v9036_v56 = vrot.slane %v9034_v53, 2 }
 0x2c8   : > { %14803 = vmatprep.mubr.msk.bf16.mxu1 %vm19104_vm15, %v7946_v14  ;;  %vm19110_vm9 = vmmov %vm19103_vm1  ;;  %6618 = vst.msk [vmem:[#allocation3 + $0x94] sm:$0xf] %vm19116_vm13, %v6610_v55  ;;  %v8494_v47 = vrot.slane %v15437_v15, 1  ;;  %v7971_v55 = vrot.slane %v15453_v3, 1  ;;  %v15471_v3 = vld [vmem:[#allocation3 + $0x10] sm:$0xff]  }
 0x2c9   : > { %v7950_v37 = vsel %vm19110_vm9, %v7947_v38, %v7949_v44  ;;  %vm19111_vm6 = vmmov %vm19105_vm0  ;;  %v15445_v38 = vld [vmem:[#allocation3 + $0x58] sm:$0xff]   ;;  %v15444_v44 = vld [vmem:[#allocation3 + $0x50] sm:$0xff]  }
 0x2ca   : > { %14788 = vmatmul.mubr.msk.bf16.gmra.mxu0 %vm19107_vm3, %v7425_v18  ;;  %v7441_v61 = vsel %vm19111_vm6, %v7436_v0, %v7440_v10  ;;  %vm19112_vm14 = vmmov %vm19093_vm2  ;;  %v15442_v18 = vld [vmem:[#allocation3 + $0x48] sm:$0xff]   ;;  %v7965_v26 = vrot.slane %v15445_v38, 1  ;;  %v8500_v46 = vrot.slane %v15444_v44, 1 }
 0x2cb   : > { %14791 = vmatprep.mubr.msk.bf16.mxu0 %vm19093_vm2, %v7433_v7  ;;  %vm19113_vm7 = vmmov %vm19093_vm2  ;;  %v8498_v0 = vrot.slane %v15442_v18, 1 }
 0x2cc   : > { %vm19114_vm5 = vmmov %vm19103_vm1 }
 0x2cd   : > { %v8485_v43 = vsel %vm19114_vm5, %v8483_v9, %v8484_v33  ;;  %vm19115_vm10 = vmmov %vm19093_vm2  ;;  %v8502_v9 = vrot.slane %v15447_v36, 1 }
 0x2ce   : > { %vm19117_vm15 = vmmov %vm19093_vm2 }
 0x2cf   : > { %14804 = vmatmul.mubr.msk.bf16.vlgmr.msra.gmra.mxu1 %vm19109_vm4, %v7948_v12  ;;  %vm19118_vm0 = vmmov %vm19103_vm1  ;;  %v15450_v12 = vld [vmem:[#allocation3 + $0x68] sm:$0xff]  }
 0x2d0   : > { %14884 = vmatpush3.bf16.msra.mxu1 %v15594_v50  ;;  %14807 = vmatprep.mubr.msk.bf16.mxu1 %vm19112_vm14, %v7950_v37  ;;  %v7954_v48 = vsel %vm19118_vm0, %v7951_v58, %v7953_v21  ;;  %vm19119_vm12 = vmmov %vm19093_vm2  ;;  %v7962_v7 = vsel %vm19118_vm0, %v7959_v57, %v7961_v59  ;;  %v15449_v50 = vld [vmem:[#allocation3 + $0x60] sm:$0xff]   ;;  %v7969_v27 = vrot.slane %v15450_v12, 1 }
 0x2d1   : > { %14885 = vmatprep.subr.bf16.mxu1 %v15436_v30  ;;  %vm19120_vm11 = vmmov %vm19118_vm0  ;;  %v8504_v6 = vrot.slane %v15449_v50, 1  ;;  %v15476_v50 = vld [vmem:[#allocation3 + $0x30] sm:$0xff]  }
 0x2d2   : > { %14792 = vmatmul.mubr.msk.bf16.gmra.mxu0 %vm19113_vm7, %v7441_v61  ;;  %v8487_v16 = vsel %vm19120_vm11, %v8484_v33, %v8486_v20  ;;  %vm19121_vm3 = vmmov %vm19093_vm2 }
 0x2d3   : > { %14847 = vmatprep.mubr.msk.bf16.mxu0 %vm19115_vm10, %v8485_v43  ;;  %vm19122_vm2 = vmmov %vm19118_vm0  ;;  %v15455_v43 = vld [vmem:[#allocation3 + $0x78] sm:$0xff]  }
 0x2d4   : > { %14886 = vmatpush3.bf16.msra.mxu1 %v15436_v30  ;;  %v8489_v39 = vsel %vm19122_vm2, %v8486_v20, %v8488_v4  ;;  %vm19123_vm8 = vmmov %vm19121_vm3  ;;  %v15448_v30 = vld [vmem:[#allocation3 + $0x60] sm:$0xff]   ;;  %v15454_v20 = vld [vmem:[#allocation3 + $0x70] sm:$0xff]  }
 0x2d5   : > { %14887 = vmatprep.subr.bf16.mxu1 %v15446_v13  ;;  %vm19124_vm4 = vmmov %vm19118_vm0  ;;  %v7967_v37 = vrot.slane %v15448_v30, 1 }
 0x2d6   : > { %v7956_v22 = vsel %vm19124_vm4, %v7953_v21, %v7955_v54  ;;  %vm19125_vm9 = vmmov %vm19121_vm3  ;;  %v15452_v21 = vld [vmem:[#allocation3 + $0x68] sm:$0xff]  }
 0x2d7   : > { %14808 = vmatmul.mubr.msk.bf16.gmra.mxu1 %vm19117_vm15, %v7952_v25  ;;  %vm19126_vm6 = vmmov %vm19118_vm0  ;;  %v7970_v58 = vsel %vm19118_vm0, %v7967_v37, %v7969_v27  ;;  %v7973_v25 = vrot.slane %v15455_v43, 1  ;;  %v8506_v51 = vrot.slane %v15452_v21, 1 }
 0x2d8   : > { %14811 = vmatprep.mubr.msk.bf16.mxu1 %vm19119_vm12, %v7954_v48  ;;  %14888 = vmatpush3.bf16.msra.mxu1 %v15446_v13  ;;  %v7958_v8 = vsel %vm19126_vm6, %v7955_v54, %v7957_v52  ;;  %vm19127_vm14 = vmmov %vm19121_vm3  ;;  %v15458_v48 = vld [vmem:[#allocation3 + $0x80] sm:$0xff]   ;;  %v15457_v54 = vld [vmem:[#allocation3 + $0x78] sm:$0xff]  }
 0x2d9   : > { %14889 = vmatprep.subr.bf16.mxu1 %v15456_v24  ;;  %vm19128_vm7 = vmmov %vm19118_vm0 }
 0x2da   : > { %14848 = vmatmul.mubr.msk.bf16.vlgmr.msra.gmra.mxu0 %vm19121_vm3, %v8487_v16  ;;  %v8491_v49 = vsel %vm19128_vm7, %v8488_v4, %v8490_v32  ;;  %vm19129_vm5 = vmmov %vm19121_vm3 }
 0x2db   : > { %14851 = vmatprep.mubr.msk.bf16.mxu0 %vm19123_vm8, %v8489_v39  ;;  %14928 = vmatpush3.bf16.msra.mxu0 %v15595_v31  ;;  %vm19130_vm10 = vmmov %vm19118_vm0  ;;  %v15465_v39 = vld [vmem:[#allocation3 + $0x8] sm:$0xfe]   ;;  %v15459_v31 = vld [vmem:[#allocation3 + $0x80] sm:$0xff]  }
 0x2dc   : > { %14929 = vmatprep.subr.bf16.mxu0 %v15441_v40  ;;  %14890 = vmatpush3.bf16.msra.mxu1 %v15456_v24  ;;  %v8493_v2 = vsel %vm19130_vm10, %v8490_v32, %v8492_v28  ;;  %vm19131_vm13 = vmmov %vm19121_vm3  ;;  %v9023_v5 = vshrl.u32 %v15465_v39, 16 }
 0x2dd   : > { %14971 = vmatprep.subr.bf16.mxu1 %v18004_v60  ;;  %vm19132_vm1 = vmmov %vm19118_vm0 }
 0x2de   : > { %v7960_v14 = vsel %vm19132_vm1, %v7957_v52, %v7959_v57  ;;  %vm19133_vm15 = vmmov %vm19121_vm3  ;;  %v7975_v52 = vrot.slane %v15458_v48, 1  ;;  %v8512_v57 = vrot.slane %v15459_v31, 1 }
 0x2df   : > { %14812 = vmatmul.mubr.msk.bf16.gmra.mxu1 %vm19125_vm9, %v7956_v22  ;;  %14930 = vmatpush3.bf16.msra.mxu0 %v15441_v40  ;;  %vm19134_vm12 = vmmov %vm19121_vm3  ;;  %v8508_v40 = vrot.slane %v15454_v20, 1  ;;  %v9031_v22 = vshrl.u32 %v15466_v17, 16  ;;  %v15467_v20 = vld [vmem:[#allocation3 + $0x98] ss:$0 sps:$4 sm:$0x11]  }
 0x2e0   : > { %14815 = vmatprep.mubr.msk.bf16.mxu1 %vm19127_vm14, %v7958_v8  ;;  %14931 = vmatprep.subr.bf16.mxu0 %v15451_v42  ;;  %vm19135_vm11 = vmmov %vm19118_vm0  ;;  %v15469_v8 = vld [vmem:[#allocation3 + $0x18] sm:$0xff]  }
 0x2e1   : > { %v8495_v23 = vsel %vm19135_vm11, %v8492_v28, %v8494_v47  ;;  %vm19136_vm2 = vmmov %vm19118_vm0  ;;  %v8510_v28 = vrot.slane %v15457_v54, 1  ;;  %v9040_v38 = vshrl.u32 %v15469_v8, 16  ;;  %v9043_v18 = vshll.u32 %v15469_v8, 16 }
 0x2e2   : > { %14852 = vmatmul.mubr.msk.bf16.gmra.mxu0 %vm19129_vm5, %v8491_v49  ;;  %v8497_v34 = vsel %vm19136_vm2, %v8494_v47, %v8496_v45  ;;  %vm19137_vm8 = vmmov %vm19121_vm3  ;;  %v15472_v49 = vld [vmem:[#allocation3 + $0x20] sm:$0xff]   ;;  %v15461_v47 = vld [vmem:[#allocation3 + $0x88] sm:$0xff]  }
 0x2e3   : > { %14855 = vmatprep.mubr.msk.bf16.mxu0 %vm19131_vm13, %v8493_v2  ;;  %14932 = vmatpush3.bf16.msra.mxu0 %v15451_v42  ;;  %vm19138_vm4 = vmmov %vm19118_vm0  ;;  %v7977_v42 = vrot.slane %v15460_v62, 1  ;;  %v15463_v2 = vld [vmem:[#allocation3 + $0x90] ss:$0 sps:$4 sm:$0x11]   ;;  %v9052_v44 = vshll.u32 %v15472_v49, 16  ;;  %v9042_v12 = vrot.slane %v9040_v38, 1 }
 0x2e4   : > { %14933 = vmatprep.subr.bf16.mxu0 %v15462_v41  ;;  %v7964_v1 = vsel %vm19138_vm4, %v7961_v59, %v7963_v19  ;;  %vm19139_vm9 = vmmov %vm19121_vm3  ;;  %v9033_v59 = vrot.slane %v9031_v22, 1 }
 0x2e5   : > { %vm19140_vm6 = vmmov %vm19118_vm0  ;;  %v7978_v11 = vsel %vm19118_vm0, %v7975_v52, %v7977_v42 }
 0x2e6   : > { %v7966_v10 = vsel %vm19140_vm6, %v7963_v19, %v7965_v26  ;;  %vm19141_vm14 = vmmov %vm19121_vm3 }
 0x2e7   : > { %14816 = vmatmul.mubr.msk.bf16.gmra.mxu1 %vm19133_vm15, %v7960_v14  ;;  %14934 = vmatpush3.bf16.msra.mxu0 %v15462_v41  ;;  %vm19142_vm7 = vmmov %vm19118_vm0  ;;  %v9026_v41 = vshll.u32 %v15465_v39, 16  ;;  %v9025_v14 = vrot.slane %v9023_v5, 1  ;;  %v15481_v39 = vld [vmem:[#allocation3 + $0x40] sm:$0xff]  }
 0x2e8   : > { %14819 = vmatprep.mubr.msk.bf16.mxu1 %vm19134_vm12, %v7962_v7  ;;  %15015 = vmatprep.subr.bf16.mxu0 %v18030_v63  ;;  %v8499_v33 = vsel %vm19142_vm7, %v8496_v45, %v8498_v0  ;;  %vm19143_vm5 = vmmov %vm19121_vm3 }
 0x2e9   : > { %vm19144_vm10 = vmmov %vm19118_vm0  ;;  %v9028_v45 = vrot.slane %v9026_v41, 2  ;;  %v9085_v41 = vshrl.u32 %v15481_v39, 16 }
 0x2ea   : > { %14856 = vmatmul.mubr.msk.bf16.gmra.mxu0 %vm19121_vm3, %v8495_v23  ;;  %v8501_v61 = vsel %vm19144_vm10, %v8498_v0, %v8500_v46  ;;  %vm19145_vm13 = vmmov %vm19121_vm3  ;;  %v9037_v23 = vor.u32 %v9036_v56, %v9033_v59  ;;  %v8514_v0 = vrot.slane %v15461_v47, 1 }
 0x2eb   : > { %14859 = vmatprep.mubr.msk.bf16.mxu0 %vm19137_vm8, %v8497_v34  ;;  %vm19146_vm1 = vmmov %vm19118_vm0  ;;  %v9049_v34 = vshrl.u32 %v15472_v49, 16  ;;  %v9029_v30 = vor.u32 %v9028_v45, %v9025_v14  ;;  %v9088_v49 = vshll.u32 %v15481_v39, 16  ;;  %v15486_v14 = vld [vmem:[#allocation3 + $0x50] sm:$0xff]  }
 0x2ec   : > { %v7968_v13 = vsel %vm19146_vm1, %v7965_v26, %v7967_v37  ;;  %vm19147_vm15 = vmmov %vm19121_vm3  ;;  %v7979_v26 = vrot.slane %v15463_v2, 1  ;;  %v15502_v2 = vld [vmem:[%s18952_s3 + $0xc0] sm:$0xff]  }
 0x2ed   : > { %vm19148_vm12 = vmmov %vm19121_vm3  ;;  %v9051_v37 = vrot.slane %v9049_v34, 1  ;;  %v9090_v38 = vrot.slane %v9088_v49, 2 }
 0x2ee   : > { %vm19149_vm11 = vmmov %vm19118_vm0 }
 0x2ef   : > { %14820 = vmatmul.mubr.msk.bf16.gmra.mxu1 %vm19139_vm9, %v7964_v1  ;;  %v8503_v29 = vsel %vm19149_vm11, %v8500_v46, %v8502_v9  ;;  %vm19150_vm2 = vmmov %vm19118_vm0  ;;  %v15464_v1 = vld [vmem:[#allocation3 + $0x90] sm:$0xff]   ;;  %v15474_v46 = vld [vmem:[#allocation3 + $0x28] sm:$0xff]  }
 0x2f0   : > { %14823 = vmatprep.mubr.msk.bf16.mxu1 %vm19141_vm14, %v7966_v10  ;;  %v8505_v24 = vsel %vm19150_vm2, %v8502_v9, %v8504_v6  ;;  %vm19151_vm8 = vmmov %vm19121_vm3 }
 0x2f1   : > { %vm19152_vm4 = vmmov %vm19118_vm0 }
 0x2f2   : > { %14860 = vmatmul.mubr.msk.bf16.gmra.mxu0 %vm19143_vm5, %v8499_v33  ;;  %v7972_v4 = vsel %vm19152_vm4, %v7969_v27, %v7971_v55  ;;  %vm19153_vm9 = vmmov %vm19121_vm3  ;;  %v9045_v33 = vrot.slane %v9043_v18, 2  ;;  %v8516_v27 = vrot.slane %v15464_v1, 1  ;;  %v15478_v18 = vld [vmem:[#allocation3 + $0x28] sm:$0xff]  }
 0x2f3   : > { %14863 = vmatprep.mubr.msk.bf16.mxu0 %vm19145_vm13, %v8501_v61  ;;  %vm19154_vm6 = vmmov %vm19118_vm0  ;;  %v9054_v61 = vrot.slane %v9052_v44, 2 }
 0x2f4   : > { %v7974_v16 = vsel %vm19154_vm6, %v7971_v55, %v7973_v25  ;;  %vm19155_vm14 = vmmov %vm19121_vm3  ;;  %vm19168_vm6 = vsmask.f32 6400  ;;  %v9067_v55 = vshrl.u32 %v15476_v50, 16 }
 0x2f5   : > { %vm19156_vm7 = vmmov %vm19118_vm0  ;;  %v9038_v36 = vsel %vm19168_vm6, %v9029_v30, %v9037_v23  ;;  %v9055_v21 = vor.u32 %v9054_v61, %v9051_v37  ;;  %v18117_v30 = vld [vmem:[#allocation3 + $0x30] sm:$0xff]   ;;  %v15497_v37 = vld [vmem:[%s18952_s3 + $0xe8] sm:$0xff]  }
 0x2f6   : > { %v8507_v35 = vsel %vm19156_vm7, %v8504_v6, %v8506_v51  ;;  %vm19157_vm5 = vmmov %vm19121_vm3  ;;  %v9058_v6 = vshrl.u32 %v15474_v46, 16  ;;  %v9069_v17 = vrot.slane %v9067_v55, 1  ;;  %v15508_v55 = vld [vmem:[%s18952_s3 + $0xe0] sm:$0xff]  }
 0x2f7   : > { %14824 = vmatmul.mubr.msk.bf16.gmra.mxu1 %vm19147_vm15, %v7968_v13  ;;  %vm19158_vm10 = vmmov %vm19118_vm0  ;;  %v9046_v13 = vor.u32 %v9045_v33, %v9042_v12  ;;  %v9106_v12 = vshll.u32 %v15486_v14, 16  ;;  %v15489_v33 = vld [vmem:[#allocation3 + $0x58] sm:$0xff]  }
 0x2f8   : > { %14827 = vmatprep.mubr.msk.bf16.mxu1 %vm19148_vm12, %v7970_v58  ;;  %v8509_v32 = vsel %vm19158_vm10, %v8506_v51, %v8508_v40  ;;  %vm19159_vm13 = vmmov %vm19121_vm3  ;;  %v9061_v58 = vshll.u32 %v15474_v46, 16  ;;  %v15482_v51 = vld [vmem:[%s18952_s3 + $0xd0] sm:$0xff]   ;;  %v9060_v48 = vrot.slane %v9058_v6, 1 }
 0x2f9   : > { %vm19160_vm1 = vmmov %vm19118_vm0  ;;  %v9108_v6 = vrot.slane %v9106_v12, 2 }
 0x2fa   : > { %14864 = vmatmul.mubr.msk.bf16.gmra.mxu0 %vm19121_vm3, %v8503_v29  ;;  %v7976_v15 = vsel %vm19160_vm1, %v7973_v25, %v7975_v52  ;;  %vm19161_vm15 = vmmov %vm19121_vm3  ;;  %v15470_v29 = vld [vmem:[#allocation3 + $0x8] sm:$0xfc]   ;;  %v15479_v25 = vld [vmem:[#allocation3 + $0x38] sm:$0xff]   ;;  %v9063_v62 = vrot.slane %v9061_v58, 2 }
 0x2fb   : > { %14867 = vmatprep.mubr.msk.bf16.mxu0 %vm19151_vm8, %v8505_v24  ;;  %vm19162_vm12 = vmmov %vm19121_vm3  ;;  %v9070_v24 = vshll.u32 %v15476_v50, 16  ;;  %v15473_v52 = vld [vmem:[#allocation3 + $0x18] sm:$0xff]   ;;  %v9694_v31 = vrot.slane %v15470_v29, 2  ;;  %v9079_v8 = vshll.u32 %v15479_v25, 16  ;;  %v15491_v58 = vld [vmem:[#allocation3 + $0x60] sm:$0xff]   ;;  %v9112_v29 = vshrl.u32 %v15489_v33, 16 }
 0x2fc   : > { %vm19163_vm11 = vmmov %vm19118_vm0  ;;  %v9064_v53 = vor.u32 %v9063_v62, %v9060_v48  ;;  %v9124_v48 = vshll.u32 %v15491_v58, 16 }
 0x2fd   : > { %v8511_v7 = vsel %vm19163_vm11, %v8508_v40, %v8510_v28  ;;  %vm19164_vm2 = vmmov %vm19118_vm0  ;;  %v9695_v40 = vrot.slane %v15471_v3, 2  ;;  %v9072_v54 = vrot.slane %v9070_v24, 2  ;;  %v9081_v47 = vrot.slane %v9079_v8, 2 }
 0x2fe   : > { %v8513_v19 = vsel %vm19164_vm2, %v8510_v28, %v8512_v57  ;;  %vm19165_vm8 = vmmov %vm19121_vm3  ;;  %v9076_v28 = vshrl.u32 %v15479_v25, 16 }
 0x2ff   : > { %14828 = vmatmul.mubr.msk.bf16.gmra.mxu1 %vm19153_vm9, %v7972_v4  ;;  %vm19166_vm4 = vmmov %vm19118_vm0  ;;  %v9073_v5 = vor.u32 %v9072_v54, %v9069_v17  ;;  %v15494_v17 = vld [vmem:[#allocation3 + $0x68] sm:$0xff]  }
 0x300   : > { %14831 = vmatprep.mubr.msk.bf16.mxu1 %vm19155_vm14, %v7974_v16  ;;  %v7980_v10 = vsel %vm19166_vm4, %v7977_v42, %v7979_v26  ;;  %vm19167_vm9 = vmmov %vm19121_vm3  ;;  %v18089_v42 = vld [vmem:[#allocation3 + $0x20] sm:$0xff]   ;;  %v9078_v56 = vrot.slane %v9076_v28, 1  ;;  %v9126_v28 = vrot.slane %v9124_v48, 2  ;;  %v9130_v8 = vshrl.u32 %v15494_v17, 16 }
 0x301   : > { %vm19169_vm14 = vmmov %vm19121_vm3  ;;  %v9699_v59 = vrot.slane %v18089_v42, 2 }
 0x302   : > { %14868 = vmatmul.mubr.msk.bf16.gmra.mxu0 %vm19157_vm5, %v8507_v35  ;;  %vm19170_vm7 = vmmov %vm19118_vm0  ;;  %v8518_v35 = vrot.slane %v15467_v20, 1  ;;  %v9082_v44 = vor.u32 %v9081_v47, %v9078_v56  ;;  %v14717_v54 = vpop.f32.mrf.mxu1 }
 0x303   : > { %14871 = vmatprep.mubr.msk.bf16.mxu0 %vm19159_vm13, %v8509_v32  ;;  %v8515_v9 = vsel %vm19170_vm7, %v8512_v57, %v8514_v0  ;;  %vm19171_vm5 = vmmov %vm19121_vm3  ;;  %v15492_v32 = vld [vmem:[%s18952_s3 + $0xc8] sm:$0xff]   ;;  %v15484_v57 = vld [vmem:[#allocation3 + $0x48] sm:$0xff]  }
 0x304   : > { %vm19172_vm10 = vmmov %vm19118_vm0  ;;  %v9097_v26 = vshll.u32 %v15484_v57, 16 }
 0x305   : > { %v8517_v43 = vsel %vm19172_vm10, %v8514_v0, %v8516_v27  ;;  %vm19173_vm13 = vmmov %vm19121_vm3  ;;  %v18113_v0 = vld [vmem:[%s18952_s3 + $0x118] sm:$0xff]  }
 0x306   : > { %vm19174_vm1 = vmmov %vm19168_vm6 }
 0x307   : > { %14832 = vmatmul.mubr.msk.bf16.gmra.mxu1 %vm19161_vm15, %v7976_v15  ;;  %v9047_v4 = vsel %vm19174_vm1, %v9037_v23, %v9046_v13  ;;  %vm19175_vm15 = vmmov %vm19121_vm3  ;;  %v9697_v15 = vrot.slane %v15473_v52, 2  ;;  %v15487_v23 = vld [vmem:[%s18952_s3 + $0xf0] sm:$0xff]  }
 0x308   : > { %14835 = vmatprep.mubr.msk.bf16.mxu1 %vm19162_vm12, %v7978_v11  ;;  %vm19176_vm0 = vmmov %vm19174_vm1 }
 0x309   : > { %v9056_v16 = vsel %vm19176_vm0, %v9046_v13, %v9055_v21  ;;  %vm19177_vm12 = vmmov %vm19121_vm3  ;;  %v15483_v13 = vld [vmem:[#allocation3 + $0x38] sm:$0xff]  }
 0x30a   : > { %14872 = vmatmul.mubr.msk.bf16.gmra.mxu0 %vm19121_vm3, %v8511_v7  ;;  %vm19178_vm11 = vmmov %vm19164_vm2  ;;  %vm19179_vm2 = vcmask 1045504   ;;  %v9087_v7 = vrot.slane %v9085_v41, 1  ;;  %v9705_v62 = vrot.slane %v15483_v13, 2 }
 0x30b   : > { %14875 = vmatprep.mubr.msk.bf16.mxu0 %vm19165_vm8, %v8513_v19  ;;  %v8519_v22 = vsel %vm19178_vm11, %v8516_v27, %v8518_v35  ;;  %vm19180_vm8 = vmmov %vm19121_vm3  ;;  %v9094_v19 = vshrl.u32 %v15484_v57, 16  ;;  %v9099_v27 = vrot.slane %v9097_v26, 2  ;;  %v15496_v35 = vld [vmem:[#allocation3 + $0x70] sm:$0xff]  }
 0x30c   : > { %vm19181_vm4 = vmmov %vm19176_vm0  ;;  %v9091_v46 = vor.u32 %v9090_v38, %v9087_v7  ;;  %v9142_v57 = vshll.u32 %v15496_v35, 16 }
 0x30d   : > { %v9065_v11 = vsel %vm19181_vm4, %v9055_v21, %v9064_v53  ;;  %vm19183_vm6 = vmmov %vm19176_vm0  ;;  %v9096_v50 = vrot.slane %v9094_v19, 1  ;;  %v9115_v21 = vshll.u32 %v15489_v33, 16  ;;  %v15499_v19 = vld [vmem:[#allocation3 + $0x78] sm:$0xff]  }
 0x30e   : > { %v9074_v45 = vsel %vm19183_vm6, %v9064_v53, %v9073_v5  ;;  %vm19185_vm7 = vmmov %vm19179_vm2  ;;  %v15493_v33 = vld [vmem:[#allocation3 + $0x58] sm:$0xff]  }
 0x30f   : > { %14836 = vmatmul.mubr.msk.bf16.gmra.mxu1 %vm19167_vm9, %v7980_v10  ;;  %vm19182_vm9 = vmmov %vm19121_vm3  ;;  %v9698_v34 = vsel %vm19185_vm7, %v9695_v40, %v9697_v15  ;;  %v9103_v10 = vshrl.u32 %v15486_v14, 16  ;;  %v9100_v20 = vor.u32 %v9099_v27, %v9096_v50  ;;  %v9117_v39 = vrot.slane %v9115_v21, 2 }
 0x310   : > { %14891 = vmatprep.mubr.msk.bf16.mxu1 %vm19169_vm14, %v9038_v36  ;;  %vm19184_vm14 = vmmov %vm19121_vm3  ;;  %v9701_v36 = vrot.slane %v15478_v18, 2  ;;  %vm19198_vm7 = vcmask 1043456   ;;  %v9144_v18 = vrot.slane %v9142_v57, 2  ;;  %v9151_v50 = vshll.u32 %v15499_v19, 16 }
 0x311   : > { %vm19187_vm10 = vmmov %vm19179_vm2  ;;  %v9105_v3 = vrot.slane %v9103_v10, 1 }
 0x312   : > { %14876 = vmatmul.mubr.msk.bf16.gmra.mxu0 %vm19171_vm5, %v8515_v9  ;;  %vm19186_vm5 = vmmov %vm19121_vm3  ;;  %v9700_v1 = vsel %vm19187_vm10, %v9697_v15, %v9699_v59  ;;  %v9703_v9 = vrot.slane %v18117_v30, 2  ;;  %v9139_v15 = vshrl.u32 %v15496_v35, 16 }
 0x313   : > { %14879 = vmatprep.mubr.msk.bf16.mxu0 %vm19173_vm13, %v8517_v43  ;;  %vm19188_vm13 = vmmov %vm19121_vm3  ;;  %v18130_v43 = vld [vmem:[#allocation3 + $0x40] sm:$0xff]  }
 0x314   : > { %vm19189_vm1 = vmmov %vm19176_vm0  ;;  %v9704_v25 = vsel %vm19179_vm2, %v9701_v36, %v9703_v9  ;;  %v9141_v38 = vrot.slane %v9139_v15, 1 }
 0x315   : > { %v9083_v61 = vsel %vm19189_vm1, %v9073_v5, %v9082_v44  ;;  %vm19192_vm11 = vmmov %vm19179_vm2  ;;  %v6904_v5 = vpop.f32.mrf.mxu1 }
 0x316   : > { %v9702_v24 = vsel %vm19192_vm11, %v9699_v59, %v9701_v36  ;;  %vm19194_vm4 = vmmov %vm19176_vm0 }
 0x317   : > { %14892 = vmatmul.mubr.msk.bf16.vlgmr.msra.gmra.mxu1 %vm19175_vm15, %v9047_v4  ;;  %vm19190_vm15 = vmmov %vm19121_vm3  ;;  %v9121_v4 = vshrl.u32 %v15491_v58, 16  ;;  %v9101_v52 = vsel %vm19194_vm4, %v9091_v46, %v9100_v20  ;;  %v14718_v59 = vpop.f32.mrf.mxu1 }
 0x318   : > { %14972 = vmatpush3.bf16.msra.mxu1 %v18004_v60  ;;  %14895 = vmatprep.mubr.msk.bf16.mxu1 %vm19177_vm12, %v9056_v16  ;;  %v9696_v60 = vsel %vm19179_vm2, %v9694_v31, %v9695_v40  ;;  %vm19191_vm12 = vmmov %vm19121_vm3  ;;  %v9707_v40 = vrot.slane %v18130_v43, 2  ;;  %v9114_v16 = vrot.slane %v9112_v29, 1  ;;  %v18144_v31 = vld [vmem:[%s18953_s4] sm:$0xf]  ;;  %v9713_v29 = vrot.slane %v15493_v33, 2 }
 0x319   : > { %14973 = vmatprep.subr.bf16.mxu1 %v15482_v51  ;;  %vm19196_vm6 = vmmov %vm19176_vm0  ;;  %v9123_v53 = vrot.slane %v9121_v4, 1 }
 0x31a   : > { %14880 = vmatmul.mubr.msk.bf16.gmra.mxu0 %vm19121_vm3, %v8519_v22  ;;  %v18148_v22 = vld [vmem:[#allocation3 + $0x50] sm:$0xff]   ;;  %v9118_v41 = vor.u32 %v9117_v39, %v9114_v16  ;;  %vm19200_vm10 = vmmov %vm19121_vm3 }
 0x31b   : > { %14935 = vmatprep.mubr.msk.bf16.mxu0 %vm19180_vm8, %v9696_v60  ;;  %vm19193_vm8 = vmmov %vm19121_vm3  ;;  %v9133_v60 = vshll.u32 %v15494_v17, 16  ;;  %v9711_v14 = vrot.slane %v18148_v22, 2  ;;  %v15498_v17 = vld [vmem:[#allocation3 + $0x68] sm:$0xff]  }
 0x31c   : > { %14974 = vmatpush3.bf16.msra.mxu1 %v15482_v51  ;;  %v9109_v51 = vor.u32 %v9108_v6, %v9105_v3  ;;  %vm19202_vm1 = vmmov %vm19121_vm3 }
 0x31d   : > { %14975 = vmatprep.subr.bf16.mxu1 %v15492_v32  ;;  %v9135_v7 = vrot.slane %v9133_v60, 2 }
 0x31e   : > { %v9110_v42 = vsel %vm19196_vm6, %v9100_v20, %v9109_v51  ;;  %v15504_v20 = vld [vmem:[#allocation3 + $0x88] sm:$0xff]  }
 0x31f   : > { %14896 = vmatmul.mubr.msk.bf16.gmra.mxu1 %vm19182_vm9, %v9065_v11  ;;  %vm19195_vm9 = vmmov %vm19121_vm3  ;;  %v9127_v11 = vor.u32 %v9126_v28, %v9123_v53  ;;  %v9166_v39 = vshrl.u32 %v15504_v20, 16  ;;  %v9169_v35 = vshll.u32 %v15504_v20, 16 }
 0x320   : > { %14899 = vmatprep.mubr.msk.bf16.mxu1 %vm19184_vm14, %v9074_v45  ;;  %14976 = vmatpush3.bf16.msra.mxu1 %v15492_v32  ;;  %v15488_v32 = vld [vmem:[#allocation3 + $0x48] sm:$0xff]   ;;  %vm19197_vm14 = vmmov %vm19121_vm3  ;;  %v9132_v45 = vrot.slane %v9130_v8, 1  ;;  %v9717_v8 = vrot.slane %v15498_v17, 2 }
 0x321   : > { %14977 = vmatprep.subr.bf16.mxu1 %v15502_v2  ;;  %v9709_v56 = vrot.slane %v15488_v32, 2 }
 0x322   : > { %14936 = vmatmul.mubr.msk.bf16.vlgmr.msra.gmra.mxu0 %vm19186_vm5, %v9698_v34  ;;  %vm19199_vm5 = vmmov %vm19179_vm2  ;;  %v9136_v36 = vor.u32 %v9135_v7, %v9132_v45  ;;  %v15505_v7 = vld [vmem:[#allocation3 + $0x80] sm:$0xff]  }
 0x323   : > { %14939 = vmatprep.mubr.msk.bf16.mxu0 %vm19188_vm13, %v9700_v1  ;;  %15016 = vmatpush3.bf16.msra.mxu0 %v18030_v63  ;;  %v9092_v63 = vsel %vm19176_vm0, %v9082_v44, %v9091_v46  ;;  %v9706_v49 = vsel %vm19199_vm5, %v9703_v9, %v9705_v62  ;;  %vm19201_vm13 = vmmov %vm19179_vm2  ;;  %v15501_v44 = vld [vmem:[#allocation3 + $0x80] sm:$0xff]   ;;  %v6907_v1 = vpop.f32.mrf.mxu1  ;;  %v9712_v10 = vsel %vm19179_vm2, %v9709_v56, %v9711_v14 }
 0x324   : > { %15017 = vmatprep.subr.bf16.mxu0 %v15487_v23  ;;  %14978 = vmatpush3.bf16.msra.mxu1 %v15502_v2  ;;  %v9708_v2 = vsel %vm19201_vm13, %v9705_v62, %v9707_v40  ;;  %v15495_v9 = vld [vmem:[#allocation3 + $0x60] sm:$0xff]   ;;  %v9160_v13 = vshll.u32 %v15501_v44, 16  ;;  %vm19214_vm5 = vmmov %vm19179_vm2 }
 0x325   : > { %15059 = vmatprep.subr.bf16.mxu1 %v18113_v0  ;;  %v14721_v6 = vpop.f32.mrf.mxu1  ;;  %v9714_v16 = vsel %vm19214_vm5, %v9711_v14, %v9713_v29  ;;  %vm19216_vm13 = vmmov %vm19179_vm2 }
 0x326   : > { %v9162_v48 = vrot.slane %v9160_v13, 2 }
 0x327   : > { %14900 = vmatmul.mubr.msk.bf16.gmra.mxu1 %vm19190_vm15, %v9083_v61  ;;  %15018 = vmatpush3.bf16.msra.mxu0 %v15487_v23  ;;  %vm19203_vm15 = vmmov %vm19176_vm0  ;;  %v9148_v61 = vshrl.u32 %v15499_v19, 16  ;;  %v6920_v62 = vpop.f32.mrf.mxu1 }
 0x328   : > { %14903 = vmatprep.mubr.msk.bf16.mxu1 %vm19191_vm12, %v9092_v63  ;;  %15019 = vmatprep.subr.bf16.mxu0 %v15497_v37  ;;  %v9119_v47 = vsel %vm19203_vm15, %v9109_v51, %v9118_v41  ;;  %vm19204_vm0 = vmmov %vm19202_vm1  ;;  %v9157_v63 = vshrl.u32 %v15501_v44, 16 }
 0x329   : > { %vm19205_vm12 = vmmov %vm19194_vm4  ;;  %v14722_v22 = vpop.f32.mrf.mxu1 }
 0x32a   : > { %14940 = vmatmul.mubr.msk.bf16.gmra.mxu0 %vm19121_vm3, %v9702_v24  ;;  %v9128_v34 = vsel %vm19205_vm12, %v9118_v41, %v9127_v11  ;;  %vm19206_vm11 = vmmov %vm19204_vm0  ;;  %v9153_v24 = vrot.slane %v9151_v50, 2  ;;  %v9159_v4 = vrot.slane %v9157_v63, 1  ;;  %v9171_v41 = vrot.slane %v9169_v35, 2 }
 0x32b   : > { %14943 = vmatprep.mubr.msk.bf16.mxu0 %vm19193_vm8, %v9704_v25  ;;  %15020 = vmatpush3.bf16.msra.mxu0 %v15497_v37  ;;  %vm19207_vm3 = vmmov %vm19179_vm2  ;;  %v9145_v37 = vor.u32 %v9144_v18, %v9141_v38  ;;  %v9715_v25 = vrot.slane %v15495_v9, 2  ;;  %v6923_v57 = vpop.f32.mrf.mxu1  ;;  %v15511_v9 = vld [vmem:[#allocation3 + $0x10] sm:$0xfc]  }
 0x32c   : > { %15021 = vmatprep.subr.bf16.mxu0 %v15508_v55  ;;  %v9710_v46 = vsel %vm19207_vm3, %v9707_v40, %v9709_v56  ;;  %vm19208_vm8 = vmmov %vm19204_vm0  ;;  %v15506_v40 = vld [vmem:[#allocation3 + $0x90] sm:$0xff]   ;;  %v9163_v32 = vor.u32 %v9162_v48, %v9159_v4  ;;  %v10233_v20 = vrot.slane %v15511_v9, 2 }
 0x32d   : > { %vm19209_vm4 = vmmov %vm19204_vm0  ;;  %v9175_v53 = vshrl.u32 %v15506_v40, 16  ;;  %v9178_v28 = vshll.u32 %v15506_v40, 16 }
 0x32e   : > { %v14761_v23 = vpop.f32.mrf.mxu0  ;;  %vm19221_vm3 = vmmov %vm19179_vm2 }
 0x32f   : > { %14904 = vmatmul.mubr.msk.bf16.gmra.mxu1 %vm19195_vm9, %v9101_v52  ;;  %15022 = vmatpush3.bf16.msra.mxu0 %v15508_v55  ;;  %v7699_v26 = vadd.f32 %v14761_v23, %v14717_v54  ;;  %vm19210_vm9 = vmmov %vm19196_vm6  ;;  %v9150_v55 = vrot.slane %v9148_v61, 1  ;;  %v9716_v52 = vsel %vm19216_vm13, %v9713_v29, %v9715_v25  ;;  %v9718_v56 = vsel %vm19221_vm3, %v9715_v25, %v9717_v8 }
 0x330   : > { %14907 = vmatprep.mubr.msk.bf16.mxu1 %vm19197_vm14, %v9110_v42  ;;  %15153 = vmatprep.subr.msk.bf16.mxu0 %vm19198_vm7, %v18144_v31  ;;  %v7554_v30 = vpop.f32.mrf.mxu0  ;;  %v9137_v21 = vsel %vm19210_vm9, %v9127_v11, %v9136_v36  ;;  %vm19211_vm6 = vmmov %vm19204_vm0  ;;  %v15500_v42 = vld [vmem:[#allocation3 + $0x70] sm:$0xff]   ;;  %v9177_v11 = vrot.slane %v9175_v53, 1 }
 0x331   : > { %7735 = vst [vmem:[#allocation5 + $0x10] sm:$0xff] %v7699_v26  ;;  %v7697_v12 = vadd.f32 %v7554_v30, %v6904_v5  ;;  %vm19212_vm14 = vmmov %vm19210_vm9  ;;  %v9154_v54 = vor.u32 %v9153_v24, %v9150_v55  ;;  %v9168_v5 = vrot.slane %v9166_v39, 1  ;;  %v18193_v24 = vld [vmem:[#allocation3 + $0x90] sm:$0xff]   ;;  %v18198_v39 = vld [vmem:[#allocation3 + $0x28] sm:$0xff]  }
 0x332   : > { %14944 = vmatmul.mubr.msk.bf16.gmra.mxu0 %vm19200_vm10, %v9706_v49  ;;  %v14762_v27 = vpop.f32.mrf.mxu0  ;;  %v9146_v51 = vsel %vm19212_vm14, %v9136_v36, %v9145_v37  ;;  %vm19213_vm7 = vmmov %vm19204_vm0  ;;  %v9719_v49 = vrot.slane %v15500_v42, 2  ;;  %v18185_v36 = vld [vmem:[#allocation3 + $0x18] sm:$0xff]  }
 0x333   : > { %14947 = vmatprep.mubr.msk.bf16.mxu0 %vm19202_vm1, %v9708_v2  ;;  %7733 = vst [vmem:[#allocation5] sm:$0xff] %v7697_v12  ;;  %v7700_v3 = vadd.f32 %v14762_v27, %v14718_v59  ;;  %vm19215_vm10 = vmmov %vm19204_vm0  ;;  %v15509_v2 = vld [vmem:[#allocation3 + $0x98] ss:$0 sps:$4 sm:$0x33]   ;;  %v9180_v59 = vrot.slane %v9178_v28, 2  ;;  %v9172_v14 = vor.u32 %v9171_v41, %v9168_v5  ;;  %v9723_v12 = vrot.slane %v15505_v7, 2 }
 0x334   : > { %v7557_v58 = vpop.f32.mrf.mxu0  ;;  %vm19217_vm1 = vmmov %vm19204_vm0  ;;  %v9184_v23 = vshrl.u32 %v15509_v2, 16  ;;  %v10234_v29 = vrot.slane %v18185_v36, 2  ;;  %v15519_v5 = vld [vmem:[#allocation3 + $0x20] sm:$0xff]  }
 0x335   : > { %7736 = vst [vmem:[#allocation5 + $0x18] sm:$0xff] %v7700_v3  ;;  %v7698_v43 = vadd.f32 %v7557_v58, %v6907_v1  ;;  %vm19218_vm15 = vmmov %vm19210_vm9  ;;  %v9181_v44 = vor.u32 %v9180_v59, %v9177_v11  ;;  %v9173_v30 = vsel %vm19210_vm9, %v9163_v32, %v9172_v14  ;;  %v15521_v59 = vld [vmem:[#allocation3 + $0x28] sm:$0xff]  }
 0x336   : > { %v9155_v60 = vsel %vm19218_vm15, %v9145_v37, %v9154_v54  ;;  %vm19219_vm12 = vmmov %vm19210_vm9  ;;  %v9186_v61 = vrot.slane %v9184_v23, 1 }
 0x337   : > { %14908 = vmatmul.mubr.msk.bf16.gmra.mxu1 %vm19204_vm0, %v9119_v47  ;;  %7734 = vst [vmem:[#allocation5 + $0x8] sm:$0xff] %v7698_v43  ;;  %v9164_v15 = vsel %vm19219_vm12, %v9154_v54, %v9163_v32  ;;  %v15503_v47 = vld [vmem:[#allocation3 + $0x78] sm:$0xff]   ;;  %vm19222_vm2 = vmmov %vm19204_vm0 }
 0x338   : > { %14911 = vmatprep.mubr.msk.bf16.mxu1 %vm19206_vm11, %v9128_v34  ;;  %vm19220_vm11 = vmmov %vm19204_vm0  ;;  %v9187_v34 = vshll.u32 %v15509_v2, 16  ;;  %v9721_v1 = vrot.slane %v15503_v47, 2 }
 0x339   : > { %vm19226_vm14 = vmmov %vm19210_vm9 }
 0x33a   : > { %14948 = vmatmul.mubr.msk.bf16.gmra.mxu0 %vm19208_vm8, %v9710_v46  ;;  %vm19223_vm8 = vmmov %vm19221_vm3  ;;  %v9182_v33 = vsel %vm19226_vm14, %v9172_v14, %v9181_v44  ;;  %v9189_v50 = vrot.slane %v9187_v34, 2  ;;  %v10790_v34 = vshrl.u32 %v15519_v5, 16 }
 0x33b   : > { %14951 = vmatprep.mubr.msk.bf16.mxu0 %vm19209_vm4, %v9712_v10  ;;  %v9720_v45 = vsel %vm19223_vm8, %v9717_v8, %v9719_v49  ;;  %vm19224_vm4 = vmmov %vm19204_vm0 }
 0x33c   : > { %vm19228_vm5 = vmmov %vm19221_vm3  ;;  %v9190_v55 = vor.u32 %v9189_v50, %v9186_v61  ;;  %v15523_v61 = vld [vmem:[#allocation3 + $0x30] sm:$0xff]   ;;  %v15536_v50 = vld [vmem:[%s18952_s3 + $0x108] sm:$0xff]   ;;  %v10792_v9 = vrot.slane %v10790_v34, 2 }
 0x33d   : > { %v9722_v3 = vsel %vm19228_vm5, %v9719_v49, %v9721_v1  ;;  %vm19230_vm13 = vmmov %vm19221_vm3 }
 0x33e   : > { %v9724_v43 = vsel %vm19230_vm13, %v9721_v1, %v9723_v12  ;;  %vm19232_vm15 = vmmov %vm19210_vm9  ;;  %vm19244_vm13 = vsmask.f32 5376 }
 0x33f   : > { %14912 = vmatmul.mubr.msk.bf16.gmra.mxu1 %vm19211_vm6, %v9137_v21  ;;  %vm19225_vm6 = vmmov %vm19204_vm0  ;;  %v15517_v21 = vld [vmem:[#allocation3 + $0x18] sm:$0xff]   ;;  %v9191_v48 = vsel %vm19232_vm15, %v9181_v44, %v9190_v55  ;;  %v10793_v44 = vshll.u32 %v15519_v5, 16 }
 0x340   : > { %14915 = vmatprep.mubr.msk.bf16.mxu1 %vm19213_vm7, %v9146_v51  ;;  %vm19227_vm7 = vmmov %vm19204_vm0  ;;  %v15516_v51 = vld [vmem:[#allocation3 + $0x10] sm:$0xfc]   ;;  %v10781_v17 = vshrl.u32 %v15517_v21, 16  ;;  %v10784_v54 = vshll.u32 %v15517_v21, 16 }
 0x341   : > { %vm19233_vm12 = vmmov %vm19221_vm3  ;;  %v10773_v32 = vshrl.u32 %v15516_v51, 16 }
 0x342   : > { %14952 = vmatmul.mubr.msk.bf16.gmra.mxu0 %vm19215_vm10, %v9714_v16  ;;  %vm19229_vm10 = vmmov %vm19204_vm0  ;;  %v10235_v40 = vsel %vm19233_vm12, %v10233_v20, %v10234_v29  ;;  %v10783_v49 = vrot.slane %v10781_v17, 2  ;;  %v10811_v20 = vshll.u32 %v15523_v61, 16 }
 0x343   : > { %14955 = vmatprep.mubr.msk.bf16.mxu0 %vm19217_vm1, %v9716_v52  ;;  %vm19231_vm1 = vmmov %vm19204_vm0  ;;  %v9727_v52 = vrot.slane %v18193_v24, 2  ;;  %v10775_v14 = vrot.slane %v10773_v32, 2  ;;  %v10808_v24 = vshrl.u32 %v15523_v61, 16 }
 0x344   : > { %vm19236_vm8 = vmmov %vm19221_vm3 }
 0x345   : > { %v14765_v38 = vpop.f32.mrf.mxu0  ;;  %v14725_v19 = vpop.f32.mrf.mxu1  ;;  %vm19238_vm9 = vmmov %vm19221_vm3 }
 0x346   : > { %v7703_v18 = vadd.f32 %v14765_v38, %v14721_v6  ;;  %v15507_v6 = vld [vmem:[#allocation3 + $0x88] sm:$0xff]   ;;  %vm19240_vm14 = vmmov %vm19221_vm3 }
 0x347   : > { %14916 = vmatmul.mubr.msk.bf16.gmra.mxu1 %vm19204_vm0, %v9155_v60  ;;  %v7570_v26 = vpop.f32.mrf.mxu0  ;;  %v6936_v10 = vpop.f32.mrf.mxu1  ;;  %v9725_v4 = vrot.slane %v15507_v6, 2  ;;  %vm19242_vm5 = vmmov %vm19221_vm3 }
 0x348   : > { %14919 = vmatprep.mubr.msk.bf16.mxu1 %vm19220_vm11, %v9164_v15  ;;  %7739 = vst [vmem:[#allocation5 + $0x30] sm:$0xff] %v7703_v18  ;;  %v7701_v46 = vadd.f32 %v7570_v26, %v6920_v62  ;;  %v15515_v62 = vld [vmem:[#allocation3 + $0x20] sm:$0xff]   ;;  %vm19234_vm11 = vmmov %vm19204_vm0  ;;  %v10786_v15 = vrot.slane %v10784_v54, 3  ;;  %v15527_v18 = vld [vmem:[%s18952_s3 + $0x110] sm:$0xff]  }
 0x349   : > { %v14766_v37 = vpop.f32.mrf.mxu0  ;;  %v14726_v63 = vpop.f32.mrf.mxu1  ;;  %v9726_v28 = vsel %vm19221_vm3, %v9723_v12, %v9725_v4  ;;  %v10236_v8 = vrot.slane %v15515_v62, 2  ;;  %v9728_v41 = vsel %vm19236_vm8, %v9725_v4, %v9727_v52  ;;  %v15520_v26 = vld [vmem:[#allocation3 + $0x30] sm:$0xff]   ;;  %v10802_v12 = vshll.u32 %v15521_v59, 16  ;;  %vm19246_vm15 = vmmov %vm19221_vm3  ;;  %v15524_v62 = vld [vmem:[#allocation3 + $0x40] sm:$0xff]  }
 0x34a   : > { %14956 = vmatmul.mubr.msk.bf16.gmra.mxu0 %vm19222_vm2, %v9718_v56  ;;  %7737 = vst [vmem:[#allocation5 + $0x20] sm:$0xff] %v7701_v46  ;;  %v7704_v27 = vadd.f32 %v14766_v37, %v14722_v22  ;;  %v10776_v22 = vshll.u32 %v15516_v51, 16  ;;  %vm19235_vm2 = vmmov %vm19204_vm0  ;;  %v15513_v56 = vld [vmem:[#allocation3 + $0x98] ss:$0 sps:$4 sm:$0x33]   ;;  %v10787_v1 = vor.u32 %v10786_v15, %v10783_v49  ;;  %v10244_v5 = vrot.slane %v15524_v62, 2 }
 0x34b   : > { %14959 = vmatprep.mubr.msk.bf16.mxu0 %vm19224_vm4, %v9720_v45  ;;  %v7573_v13 = vpop.f32.mrf.mxu0  ;;  %v6939_v25 = vpop.f32.mrf.mxu1  ;;  %vm19237_vm4 = vmmov %vm19204_vm0  ;;  %v9729_v36 = vrot.slane %v15513_v56, 2 }
 0x34c   : > { %7740 = vst [vmem:[#allocation5 + $0x38] sm:$0xff] %v7704_v27  ;;  %v7702_v58 = vadd.f32 %v7573_v13, %v6923_v57  ;;  %v10238_v57 = vrot.slane %v18198_v39, 2  ;;  %v10778_v45 = vrot.slane %v10776_v22, 3  ;;  %vm19247_vm12 = vmmov %vm19221_vm3  ;;  %vm19249_vm3 = vcmask 1043456  }
 0x34d   : > { %v9730_v27 = vsel %vm19242_vm5, %v9727_v52, %v9729_v36  ;;  %v18246_v52 = vld [vmem:[#allocation3 + $0x48] sm:$0xff]   ;;  %vm19251_vm8 = vmmov %vm19204_vm0 }
 0x34e   : > { %7738 = vst [vmem:[#allocation5 + $0x28] sm:$0xff] %v7702_v58  ;;  %v10779_v37 = vor.u32 %v10778_v45, %v10775_v14  ;;  %v10804_v58 = vrot.slane %v10802_v12, 3 }
 0x34f   : > { %14920 = vmatmul.mubr.msk.bf16.gmra.mxu1 %vm19225_vm6, %v9173_v30  ;;  %vm19239_vm6 = vmmov %vm19204_vm0  ;;  %v10239_v30 = vsel %vm19240_vm14, %v10236_v8, %v10238_v57 }
 0x350   : > { %14923 = vmatprep.mubr.msk.bf16.mxu1 %vm19227_vm7, %v9182_v33  ;;  %v18221_v33 = vld [vmem:[#allocation3 + $0x38] sm:$0xff]   ;;  %vm19241_vm7 = vmmov %vm19204_vm0 }
 0x351   : > { %vm19255_vm14 = vmmov %vm19204_vm0 }
 0x352   : > { %14960 = vmatmul.mubr.msk.bf16.gmra.mxu0 %vm19229_vm10, %v9722_v3  ;;  %v10240_v3 = vrot.slane %v15520_v26, 2  ;;  %vm19243_vm10 = vmmov %vm19204_vm0  ;;  %v18264_v26 = vld [vmem:[#allocation3 + $0x58] sm:$0xff]  }
 0x353   : > { %14963 = vmatprep.mubr.msk.bf16.mxu0 %vm19231_vm1, %v9724_v43  ;;  %v14769_v16 = vpop.f32.mrf.mxu0  ;;  %v10242_v43 = vrot.slane %v18221_v33, 2  ;;  %vm19245_vm1 = vmmov %vm19204_vm0 }
 0x354   : > { %v7707_v35 = vadd.f32 %v14769_v16, %v14725_v19  ;;  %v10237_v19 = vsel %vm19238_vm9, %v10234_v29, %v10236_v8  ;;  %v15525_v29 = vld [vmem:[#allocation3 + $0x38] sm:$0xff]   ;;  %vm19253_vm9 = vmmov %vm19204_vm0 }
 0x355   : > { %v18202_v42 = vpop.f32.mrf.mxu1  ;;  %v7586_v53 = vpop.f32.mrf.mxu0  ;;  %v10243_v17 = vsel %vm19247_vm12, %v10240_v3, %v10242_v43  ;;  %v10817_v39 = vshrl.u32 %v15525_v29, 16 }
 0x356   : > { %7743 = vst [vmem:[#allocation5 + $0x50] sm:$0xff] %v7707_v35  ;;  %v7705_v60 = vadd.f32 %v7586_v53, %v6936_v10  ;;  %v10799_v10 = vshrl.u32 %v15521_v59, 16  ;;  %v10820_v35 = vshll.u32 %v15525_v29, 16  ;;  %v10810_v53 = vrot.slane %v10808_v24, 2  ;;  %v15530_v59 = vld [vmem:[#allocation3 + $0x48] sm:$0xff]  }
 0x357   : > { %14924 = vmatmul.mubr.msk.bf16.gmra.mxu1 %vm19204_vm0, %v9191_v48  ;;  %v18208_v2 = vpop.f32.mrf.mxu1  ;;  %v14770_v11 = vpop.f32.mrf.mxu0  ;;  %v10241_v48 = vsel %vm19246_vm15, %v10238_v57, %v10240_v3  ;;  %v10835_v34 = vshrl.u32 %v15530_v59, 16  ;;  %vm19261_vm15 = vmmov %vm19204_vm0 }
 0x358   : > { %14979 = vmatprep.mubr.msk.bf16.mxu1 %vm19234_vm11, %v10235_v40  ;;  %7741 = vst [vmem:[#allocation5 + $0x40] sm:$0xff] %v7705_v60  ;;  %v7708_v47 = vadd.f32 %v14770_v11, %v14726_v63  ;;  %v10795_v63 = vrot.slane %v10793_v44, 3  ;;  %v10801_v6 = vrot.slane %v10799_v10, 2  ;;  %vm19248_vm11 = vmmov %vm19204_vm0  ;;  %v10246_v11 = vrot.slane %v18246_v52, 2  ;;  %v15537_v52 = vld [vmem:[#allocation3 + $0x60] sm:$0xff]  }
 0x359   : > { %v18211_v7 = vpop.f32.mrf.mxu1  ;;  %v7589_v38 = vpop.f32.mrf.mxu0  ;;  %v10838_v44 = vshll.u32 %v15530_v59, 16 }
 0x35a   : > { %14964 = vmatmul.mubr.msk.bf16.gmra.mxu0 %vm19235_vm2, %v9726_v28  ;;  %7744 = vst [vmem:[#allocation5 + $0x58] sm:$0xff] %v7708_v47  ;;  %v7706_v23 = vadd.f32 %v7589_v38, %v6939_v25  ;;  %v15545_v25 = vld [vmem:[%s18952_s3 + $0x100] sm:$0xff]   ;;  %v10796_v4 = vor.u32 %v10795_v63, %v10792_v9  ;;  %v10805_v40 = vor.u32 %v10804_v58, %v10801_v6  ;;  %v10813_v28 = vrot.slane %v10811_v20, 3  ;;  %vm19250_vm2 = vmmov %vm19244_vm13  ;;  %v15529_v38 = vld [vmem:[#allocation3 + $0x50] sm:$0xff]  }
 0x35b   : > { %14967 = vmatprep.mubr.msk.bf16.mxu0 %vm19237_vm4, %v9728_v41  ;;  %v18219_v46 = vpop.f32.mrf.mxu1  ;;  %v15528_v41 = vld [vmem:[#allocation3 + $0x40] sm:$0xff]   ;;  %vm19252_vm4 = vmmov %vm19250_vm2  ;;  %v10248_v33 = vrot.slane %v15529_v38, 2  ;;  %v10250_v9 = vrot.slane %v18264_v26, 2  ;;  %v15534_v63 = vld [vmem:[#allocation3 + $0x58] sm:$0xff]  }
 0x35c   : > { %7742 = vst [vmem:[#allocation5 + $0x48] sm:$0xff] %v7706_v23  ;;  %v10797_v8 = vsel %vm19250_vm2, %v10787_v1, %v10796_v4  ;;  %v10806_v49 = vsel %vm19252_vm4, %v10796_v4, %v10805_v40  ;;  %v10814_v47 = vor.u32 %v10813_v28, %v10810_v53  ;;  %v10826_v45 = vshrl.u32 %v15528_v41, 16  ;;  %v15533_v20 = vld [vmem:[#allocation3 + $0x60] sm:$0xff]  }
 0x35d   : > { %v18229_v13 = vpop.f32.mrf.mxu1  ;;  %v10856_v62 = vshll.u32 %v15534_v63, 16 }
 0x35e   : > { %v10828_v10 = vrot.slane %v10826_v45, 2 }
 0x35f   : > { %14980 = vmatmul.mubr.msk.bf16.vlgmr.msra.gmra.mxu1 %vm19239_vm6, %v10237_v19  ;;  %v18235_v21 = vpop.f32.mrf.mxu1  ;;  %vm19254_vm6 = vmmov %vm19242_vm5 }
 0x360   : > { %15060 = vmatpush3.bf16.msra.mxu1 %v18113_v0  ;;  %14983 = vmatprep.mubr.msk.bf16.mxu1 %vm19241_vm7, %v10239_v30  ;;  %v10788_v0 = vsel %vm19244_vm13, %v10779_v37, %v10787_v1  ;;  %v10245_v14 = vsel %vm19254_vm6, %v10242_v43, %v10244_v5  ;;  %vm19256_vm7 = vmmov %vm19242_vm5 }
 0x361   : > { %15061 = vmatprep.subr.bf16.mxu1 %v15527_v18  ;;  %v14773_v55 = vpop.f32.mrf.mxu0  ;;  %v18244_v54 = vpop.f32.mrf.mxu1  ;;  %v10247_v23 = vsel %vm19256_vm7, %v10244_v5, %v10246_v11  ;;  %vm19257_vm5 = vmmov %vm19204_vm0 }
 0x362   : > { %14968 = vmatmul.mubr.msk.bf16.gmra.mxu0 %vm19243_vm10, %v9730_v27  ;;  %v7711_v51 = vadd.f32 %v14773_v55, %v18202_v42  ;;  %v12200_v42 = vsel %vm19249_vm3, %v18144_v31, 0  ;;  %v10822_v31 = vrot.slane %v10820_v35, 3  ;;  %vm19258_vm10 = vmmov %vm19250_vm2  ;;  %v10840_v27 = vrot.slane %v10838_v44, 3 }
 0x363   : > { %15023 = vmatprep.mubr.msk.bf16.mxu0 %vm19245_vm1, %v10788_v0  ;;  %v7602_v16 = vpop.f32.mrf.mxu0  ;;  %v18256_v57 = vpop.f32.mrf.mxu1  ;;  %v10815_v1 = vsel %vm19258_vm10, %v10805_v40, %v10814_v47  ;;  %vm19259_vm13 = vmmov %vm19204_vm0  ;;  %v18283_v40 = vld [vmem:[#allocation3 + $0x68] sm:$0xff]  }
 0x364   : > { %15062 = vmatpush3.bf16.msra.mxu1 %v15527_v18  ;;  %7747 = vst [vmem:[#allocation5 + $0x70] sm:$0xff] %v7711_v51  ;;  %v7709_v32 = vadd.f32 %v7602_v16, %v18208_v2  ;;  %v10819_v2 = vrot.slane %v10817_v39, 2  ;;  %vm19260_vm1 = vmmov %vm19250_vm2  ;;  %v10254_v5 = vrot.slane %v18283_v40, 2  ;;  %v18327_v40 = vld [vmem:[#allocation3 + $0x88] sm:$0xff]  }
 0x365   : > { %15063 = vmatprep.subr.bf16.mxu1 %v15536_v50  ;;  %v14774_v22 = vpop.f32.mrf.mxu0  ;;  %vm19263_vm12 = vmmov %vm19257_vm5 }
 0x366   : > { %7745 = vst [vmem:[#allocation5 + $0x60] sm:$0xff] %v7709_v32  ;;  %v7712_v60 = vadd.f32 %v14774_v22, %v18211_v7  ;;  %v10829_v7 = vshll.u32 %v15528_v41, 16  ;;  %v10823_v19 = vor.u32 %v10822_v31, %v10819_v2  ;;  %vm19265_vm3 = vmmov %vm19257_vm5  ;;  %v10252_v22 = vrot.slane %v15533_v20, 2  ;;  %v15539_v41 = vld [vmem:[#allocation3 + $0x68] sm:$0xff]  }
 0x367   : > { %14984 = vmatmul.mubr.msk.bf16.gmra.mxu1 %vm19204_vm0, %v10241_v48  ;;  %v7605_v15 = vpop.f32.mrf.mxu0  ;;  %vm19262_vm0 = vmmov %vm19254_vm6  ;;  %v10853_v48 = vshrl.u32 %v15534_v63, 16  ;;  %v10862_v31 = vshrl.u32 %v15537_v52, 16  ;;  %v15543_v63 = vld [vmem:[#allocation3 + $0x78] sm:$0xff]  }
 0x368   : > { %14987 = vmatprep.mubr.msk.bf16.mxu1 %vm19248_vm11, %v10243_v17  ;;  %15064 = vmatpush3.bf16.msra.mxu1 %v15536_v50  ;;  %7748 = vst [vmem:[#allocation5 + $0x78] sm:$0xff] %v7712_v60  ;;  %v7710_v56 = vadd.f32 %v7605_v15, %v18219_v46  ;;  %v15532_v46 = vld [vmem:[#allocation3 + $0x50] sm:$0xff]   ;;  %v10831_v12 = vrot.slane %v10829_v7, 3  ;;  %v10824_v37 = vsel %vm19260_vm1, %v10814_v47, %v10823_v19  ;;  %v10837_v50 = vrot.slane %v10835_v34, 2  ;;  %vm19264_vm11 = vmmov %vm19262_vm0 }
 0x369   : > { %15065 = vmatprep.subr.bf16.mxu1 %v15545_v25  ;;  %v10844_v58 = vshrl.u32 %v15532_v46, 16  ;;  %v10847_v43 = vshll.u32 %v15532_v46, 16  ;;  %v10249_v24 = vsel %vm19262_vm0, %v10246_v11, %v10248_v33  ;;  %v10251_v4 = vsel %vm19264_vm11, %v10248_v33, %v10250_v9  ;;  %vm19266_vm2 = vmmov %vm19260_vm1  ;;  %v15538_v47 = vld [vmem:[#allocation3 + $0x70] sm:$0xff]  }
 0x36a   : > { %15024 = vmatmul.mubr.msk.bf16.vlgmr.msra.gmra.mxu0 %vm19251_vm8, %v10797_v8  ;;  %7746 = vst [vmem:[#allocation5 + $0x68] sm:$0xff] %v7710_v56  ;;  %v10832_v55 = vor.u32 %v10831_v12, %v10828_v10  ;;  %vm19267_vm8 = vmmov %vm19265_vm3  ;;  %v10855_v8 = vrot.slane %v10853_v48, 2  ;;  %v10858_v60 = vrot.slane %v10856_v62, 3  ;;  %v10865_v56 = vshll.u32 %v15537_v52, 16  ;;  %v15541_v46 = vld [vmem:[#allocation3 + $0x70] sm:$0xff]  }
 0x36b   : > { %15027 = vmatprep.mubr.msk.bf16.mxu0 %vm19253_vm9, %v10806_v49  ;;  %15104 = vmatpush3.bf16.msra.mxu0 %v12200_v42  ;;  %v10846_v39 = vrot.slane %v10844_v58, 2  ;;  %v10849_v35 = vrot.slane %v10847_v43, 3  ;;  %vm19268_vm4 = vmmov %vm19260_vm1  ;;  %v10256_v33 = vrot.slane %v15538_v47, 2  ;;  %v10880_v58 = vshrl.u32 %v15541_v46, 16 }
 0x36c   : > { %15066 = vmatpush3.bf16.msra.mxu1 %v15545_v25  ;;  %v10833_v42 = vsel %vm19266_vm2, %v10823_v19, %v10832_v55  ;;  %vm19269_vm9 = vmmov %vm19265_vm3  ;;  %v10859_v7 = vor.u32 %v10858_v60, %v10855_v8  ;;  %v10874_v19 = vshll.u32 %v15539_v41, 16  ;;  %v10867_v12 = vrot.slane %v10865_v56, 3 }
 0x36d   : > { %v10850_v2 = vor.u32 %v10849_v35, %v10846_v39  ;;  %vm19270_vm6 = vmmov %vm19262_vm0  ;;  %v10883_v43 = vshll.u32 %v15541_v46, 16  ;;  %v10257_v20 = vsel %vm19262_vm0, %v10254_v5, %v10256_v33  ;;  %v10889_v48 = vshrl.u32 %v15543_v63, 16 }
 0x36e   : > { %v10253_v59 = vsel %vm19270_vm6, %v10250_v9, %v10252_v22  ;;  %vm19272_vm7 = vmmov %vm19262_vm0  ;;  %v10892_v62 = vshll.u32 %v15543_v63, 16  ;;  %v10882_v39 = vrot.slane %v10880_v58, 2  ;;  %v15551_v63 = vld [vmem:[#allocation3 + $0xa0] ss:$0 sps:$4 sm:$0x33]  }
 0x36f   : > { %v14737_v18 = vpop.f32.mrf.mxu1  ;;  %14988 = vmatmul.mubr.msk.bf16.gmra.mxu1 %vm19255_vm14, %v10245_v14  ;;  %vm19271_vm14 = vmmov %vm19265_vm3  ;;  %v10255_v38 = vsel %vm19272_vm7, %v10252_v22, %v10254_v5  ;;  %v10885_v35 = vrot.slane %v10883_v43, 3  ;;  %v10891_v60 = vrot.slane %v10889_v48, 2 }
 0x370   : > { %14991 = vmatprep.mubr.msk.bf16.mxu1 %vm19257_vm5, %v10247_v23  ;;  %v18304_v23 = vld [vmem:[#allocation3 + $0x78] sm:$0xff]   ;;  %vm19273_vm5 = vmmov %vm19265_vm3  ;;  %v10894_v5 = vrot.slane %v10892_v62, 3  ;;  %v10268_v62 = vrot.slane %v15551_v63, 2 }
 0x371   : > { %v6984_v30 = vpop.f32.mrf.mxu1  ;;  %vm19274_vm10 = vmmov %vm19260_vm1  ;;  %v10258_v9 = vrot.slane %v18304_v23, 2  ;;  %v15550_v23 = vld [vmem:[#allocation3 + $0x90] sm:$0xff]  }
 0x372   : > { %v14777_v36 = vpop.f32.mrf.mxu0  ;;  %15028 = vmatmul.mubr.msk.bf16.gmra.mxu0 %vm19259_vm13, %v10815_v1  ;;  %vm19275_vm13 = vmmov %vm19265_vm3  ;;  %v10919_v58 = vshll.u32 %v15550_v23, 16 }
 0x373   : > { %v18270_v61 = vpop.f32.mrf.mxu1  ;;  %v7715_v3 = vadd.f32 %v14777_v36, %v18229_v13  ;;  %15031 = vmatprep.mubr.msk.bf16.mxu0 %vm19261_vm15, %v10824_v37  ;;  %v10841_v13 = vor.u32 %v10840_v27, %v10837_v50  ;;  %v10860_v37 = vsel %vm19260_vm1, %v10850_v2, %v10859_v7  ;;  %v10876_v27 = vrot.slane %v10874_v19, 3  ;;  %vm19276_vm15 = vmmov %vm19265_vm3  ;;  %v15547_v19 = vld [vmem:[#allocation3 + $0x90] sm:$0xff]  }
 0x374   : > { %v7618_v0 = vpop.f32.mrf.mxu0  ;;  %vm19278_vm11 = vmmov %vm19262_vm0 }
 0x375   : > { %v18275_v6 = vpop.f32.mrf.mxu1  ;;  %7751 = vst [vmem:[#allocation5 + $0x90] sm:$0xff] %v7715_v3  ;;  %v7713_v29 = vadd.f32 %v7618_v0, %v18235_v21  ;;  %v10842_v28 = vsel %vm19268_vm4, %v10832_v55, %v10841_v13  ;;  %v10851_v26 = vsel %vm19274_vm10, %v10841_v13, %v10850_v2  ;;  %vm19279_vm2 = vmmov %vm19260_vm1  ;;  %v10886_v2 = vor.u32 %v10885_v35, %v10882_v39 }
 0x376   : > { %v14778_v25 = vpop.f32.mrf.mxu0  ;;  %vm19281_vm4 = vmmov %vm19260_vm1 }
 0x377   : > { %v18279_v51 = vpop.f32.mrf.mxu1  ;;  %14992 = vmatmul.mubr.msk.bf16.gmra.mxu1 %vm19263_vm12, %v10249_v24  ;;  %7749 = vst [vmem:[#allocation5 + $0x80] sm:$0xff] %v7713_v29  ;;  %v7716_v16 = vadd.f32 %v14778_v25, %v18244_v54  ;;  %v15542_v29 = vld [vmem:[#allocation3 + $0x80] sm:$0xff]   ;;  %vm19277_vm12 = vmmov %vm19265_vm3 }
 0x378   : > { %14995 = vmatprep.mubr.msk.bf16.mxu1 %vm19265_vm3, %v10251_v4  ;;  %v7621_v21 = vpop.f32.mrf.mxu0  ;;  %v10259_v4 = vsel %vm19278_vm11, %v10256_v33, %v10258_v9  ;;  %v10260_v52 = vrot.slane %v15542_v29, 2  ;;  %vm19283_vm6 = vmmov %vm19262_vm0 }
 0x379   : > { %v18287_v17 = vpop.f32.mrf.mxu1  ;;  %7752 = vst [vmem:[#allocation5 + $0x98] sm:$0xff] %v7716_v16  ;;  %v7714_v32 = vadd.f32 %v7621_v21, %v18256_v57  ;;  %vm19285_vm7 = vmmov %vm19262_vm0 }
 0x37a   : > { %v14781_v53 = vpop.f32.mrf.mxu0  ;;  %15032 = vmatmul.mubr.msk.bf16.gmra.mxu0 %vm19267_vm8, %v10833_v42  ;;  %vm19280_vm8 = vmmov %vm19265_vm3 }
 0x37b   : > { %v18293_v54 = vpop.f32.mrf.mxu1  ;;  %7750 = vst [vmem:[#allocation5 + $0x88] sm:$0xff] %v7714_v32  ;;  %v7719_v49 = vadd.f32 %v14781_v53, %v14737_v18  ;;  %15035 = vmatprep.mubr.msk.bf16.mxu0 %vm19269_vm9, %v10842_v28  ;;  %v10871_v18 = vshrl.u32 %v15539_v41, 16  ;;  %v15546_v32 = vld [vmem:[#allocation3 + $0x80] sm:$0xff]   ;;  %v15548_v53 = vld [vmem:[#allocation3 + $0x88] sm:$0xff]   ;;  %v10262_v41 = vrot.slane %v18327_v40, 2  ;;  %vm19282_vm9 = vmmov %vm19265_vm3 }
 0x37c   : > { %v7634_v15 = vpop.f32.mrf.mxu0  ;;  %v10907_v47 = vshrl.u32 %v15548_v53, 16  ;;  %vm19287_vm10 = vmmov %vm19260_vm1 }
 0x37d   : > { %v18297_v57 = vpop.f32.mrf.mxu1  ;;  %7755 = vst [vmem:[#allocation5 + $0xb0] sm:$0xff] %v7719_v49  ;;  %v7717_v11 = vadd.f32 %v7634_v15, %v6984_v30  ;;  %v10864_v30 = vrot.slane %v10862_v31, 2  ;;  %v10873_v50 = vrot.slane %v10871_v18, 2  ;;  %v10261_v31 = vsel %vm19283_vm6, %v10258_v9, %v10260_v52  ;;  %vm19291_vm11 = vmmov %vm19262_vm0 }
 0x37e   : > { %v14782_v14 = vpop.f32.mrf.mxu0  ;;  %v10263_v18 = vsel %vm19285_vm7, %v10260_v52, %v10262_v41  ;;  %v10909_v33 = vrot.slane %v10907_v47, 2  ;;  %v10916_v9 = vshrl.u32 %v15550_v23, 16  ;;  %v7771_v52 = vld [vmem:[#allocation5 + $0x10] sm:$0xff]  ;;  %vm19296_vm6 = vmmov %vm19265_vm3  ;;  %vm19298_vm7 = vcmask 1044480  }
 0x37f   : > { %v18300_v45 = vpop.f32.mrf.mxu1  ;;  %14996 = vmatmul.mubr.msk.bf16.gmra.mxu1 %vm19271_vm14, %v10253_v59  ;;  %7753 = vst [vmem:[#allocation5 + $0xa0] sm:$0xff] %v7717_v11  ;;  %v7720_v34 = vadd.f32 %v14782_v14, %v18270_v61  ;;  %v10868_v24 = vor.u32 %v10867_v12, %v10864_v30  ;;  %v10898_v11 = vshrl.u32 %v15546_v32, 16  ;;  %v10901_v59 = vshll.u32 %v15546_v32, 16  ;;  %vm19284_vm14 = vmmov %vm19265_vm3 }
 0x380   : > { %14999 = vmatprep.mubr.msk.bf16.mxu1 %vm19273_vm5, %v10255_v38  ;;  %v7637_v44 = vpop.f32.mrf.mxu0  ;;  %v10910_v14 = vshll.u32 %v15548_v53, 16  ;;  %vm19286_vm5 = vmmov %vm19265_vm3  ;;  %v10918_v48 = vrot.slane %v10916_v9, 2  ;;  %v15559_v53 = vld [vmem:[#allocation2 + $0x10] sm:$0xff]  }
 0x381   : > { %v18309_v1 = vpop.f32.mrf.mxu1  ;;  %7756 = vst [vmem:[#allocation5 + $0xb8] sm:$0xff] %v7720_v34  ;;  %v7718_v10 = vadd.f32 %v7637_v44, %v18275_v6  ;;  %v10869_v22 = vsel %vm19279_vm2, %v10859_v7, %v10868_v24  ;;  %v10900_v30 = vrot.slane %v10898_v11, 2  ;;  %v10903_v46 = vrot.slane %v10901_v59, 3  ;;  %vm19292_vm2 = vmmov %vm19260_vm1 }
 0x382   : > { %v14785_v36 = vpop.f32.mrf.mxu0  ;;  %15036 = vmatmul.mubr.msk.bf16.gmra.mxu0 %vm19275_vm13, %v10851_v26  ;;  %vm19288_vm13 = vmmov %vm19265_vm3 }
 0x383   : > { %v18314_v61 = vpop.f32.mrf.mxu1  ;;  %7754 = vst [vmem:[#allocation5 + $0xa8] sm:$0xff] %v7718_v10  ;;  %v7723_v3 = vadd.f32 %v14785_v36, %v18279_v51  ;;  %15039 = vmatprep.mubr.msk.bf16.mxu0 %vm19276_vm15, %v10860_v37  ;;  %v10877_v51 = vor.u32 %v10876_v27, %v10873_v50  ;;  %v15549_v10 = vld [vmem:[#allocation3 + $0x98] sm:$0xff]   ;;  %v10912_v36 = vrot.slane %v10910_v14, 3  ;;  %v10264_v27 = vrot.slane %v15547_v19, 2  ;;  %vm19289_vm15 = vmmov %vm19265_vm3 }
 0x384   : > { %v7650_v0 = vpop.f32.mrf.mxu0 }
 0x385   : > { %v18319_v6 = vpop.f32.mrf.mxu1  ;;  %7759 = vst [vmem:[#allocation5 + $0xd0] sm:$0xff] %v7723_v3  ;;  %v7721_v55 = vadd.f32 %v7650_v0, %v18287_v17  ;;  %v10887_v26 = vsel %vm19287_vm10, %v10877_v51, %v10886_v2  ;;  %v15552_v3 = vld [vmem:[#allocation3 + $0x98] sm:$0xff]   ;;  %v10265_v29 = vsel %vm19262_vm0, %v10262_v41, %v10264_v27  ;;  %v7769_v41 = vld [vmem:[#allocation5] sm:$0xff]  ;;  %vm19300_vm10 = vmmov %vm19265_vm3 }
 0x386   : > { %v14786_v25 = vpop.f32.mrf.mxu0  ;;  %v10925_v40 = vshrl.u32 %v15552_v3, 16  ;;  %v10928_v35 = vshll.u32 %v15552_v3, 16  ;;  %v15560_v3 = vld [vmem:[#allocation2 + $0x18] sm:$0xff]  }
 0x387   : > { %v18323_v13 = vpop.f32.mrf.mxu1  ;;  %15000 = vmatmul.mubr.msk.bf16.gmra.mxu1 %vm19277_vm12, %v10257_v20  ;;  %7757 = vst [vmem:[#allocation5 + $0xc0] sm:$0xff] %v7721_v55  ;;  %v7724_v16 = vadd.f32 %v14786_v25, %v18293_v54  ;;  %v10878_v54 = vsel %vm19281_vm4, %v10868_v24, %v10877_v51  ;;  %v10266_v55 = vrot.slane %v15549_v10, 2  ;;  %v10904_v20 = vor.u32 %v10903_v46, %v10900_v30  ;;  %vm19290_vm12 = vmmov %vm19265_vm3  ;;  %v7770_v10 = vld [vmem:[#allocation5 + $0x8] sm:$0xff] }
 0x388   : > { %15003 = vmatprep.mubr.msk.bf16.mxu1 %vm19265_vm3, %v10259_v4  ;;  %v7653_v21 = vpop.f32.mrf.mxu0  ;;  %v18362_v25 = vor.u32 %v10912_v36, %v10909_v33  ;;  %vm19294_vm4 = vmmov %vm19265_vm3 }
 0x389   : > { %v18331_v17 = vpop.f32.mrf.mxu1  ;;  %7760 = vst [vmem:[#allocation5 + $0xd8] sm:$0xff] %v7724_v16  ;;  %v7722_v42 = vadd.f32 %v7653_v21, %v18297_v57  ;;  %v15553_v16 = vld [vmem:[#allocation3 + $0x10] sm:$0xf8]   ;;  %v18368_v21 = vld [vmem:[#allocation3 + $0x18] sm:$0xff]  }
 0x38a   : > { %v14789_v28 = vpop.f32.mrf.mxu0  ;;  %15040 = vmatmul.mubr.msk.bf16.gmra.mxu0 %vm19280_vm8, %v10869_v22  ;;  %v15558_v22 = vld [vmem:[#allocation2 + $0x8] sm:$0xfe]   ;;  %vm19293_vm8 = vmmov %vm19260_vm1  ;;  %v11444_v11 = vrot.slane %v15553_v16, 3  ;;  %v11445_v59 = vrot.slane %v18368_v21, 3 }
 0x38b   : > { %v18337_v8 = vpop.f32.mrf.mxu1  ;;  %7758 = vst [vmem:[#allocation5 + $0xc8] sm:$0xff] %v7722_v42  ;;  %v7727_v49 = vadd.f32 %v14789_v28, %v18300_v45  ;;  %15043 = vmatprep.mubr.msk.bf16.mxu0 %vm19282_vm9, %v10878_v54  ;;  %v10895_v45 = vor.u32 %v10894_v5, %v10891_v60  ;;  %v10914_v5 = vsel %vm19293_vm8, %v10904_v20, %v18362_v25  ;;  %vm19295_vm9 = vmmov %vm19262_vm0  ;;  %v11976_v19 = vshrl.u32 %v15558_v22, 16 }
 0x38c   : > { %v7666_v15 = vpop.f32.mrf.mxu0  ;;  %v11979_v23 = vshll.u32 %v15558_v22, 16  ;;  %v11446_v36 = vsel %vm19298_vm7, %v11444_v11, %v11445_v59  ;;  %v7776_v22 = vld [vmem:[#allocation5 + $0x38] sm:$0xff]  ;;  %vm19303_vm0 = vmmov %vm19298_vm7  ;;  %v7774_v11 = vld [vmem:[#allocation5 + $0x28] sm:$0xff] }
 0x38d   : > { %v18342_v57 = vpop.f32.mrf.mxu1  ;;  %7763 = vst [vmem:[#allocation5 + $0xf0] sm:$0xff] %v7727_v49  ;;  %v7725_v56 = vadd.f32 %v7666_v15, %v18309_v1  ;;  %v10896_v50 = vsel %vm19260_vm1, %v10886_v2, %v10895_v45  ;;  %v10905_v60 = vsel %vm19292_vm2, %v10895_v45, %v10904_v20  ;;  %v10269_v2 = vsel %vm19295_vm9, %v10266_v55, %v10268_v62  ;;  %v7773_v62 = vld [vmem:[#allocation5 + $0x20] sm:$0xff]  ;;  %vm19307_vm8 = vmmov %vm19260_vm1 }
 0x38e   : > { %v14790_v7 = vpop.f32.mrf.mxu0  ;;  %vm19306_vm2 = vsmask.f32 6400  ;;  %vm19309_vm9 = vcmask 64512   ;;  %vm19312_vm7 = vmmov %vm19303_vm0 }
 0x38f   : > { %v14805_v38 = vpop.f32.mrf.mxu1  ;;  %15004 = vmatmul.mubr.msk.bf16.gmra.mxu1 %vm19284_vm14, %v10261_v31  ;;  %7761 = vst [vmem:[#allocation5 + $0xe0] sm:$0xff] %v7725_v56  ;;  %v7728_v34 = vadd.f32 %v14790_v7, %v18314_v61  ;;  %v10927_v31 = vrot.slane %v10925_v40, 2  ;;  %v18383_v56 = vld [vmem:[#allocation3 + $0x20] sm:$0xff]   ;;  %v10930_v7 = vrot.slane %v10928_v35, 3  ;;  %vm19297_vm14 = vmmov %vm19265_vm3 }
 0x390   : > { %15007 = vmatprep.mubr.msk.bf16.mxu1 %vm19286_vm5, %v10263_v18  ;;  %v7669_v44 = vpop.f32.mrf.mxu0  ;;  %v8238_v28 = vadd.f32 %v14805_v38, %v7771_v52  ;;  %v7772_v38 = vld [vmem:[#allocation5 + $0x18] sm:$0xff]  ;;  %vm19299_vm5 = vmmov %vm19260_vm1 }
 0x391   : > { %v8093_v1 = vpop.f32.mrf.mxu1  ;;  %7764 = vst [vmem:[#allocation5 + $0xf8] sm:$0xff] %v7728_v34  ;;  %v7726_v12 = vadd.f32 %v7669_v44, %v18319_v6  ;;  %v11984_v34 = vshrl.u32 %v15559_v53, 16  ;;  %v11987_v44 = vshll.u32 %v15559_v53, 16  ;;  %v18401_v63 = vor.u32 %v10930_v7, %v10927_v31  ;;  %v15561_v31 = vld [vmem:[#allocation3 + $0x30] sm:$0xff]  }
 0x392   : > { %v14793_v37 = vpop.f32.mrf.mxu0  ;;  %15044 = vmatmul.mubr.msk.bf16.gmra.mxu0 %vm19288_vm13, %v10887_v26  ;;  %vm19301_vm13 = vmmov %vm19265_vm3 }
 0x393   : > { %v18354_v61 = vpop.f32.mrf.mxu1  ;;  %7762 = vst [vmem:[#allocation5 + $0xe8] sm:$0xff] %v7726_v12  ;;  %v7731_v0 = vadd.f32 %v14793_v37, %v18323_v13  ;;  %15047 = vmatprep.mubr.msk.bf16.mxu0 %vm19289_vm15, %v10896_v50  ;;  %v10267_v13 = vsel %vm19291_vm11, %v10264_v27, %v10266_v55  ;;  %v11447_v37 = vrot.slane %v18383_v56, 3  ;;  %v18396_v50 = vld [vmem:[#allocation3 + $0x28] sm:$0xff]   ;;  %v11981_v55 = vrot.slane %v11979_v23, 2  ;;  %vm19302_vm15 = vmmov %vm19265_vm3 }
 0x394   : > { %v7682_v6 = vpop.f32.mrf.mxu0  ;;  %v8239_v26 = vadd.f32 %v18354_v61, %v7772_v38  ;;  %v11989_v20 = vrot.slane %v11987_v44, 2  ;;  %vm19305_vm11 = vmmov %vm19303_vm0 }
 0x395   : > { %v18358_v43 = vpop.f32.mrf.mxu1  ;;  %7767 = vst [vmem:[#allocation5 + $0x110] sm:$0xff] %v7731_v0  ;;  %v7729_v24 = vadd.f32 %v7682_v6, %v18331_v17  ;;  %v10921_v17 = vrot.slane %v10919_v58, 3  ;;  %v7775_v0 = vld [vmem:[#allocation5 + $0x30] sm:$0xff] }
 0x396   : > { %v14794_v51 = vpop.f32.mrf.mxu0  ;;  %v8237_v61 = vadd.f32 %v18358_v43, %v7770_v10  ;;  %v11451_v10 = vrot.slane %v15561_v31, 3 }
 0x397   : > { %v18364_v4 = vpop.f32.mrf.mxu1  ;;  %15008 = vmatmul.mubr.msk.bf16.gmra.mxu1 %vm19290_vm12, %v10265_v29  ;;  %7765 = vst [vmem:[#allocation5 + $0x100] sm:$0xff] %v7729_v24  ;;  %v7732_v39 = vadd.f32 %v14794_v51, %v18337_v8  ;;  %v15555_v8 = vld [vmem:[#allocation3 + $0xa0] ss:$0 sps:$4 sm:$0x77]   ;;  %v10922_v14 = vor.u32 %v10921_v17, %v10918_v48  ;;  %v11978_v29 = vrot.slane %v11976_v19, 1  ;;  %v11986_v24 = vrot.slane %v11984_v34, 1  ;;  %vm19304_vm12 = vmmov %vm19265_vm3 }
 0x398   : > { %15011 = vmatprep.mubr.msk.bf16.mxu1 %vm19265_vm3, %v10267_v13  ;;  %v7685_v32 = vpop.f32.mrf.mxu0  ;;  %v10934_v46 = vshrl.u32 %v15555_v8, 16  ;;  %v15563_v51 = vld [vmem:[#allocation2 + $0x20] sm:$0xff]   ;;  %v8242_v43 = vadd.f32 %v18364_v4, %v7775_v0  ;;  %v11449_v17 = vrot.slane %v18396_v50, 3  ;;  %v11993_v4 = vshrl.u32 %v15560_v3, 16 }
 0x399   : > { %v18372_v42 = vpop.f32.mrf.mxu1  ;;  %7768 = vst [vmem:[#allocation5 + $0x118] sm:$0xff] %v7732_v39  ;;  %v7730_v54 = vadd.f32 %v7685_v32, %v18342_v57  ;;  %v8236_v57 = vadd.f32 %v8093_v1, %v7769_v41  ;;  %v10937_v1 = vshll.u32 %v15555_v8, 16  ;;  %v10923_v9 = vsel %vm19299_vm5, %v18362_v25, %v10922_v14  ;;  %vm19313_vm5 = vmmov %vm19306_vm2 }
 0x39a   : > { %v14849_v49 = vpop.f32.mrf.mxu0  ;;  %15048 = vmatmul.mubr.msk.bf16.gmra.mxu0 %vm19294_vm4, %v10905_v60  ;;  %v10936_v48 = vrot.slane %v10934_v46, 2  ;;  %v10932_v16 = vsel %vm19260_vm1, %v10922_v14, %v18401_v63  ;;  %v8240_v35 = vadd.f32 %v18372_v42, %v7773_v62  ;;  %v11996_v32 = vshll.u32 %v15560_v3, 16  ;;  %v18427_v14 = vld [vmem:[#allocation3 + $0x38] sm:$0xff]   ;;  %vm19308_vm4 = vmmov %vm19265_vm3 }
 0x39b   : > { %v18379_v15 = vpop.f32.mrf.mxu1  ;;  %7766 = vst [vmem:[#allocation5 + $0x108] sm:$0xff] %v7730_v54  ;;  %v8777_v47 = vadd.f32 %v14849_v49, %v8238_v28  ;;  %15051 = vmatprep.mubr.msk.bf16.mxu0 %vm19296_vm6, %v10914_v5  ;;  %v10939_v25 = vrot.slane %v10937_v1, 3  ;;  %v11982_v54 = vor.u32 %v11981_v55, %v11978_v29  ;;  %v18415_v60 = vor.u32 %v11989_v20, %v11986_v24  ;;  %vm19310_vm6 = vmmov %vm19303_vm0 }
 0x39c   : > { %v8632_v45 = vpop.f32.mrf.mxu0  ;;  %v12002_v5 = vshrl.u32 %v15563_v51, 16  ;;  %v12005_v8 = vshll.u32 %v15563_v51, 16  ;;  %v8243_v41 = vadd.f32 %v18379_v15, %v7776_v22  ;;  %v15564_v15 = vld [vmem:[#allocation2 + $0x28] sm:$0xff]   ;;  %v11998_v38 = vrot.slane %v11996_v32, 2  ;;  %v7783_v32 = vld [vmem:[#allocation5 + $0x70] sm:$0xff]  ;;  %vm19316_vm1 = vmmov %vm19309_vm9 }
 0x39d   : > { %v18386_v18 = vpop.f32.mrf.mxu1  ;;  %8813 = vst [vmem:[#allocation5 + $0x10] sm:$0xff] %v8777_v47  ;;  %v8775_v30 = vadd.f32 %v8632_v45, %v8236_v57  ;;  %v10940_v42 = vor.u32 %v10939_v25, %v10936_v48  ;;  %v11450_v47 = vsel %vm19305_vm11, %v11447_v37, %v11449_v17  ;;  %v7779_v45 = vld [vmem:[#allocation5 + $0x50] sm:$0xff]  ;;  %v11991_v34 = vsel %vm19306_vm2, %v11982_v54, %v18415_v60  ;;  %v15565_v48 = vld [vmem:[#allocation3 + $0x40] sm:$0xff]   ;;  %vm19319_vm11 = vmmov %vm19265_vm3 }
 0x39e   : > { %v14850_v12 = vpop.f32.mrf.mxu0  ;;  %v8241_v7 = vadd.f32 %v18386_v18, %v7774_v11  ;;  %v12004_v44 = vrot.slane %v12002_v5, 1 }
 0x39f   : > { %v18389_v33 = vpop.f32.mrf.mxu1  ;;  %15012 = vmatmul.mubr.msk.bf16.gmra.mxu1 %vm19297_vm14, %v10269_v2  ;;  %8811 = vst [vmem:[#allocation5] sm:$0xff] %v8775_v30  ;;  %v8778_v27 = vadd.f32 %v14850_v12, %v8239_v26  ;;  %v11448_v2 = vsel %vm19303_vm0, %v11445_v59, %v11447_v37  ;;  %v11995_v59 = vrot.slane %v11993_v4, 1  ;;  %v12007_v26 = vrot.slane %v12005_v8, 2  ;;  %v15567_v30 = vld [vmem:[#allocation2 + $0x30] sm:$0xff]   ;;  %vm19311_vm14 = vmmov %vm19265_vm3  ;;  %v15568_v4 = vld [vmem:[#allocation2 + $0x38] sm:$0xff]  }
 0x3a0   : > { %15067 = vmatprep.mubr.msk.bf16.mxu1 %vm19300_vm10, %v11446_v36  ;;  %v8635_v58 = vpop.f32.mrf.mxu0  ;;  %v8246_v46 = vadd.f32 %v18389_v33, %v7779_v45  ;;  %v10941_v18 = vsel %vm19307_vm8, %v18401_v63, %v10940_v42  ;;  %v7777_v12 = vld [vmem:[#allocation5 + $0x40] sm:$0xff]  ;;  %v12020_v24 = vshrl.u32 %v15567_v30, 16  ;;  %v12023_v20 = vshll.u32 %v15567_v30, 16  ;;  %vm19314_vm10 = vmmov %vm19265_vm3 }
 0x3a1   : > { %v18404_v6 = vpop.f32.mrf.mxu1  ;;  %8814 = vst [vmem:[#allocation5 + $0x18] sm:$0xff] %v8778_v27  ;;  %v8776_v13 = vadd.f32 %v8635_v58, %v8237_v61  ;;  %v11453_v61 = vrot.slane %v18427_v14, 3  ;;  %v12011_v27 = vshrl.u32 %v15564_v15, 16  ;;  %v11999_v33 = vor.u32 %v11998_v38, %v11995_v59  ;;  %v7780_v58 = vld [vmem:[#allocation5 + $0x58] sm:$0xff]  ;;  %vm19322_vm8 = vmmov %vm19313_vm5 }
 0x3a2   : > { %v14853_v40 = vpop.f32.mrf.mxu0  ;;  %15052 = vmatmul.mubr.msk.bf16.gmra.mxu0 %vm19301_vm13, %v10923_v9  ;;  %v12014_v9 = vshll.u32 %v15564_v15, 16  ;;  %v8244_v3 = vadd.f32 %v18404_v6, %v7777_v12  ;;  %v12008_v63 = vor.u32 %v12007_v26, %v12004_v44  ;;  %v7778_v6 = vld [vmem:[#allocation5 + $0x48] sm:$0xff]  ;;  %vm19315_vm13 = vmmov %vm19306_vm2  ;;  %v12022_v5 = vrot.slane %v12020_v24, 1  ;;  %v7784_v38 = vld [vmem:[#allocation5 + $0x78] sm:$0xff] }
 0x3a3   : > { %v14814_v39 = vpop.f32.mrf.mxu1  ;;  %8812 = vst [vmem:[#allocation5 + $0x8] sm:$0xff] %v8776_v13  ;;  %v8781_v52 = vadd.f32 %v14853_v40, %v8242_v43  ;;  %15055 = vmatprep.mubr.msk.bf16.mxu0 %vm19302_vm15, %v10932_v16  ;;  %v11452_v13 = vsel %vm19310_vm6, %v11449_v17, %v11451_v10  ;;  %v11454_v40 = vsel %vm19312_vm7, %v11451_v10, %v11453_v61  ;;  %v12013_v16 = vrot.slane %v12011_v27, 1  ;;  %vm19317_vm15 = vmmov %vm19316_vm1 }
 0x3a4   : > { %v8648_v53 = vpop.f32.mrf.mxu0  ;;  %v8247_v51 = vadd.f32 %v14814_v39, %v7780_v58  ;;  %v18455_v39 = vld [vmem:[#allocation3 + $0x48] sm:$0xff]   ;;  %v12000_v17 = vsel %vm19313_vm5, %v18415_v60, %v11999_v33  ;;  %v12009_v54 = vsel %vm19315_vm13, %v11999_v33, %v12008_v63  ;;  %v12025_v8 = vrot.slane %v12023_v20, 2  ;;  %v7787_v33 = vld [vmem:[#allocation5 + $0x90] sm:$0xff]  ;;  %vm19325_vm6 = vmmov %vm19303_vm0 }
 0x3a5   : > { %v18413_v28 = vpop.f32.mrf.mxu1  ;;  %8817 = vst [vmem:[#allocation5 + $0x30] sm:$0xff] %v8781_v52  ;;  %v8779_v49 = vadd.f32 %v8648_v53, %v8240_v35  ;;  %v12016_v35 = vrot.slane %v12014_v9, 2  ;;  %v11455_v42 = vrot.slane %v15565_v48, 3  ;;  %v12032_v59 = vshll.u32 %v15568_v4, 16  ;;  %v18476_v9 = vld [vmem:[#allocation3 + $0x58] sm:$0xff]   ;;  %v7785_v48 = vld [vmem:[#allocation5 + $0x80] sm:$0xff]  ;;  %vm19327_vm7 = vmmov %vm19303_vm0 }
 0x3a6   : > { %v14854_v56 = vpop.f32.mrf.mxu0  ;;  %v8245_v52 = vadd.f32 %v18413_v28, %v7778_v6  ;;  %vm19329_vm13 = vmmov %vm19313_vm5 }
 0x3a7   : > { %v18421_v57 = vpop.f32.mrf.mxu1  ;;  %15068 = vmatmul.mubr.msk.bf16.vlgmr.msra.gmra.mxu1 %vm19304_vm12, %v11448_v2  ;;  %8815 = vst [vmem:[#allocation5 + $0x20] sm:$0xff] %v8779_v49  ;;  %v18430_v21 = vadd.f32 %v14854_v56, %v8243_v41  ;;  %v15571_v41 = vld [vmem:[#allocation2 + $0x40] sm:$0xff]   ;;  %v7781_v2 = vld [vmem:[#allocation5 + $0x60] sm:$0xff]  ;;  %v12017_v11 = vor.u32 %v12016_v35, %v12013_v16  ;;  %v11457_v56 = vrot.slane %v18455_v39, 3  ;;  %vm19318_vm12 = vmmov %vm19306_vm2 }
 0x3a8   : > { %15071 = vmatprep.mubr.msk.bf16.mxu1 %vm19265_vm3, %v11450_v47  ;;  %v8651_v19 = vpop.f32.mrf.mxu0  ;;  %v8250_v49 = vadd.f32 %v18421_v57, %v7783_v32  ;;  %v12041_v44 = vshll.u32 %v15571_v41, 16  ;;  %vm19320_vm3 = vmmov %vm19303_vm0 }
 0x3a9   : > { %v8141_v23 = vpop.f32.mrf.mxu1  ;;  %v18436_v1 = vadd.f32 %v8651_v19, %v8241_v7  ;;  %v12029_v7 = vshrl.u32 %v15568_v4, 16  ;;  %v18466_v19 = vor.u32 %v12025_v8, %v12022_v5  ;;  %v12018_v12 = vsel %vm19318_vm12, %v12008_v63, %v12017_v11  ;;  %vm19321_vm2 = vmmov %vm19308_vm4 }
 0x3aa   : > { %v14857_v36 = vpop.f32.mrf.mxu0  ;;  %15056 = vmatmul.mubr.msk.bf16.gmra.mxu0 %vm19308_vm4, %v10941_v18  ;;  %v8248_v47 = vadd.f32 %v8141_v23, %v7781_v2  ;;  %v11456_v23 = vsel %vm19303_vm0, %v11453_v61, %v11455_v42  ;;  %v7782_v18 = vld [vmem:[#allocation5 + $0x68] sm:$0xff]  ;;  %v11458_v27 = vsel %vm19320_vm3, %v11455_v42, %v11457_v56  ;;  %v12034_v61 = vrot.slane %v12032_v59, 2  ;;  %vm19323_vm4 = vmmov %vm19316_vm1  ;;  %v7791_v59 = vld [vmem:[#allocation5 + $0xb0] sm:$0xff] }
 0x3ab   : > { %v14818_v37 = vpop.f32.mrf.mxu1  ;;  %v8785_v0 = vadd.f32 %v14857_v36, %v8246_v46  ;;  %15105 = vmatprep.mubr.msk.bf16.mxu0 %vm19309_vm9, %v11991_v34  ;;  %v12038_v34 = vshrl.u32 %v15571_v41, 16  ;;  %v15569_v46 = vld [vmem:[#allocation3 + $0x50] sm:$0xff]   ;;  %v12031_v14 = vrot.slane %v12029_v7, 1  ;;  %v12027_v63 = vsel %vm19322_vm8, %v12017_v11, %v18466_v19  ;;  %vm19324_vm9 = vmmov %vm19316_vm1 }
 0x3ac   : > { %v8664_v29 = vpop.f32.mrf.mxu0  ;;  %v8251_v26 = vadd.f32 %v14818_v37, %v7784_v38  ;;  %v15572_v37 = vld [vmem:[#allocation2 + $0x48] sm:$0xff]   ;;  %v12043_v20 = vrot.slane %v12041_v44, 2  ;;  %vm19331_vm12 = vmmov %vm19313_vm5 }
 0x3ad   : > { %v18444_v55 = vpop.f32.mrf.mxu1  ;;  %8821 = vst [vmem:[#allocation5 + $0x50] sm:$0xff] %v8785_v0  ;;  %v8783_v43 = vadd.f32 %v8664_v29, %v8244_v3  ;;  %v12040_v24 = vrot.slane %v12038_v34, 1  ;;  %v12047_v16 = vshrl.u32 %v15572_v37, 16  ;;  %v12050_v35 = vshll.u32 %v15572_v37, 16  ;;  %vm19333_vm3 = vmmov %vm19303_vm0 }
 0x3ae   : > { %v14858_v25 = vpop.f32.mrf.mxu0  ;;  %v8249_v3 = vadd.f32 %v18444_v55, %v7782_v18  ;;  %v11459_v55 = vrot.slane %v15569_v46, 3  ;;  %vm19334_vm8 = vmmov %vm19313_vm5 }
 0x3af   : > { %v18449_v62 = vpop.f32.mrf.mxu1  ;;  %15072 = vmatmul.mubr.msk.bf16.gmra.mxu1 %vm19311_vm14, %v11452_v13  ;;  %8819 = vst [vmem:[#allocation5 + $0x40] sm:$0xff] %v8783_v43  ;;  %v8786_v50 = vadd.f32 %v14858_v25, %v8247_v51  ;;  %v15575_v51 = vld [vmem:[#allocation2 + $0x50] sm:$0xff]   ;;  %v12044_v32 = vor.u32 %v12043_v20, %v12040_v24  ;;  %vm19326_vm14 = vmmov %vm19321_vm2  ;;  %v12052_v11 = vrot.slane %v12050_v35, 2 }
 0x3b0   : > { %15075 = vmatprep.mubr.msk.bf16.mxu1 %vm19314_vm10, %v11454_v40  ;;  %v8667_v22 = vpop.f32.mrf.mxu0  ;;  %v8254_v43 = vadd.f32 %v18449_v62, %v7787_v33  ;;  %v11461_v40 = vrot.slane %v18476_v9, 3  ;;  %v11460_v41 = vsel %vm19325_vm6, %v11457_v56, %v11459_v55  ;;  %vm19328_vm10 = vmmov %vm19321_vm2  ;;  %v15576_v56 = vld [vmem:[#allocation2 + $0x58] sm:$0xff]   ;;  %v7792_v33 = vld [vmem:[#allocation5 + $0xb8] sm:$0xff] }
 0x3b1   : > { %v8157_v53 = vpop.f32.mrf.mxu1  ;;  %8822 = vst [vmem:[#allocation5 + $0x58] sm:$0xff] %v8786_v50  ;;  %v8784_v28 = vadd.f32 %v8667_v22, %v8245_v52  ;;  %v12035_v50 = vor.u32 %v12034_v61, %v12031_v14  ;;  %v12056_v22 = vshrl.u32 %v15575_v51, 16  ;;  %v12065_v14 = vshrl.u32 %v15576_v56, 16  ;;  %vm19337_vm6 = vmmov %vm19303_vm0 }
 0x3b2   : > { %v14861_v31 = vpop.f32.mrf.mxu0  ;;  %15106 = vmatmul.mubr.msk.bf16.vlgmr.msra.gmra.mxu0 %vm19316_vm1, %v12000_v17  ;;  %v8252_v39 = vadd.f32 %v8157_v53, %v7785_v48  ;;  %v7788_v17 = vld [vmem:[#allocation5 + $0x98] sm:$0xff]  ;;  %v11462_v2 = vsel %vm19327_vm7, %v11459_v55, %v11461_v40  ;;  %v12068_v61 = vshll.u32 %v15576_v56, 16  ;;  %v15577_v48 = vld [vmem:[#allocation3 + $0x70] sm:$0xff]   ;;  %vm19339_vm7 = vmmov %vm19303_vm0 }
 0x3b3   : > { %v14822_v60 = vpop.f32.mrf.mxu1  ;;  %8820 = vst [vmem:[#allocation5 + $0x48] sm:$0xff] %v8784_v28  ;;  %v8789_v15 = vadd.f32 %v14861_v31, %v8250_v49  ;;  %15109 = vmatprep.mubr.msk.bf16.mxu0 %vm19317_vm15, %v12009_v54  ;;  %v12059_v54 = vshll.u32 %v15575_v51, 16  ;;  %v15573_v49 = vld [vmem:[#allocation3 + $0x60] sm:$0xff]   ;;  %v7786_v28 = vld [vmem:[#allocation5 + $0x88] sm:$0xff]  ;;  %v12049_v31 = vrot.slane %v12047_v16, 1  ;;  %v12045_v34 = vsel %vm19329_vm13, %v12035_v50, %v12044_v32  ;;  %vm19330_vm15 = vmmov %vm19316_vm1 }
 0x3b4   : > { %v8680_v57 = vpop.f32.mrf.mxu0  ;;  %v8255_v5 = vadd.f32 %v14822_v60, %v7788_v17  ;;  %v12036_v60 = vsel %vm19313_vm5, %v18466_v19, %v12035_v50  ;;  %v12058_v44 = vrot.slane %v12056_v22, 1  ;;  %v18518_v50 = vld [vmem:[#allocation3 + $0x78] sm:$0xff]   ;;  %v15580_v17 = vld [vmem:[#allocation2 + $0x68] sm:$0xff]   ;;  %vm19341_vm13 = vmmov %vm19313_vm5 }
 0x3b5   : > { %v8160_v45 = vpop.f32.mrf.mxu1  ;;  %8825 = vst [vmem:[#allocation5 + $0x70] sm:$0xff] %v8789_v15  ;;  %v18468_v30 = vadd.f32 %v8680_v57, %v8248_v47  ;;  %v18497_v47 = vld [vmem:[#allocation3 + $0x68] sm:$0xff]   ;;  %v12083_v56 = vshrl.u32 %v15580_v17, 16 }
 0x3b6   : > { %v14862_v10 = vpop.f32.mrf.mxu0  ;;  %v8253_v15 = vadd.f32 %v8160_v45, %v7786_v28  ;;  %v11463_v45 = vrot.slane %v15573_v49, 3  ;;  %v11465_v9 = vrot.slane %v18497_v47, 3  ;;  %v7793_v47 = vld [vmem:[#allocation5 + $0xc0] sm:$0xff] }
 0x3b7   : > { %v14825_v36 = vpop.f32.mrf.mxu1  ;;  %15076 = vmatmul.mubr.msk.bf16.gmra.mxu1 %vm19319_vm11, %v11456_v23  ;;  %v18479_v0 = vadd.f32 %v14862_v10, %v8251_v26  ;;  %v12061_v26 = vrot.slane %v12059_v54, 2  ;;  %v15579_v23 = vld [vmem:[#allocation2 + $0x60] sm:$0xff]   ;;  %v7789_v10 = vld [vmem:[#allocation5 + $0xa0] sm:$0xff]  ;;  %vm19332_vm11 = vmmov %vm19321_vm2 }
 0x3b8   : > { %15079 = vmatprep.mubr.msk.bf16.mxu1 %vm19321_vm2, %v11458_v27  ;;  %v8683_v58 = vpop.f32.mrf.mxu0  ;;  %v8258_v46 = vadd.f32 %v14825_v36, %v7791_v59  ;;  %v12053_v27 = vor.u32 %v12052_v11, %v12049_v31  ;;  %v12074_v24 = vshrl.u32 %v15579_v23, 16  ;;  %v12077_v20 = vshll.u32 %v15579_v23, 16  ;;  %v7795_v54 = vld [vmem:[#allocation5 + $0xd0] sm:$0xff] }
 0x3b9   : > { %v8173_v29 = vpop.f32.mrf.mxu1  ;;  %v18485_v13 = vadd.f32 %v8683_v58, %v8249_v3  ;;  %v11464_v55 = vsel %vm19303_vm0, %v11461_v40, %v11463_v45  ;;  %v12070_v40 = vrot.slane %v12068_v61, 2  ;;  %v11467_v11 = vrot.slane %v15577_v48, 3  ;;  %v7794_v61 = vld [vmem:[#allocation5 + $0xc8] sm:$0xff] }
 0x3ba   : > { %v14865_v6 = vpop.f32.mrf.mxu0  ;;  %15110 = vmatmul.mubr.msk.bf16.gmra.mxu0 %vm19323_vm4, %v12018_v12  ;;  %v8256_v37 = vadd.f32 %v8173_v29, %v7789_v10  ;;  %v12054_v16 = vsel %vm19331_vm12, %v12044_v32, %v12053_v27  ;;  %v12076_v49 = vrot.slane %v12074_v24, 1  ;;  %v12079_v28 = vrot.slane %v12077_v20, 2  ;;  %vm19335_vm4 = vmmov %vm19316_vm1 }
 0x3bb   : > { %v14826_v25 = vpop.f32.mrf.mxu1  ;;  %v18489_v52 = vadd.f32 %v14865_v6, %v8254_v43  ;;  %15113 = vmatprep.mubr.msk.bf16.mxu0 %vm19324_vm9, %v12027_v63  ;;  %v12062_v63 = vor.u32 %v12061_v26, %v12058_v44  ;;  %v7790_v6 = vld [vmem:[#allocation5 + $0xa8] sm:$0xff]  ;;  %v12086_v59 = vshll.u32 %v15580_v17, 16  ;;  %vm19336_vm9 = vmmov %vm19316_vm1  ;;  %v7796_v26 = vld [vmem:[#allocation5 + $0xd8] sm:$0xff]  ;;  %v12085_v24 = vrot.slane %v12083_v56, 1 }
 0x3bc   : > { %v8696_v62 = vpop.f32.mrf.mxu0  ;;  %v8259_v51 = vadd.f32 %v14826_v25, %v7792_v33  ;;  %v12067_v25 = vrot.slane %v12065_v14, 1  ;;  %v15581_v14 = vld [vmem:[#allocation3 + $0x80] sm:$0xff]   ;;  %vm19343_vm12 = vmmov %vm19313_vm5 }
 0x3bd   : > { %v8176_v4 = vpop.f32.mrf.mxu1  ;;  %v18492_v8 = vadd.f32 %v8696_v62, %v8252_v39  ;;  %v11466_v39 = vsel %vm19333_vm3, %v11463_v45, %v11465_v9  ;;  %v12063_v32 = vsel %vm19334_vm8, %v12053_v27, %v12062_v63  ;;  %v12088_v20 = vrot.slane %v12086_v59, 2  ;;  %vm19345_vm3 = vmmov %vm19303_vm0 }
 0x3be   : > { %v14866_v42 = vpop.f32.mrf.mxu0  ;;  %v8257_v62 = vadd.f32 %v8176_v4, %v7790_v6  ;;  %v12071_v44 = vor.u32 %v12070_v40, %v12067_v25  ;;  %v7799_v6 = vld [vmem:[#allocation5 + $0xf0] sm:$0xff]  ;;  %vm19346_vm8 = vmmov %vm19313_vm5 }
 0x3bf   : > { %v14829_v53 = vpop.f32.mrf.mxu1  ;;  %15080 = vmatmul.mubr.msk.bf16.gmra.mxu1 %vm19326_vm14, %v11460_v41  ;;  %v18499_v7 = vadd.f32 %v14866_v42, %v8255_v5  ;;  %v15583_v42 = vld [vmem:[#allocation2 + $0x70] sm:$0xff]   ;;  %vm19338_vm14 = vmmov %vm19321_vm2 }
 0x3c0   : > { %15083 = vmatprep.mubr.msk.bf16.mxu1 %vm19328_vm10, %v11462_v2  ;;  %v8699_v38 = vpop.f32.mrf.mxu0  ;;  %v8262_v2 = vadd.f32 %v14829_v53, %v7795_v54  ;;  %v12092_v45 = vshrl.u32 %v15583_v42, 16  ;;  %v12095_v10 = vshll.u32 %v15583_v42, 16  ;;  %vm19340_vm10 = vmmov %vm19321_vm2  ;;  %v11471_v54 = vrot.slane %v15581_v14, 3  ;;  %v15585_v14 = vld [vmem:[#allocation3 + $0x90] sm:$0xff]  }
 0x3c1   : > { %v8189_v57 = vpop.f32.mrf.mxu1  ;;  %v18505_v18 = vadd.f32 %v8699_v38, %v8253_v15 }
 0x3c2   : > { %v14869_v12 = vpop.f32.mrf.mxu0  ;;  %15114 = vmatmul.mubr.msk.bf16.gmra.mxu0 %vm19316_vm1, %v12036_v60  ;;  %v11469_v60 = vrot.slane %v18518_v50, 3  ;;  %v8260_v38 = vadd.f32 %v8189_v57, %v7793_v47  ;;  %v12094_v50 = vrot.slane %v12092_v45, 1  ;;  %v12097_v17 = vrot.slane %v12095_v10, 2  ;;  %v7800_v47 = vld [vmem:[#allocation5 + $0xf8] sm:$0xff]  ;;  %v7798_v45 = vld [vmem:[#allocation5 + $0xe8] sm:$0xff] }
 0x3c3   : > { %v14830_v19 = vpop.f32.mrf.mxu1  ;;  %v18509_v3 = vadd.f32 %v14869_v12, %v8258_v46  ;;  %15117 = vmatprep.mubr.msk.bf16.mxu0 %vm19330_vm15, %v12045_v34  ;;  %v12080_v46 = vor.u32 %v12079_v28, %v12076_v49  ;;  %vm19342_vm15 = vmmov %vm19316_vm1 }
 0x3c4   : > { %v8712_v36 = vpop.f32.mrf.mxu0  ;;  %v8263_v12 = vadd.f32 %v14830_v19, %v7796_v26  ;;  %v12072_v19 = vsel %vm19313_vm5, %v12062_v63, %v12071_v44  ;;  %v12098_v56 = vor.u32 %v12097_v17, %v12094_v50 }
 0x3c5   : > { %v8192_v58 = vpop.f32.mrf.mxu1  ;;  %v18512_v43 = vadd.f32 %v8712_v36, %v8256_v37  ;;  %v11468_v37 = vsel %vm19337_vm6, %v11465_v9, %v11467_v11  ;;  %v11470_v36 = vsel %vm19339_vm7, %v11467_v11, %v11469_v60  ;;  %v15584_v9 = vld [vmem:[#allocation2 + $0x78] sm:$0xff]   ;;  %vm19349_vm6 = vmmov %vm19303_vm0 }
 0x3c6   : > { %v14870_v29 = vpop.f32.mrf.mxu0  ;;  %v12104_v11 = vshll.u32 %v15584_v9, 16  ;;  %vm19351_vm7 = vmmov %vm19303_vm0 }
 0x3c7   : > { %v14833_v35 = vpop.f32.mrf.mxu1  ;;  %15084 = vmatmul.mubr.msk.bf16.gmra.mxu1 %vm19332_vm11, %v11464_v55  ;;  %v18520_v22 = vadd.f32 %v14870_v29, %v8259_v51  ;;  %v18536_v51 = vld [vmem:[#allocation3 + $0x88] sm:$0xff]   ;;  %v8261_v55 = vadd.f32 %v8192_v58, %v7794_v61  ;;  %vm19344_vm11 = vmmov %vm19321_vm2  ;;  %v15588_v61 = vld [vmem:[#allocation2 + $0x88] sm:$0xff]  }
 0x3c8   : > { %15087 = vmatprep.mubr.msk.bf16.mxu1 %vm19321_vm2, %v11466_v39  ;;  %v8715_v5 = vpop.f32.mrf.mxu0  ;;  %v12081_v39 = vsel %vm19341_vm13, %v12071_v44, %v12080_v46  ;;  %v8266_v25 = vadd.f32 %v14833_v35, %v7799_v6  ;;  %v7797_v58 = vld [vmem:[#allocation5 + $0xe0] sm:$0xff]  ;;  %v11473_v49 = vrot.slane %v18536_v51, 3  ;;  %vm19353_vm13 = vmmov %vm19313_vm5 }
 0x3c9   : > { %v8205_v41 = vpop.f32.mrf.mxu1  ;;  %v18524_v31 = vadd.f32 %v8715_v5, %v8257_v62  ;;  %v15587_v62 = vld [vmem:[#allocation2 + $0x80] sm:$0xff]   ;;  %v15590_v6 = vld [vmem:[#allocation2 + $0x90] sm:$0xff]  }
 0x3ca   : > { %v14873_v4 = vpop.f32.mrf.mxu0  ;;  %15118 = vmatmul.mubr.msk.bf16.gmra.mxu0 %vm19335_vm4, %v12054_v16  ;;  %v8264_v28 = vadd.f32 %v8205_v41, %v7797_v58  ;;  %v12110_v59 = vshrl.u32 %v15587_v62, 16  ;;  %vm19347_vm4 = vmmov %vm19316_vm1 }
 0x3cb   : > { %v14834_v15 = vpop.f32.mrf.mxu1  ;;  %v18528_v34 = vadd.f32 %v14873_v4, %v8262_v2  ;;  %15121 = vmatprep.mubr.msk.bf16.mxu0 %vm19336_vm9, %v12063_v32  ;;  %v12089_v32 = vor.u32 %v12088_v20, %v12085_v24  ;;  %v12101_v2 = vshrl.u32 %v15584_v9, 16  ;;  %v12106_v24 = vrot.slane %v12104_v11, 2  ;;  %v7803_v20 = vld [vmem:[#allocation5 + $0x110] sm:$0xff]  ;;  %vm19348_vm9 = vmmov %vm19316_vm1 }
 0x3cc   : > { %v8728_v53 = vpop.f32.mrf.mxu0  ;;  %v8267_v44 = vadd.f32 %v14834_v15, %v7800_v47 }
 0x3cd   : > { %v8208_v23 = vpop.f32.mrf.mxu1  ;;  %v18531_v27 = vadd.f32 %v8728_v53, %v8260_v38  ;;  %v12113_v38 = vshll.u32 %v15587_v62, 16  ;;  %v11472_v53 = vsel %vm19303_vm0, %v11469_v60, %v11471_v54  ;;  %v12090_v41 = vsel %vm19343_vm12, %v12080_v46, %v12089_v32  ;;  %v18560_v46 = vld [vmem:[#allocation3 + $0x98] sm:$0xff]   ;;  %vm19355_vm12 = vmmov %vm19313_vm5 }
 0x3ce   : > { %v14874_v33 = vpop.f32.mrf.mxu0  ;;  %v12103_v15 = vrot.slane %v12101_v2, 1  ;;  %v11475_v62 = vrot.slane %v15585_v14, 3 }
 0x3cf   : > { %v14837_v57 = vpop.f32.mrf.mxu1  ;;  %15088 = vmatmul.mubr.msk.bf16.gmra.mxu1 %vm19338_vm14, %v11468_v37  ;;  %v18538_v48 = vadd.f32 %v14874_v33, %v8263_v12  ;;  %v11474_v37 = vsel %vm19345_vm3, %v11471_v54, %v11473_v49  ;;  %v8265_v33 = vadd.f32 %v8208_v23, %v7798_v45  ;;  %v12115_v9 = vrot.slane %v12113_v38, 2  ;;  %v7801_v23 = vld [vmem:[#allocation5 + $0x100] sm:$0xff]  ;;  %v15589_v45 = vld [vmem:[#allocation3 + $0xa0] ss:$0 sps:$4 sm:$0x77]   ;;  %vm19350_vm14 = vmmov %vm19321_vm2 }
 0x3d0   : > { %15091 = vmatprep.mubr.msk.bf16.mxu1 %vm19340_vm10, %v11470_v36  ;;  %v8731_v29 = vpop.f32.mrf.mxu0  ;;  %v12122_v54 = vshll.u32 %v15588_v61, 16  ;;  %vm19352_vm10 = vmmov %vm19321_vm2 }
 0x3d1   : > { %v8221_v16 = vpop.f32.mrf.mxu1  ;;  %v18543_v40 = vadd.f32 %v8731_v29, %v8261_v55  ;;  %v12099_v55 = vsel %vm19346_vm8, %v12089_v32, %v12098_v56  ;;  %v8270_v29 = vadd.f32 %v14837_v57, %v7803_v20  ;;  %v12107_v32 = vor.u32 %v12106_v24, %v12103_v15  ;;  %v8849_v20 = vld [vmem:[#allocation5 + $0x10] sm:$0xff]  ;;  %vm19357_vm3 = vmmov %vm19313_vm5 }
 0x3d2   : > { %v14877_v5 = vpop.f32.mrf.mxu0  ;;  %15122 = vmatmul.mubr.msk.bf16.gmra.mxu0 %vm19316_vm1, %v12072_v19  ;;  %v12112_v19 = vrot.slane %v12110_v59, 1  ;;  %v8268_v58 = vadd.f32 %v8221_v16, %v7801_v23  ;;  %v11477_v57 = vrot.slane %v18560_v46, 3  ;;  %v12131_v59 = vshll.u32 %v15590_v6, 16  ;;  %v7802_v16 = vld [vmem:[#allocation5 + $0x108] sm:$0xff]  ;;  %v8847_v23 = vld [vmem:[#allocation5] sm:$0xff]  ;;  %vm19359_vm8 = vmmov %vm19316_vm1 }
 0x3d3   : > { %v14838_v63 = vpop.f32.mrf.mxu1  ;;  %v18547_v42 = vadd.f32 %v14877_v5, %v8266_v25  ;;  %15125 = vmatprep.mubr.msk.bf16.mxu0 %vm19342_vm15, %v12081_v39  ;;  %v12119_v25 = vshrl.u32 %v15588_v61, 16  ;;  %v12124_v61 = vrot.slane %v12122_v54, 2  ;;  %vm19354_vm15 = vmmov %vm19316_vm1 }
 0x3d4   : > { %v8744_v35 = vpop.f32.mrf.mxu0  ;;  %v12116_v47 = vor.u32 %v12115_v9, %v12112_v19  ;;  %v12133_v19 = vrot.slane %v12131_v59, 2 }
 0x3d5   : > { %v8224_v4 = vpop.f32.mrf.mxu1  ;;  %v18550_v26 = vadd.f32 %v8744_v35, %v8264_v28  ;;  %v7804_v28 = vld [vmem:[#allocation5 + $0x118] sm:$0xff]  ;;  %v12128_v35 = vshrl.u32 %v15590_v6, 16  ;;  %v12121_v14 = vrot.slane %v12119_v25, 1 }
 0x3d6   : > { %v14878_v10 = vpop.f32.mrf.mxu0  ;;  %v8271_v38 = vadd.f32 %v14838_v63, %v7804_v28  ;;  %v8269_v15 = vadd.f32 %v8224_v4, %v7802_v16  ;;  %v12108_v63 = vsel %vm19313_vm5, %v12098_v56, %v12107_v32  ;;  %v8850_v28 = vld [vmem:[#allocation5 + $0x18] sm:$0xff]  ;;  %v8848_v16 = vld [vmem:[#allocation5 + $0x8] sm:$0xff] }
 0x3d7   : > { %v14893_v12 = vpop.f32.mrf.mxu1  ;;  %15092 = vmatmul.mubr.msk.bf16.gmra.mxu1 %vm19344_vm11, %v11472_v53  ;;  %v18556_v36 = vadd.f32 %v14878_v10, %v8267_v44  ;;  %v11476_v53 = vsel %vm19349_vm6, %v11473_v49, %v11475_v62  ;;  %v12130_v46 = vrot.slane %v12128_v35, 1  ;;  %vm19356_vm11 = vmmov %vm19321_vm2 }
 0x3d8   : > { %15095 = vmatprep.mubr.msk.bf16.mxu1 %vm19321_vm2, %v11474_v37  ;;  %v8747_v60 = vpop.f32.mrf.mxu0  ;;  %v11478_v37 = vsel %vm19351_vm7, %v11475_v62, %v11477_v57  ;;  %v9449_v9 = vadd.f32 %v14893_v12, %v8849_v20  ;;  %v12125_v62 = vor.u32 %v12124_v61, %v12121_v14  ;;  %vm19358_vm2 = vmmov %vm19316_vm1 }
 0x3d9   : > { %v9304_v51 = vpop.f32.mrf.mxu1  ;;  %v18562_v39 = vadd.f32 %v8747_v60, %v8265_v33  ;;  %v15591_v33 = vld [vmem:[#allocation2 + $0x98] ss:$0 sps:$4 sm:$0x33]   ;;  %v12134_v35 = vor.u32 %v12133_v19, %v12130_v46 }
 0x3da   : > { %v14881_v50 = vpop.f32.mrf.mxu0  ;;  %15126 = vmatmul.mubr.msk.bf16.gmra.mxu0 %vm19347_vm4, %v12090_v41  ;;  %v12137_v56 = vshrl.u32 %v15591_v33, 16  ;;  %v9447_v25 = vadd.f32 %v9304_v51, %v8847_v23  ;;  %vm19360_vm4 = vmmov %vm19357_vm3 }
 0x3db   : > { %v14894_v17 = vpop.f32.mrf.mxu1  ;;  %v18565_v5 = vadd.f32 %v14881_v50, %v8270_v29  ;;  %15129 = vmatprep.mubr.msk.bf16.mxu0 %vm19348_vm9, %v12099_v55  ;;  %v12117_v55 = vsel %vm19353_vm13, %v12107_v32, %v12116_v47  ;;  %v11479_v29 = vrot.slane %v15589_v45, 3  ;;  %v12140_v32 = vshll.u32 %v15591_v33, 16  ;;  %vm19361_vm9 = vmmov %vm19316_vm1 }
 0x3dc   : > { %v8760_v2 = vpop.f32.mrf.mxu0  ;;  %v9450_v59 = vadd.f32 %v14894_v17, %v8850_v28  ;;  %v12139_v61 = vrot.slane %v12137_v56, 1  ;;  %v12135_v20 = vsel %vm19357_vm3, %v12125_v62, %v12134_v35  ;;  %v8857_v56 = vld [vmem:[#allocation5 + $0x50] sm:$0xff] }
 0x3dd   : > { %v9307_v11 = vpop.f32.mrf.mxu1  ;;  %v18569_v44 = vadd.f32 %v8760_v2, %v8268_v58  ;;  %v11480_v45 = vsel %vm19303_vm0, %v11477_v57, %v11479_v29  ;;  %v12142_v33 = vrot.slane %v12140_v32, 2  ;;  %v8851_v57 = vld [vmem:[#allocation5 + $0x20] sm:$0xff] }
 0x3de   : > { %v14882_v10 = vpop.f32.mrf.mxu0 }
 0x3df   : > { %v14897_v41 = vpop.f32.mrf.mxu1  ;;  %15096 = vmatmul.mubr.msk.bf16.gmra.mxu1 %vm19350_vm14, %v11476_v53  ;;  %v18574_v24 = vadd.f32 %v14882_v10, %v8271_v38  ;;  %v12126_v10 = vsel %vm19355_vm12, %v12116_v47, %v12125_v62 }
 0x3e0   : > { %15099 = vmatprep.mubr.msk.bf16.mxu1 %vm19352_vm10, %v11478_v37  ;;  %v8763_v49 = vpop.f32.mrf.mxu0 }
 0x3e1   : > { %v9320_v60 = vpop.f32.mrf.mxu1  ;;  %v18579_v6 = vadd.f32 %v8763_v49, %v8269_v15  ;;  %v8853_v15 = vld [vmem:[#allocation5 + $0x30] sm:$0xff] }
 0x3e2   : > { %v14937_v50 = vpop.f32.mrf.mxu0  ;;  %15130 = vmatmul.mubr.msk.bf16.gmra.mxu0 %vm19316_vm1, %v12108_v63  ;;  %v9451_v46 = vadd.f32 %v9320_v60, %v8851_v57 }
 0x3e3   : > { %v14898_v4 = vpop.f32.mrf.mxu1  ;;  %v18582_v54 = vadd.f32 %v14937_v50, %v9449_v9  ;;  %15133 = vmatprep.mubr.msk.bf16.mxu0 %vm19354_vm15, %v12117_v55 }
 0x3e4   : > { %v9454_v58 = vadd.f32 %v14898_v4, %v18430_v21  ;;  %v9843_v12 = vpop.f32.mrf.mxu0  ;;  %v9448_v21 = vadd.f32 %v9307_v11, %v8848_v16  ;;  %v12143_v11 = vor.u32 %v12142_v33, %v12139_v61 }
 0x3e5   : > { %v9323_v2 = vpop.f32.mrf.mxu1  ;;  %v18586_v38 = vadd.f32 %v9843_v12, %v9447_v25 }
 0x3e6   : > { %v9452_v53 = vadd.f32 %v9323_v2, %v18436_v1  ;;  %v14938_v51 = vpop.f32.mrf.mxu0  ;;  %v9453_v1 = vadd.f32 %v14897_v41, %v8853_v15  ;;  %v12144_v62 = vsel %vm19360_vm4, %v12134_v35, %v12143_v11  ;;  %v8855_v2 = vld [vmem:[#allocation5 + $0x40] sm:$0xff] }
 0x3e7   : > { %v14901_v37 = vpop.f32.mrf.mxu1  ;;  %15100 = vmatmul.mubr.msk.bf16.gmra.mxu1 %vm19356_vm11, %v11480_v45  ;;  %v18592_v14 = vadd.f32 %v14938_v51, %v9450_v59 }
 0x3e8   : > { %v9846_v17 = vpop.f32.mrf.mxu0  ;;  %v9457_v28 = vadd.f32 %v14901_v37, %v8857_v56  ;;  %v8856_v37 = vld [vmem:[#allocation5 + $0x48] sm:$0xff] }
 0x3e9   : > { %v9336_v63 = vpop.f32.mrf.mxu1  ;;  %v18595_v49 = vadd.f32 %v9846_v17, %v9448_v21 }
 0x3ea   : > { %v14941_v55 = vpop.f32.mrf.mxu0  ;;  %15134 = vmatmul.mubr.msk.bf16.gmra.mxu0 %vm19358_vm2, %v12126_v10  ;;  %v9455_v16 = vadd.f32 %v9336_v63, %v8855_v2  ;;  %v8858_v10 = vld [vmem:[#allocation5 + $0x58] sm:$0xff] }
 0x3eb   : > { %v14902_v47 = vpop.f32.mrf.mxu1  ;;  %v18598_v19 = vadd.f32 %v14941_v55, %v9453_v1  ;;  %15137 = vmatprep.mubr.msk.bf16.mxu0 %vm19359_vm8, %v12135_v20  ;;  %v8861_v1 = vld [vmem:[#allocation5 + $0x70] sm:$0xff] }
 0x3ec   : > { %v9859_v9 = vpop.f32.mrf.mxu0  ;;  %v9458_v61 = vadd.f32 %v14902_v47, %v8858_v10 }
 0x3ed   : > { %v9339_v29 = vpop.f32.mrf.mxu1  ;;  %v18601_v23 = vadd.f32 %v9859_v9, %v9451_v46 }
 0x3ee   : > { %v14942_v50 = vpop.f32.mrf.mxu0  ;;  %v9456_v17 = vadd.f32 %v9339_v29, %v8856_v37 }
 0x3ef   : > { %v14905_v4 = vpop.f32.mrf.mxu1  ;;  %v18603_v41 = vadd.f32 %v14942_v50, %v9454_v58 }
 0x3f0   : > { %v9862_v25 = vpop.f32.mrf.mxu0 }
 0x3f1   : > { %v9352_v32 = vpop.f32.mrf.mxu1  ;;  %v18606_v60 = vadd.f32 %v9862_v25, %v9452_v53 }
 0x3f2   : > { %v9459_v12 = vadd.f32 %v9352_v32, %v18468_v30  ;;  %v14945_v59 = vpop.f32.mrf.mxu0  ;;  %15138 = vmatmul.mubr.msk.bf16.gmra.mxu0 %vm19361_vm9, %v12144_v62 }
 0x3f3   : > { %v14906_v45 = vpop.f32.mrf.mxu1  ;;  %v18610_v51 = vadd.f32 %v14945_v59, %v9457_v28 }
 0x3f4   : > { %v9462_v58 = vadd.f32 %v14906_v45, %v18479_v0  ;;  %v9875_v35 = vpop.f32.mrf.mxu0  ;;  %v9461_v0 = vadd.f32 %v14905_v4, %v8861_v1 }
 0x3f5   : > { %v9355_v21 = vpop.f32.mrf.mxu1  ;;  %v18613_v33 = vadd.f32 %v9875_v35, %v9455_v16 }
 0x3f6   : > { %v9460_v53 = vadd.f32 %v9355_v21, %v18485_v13  ;;  %v14946_v30 = vpop.f32.mrf.mxu0 }
 0x3f7   : > { %v14909_v15 = vpop.f32.mrf.mxu1  ;;  %v18616_v20 = vadd.f32 %v14946_v30, %v9458_v61 }
 0x3f8   : > { %v9465_v63 = vadd.f32 %v14909_v15, %v18489_v52  ;;  %v9878_v57 = vpop.f32.mrf.mxu0 }
 0x3f9   : > { %v9368_v55 = vpop.f32.mrf.mxu1  ;;  %v18619_v46 = vadd.f32 %v9878_v57, %v9456_v17 }
 0x3fa   : > { %v9463_v47 = vadd.f32 %v9368_v55, %v18492_v8  ;;  %v14949_v11 = vpop.f32.mrf.mxu0 }
 0x3fb   : > { %v14910_v9 = vpop.f32.mrf.mxu1  ;;  %v18622_v50 = vadd.f32 %v14949_v11, %v9461_v0 }
 0x3fc   : > { %v9466_v13 = vadd.f32 %v14910_v9, %v18499_v7  ;;  %v9891_v62 = vpop.f32.mrf.mxu0 }
 0x3fd   : > { %v9371_v29 = vpop.f32.mrf.mxu1  ;;  %v18625_v56 = vadd.f32 %v9891_v62, %v9459_v12 }
 0x3fe   : > { %v9464_v52 = vadd.f32 %v9371_v29, %v18505_v18  ;;  %v14950_v25 = vpop.f32.mrf.mxu0 }
 0x3ff   : > { %v14913_v32 = vpop.f32.mrf.mxu1  ;;  %v18628_v28 = vadd.f32 %v14950_v25, %v9462_v58 }
 0x400   : > { %v9469_v4 = vadd.f32 %v14913_v32, %v18509_v3  ;;  %v9894_v2 = vpop.f32.mrf.mxu0 }
 0x401   : > { %v9384_v8 = vpop.f32.mrf.mxu1  ;;  %v18631_v59 = vadd.f32 %v9894_v2, %v9460_v53 }
 0x402   : > { %v9467_v45 = vadd.f32 %v9384_v8, %v18512_v43  ;;  %v14953_v16 = vpop.f32.mrf.mxu0 }
 0x403   : > { %v14914_v7 = vpop.f32.mrf.mxu1  ;;  %v18634_v10 = vadd.f32 %v14953_v16, %v9465_v63 }
 0x404   : > { %v9470_v12 = vadd.f32 %v14914_v7, %v18520_v22  ;;  %v9907_v35 = vpop.f32.mrf.mxu0 }
 0x405   : > { %v9387_v18 = vpop.f32.mrf.mxu1  ;;  %v18637_v21 = vadd.f32 %v9907_v35, %v9463_v47 }
 0x406   : > { %v9468_v58 = vadd.f32 %v9387_v18, %v18524_v31  ;;  %v14954_v61 = vpop.f32.mrf.mxu0 }
 0x407   : > { %v14917_v3 = vpop.f32.mrf.mxu1  ;;  %v18640_v37 = vadd.f32 %v14954_v61, %v9466_v13 }
 0x408   : > { %v9473_v53 = vadd.f32 %v14917_v3, %v18528_v34  ;;  %v9910_v30 = vpop.f32.mrf.mxu0 }
 0x409   : > { %v9400_v43 = vpop.f32.mrf.mxu1  ;;  %v18643_v15 = vadd.f32 %v9910_v30, %v9464_v52 }
 0x40a   : > { %v9471_v17 = vadd.f32 %v9400_v43, %v18531_v27  ;;  %v14957_v63 = vpop.f32.mrf.mxu0 }
 0x40b   : > { %v14918_v22 = vpop.f32.mrf.mxu1  ;;  %v18646_v1 = vadd.f32 %v14957_v63, %v9469_v4 }
 0x40c   : > { %v9474_v57 = vadd.f32 %v14918_v22, %v18538_v48  ;;  %v9923_v55 = vpop.f32.mrf.mxu0 }
 0x40d   : > { %v9403_v31 = vpop.f32.mrf.mxu1  ;;  %v18649_v0 = vadd.f32 %v9923_v55, %v9467_v45 }
 0x40e   : > { %v9472_v47 = vadd.f32 %v9403_v31, %v18543_v40  ;;  %v14958_v11 = vpop.f32.mrf.mxu0 }
 0x40f   : > { %v14921_v34 = vpop.f32.mrf.mxu1  ;;  %v18652_v9 = vadd.f32 %v14958_v11, %v9470_v12 }
 0x410   : > { %v9477_v13 = vadd.f32 %v14921_v34, %v18547_v42  ;;  %v9926_v62 = vpop.f32.mrf.mxu0 }
 0x411   : > { %v9416_v27 = vpop.f32.mrf.mxu1  ;;  %v18655_v29 = vadd.f32 %v9926_v62, %v9468_v58 }
 0x412   : > { %v9475_v52 = vadd.f32 %v9416_v27, %v18550_v26  ;;  %v14961_v25 = vpop.f32.mrf.mxu0 }
 0x413   : > { %v14922_v48 = vpop.f32.mrf.mxu1  ;;  %v18658_v32 = vadd.f32 %v14961_v25, %v9473_v53 }
 0x414   : > { %v9478_v4 = vadd.f32 %v14922_v48, %v18556_v36  ;;  %v9939_v2 = vpop.f32.mrf.mxu0 }
 0x415   : > { %v9419_v40 = vpop.f32.mrf.mxu1  ;;  %v18661_v8 = vadd.f32 %v9939_v2, %v9471_v17 }
 0x416   : > { %v9476_v45 = vadd.f32 %v9419_v40, %v18562_v39  ;;  %v14962_v16 = vpop.f32.mrf.mxu0 }
 0x417   : > { %v14925_v42 = vpop.f32.mrf.mxu1  ;;  %v18664_v7 = vadd.f32 %v14962_v16, %v9474_v57 }
 0x418   : > { %v9481_v12 = vadd.f32 %v14925_v42, %v18565_v5  ;;  %v9942_v35 = vpop.f32.mrf.mxu0 }
 0x419   : > { %v9432_v26 = vpop.f32.mrf.mxu1  ;;  %v18667_v18 = vadd.f32 %v9942_v35, %v9472_v47 }
 0x41a   : > { %v9479_v58 = vadd.f32 %v9432_v26, %v18569_v44  ;;  %v14965_v61 = vpop.f32.mrf.mxu0 }
 0x41b   : > { %v14926_v36 = vpop.f32.mrf.mxu1  ;;  %v18670_v3 = vadd.f32 %v14965_v61, %v9477_v13 }
 0x41c   : > { %v9482_v53 = vadd.f32 %v14926_v36, %v18574_v24  ;;  %v9955_v30 = vpop.f32.mrf.mxu0 }
 0x41d   : > { %v9435_v39 = vpop.f32.mrf.mxu1  ;;  %v18673_v43 = vadd.f32 %v9955_v30, %v9475_v52 }
 0x41e   : > { %v9480_v17 = vadd.f32 %v9435_v39, %v18579_v6  ;;  %v14966_v63 = vpop.f32.mrf.mxu0 }
 0x41f   : > { %v14981_v5 = vpop.f32.mrf.mxu1  ;;  %v18676_v22 = vadd.f32 %v14966_v63, %v9478_v4 }
 0x420   : > { %v10527_v57 = vadd.f32 %v14981_v5, %v18582_v54  ;;  %v9958_v55 = vpop.f32.mrf.mxu0 }
 0x421   : > { %v10382_v44 = vpop.f32.mrf.mxu1  ;;  %v18679_v31 = vadd.f32 %v9958_v55, %v9476_v45 }
 0x422   : > { %v10525_v47 = vadd.f32 %v10382_v44, %v18586_v38  ;;  %v14969_v11 = vpop.f32.mrf.mxu0 }
 0x423   : > { %v14982_v24 = vpop.f32.mrf.mxu1  ;;  %v18682_v34 = vadd.f32 %v14969_v11, %v9481_v12 }
 0x424   : > { %v10528_v13 = vadd.f32 %v14982_v24, %v18592_v14  ;;  %v9971_v62 = vpop.f32.mrf.mxu0 }
 0x425   : > { %v10385_v6 = vpop.f32.mrf.mxu1  ;;  %v18685_v27 = vadd.f32 %v9971_v62, %v9479_v58 }
 0x426   : > { %v10526_v52 = vadd.f32 %v10385_v6, %v18595_v49  ;;  %v14970_v25 = vpop.f32.mrf.mxu0 }
 0x427   : > { %v14985_v54 = vpop.f32.mrf.mxu1  ;;  %v18688_v48 = vadd.f32 %v14970_v25, %v9482_v53 }
 0x428   : > { %v10531_v4 = vadd.f32 %v14985_v54, %v18598_v19  ;;  %v9974_v2 = vpop.f32.mrf.mxu0 }
 0x429   : > { %v10398_v38 = vpop.f32.mrf.mxu1  ;;  %v18691_v40 = vadd.f32 %v9974_v2, %v9480_v17 }
 0x42a   : > { %v10529_v45 = vadd.f32 %v10398_v38, %v18601_v23  ;;  %v15025_v16 = vpop.f32.mrf.mxu0 }
 0x42b   : > { %v14986_v14 = vpop.f32.mrf.mxu1  ;;  %v18694_v42 = vadd.f32 %v15025_v16, %v10527_v57 }
 0x42c   : > { %v10532_v12 = vadd.f32 %v14986_v14, %v18603_v41  ;;  %v11054_v35 = vpop.f32.mrf.mxu0 }
 0x42d   : > { %v10401_v49 = vpop.f32.mrf.mxu1  ;;  %v18697_v26 = vadd.f32 %v11054_v35, %v10525_v47 }
 0x42e   : > { %v10530_v58 = vadd.f32 %v10401_v49, %v18606_v60  ;;  %v15026_v61 = vpop.f32.mrf.mxu0 }
 0x42f   : > { %v14989_v19 = vpop.f32.mrf.mxu1  ;;  %v18700_v36 = vadd.f32 %v15026_v61, %v10528_v13 }
 0x430   : > { %v10535_v53 = vadd.f32 %v14989_v19, %v18610_v51  ;;  %v11057_v30 = vpop.f32.mrf.mxu0 }
 0x431   : > { %v10414_v23 = vpop.f32.mrf.mxu1  ;;  %v18703_v39 = vadd.f32 %v11057_v30, %v10526_v52 }
 0x432   : > { %v10533_v17 = vadd.f32 %v10414_v23, %v18613_v33  ;;  %v15029_v63 = vpop.f32.mrf.mxu0 }
 0x433   : > { %v14990_v41 = vpop.f32.mrf.mxu1  ;;  %v18706_v5 = vadd.f32 %v15029_v63, %v10531_v4 }
 0x434   : > { %v10536_v57 = vadd.f32 %v14990_v41, %v18616_v20  ;;  %v11070_v55 = vpop.f32.mrf.mxu0 }
 0x435   : > { %v10417_v60 = vpop.f32.mrf.mxu1  ;;  %v18709_v44 = vadd.f32 %v11070_v55, %v10529_v45 }
 0x436   : > { %v10534_v47 = vadd.f32 %v10417_v60, %v18619_v46  ;;  %v15030_v11 = vpop.f32.mrf.mxu0 }
 0x437   : > { %v14993_v51 = vpop.f32.mrf.mxu1  ;;  %v18712_v24 = vadd.f32 %v15030_v11, %v10532_v12 }
 0x438   : > { %v10539_v13 = vadd.f32 %v14993_v51, %v18622_v50  ;;  %v11073_v62 = vpop.f32.mrf.mxu0 }
 0x439   : > { %v10430_v33 = vpop.f32.mrf.mxu1  ;;  %v18715_v6 = vadd.f32 %v11073_v62, %v10530_v58 }
 0x43a   : > { %v10537_v52 = vadd.f32 %v10430_v33, %v18625_v56  ;;  %v15033_v25 = vpop.f32.mrf.mxu0 }
 0x43b   : > { %v14994_v20 = vpop.f32.mrf.mxu1  ;;  %v18718_v54 = vadd.f32 %v15033_v25, %v10535_v53 }
 0x43c   : > { %v10540_v4 = vadd.f32 %v14994_v20, %v18628_v28  ;;  %v11086_v2 = vpop.f32.mrf.mxu0 }
 0x43d   : > { %v10433_v46 = vpop.f32.mrf.mxu1  ;;  %v18721_v38 = vadd.f32 %v11086_v2, %v10533_v17 }
 0x43e   : > { %v10538_v45 = vadd.f32 %v10433_v46, %v18631_v59  ;;  %v15034_v16 = vpop.f32.mrf.mxu0 }
 0x43f   : > { %v14997_v50 = vpop.f32.mrf.mxu1  ;;  %v18724_v14 = vadd.f32 %v15034_v16, %v10536_v57 }
 0x440   : > { %v10543_v12 = vadd.f32 %v14997_v50, %v18634_v10  ;;  %v11089_v35 = vpop.f32.mrf.mxu0 }
 0x441   : > { %v10446_v56 = vpop.f32.mrf.mxu1  ;;  %v18727_v49 = vadd.f32 %v11089_v35, %v10534_v47 }
 0x442   : > { %v10541_v58 = vadd.f32 %v10446_v56, %v18637_v21  ;;  %v15037_v61 = vpop.f32.mrf.mxu0 }
 0x443   : > { %v14998_v28 = vpop.f32.mrf.mxu1  ;;  %v18730_v19 = vadd.f32 %v15037_v61, %v10539_v13 }
 0x444   : > { %v10544_v53 = vadd.f32 %v14998_v28, %v18640_v37  ;;  %v11102_v30 = vpop.f32.mrf.mxu0 }
 0x445   : > { %v10449_v59 = vpop.f32.mrf.mxu1  ;;  %v18733_v23 = vadd.f32 %v11102_v30, %v10537_v52 }
 0x446   : > { %v10542_v17 = vadd.f32 %v10449_v59, %v18643_v15  ;;  %v15038_v63 = vpop.f32.mrf.mxu0 }
 0x447   : > { %v15001_v10 = vpop.f32.mrf.mxu1  ;;  %v18736_v41 = vadd.f32 %v15038_v63, %v10540_v4 }
 0x448   : > { %v10547_v57 = vadd.f32 %v15001_v10, %v18646_v1  ;;  %v11105_v55 = vpop.f32.mrf.mxu0 }
 0x449   : > { %v10462_v21 = vpop.f32.mrf.mxu1  ;;  %v18739_v60 = vadd.f32 %v11105_v55, %v10538_v45 }
 0x44a   : > { %v10545_v47 = vadd.f32 %v10462_v21, %v18649_v0  ;;  %v15041_v11 = vpop.f32.mrf.mxu0 }
 0x44b   : > { %v15002_v37 = vpop.f32.mrf.mxu1  ;;  %v18742_v51 = vadd.f32 %v15041_v11, %v10543_v12 }
 0x44c   : > { %v10548_v13 = vadd.f32 %v15002_v37, %v18652_v9  ;;  %v11118_v62 = vpop.f32.mrf.mxu0 }
 0x44d   : > { %v10465_v15 = vpop.f32.mrf.mxu1  ;;  %v18745_v33 = vadd.f32 %v11118_v62, %v10541_v58 }
 0x44e   : > { %v10546_v52 = vadd.f32 %v10465_v15, %v18655_v29  ;;  %v15042_v25 = vpop.f32.mrf.mxu0 }
 0x44f   : > { %v15005_v1 = vpop.f32.mrf.mxu1  ;;  %v18748_v20 = vadd.f32 %v15042_v25, %v10544_v53 }
 0x450   : > { %v10551_v4 = vadd.f32 %v15005_v1, %v18658_v32  ;;  %v11121_v2 = vpop.f32.mrf.mxu0 }
 0x451   : > { %v10478_v0 = vpop.f32.mrf.mxu1  ;;  %v18751_v46 = vadd.f32 %v11121_v2, %v10542_v17 }
 0x452   : > { %v10549_v45 = vadd.f32 %v10478_v0, %v18661_v8  ;;  %v15045_v16 = vpop.f32.mrf.mxu0 }
 0x453   : > { %v15006_v9 = vpop.f32.mrf.mxu1  ;;  %v18754_v50 = vadd.f32 %v15045_v16, %v10547_v57 }
 0x454   : > { %v10552_v12 = vadd.f32 %v15006_v9, %v18664_v7  ;;  %v11134_v35 = vpop.f32.mrf.mxu0 }
 0x455   : > { %v10481_v29 = vpop.f32.mrf.mxu1  ;;  %v18757_v56 = vadd.f32 %v11134_v35, %v10545_v47 }
 0x456   : > { %v10550_v58 = vadd.f32 %v10481_v29, %v18667_v18  ;;  %v15046_v61 = vpop.f32.mrf.mxu0 }
 0x457   : > { %v15009_v32 = vpop.f32.mrf.mxu1  ;;  %v18760_v28 = vadd.f32 %v15046_v61, %v10548_v13 }
 0x458   : > { %v10555_v53 = vadd.f32 %v15009_v32, %v18670_v3  ;;  %v11137_v30 = vpop.f32.mrf.mxu0 }
 0x459   : > { %v10494_v8 = vpop.f32.mrf.mxu1  ;;  %v18763_v59 = vadd.f32 %v11137_v30, %v10546_v52 }
 0x45a   : > { %v10553_v17 = vadd.f32 %v10494_v8, %v18673_v43  ;;  %v15049_v63 = vpop.f32.mrf.mxu0 }
 0x45b   : > { %v15010_v7 = vpop.f32.mrf.mxu1  ;;  %v18766_v10 = vadd.f32 %v15049_v63, %v10551_v4 }
 0x45c   : > { %v10556_v57 = vadd.f32 %v15010_v7, %v18676_v22  ;;  %v11150_v55 = vpop.f32.mrf.mxu0 }
 0x45d   : > { %v10497_v18 = vpop.f32.mrf.mxu1  ;;  %v18769_v21 = vadd.f32 %v11150_v55, %v10549_v45 }
 0x45e   : > { %v10554_v47 = vadd.f32 %v10497_v18, %v18679_v31  ;;  %v15050_v11 = vpop.f32.mrf.mxu0 }
 0x45f   : > { %v15013_v3 = vpop.f32.mrf.mxu1  ;;  %v18772_v37 = vadd.f32 %v15050_v11, %v10552_v12 }
 0x460   : > { %v10559_v13 = vadd.f32 %v15013_v3, %v18682_v34  ;;  %v11153_v62 = vpop.f32.mrf.mxu0 }
 0x461   : > { %v10510_v43 = vpop.f32.mrf.mxu1  ;;  %v18775_v15 = vadd.f32 %v11153_v62, %v10550_v58 }
 0x462   : > { %v10557_v52 = vadd.f32 %v10510_v43, %v18685_v27  ;;  %v15053_v25 = vpop.f32.mrf.mxu0 }
 0x463   : > { %v15014_v22 = vpop.f32.mrf.mxu1  ;;  %v18778_v1 = vadd.f32 %v15053_v25, %v10555_v53 }
 0x464   : > { %v10560_v4 = vadd.f32 %v15014_v22, %v18688_v48  ;;  %v11166_v2 = vpop.f32.mrf.mxu0 }
 0x465   : > { %v10513_v31 = vpop.f32.mrf.mxu1  ;;  %v18781_v0 = vadd.f32 %v11166_v2, %v10553_v17 }
 0x466   : > { %v10558_v45 = vadd.f32 %v10513_v31, %v18691_v40  ;;  %v15054_v16 = vpop.f32.mrf.mxu0 }
 0x467   : > { %v15069_v34 = vpop.f32.mrf.mxu1  ;;  %v18784_v9 = vadd.f32 %v15054_v16, %v10556_v57 }
 0x468   : > { %v11169_v12 = vpop.f32.mrf.mxu0  ;;  %v11738_v7 = vadd.f32 %v15069_v34, %v18694_v42 }
 0x469   : > { %v11593_v35 = vpop.f32.mrf.mxu1  ;;  %v18786_v29 = vadd.f32 %v11169_v12, %v10554_v47 }
 0x46a   : > { %v15057_v27 = vpop.f32.mrf.mxu0  ;;  %v11736_v47 = vadd.f32 %v11593_v35, %v18697_v26 }
 0x46b   : > { %v15070_v58 = vpop.f32.mrf.mxu1  ;;  %v18788_v61 = vadd.f32 %v15057_v27, %v10559_v13  ;;  %v18801_v13 = vld [vmem:[%s18954_s5] ss:$0 sm:$0xff] }
 0x46c   : > { %v11182_v32 = vpop.f32.mrf.mxu0  ;;  %v11739_v43 = vadd.f32 %v15070_v58, %v18700_v36 }
 0x46d   : > { %v11596_v48 = vpop.f32.mrf.mxu1  ;;  %v18790_v53 = vadd.f32 %v11182_v32, %v10557_v52 }
 0x46e   : > { %v15058_v30 = vpop.f32.mrf.mxu0  ;;  %v11737_v22 = vadd.f32 %v11596_v48, %v18703_v39 }
 0x46f   : > { %v15073_v8 = vpop.f32.mrf.mxu1  ;;  %v18792_v17 = vadd.f32 %v15058_v30, %v10560_v4 }
 0x470   : > { %v11185_v40 = vpop.f32.mrf.mxu0 }
 0x471   : > { %v11609_v63 = vpop.f32.mrf.mxu1  ;;  %v18795_v57 = vadd.f32 %v11185_v40, %v10558_v45  ;;  %v11742_v45 = vadd.f32 %v15073_v8, %v18706_v5 }
 0x472   : > { %v15107_v55 = vpop.f32.mrf.mxu0  ;;  %v11740_v35 = vadd.f32 %v11609_v63, %v18709_v44 }
 0x473   : > { %v15074_v18 = vpop.f32.mrf.mxu1  ;;  %v12381_v11 = vadd.f32 %v15107_v55, %v11738_v7 }
 0x474   : > { %v12236_v3 = vpop.f32.mrf.mxu0  ;;  %v11743_v48 = vadd.f32 %v15074_v18, %v18712_v24 }
 0x475   : > { %v11612_v62 = vpop.f32.mrf.mxu1  ;;  %12417 = vst [vmem:[#allocation5 + $0x10] sm:$0xff] %v12381_v11  ;;  %v12379_v52 = vadd.f32 %v12236_v3, %v11736_v47 }
 0x476   : > { %v15108_v42 = vpop.f32.mrf.mxu0  ;;  %v11741_v44 = vadd.f32 %v11612_v62, %v18715_v6 }
 0x477   : > { %v15077_v25 = vpop.f32.mrf.mxu1  ;;  %12415 = vst [vmem:[#allocation5] sm:$0xff] %v12379_v52  ;;  %v12460_v26 = vadd.f32 %v18801_v13, %v12379_v52  ;;  %v12382_v4 = vadd.f32 %v15108_v42, %v11739_v43 }
 0x478   : > { %v12239_v2 = vpop.f32.mrf.mxu0  ;;  %v11746_v52 = vadd.f32 %v15077_v25, %v18718_v54 }
 0x479   : > { %v11625_v31 = vpop.f32.mrf.mxu1  ;;  %12418 = vst [vmem:[#allocation5 + $0x18] sm:$0xff] %v12382_v4  ;;  %v12380_v16 = vadd.f32 %v12239_v2, %v11737_v22  ;;  %v12464_v12 = vmul.f32 0.1, %v12460_v26  ;;  %vm12462_vm6 = vcmp.ge.f32.partialorder %v12460_v26, 0.0 }
 0x47a   : > { %v15111_v34 = vpop.f32.mrf.mxu0  ;;  %v11744_v6 = vadd.f32 %v11625_v31, %v18721_v38 }
 0x47b   : > { %v15078_v36 = vpop.f32.mrf.mxu1  ;;  %12416 = vst [vmem:[#allocation5 + $0x8] sm:$0xff] %v12380_v16  ;;  %v12461_v39 = vadd.f32 %v18801_v13, %v12380_v16  ;;  %v12385_v27 = vadd.f32 %v15111_v34, %v11742_v45  ;;  %v12466_v7 = vsel %vm12462_vm6, %v12460_v26, %v12464_v12 }
 0x47c   : > { %v12252_v58 = vpop.f32.mrf.mxu0  ;;  %v11747_v2 = vadd.f32 %v15078_v36, %v18724_v14 }
 0x47d   : > { %v11628_v32 = vpop.f32.mrf.mxu1  ;;  %vm12463_vm14 = vcmp.ge.f32.partialorder %v12461_v39, 0.0  ;;  %v12465_v5 = vmul.f32 0.1, %v12461_v39  ;;  %12421 = vst [vmem:[#allocation5 + $0x30] sm:$0xff] %v12385_v27  ;;  %v12383_v30 = vadd.f32 %v12252_v58, %v11740_v35 }
 0x47e   : > { %v15112_v8 = vpop.f32.mrf.mxu0  ;;  %v11745_v31 = vadd.f32 %v11628_v32, %v18727_v49 }
 0x47f   : > { %v15081_v40 = vpop.f32.mrf.mxu1  ;;  %v12467_v55 = vsel %vm12463_vm14, %v12461_v39, %v12465_v5  ;;  %12419 = vst [vmem:[#allocation5 + $0x20] sm:$0xff] %v12383_v30  ;;  %v12386_v63 = vadd.f32 %v15112_v8, %v11743_v48 }
 0x480   : > { %v12478_v47 = vld [vmem:[#allocation5 + $0x12] sm:$0xff]  ;;  %v13885_v11 = vpack.c.bf16 %v12467_v55, %v12466_v7  ;;  %v12255_v3 = vpop.f32.mrf.mxu0  ;;  %v11750_v48 = vadd.f32 %v15081_v40, %v18730_v19 }
 0x481   : > { %v11641_v43 = vpop.f32.mrf.mxu1  ;;  %12422 = vst [vmem:[#allocation5 + $0x38] sm:$0xff] %v12386_v63  ;;  %v12384_v24 = vadd.f32 %v12255_v3, %v11741_v44  ;;  %v12480_v18 = vadd.f32 %v18801_v13, %v12478_v47 }
 0x482   : > { %13886 = vst [vmem:[%s18816_s15] sm:$0xff] %v13885_v11   ;;  %v15115_v42 = vpop.f32.mrf.mxu0  ;;  %v11748_v7 = vadd.f32 %v11641_v43, %v18733_v23 }
 0x483   : > { %v15082_v22 = vpop.f32.mrf.mxu1  ;;  %12420 = vst [vmem:[#allocation5 + $0x28] sm:$0xff] %v12384_v24  ;;  %v12389_v62 = vadd.f32 %v15115_v42, %v11746_v52  ;;  %v12484_v25 = vmul.f32 0.1, %v12480_v18  ;;  %vm12482_vm7 = vcmp.ge.f32.partialorder %v12480_v18, 0.0 }
 0x484   : > { %v12268_v26 = vpop.f32.mrf.mxu0  ;;  %v11751_v55 = vadd.f32 %v15082_v22, %v18736_v41 }
 0x485   : > { %v11644_v4 = vpop.f32.mrf.mxu1  ;;  %12425 = vst [vmem:[#allocation5 + $0x50] sm:$0xff] %v12389_v62  ;;  %v12387_v54 = vadd.f32 %v12268_v26, %v11744_v6  ;;  %v12544_v35 = vadd.f32 %v18801_v13, %v12389_v62  ;;  %v12486_v5 = vsel %vm12482_vm7, %v12480_v18, %v12484_v25 }
 0x486   : > { %v12479_v45 = vld [vmem:[#allocation5 + $0x1a] sm:$0xff]  ;;  %v15116_v16 = vpop.f32.mrf.mxu0  ;;  %v11749_v6 = vadd.f32 %v11644_v4, %v18739_v60 }
 0x487   : > { %v15085_v34 = vpop.f32.mrf.mxu1  ;;  %v12481_v12 = vadd.f32 %v18801_v13, %v12479_v45  ;;  %12423 = vst [vmem:[#allocation5 + $0x40] sm:$0xff] %v12387_v54  ;;  %v12390_v39 = vadd.f32 %v15116_v16, %v11747_v2  ;;  %vm12546_vm10 = vcmp.ge.f32.partialorder %v12544_v35, 0.0  ;;  %v12548_v11 = vmul.f32 0.1, %v12544_v35 }
 0x488   : > { %v12520_v38 = vld [vmem:[#allocation5 + $0x36] sm:$0xff]  ;;  %v12271_v27 = vpop.f32.mrf.mxu0 }
 0x489   : > { %v11657_v58 = vpop.f32.mrf.mxu1  ;;  %vm12483_vm5 = vcmp.ge.f32.partialorder %v12481_v12, 0.0  ;;  %v12485_v14 = vmul.f32 0.1, %v12481_v12  ;;  %v12522_v36 = vadd.f32 %v18801_v13, %v12520_v38  ;;  %12426 = vst [vmem:[#allocation5 + $0x58] sm:$0xff] %v12390_v39  ;;  %v12388_v44 = vadd.f32 %v12271_v27, %v11745_v31 }
 0x48a   : > { %v12499_v30 = vld [vmem:[#allocation5 + $0x24] sm:$0xff]  ;;  %v12500_v8 = vld [vmem:[#allocation5 + $0x2c] sm:$0xff]  ;;  %v15119_v63 = vpop.f32.mrf.mxu0  ;;  %v11754_v39 = vadd.f32 %v15085_v34, %v18742_v51 }
 0x48b   : > { %v15086_v47 = vpop.f32.mrf.mxu1  ;;  %v12487_v49 = vsel %vm12483_vm5, %v12481_v12, %v12485_v14  ;;  %v12501_v32 = vadd.f32 %v18801_v13, %v12499_v30  ;;  %v12502_v19 = vadd.f32 %v18801_v13, %v12500_v8  ;;  %12424 = vst [vmem:[#allocation5 + $0x48] sm:$0xff] %v12388_v44  ;;  %v12543_v40 = vadd.f32 %v18801_v13, %v12388_v44 }
 0x48c   : > { %v13890_v3 = vpack.c.bf16 %v12487_v49, %v12486_v5  ;;  %v12393_v52 = vadd.f32 %v15119_v63, %v11750_v48  ;;  %v12284_v24 = vpop.f32.mrf.mxu0  ;;  %v12526_v43 = vmul.f32 0.1, %v12522_v36  ;;  %vm12524_vm0 = vcmp.ge.f32.partialorder %v12522_v36, 0.0 }
 0x48d   : > { %v11660_v23 = vpop.f32.mrf.mxu1  ;;  %vm12503_vm13 = vcmp.ge.f32.partialorder %v12501_v32, 0.0  ;;  %v12505_v41 = vmul.f32 0.1, %v12501_v32  ;;  %v12391_v18 = vadd.f32 %v12284_v24, %v11748_v7  ;;  %vm12504_vm1 = vcmp.ge.f32.partialorder %v12502_v19, 0.0 }
 0x48e   : > { %13962 = vst [vmem:[%s18816_s15 + $0x8] sm:$0xff] %v13890_v3   ;;  %v12506_v42 = vmul.f32 0.1, %v12502_v19  ;;  %v12521_v22 = vld [vmem:[#allocation5 + $0x3e] sm:$0xff]  ;;  %vm12545_vm15 = vcmp.ge.f32.partialorder %v12543_v40, 0.0  ;;  %12429 = vst [vmem:[#allocation5 + $0x70] sm:$0xff] %v12393_v52  ;;  %v15120_v62 = vpop.f32.mrf.mxu0  ;;  %v12550_v12 = vsel %vm12546_vm10, %v12544_v35, %v12548_v11  ;;  %v12528_v8 = vsel %vm12524_vm0, %v12522_v36, %v12526_v43 }
 0x48f   : > { %v15089_v26 = vpop.f32.mrf.mxu1  ;;  %v12507_v2 = vsel %vm12503_vm13, %v12501_v32, %v12505_v41  ;;  %v12523_v54 = vadd.f32 %v18801_v13, %v12521_v22  ;;  %v12547_v25 = vmul.f32 0.1, %v12543_v40  ;;  %12427 = vst [vmem:[#allocation5 + $0x60] sm:$0xff] %v12391_v18  ;;  %v12394_v45 = vadd.f32 %v15120_v62, %v11751_v55 }
 0x490   : > { %v12508_v16 = vsel %vm12504_vm1, %v12502_v19, %v12506_v42  ;;  %v12287_v38 = vpop.f32.mrf.mxu0  ;;  %v11752_v35 = vadd.f32 %v11657_v58, %v18745_v33  ;;  %v11755_v63 = vadd.f32 %v15086_v47, %v18748_v20  ;;  %v11758_v47 = vadd.f32 %v15089_v26, %v18754_v50 }
 0x491   : > { %v11673_v31 = vpop.f32.mrf.mxu1  ;;  %v13895_v60 = vpack.c.bf16 %v12508_v16, %v12507_v2  ;;  %vm12525_vm12 = vcmp.ge.f32.partialorder %v12523_v54, 0.0  ;;  %v12527_v4 = vmul.f32 0.1, %v12523_v54  ;;  %v12549_v27 = vsel %vm12545_vm15, %v12543_v40, %v12547_v25  ;;  %12430 = vst [vmem:[#allocation5 + $0x78] sm:$0xff] %v12394_v45 }
 0x492   : > { %v13905_v14 = vpack.c.bf16 %v12550_v12, %v12549_v27  ;;  %v12392_v48 = vadd.f32 %v12287_v38, %v11749_v6  ;;  %v15123_v5 = vpop.f32.mrf.mxu0  ;;  %v11753_v40 = vadd.f32 %v11660_v23, %v18751_v46  ;;  %v11756_v41 = vadd.f32 %v11673_v31, %v18757_v56 }
 0x493   : > { %v15090_v30 = vpop.f32.mrf.mxu1  ;;  %13963 = vst [vmem:[%s18816_s15 + $0x10] sm:$0xff] %v13895_v60   ;;  %v12529_v7 = vsel %vm12525_vm12, %v12523_v54, %v12527_v4  ;;  %v12397_v51 = vadd.f32 %v15123_v5, %v11754_v39 }
 0x494   : > { %v13900_v34 = vpack.c.bf16 %v12529_v7, %v12528_v8  ;;  %13965 = vst [vmem:[%s18816_s15 + $0x20] sm:$0xff] %v13905_v14   ;;  %12428 = vst [vmem:[#allocation5 + $0x68] sm:$0xff] %v12392_v48  ;;  %v12300_v55 = vpop.f32.mrf.mxu0  ;;  %v11759_v12 = vadd.f32 %v15090_v30, %v18760_v28 }
 0x495   : > { %v11676_v44 = vpop.f32.mrf.mxu1  ;;  %12433 = vst [vmem:[#allocation5 + $0x90] sm:$0xff] %v12397_v51  ;;  %v12627_v49 = vadd.f32 %v18801_v13, %v12397_v51  ;;  %v12395_v32 = vadd.f32 %v12300_v55, %v11752_v35 }
 0x496   : > { %13964 = vst [vmem:[%s18816_s15 + $0x18] sm:$0xff] %v13900_v34   ;;  %v12562_v11 = vld [vmem:[#allocation5 + $0x5a] sm:$0xff]  ;;  %v15124_v3 = vpop.f32.mrf.mxu0  ;;  %v11757_v39 = vadd.f32 %v11676_v44, %v18763_v59 }
 0x497   : > { %v15093_v36 = vpop.f32.mrf.mxu1  ;;  %v12564_v19 = vadd.f32 %v18801_v13, %v12562_v11  ;;  %12431 = vst [vmem:[#allocation5 + $0x80] sm:$0xff] %v12395_v32  ;;  %v12398_v33 = vadd.f32 %v15124_v3, %v11755_v63  ;;  %v12631_v20 = vmul.f32 0.1, %v12627_v49  ;;  %vm12629_vm11 = vcmp.ge.f32.partialorder %v12627_v49, 0.0 }
 0x498   : > { %v12584_v58 = vld [vmem:[#allocation5 + $0x74] sm:$0xff]  ;;  %v12303_v52 = vpop.f32.mrf.mxu0  ;;  %v11762_v63 = vadd.f32 %v15093_v36, %v18766_v10 }
 0x499   : > { %v11689_v24 = vpop.f32.mrf.mxu1  ;;  %v12586_v43 = vadd.f32 %v18801_v13, %v12584_v58  ;;  %12434 = vst [vmem:[#allocation5 + $0x98] sm:$0xff] %v12398_v33  ;;  %v12568_v18 = vmul.f32 0.1, %v12564_v19  ;;  %v12628_v42 = vadd.f32 %v18801_v13, %v12398_v33  ;;  %v12396_v22 = vadd.f32 %v12303_v52, %v11753_v40 }
 0x49a   : > { %v15127_v6 = vpop.f32.mrf.mxu0  ;;  %vm12566_vm3 = vcmp.ge.f32.partialorder %v12564_v19, 0.0  ;;  %v12633_v16 = vsel %vm12629_vm11, %v12627_v49, %v12631_v20 }
 0x49b   : > { %v15094_v62 = vpop.f32.mrf.mxu1  ;;  %vm12588_vm2 = vcmp.ge.f32.partialorder %v12586_v43, 0.0  ;;  %v12590_v46 = vmul.f32 0.1, %v12586_v43  ;;  %v12563_v23 = vld [vmem:[#allocation5 + $0x62] sm:$0xff]  ;;  %v12583_v2 = vld [vmem:[#allocation5 + $0x6c] sm:$0xff]  ;;  %v12401_v54 = vadd.f32 %v15127_v6, %v11758_v47  ;;  %vm12630_vm8 = vcmp.ge.f32.partialorder %v12628_v42, 0.0 }
 0x49c   : > { %v12565_v25 = vadd.f32 %v18801_v13, %v12563_v23  ;;  %v12585_v50 = vadd.f32 %v18801_v13, %v12583_v2  ;;  %v12632_v56 = vmul.f32 0.1, %v12628_v42  ;;  %12432 = vst [vmem:[#allocation5 + $0x88] sm:$0xff] %v12396_v22  ;;  %v12316_v26 = vpop.f32.mrf.mxu0  ;;  %v12570_v14 = vsel %vm12566_vm3, %v12564_v19, %v12568_v18 }
 0x49d   : > { %v11692_v45 = vpop.f32.mrf.mxu1  ;;  %12437 = vst [vmem:[#allocation5 + $0xb0] sm:$0xff] %v12401_v54  ;;  %v12399_v38 = vadd.f32 %v12316_v26, %v11756_v41  ;;  %v12592_v48 = vsel %vm12588_vm2, %v12586_v43, %v12590_v46  ;;  %v11760_v19 = vadd.f32 %v11689_v24, %v18769_v21  ;;  %v11763_v10 = vadd.f32 %v15094_v62, %v18772_v37 }
 0x49e   : > { %vm12567_vm4 = vcmp.ge.f32.partialorder %v12565_v25, 0.0  ;;  %v12569_v31 = vmul.f32 0.1, %v12565_v25  ;;  %vm12587_vm9 = vcmp.ge.f32.partialorder %v12585_v50, 0.0  ;;  %v12589_v60 = vmul.f32 0.1, %v12585_v50  ;;  %v15128_v4 = vpop.f32.mrf.mxu0 }
 0x49f   : > { %v15097_v27 = vpop.f32.mrf.mxu1  ;;  %v12604_v5 = vld [vmem:[#allocation5 + $0x7e] sm:$0xff]  ;;  %v12634_v8 = vsel %vm12630_vm8, %v12628_v42, %v12632_v56  ;;  %12435 = vst [vmem:[#allocation5 + $0xa0] sm:$0xff] %v12399_v38  ;;  %v12402_v28 = vadd.f32 %v15128_v4, %v11759_v12  ;;  %v11761_v41 = vadd.f32 %v11692_v45, %v18775_v15 }
 0x4a0   : > { %v12571_v59 = vsel %vm12567_vm4, %v12565_v25, %v12569_v31  ;;  %v12591_v30 = vsel %vm12587_vm9, %v12585_v50, %v12589_v60  ;;  %v12606_v7 = vadd.f32 %v18801_v13, %v12604_v5  ;;  %v13925_v35 = vpack.c.bf16 %v12634_v8, %v12633_v16  ;;  %v12319_v51 = vpop.f32.mrf.mxu0 }
 0x4a1   : > { %v11705_v34 = vpop.f32.mrf.mxu1  ;;  %v13910_v55 = vpack.c.bf16 %v12571_v59, %v12570_v14  ;;  %v13915_v44 = vpack.c.bf16 %v12592_v48, %v12591_v30  ;;  %12438 = vst [vmem:[#allocation5 + $0xb8] sm:$0xff] %v12402_v28  ;;  %v12400_v49 = vadd.f32 %v12319_v51, %v11757_v39  ;;  %v11766_v54 = vadd.f32 %v15097_v27, %v18778_v1 }
 0x4a2   : > { %13969 = vst [vmem:[%s18816_s15 + $0x40] sm:$0xff] %v13925_v35   ;;  %v15131_v32 = vpop.f32.mrf.mxu0  ;;  %v12610_v58 = vmul.f32 0.1, %v12606_v7  ;;  %vm12608_vm6 = vcmp.ge.f32.partialorder %v12606_v7, 0.0  ;;  %v11764_v56 = vadd.f32 %v11705_v34, %v18781_v0 }
 0x4a3   : > { %v15098_v11 = vpop.f32.mrf.mxu1  ;;  %13966 = vst [vmem:[%s18816_s15 + $0x28] sm:$0xff] %v13910_v55   ;;  %13967 = vst [vmem:[%s18816_s15 + $0x30] sm:$0xff] %v13915_v44   ;;  %v12605_v3 = vld [vmem:[#allocation5 + $0x86] sm:$0xff]  ;;  %v12405_v33 = vadd.f32 %v15131_v32, %v11762_v63 }
 0x4a4   : > { %12436 = vst [vmem:[#allocation5 + $0xa8] sm:$0xff] %v12400_v49  ;;  %v12607_v40 = vadd.f32 %v18801_v13, %v12605_v3  ;;  %v12332_v52 = vpop.f32.mrf.mxu0  ;;  %v12612_v24 = vsel %vm12608_vm6, %v12606_v7, %v12610_v58  ;;  %v11767_v45 = vadd.f32 %v15098_v11, %v18784_v9 }
 0x4a5   : > { %v11708_v43 = vpop.f32.mrf.mxu1  ;;  %12441 = vst [vmem:[#allocation5 + $0xd0] sm:$0xff] %v12405_v33  ;;  %v12403_v36 = vadd.f32 %v12332_v52, %v11760_v19 }
 0x4a6   : > { %vm12609_vm14 = vcmp.ge.f32.partialorder %v12607_v40, 0.0  ;;  %v12611_v20 = vmul.f32 0.1, %v12607_v40  ;;  %v15132_v47 = vpop.f32.mrf.mxu0  ;;  %v11765_v1 = vadd.f32 %v11708_v43, %v18786_v29 }
 0x4a7   : > { %12439 = vst [vmem:[#allocation5 + $0xc0] sm:$0xff] %v12403_v36  ;;  %v12406_v21 = vadd.f32 %v15132_v47, %v11763_v10  ;;  %v15101_v6 = vpop.f32.mrf.mxu1 }
 0x4a8   : > { %v12613_v18 = vsel %vm12609_vm14, %v12607_v40, %v12611_v20  ;;  %v12667_v42 = vld [vmem:[#allocation5 + $0xb4] sm:$0xff]  ;;  %v12335_v22 = vpop.f32.mrf.mxu0  ;;  %v11770_v27 = vadd.f32 %v15101_v6, %v18788_v61 }
 0x4a9   : > { %v13920_v46 = vpack.c.bf16 %v12613_v18, %v12612_v24  ;;  %12442 = vst [vmem:[#allocation5 + $0xd8] sm:$0xff] %v12406_v21  ;;  %v12404_v23 = vadd.f32 %v12335_v22, %v11761_v41  ;;  %v12669_v37 = vadd.f32 %v18801_v13, %v12667_v42  ;;  %v12711_v26 = vadd.f32 %v18801_v13, %v12406_v21  ;;  %v11721_v39 = vpop.f32.mrf.mxu1 }
 0x4aa   : > { %v15135_v25 = vpop.f32.mrf.mxu0  ;;  %v11768_v63 = vadd.f32 %v11721_v39, %v18790_v53 }
 0x4ab   : > { %v12646_v62 = vld [vmem:[#allocation5 + $0xa2] sm:$0xff]  ;;  %v12647_v2 = vld [vmem:[#allocation5 + $0xaa] sm:$0xff]  ;;  %13968 = vst [vmem:[%s18816_s15 + $0x38] sm:$0xff] %v13920_v46   ;;  %12440 = vst [vmem:[#allocation5 + $0xc8] sm:$0xff] %v12404_v23  ;;  %v12409_v16 = vadd.f32 %v15135_v25, %v11766_v54  ;;  %v12673_v31 = vmul.f32 0.1, %v12669_v37  ;;  %v15102_v59 = vpop.f32.mrf.mxu1 }
 0x4ac   : > { %v12648_v15 = vadd.f32 %v18801_v13, %v12646_v62  ;;  %v12649_v50 = vadd.f32 %v18801_v13, %v12647_v2  ;;  %v12348_v12 = vpop.f32.mrf.mxu0  ;;  %vm12671_vm10 = vcmp.ge.f32.partialorder %v12669_v37, 0.0  ;;  %vm12713_vm13 = vcmp.ge.f32.partialorder %v12711_v26, 0.0 }
 0x4ad   : > { %12445 = vst [vmem:[#allocation5 + $0xf0] sm:$0xff] %v12409_v16  ;;  %v12407_v14 = vadd.f32 %v12348_v12, %v11764_v56  ;;  %v12715_v28 = vmul.f32 0.1, %v12711_v26  ;;  %v12675_v51 = vsel %vm12671_vm10, %v12669_v37, %v12673_v31  ;;  %v11771_v52 = vadd.f32 %v15102_v59, %v18792_v17  ;;  %v11724_v43 = vpop.f32.mrf.mxu1 }
 0x4ae   : > { %vm12650_vm7 = vcmp.ge.f32.partialorder %v12648_v15, 0.0  ;;  %vm12651_vm5 = vcmp.ge.f32.partialorder %v12649_v50, 0.0  ;;  %v12652_v38 = vmul.f32 0.1, %v12648_v15  ;;  %v12653_v60 = vmul.f32 0.1, %v12649_v50  ;;  %v15136_v0 = vpop.f32.mrf.mxu0 }
 0x4af   : > { %v12668_v4 = vld [vmem:[#allocation5 + $0xbc] sm:$0xff]  ;;  %v12410_v5 = vadd.f32 %v15136_v0, %v11767_v45  ;;  %12443 = vst [vmem:[#allocation5 + $0xe0] sm:$0xff] %v12407_v14  ;;  %v12712_v29 = vadd.f32 %v18801_v13, %v12407_v14  ;;  %v12717_v58 = vsel %vm12713_vm13, %v12711_v26, %v12715_v28  ;;  %v11769_v18 = vadd.f32 %v11724_v43, %v18795_v57 }
 0x4b0   : > { %v12654_v48 = vsel %vm12650_vm7, %v12648_v15, %v12652_v38  ;;  %v12670_v9 = vadd.f32 %v18801_v13, %v12668_v4  ;;  %v12655_v8 = vsel %vm12651_vm5, %v12649_v50, %v12653_v60  ;;  %v12351_v30 = vpop.f32.mrf.mxu0 }
 0x4b1   : > { %v13930_v7 = vpack.c.bf16 %v12655_v8, %v12654_v48  ;;  %12446 = vst [vmem:[#allocation5 + $0xf8] sm:$0xff] %v12410_v5  ;;  %v12408_v61 = vadd.f32 %v12351_v30, %v11765_v1  ;;  %vm12714_vm15 = vcmp.ge.f32.partialorder %v12712_v29, 0.0  ;;  %v12716_v44 = vmul.f32 0.1, %v12712_v29 }
 0x4b2   : > { %vm12672_vm1 = vcmp.ge.f32.partialorder %v12670_v9, 0.0  ;;  %v12674_v35 = vmul.f32 0.1, %v12670_v9  ;;  %v12688_v34 = vld [vmem:[#allocation5 + $0xc6] sm:$0xff]  ;;  %v12689_v55 = vld [vmem:[#allocation5 + $0xce] sm:$0xff]  ;;  %v15139_v49 = vpop.f32.mrf.mxu0 }
 0x4b3   : > { %13970 = vst [vmem:[%s18816_s15 + $0x48] sm:$0xff] %v13930_v7   ;;  %v12690_v11 = vadd.f32 %v18801_v13, %v12688_v34  ;;  %v12691_v3 = vadd.f32 %v18801_v13, %v12689_v55  ;;  %12444 = vst [vmem:[#allocation5 + $0xe8] sm:$0xff] %v12408_v61  ;;  %v12413_v19 = vadd.f32 %v15139_v49, %v11770_v27 }
 0x4b4   : > { %v12676_v32 = vsel %vm12672_vm1, %v12670_v9, %v12674_v35  ;;  %v12718_v40 = vsel %vm12714_vm15, %v12712_v29, %v12716_v44  ;;  %v12364_v10 = vpop.f32.mrf.mxu0 }
 0x4b5   : > { %v13935_v33 = vpack.c.bf16 %v12676_v32, %v12675_v51  ;;  %vm12692_vm0 = vcmp.ge.f32.partialorder %v12690_v11, 0.0  ;;  %vm12693_vm12 = vcmp.ge.f32.partialorder %v12691_v3, 0.0  ;;  %v12694_v53 = vmul.f32 0.1, %v12690_v11  ;;  %12449 = vst [vmem:[#allocation5 + $0x110] sm:$0xff] %v12413_v19 }
 0x4b6   : > { %v12695_v36 = vmul.f32 0.1, %v12691_v3  ;;  %v13945_v20 = vpack.c.bf16 %v12718_v40, %v12717_v58  ;;  %v12411_v47 = vadd.f32 %v12364_v10, %v11768_v63  ;;  %v15140_v41 = vpop.f32.mrf.mxu0 }
 0x4b7   : > { %13971 = vst [vmem:[%s18816_s15 + $0x50] sm:$0xff] %v13935_v33   ;;  %v12696_v21 = vsel %vm12692_vm0, %v12690_v11, %v12694_v53  ;;  %v12414_v42 = vadd.f32 %v15140_v41, %v11771_v52 }
 0x4b8   : > { %v12697_v24 = vsel %vm12693_vm12, %v12691_v3, %v12695_v36  ;;  %13973 = vst [vmem:[%s18816_s15 + $0x60] sm:$0xff] %v13945_v20   ;;  %v12731_v17 = vld [vmem:[#allocation5 + $0xf2] sm:$0xff]  ;;  %12447 = vst [vmem:[#allocation5 + $0x100] sm:$0xff] %v12411_v47  ;;  %v12367_v6 = vpop.f32.mrf.mxu0 }
 0x4b9   : > { %v13940_v22 = vpack.c.bf16 %v12697_v24, %v12696_v21  ;;  %v12733_v46 = vadd.f32 %v18801_v13, %v12731_v17  ;;  %12450 = vst [vmem:[#allocation5 + $0x118] sm:$0xff] %v12414_v42  ;;  %v12412_v23 = vadd.f32 %v12367_v6, %v11769_v18 }
 0x4ba   : > { %v12730_v37 = vld [vmem:[#allocation5 + $0xea] sm:$0xff] }
 0x4bb   : > { %13972 = vst [vmem:[%s18816_s15 + $0x58] sm:$0xff] %v13940_v22   ;;  %v12737_v62 = vmul.f32 0.1, %v12733_v46  ;;  %v12732_v2 = vadd.f32 %v18801_v13, %v12730_v37  ;;  %12448 = vst [vmem:[#allocation5 + $0x108] sm:$0xff] %v12412_v23  ;;  %vm12735_vm11 = vcmp.ge.f32.partialorder %v12733_v46, 0.0 }
 0x4bd   : > { %vm12734_vm3 = vcmp.ge.f32.partialorder %v12732_v2, 0.0  ;;  %v12736_v57 = vmul.f32 0.1, %v12732_v2  ;;  %v12739_v54 = vsel %vm12735_vm11, %v12733_v46, %v12737_v62 }
 0x4bf   : > { %v12738_v25 = vsel %vm12734_vm3, %v12732_v2, %v12736_v57  ;;  %v12751_v15 = vld [vmem:[#allocation5 + $0xfc] sm:$0xff] }
 0x4c0   : > { %v13950_v50 = vpack.c.bf16 %v12739_v54, %v12738_v25  ;;  %v12753_v56 = vadd.f32 %v18801_v13, %v12751_v15  ;;  %v12773_v26 = vld [vmem:[#allocation5 + $0x116] sm:$0xff] }
 0x4c1   : > { %v12775_v45 = vadd.f32 %v18801_v13, %v12773_v26 }
 0x4c2   : > { %13974 = vst [vmem:[%s18816_s15 + $0x68] sm:$0xff] %v13950_v50   ;;  %v12752_v16 = vld [vmem:[#allocation5 + $0x104] sm:$0xff]  ;;  %v12772_v12 = vld [vmem:[#allocation5 + $0x10e] sm:$0xff]  ;;  %v12757_v39 = vmul.f32 0.1, %v12753_v56  ;;  %vm12755_vm2 = vcmp.ge.f32.partialorder %v12753_v56, 0.0 }
 0x4c3   : > { %v12754_v38 = vadd.f32 %v18801_v13, %v12752_v16  ;;  %v12774_v1 = vadd.f32 %v18801_v13, %v12772_v12  ;;  %v12779_v31 = vmul.f32 0.1, %v12775_v45  ;;  %vm12777_vm8 = vcmp.ge.f32.partialorder %v12775_v45, 0.0 }
 0x4c4   : > { %v12759_v27 = vsel %vm12755_vm2, %v12753_v56, %v12757_v39 }
 0x4c5   : > { %vm12756_vm4 = vcmp.ge.f32.partialorder %v12754_v38, 0.0  ;;  %v12758_v60 = vmul.f32 0.1, %v12754_v38  ;;  %vm12776_vm9 = vcmp.ge.f32.partialorder %v12774_v1, 0.0  ;;  %v12778_v4 = vmul.f32 0.1, %v12774_v1 }
 0x4c6   : > { %v12781_v0 = vsel %vm12777_vm8, %v12775_v45, %v12779_v31 }
 0x4c7   : > { %v12760_v14 = vsel %vm12756_vm4, %v12754_v38, %v12758_v60  ;;  %v12780_v9 = vsel %vm12776_vm9, %v12774_v1, %v12778_v4 }
 0x4c8   : > { %v13955_v48 = vpack.c.bf16 %v12760_v14, %v12759_v27  ;;  %v13960_v13 = vpack.c.bf16 %v12781_v0, %v12780_v9 }
 0x4ca   : > { %13975 = vst [vmem:[%s18816_s15 + $0x70] sm:$0xff] %v13955_v48   ;;  %13976 = vst [vmem:[%s18816_s15 + $0x78] sm:$0xff] %v13960_v13  }
 0x4cb   : > { %15609 = shalt.err (!%p15606_p3)
}
 0x4cc   : > { %s15610_s10 = scalar_lea.hbm %s18901_s20, 2048  ;;  %s15614_s13 = scalar_lea.hbm %s18955_s6, 4096 }
 0x4cd   : > { %p15611_p4 = scmp.ne.s32.totalorder %s18901_s20, %s15610_s10  ;;  %p15615_p9 = scmp.lt.s32.totalorder %s18901_s20, %s18955_s6 }
 0x4ce   : > { %p15616_p10 = scmp.lt.s32.totalorder %s15614_s13, %s15610_s10 }
 0x4cf   : > { %p15612_p7 = pnand %p15611_p4, %p15736_p5 }
 0x4d0   : > { %p15617_p11 = por %p15616_p10, %p15615_p9 }
 0x4d1   : > { %p15613_p8 = pneg %p15612_p7 }
 0x4d3   : > { %p15618_p12 = pnand %p15617_p11, %p15613_p8 }
 0x4d5   : > { %15621 = shalt.err (!%p15618_p12)
}
 0x4d6   : > { %s15661_s16 = smov 64   ;;  %s15662_s18 = smov 4  }
 0x4d7   : > { %15154 = dma.vmem_to_hbm [thread:$0]  (%p15736_p5), %s18903_s17, 2048, %s18901_s20, %s18909_s25, %s15661_s16, %s15661_s16, %s15662_s18  }
 0x4d8 PF: > { %p15160_p13 = scmp.ge.s32.totalorder %s15656_s24, 2  ;;  %s12822_s19 = sand.u32 1, %s15644_s21  }
 0x4d9   : > { %s12823_s26 = scalar_lea.sflag [#allocation7], %s12822_s19 }
 0x4da   : > { %p15157_p0 = pnand %p15160_p13, %p15740_p6 }
 0x4dc   : > { %p15158_p1 = pneg %p15157_p0 }
 0x4de   : > { %15639 = dma.done.wait (%p15158_p1), %s12823_s26, 2048  }
 0x4df   : > { %15641 = vsyncadd (%p15158_p1), %s12823_s26, 4294965248  ;;  %p16_p2 = scmp.ge.s32.totalorder %s15723_s27, 4   ;;  %s19362_s21 = smov %s15648_s22 }
 0x4e0   : > { %s19363_s22 = smov %s15652_s23  ;;  %s19364_s23 = smov %s15734_s30 }
 0x4e1   : > { %s19365_s24 = smov %s15723_s27  ;;  %18 = sbr.rel (!%p16_p2) target bundleno = 3 (0x3), region = 125 }
 0x4e6   :  { %12828 = vsyncpa [#allocation7], 1 }
 0x4e7   :  { %12830 = vsyncpa [#allocation7 + $0x1], 1 }

</bundles_post_ra>
